<compile_context>
chip_gen: v6e
topology: v6e:2x2x1
jax: 0.10.0
libtpu: 0.0.40
codegen_flags: <defaults>
</compile_context>

<pallas_src>
import functools

import jax
import jax.numpy as jnp
from jax.experimental import pallas as pl
from jax.experimental.pallas import tpu as pltpu

EPS = 1e-5
LANE = 128


def _rup(x, m):
    return (x + m - 1) // m * m


def _pad2(a, rows, cols):
    out = jnp.zeros((rows, cols), a.dtype)
    return out.at[: a.shape[0], : a.shape[1]].set(a)


def _pick_tile(m, target):
    # Largest divisor of m that is <= target (multiple of 8).
    # NOTE: can silently degrade for awkward m (perf cliff, still correct).
    tm = min(target, m)
    while m % tm:
        tm -= 8
    return tm


def _vmem_limit(block_bytes, scratch_bytes=0):
    # inputs+outputs double-buffered + scratch + headroom, clamped to [16,64] MiB.
    need = 2 * block_bytes + scratch_bytes + (8 << 20)
    return int(min(max(need, 16 << 20), 64 << 20))


# ----------------------------------------------------------------------------
# Kernels
# ----------------------------------------------------------------------------
def _conv1_stats_kernel(x_ref, w_ref, y1_ref, st1_ref, std_ref, *, P_p):
    # x: (TM, Cin) bf16 (UNPADDED Cin); w: (Cin, P_p + C4_p) bf16 -- fused
    # conv1 / downsample weight so both 1x1 convs share one MXU stream.
    y = jnp.dot(x_ref[...], w_ref[...], preferred_element_type=jnp.float32)
    y1 = y[:, :P_p]
    yd = y[:, P_p:]
    # Stats from the f32 accumulator; activation stored as bf16.
    y1_ref[...] = y1.astype(jnp.bfloat16)
    st1_ref[...] = jnp.concatenate(
        [jnp.sum(y1, axis=0, keepdims=True),
         jnp.sum(y1 * y1, axis=0, keepdims=True)], axis=0)[None]
    std_ref[...] = jnp.concatenate(
        [jnp.sum(yd, axis=0, keepdims=True),
         jnp.sum(yd * yd, axis=0, keepdims=True)], axis=0)[None]


def _conv2_stats_kernel(y1_ref, sc1_ref, sh1_ref, w2_ref,
                        y2_ref, st2_ref, hp_ref, *, H, W):
    # y1: (HW, P_p) bf16 (one image); w2: (9, P_p, P_p) bf16;
    # hp: VMEM scratch (H+2, W+2, P_p) bf16 holding the zero-halo image.
    HW, P_p = y1_ref.shape
    bf16 = jnp.bfloat16
    h1 = jnp.maximum(
        y1_ref[...].astype(jnp.float32) * sc1_ref[...] + sh1_ref[...], 0.0)

    # Zero only the 1-pixel halo border (interior fully rewritten below).
    # Done every step so "parallel" megacore sharding stays correct.
    zrow = jnp.zeros((1, W + 2, P_p), bf16)
    hp_ref[0:1, :, :] = zrow
    hp_ref[H + 1:H + 2, :, :] = zrow
    zcol = jnp.zeros((H, 1, P_p), bf16)
    hp_ref[1:H + 1, 0:1, :] = zcol
    hp_ref[1:H + 1, W + 1:W + 2, :] = zcol
    hp_ref[1:H + 1, 1:W + 1, :] = h1.astype(bf16).reshape(H, W, P_p)

    # 3x3 conv = 9 shifted (HW,P_p)@(P_p,P_p) dots accumulated in f32.
    # No im2col buffer / concatenate (removes the double VMEM copy).
    # TODO(synk): group taps per row (K=3*P_p) on v6e/v7x for MXU depth.
    acc = jnp.zeros((HW, P_p), jnp.float32)
    for t in range(9):
        dy, dx = divmod(t, 3)
        lhs = hp_ref[dy:dy + H, dx:dx + W, :].reshape(HW, P_p)
        acc = acc + jnp.dot(lhs, w2_ref[t], preferred_element_type=jnp.float32)

    y2_ref[...] = acc.astype(bf16)
    st2_ref[...] = jnp.concatenate(
        [jnp.sum(acc, axis=0, keepdims=True),
         jnp.sum(acc * acc, axis=0, keepdims=True)], axis=0)[None]


def _conv3_stats_kernel(y2_ref, sc2_ref, sh2_ref, w3_ref, y3_ref, st3_ref):
    h2 = jnp.maximum(
        y2_ref[...].astype(jnp.float32) * sc2_ref[...] + sh2_ref[...], 0.0)
    y3 = jnp.dot(h2.astype(jnp.bfloat16), w3_ref[...],
                 preferred_element_type=jnp.float32)
    y3_ref[...] = y3.astype(jnp.bfloat16)
    st3_ref[...] = jnp.concatenate(
        [jnp.sum(y3, axis=0, keepdims=True),
         jnp.sum(y3 * y3, axis=0, keepdims=True)], axis=0)[None]


def _tail_kernel(y3_ref, x_ref, wd_ref, sc3_ref, sh3_ref, scd_ref, shd_ref,
                 o_ref):
    # Recompute the downsample conv (cheaper than storing (M, C4) to HBM).
    yd = jnp.dot(x_ref[...], wd_ref[...], preferred_element_type=jnp.float32)
    z = y3_ref[...].astype(jnp.float32) * sc3_ref[...] + sh3_ref[...]
    r = yd * scd_ref[...] + shd_ref[...]
    o_ref[...] = jnp.maximum(z + r, 0.0)


# ----------------------------------------------------------------------------
# Host-side glue: fold sum/sumsq partials into BN scale/shift (tiny vectors).
# ----------------------------------------------------------------------------
def _fold_bn(st, gamma, beta, count, c_pad):
    ssum = jnp.sum(st[:, 0, :], axis=0)
    qsum = jnp.sum(st[:, 1, :], axis=0)
    mean = ssum / count
    var = jnp.maximum(qsum / count - mean * mean, 0.0)   # clamp: cancellation
    gp = jnp.zeros((c_pad,), jnp.float32).at[: gamma.shape[0]].set(gamma)
    bp = jnp.zeros((c_pad,), jnp.float32).at[: beta.shape[0]].set(beta)
    scale = gp * jax.lax.rsqrt(var + EPS)
    shift = bp - mean * scale
    return scale[None, :], shift[None, :]                # (1, C_pad) each


# ----------------------------------------------------------------------------
# Forward wrapper
# ----------------------------------------------------------------------------
@functools.partial(jax.jit, static_argnames=("tm",))
def bottleneck_forward(x_nchw, p, tm=512):
    f32, bf16 = jnp.float32, jnp.bfloat16
    N, Cin, H, W = x_nchw.shape
    P = p["w1"].shape[1]
    C4 = p["w3"].shape[1]
    HW = H * W
    M = N * HW
    assert M % 8 == 0 and HW % 8 == 0
    P_p, C4_p = _rup(P, LANE), _rup(C4, LANE)
    TM = _pick_tile(M, tm)
    G = M // TM

    # --- layout plumbing: NHWC, bf16 operands; x channel dim stays UNPADDED --
    x_nhwc = jnp.transpose(x_nchw, (0, 2, 3, 1)).astype(f32)
    x2d = x_nhwc.reshape(M, Cin).astype(bf16)

    # Fused conv1 + downsample weight (Cin, P_p + C4_p); lane padding only on
    # the output dim, K stays = Cin (MXU pads K internally).
    w1d = jnp.zeros((Cin, P_p + C4_p), f32)
    w1d = w1d.at[:, :P].set(p["w1"]).at[:, P_p:P_p + C4].set(p["wd"])
    w1dp = w1d.astype(bf16)
    w2p = jnp.zeros((9, P_p, P_p), f32).at[:, :P, :P].set(p["w2"]).astype(bf16)
    w3p = _pad2(p["w3"], P_p, C4_p).astype(bf16)
    wdp = _pad2(p["wd"], Cin, C4_p).astype(bf16)

    # ---- pass 1: fused conv1 (1x1) + downsample conv batch stats ------------
    blk1 = (TM * Cin * 2 + Cin * (P_p + C4_p) * 2 + TM * P_p * 2
            + 2 * P_p * 4 + 2 * C4_p * 4)
    cp1 = pltpu.CompilerParams(dimension_semantics=("parallel",),
                               vmem_limit_bytes=_vmem_limit(blk1))
    ce1 = pl.CostEstimate(
        flops=2 * M * Cin * (P_p + C4_p), transcendentals=0,
        bytes_accessed=(M * Cin * 2 + Cin * (P_p + C4_p) * 2 + M * P_p * 2
                        + G * 2 * (P_p + C4_p) * 4))
    y1, st1, std = pl.pallas_call(
        functools.partial(_conv1_stats_kernel, P_p=P_p),
        grid=(G,),
        in_specs=[pl.BlockSpec((TM, Cin), lambda i: (i, 0)),
                  pl.BlockSpec((Cin, P_p + C4_p), lambda i: (0, 0))],
        out_specs=[pl.BlockSpec((TM, P_p), lambda i: (i, 0)),
                   pl.BlockSpec((1, 2, P_p), lambda i: (i, 0, 0)),
                   pl.BlockSpec((1, 2, C4_p), lambda i: (i, 0, 0))],
        out_shape=[jax.ShapeDtypeStruct((M, P_p), bf16),
                   jax.ShapeDtypeStruct((G, 2, P_p), f32),
                   jax.ShapeDtypeStruct((G, 2, C4_p), f32)],
        compiler_params=cp1, cost_estimate=ce1,
    )(x2d, w1dp)

    sc1, sh1 = _fold_bn(st1, p["g1"], p["b1"], M, P_p)
    scd, shd = _fold_bn(std, p["gd"], p["bd"], M, C4_p)

    # ---- pass 2: BN1+ReLU, 3x3 conv (9 accumulated dots), BN2 stats ---------
    blk2 = (HW * P_p * 2 + 2 * 2 * P_p * 4 + 9 * P_p * P_p * 2
            + HW * P_p * 2 + 2 * P_p * 4)
    scr2 = (H + 2) * (W + 2) * P_p * 2
    cp2 = pltpu.CompilerParams(dimension_semantics=("parallel",),
                               vmem_limit_bytes=_vmem_limit(blk2, scr2))
    ce2 = pl.CostEstimate(
        flops=2 * M * 9 * P_p * P_p, transcendentals=0,
        bytes_accessed=2 * M * P_p * 2 + 9 * P_p * P_p * 2 + N * 2 * P_p * 4)
    y2, st2 = pl.pallas_call(
        functools.partial(_conv2_stats_kernel, H=H, W=W),
        grid=(N,),
        in_specs=[pl.BlockSpec((HW, P_p), lambda n: (n, 0)),
                  pl.BlockSpec((1, P_p), lambda n: (0, 0)),
                  pl.BlockSpec((1, P_p), lambda n: (0, 0)),
                  pl.BlockSpec((9, P_p, P_p), lambda n: (0, 0, 0))],
        out_specs=[pl.BlockSpec((HW, P_p), lambda n: (n, 0)),
                   pl.BlockSpec((1, 2, P_p), lambda n: (n, 0, 0))],
        out_shape=[jax.ShapeDtypeStruct((M, P_p), bf16),
                   jax.ShapeDtypeStruct((N, 2, P_p), f32)],
        scratch_shapes=[pltpu.VMEM((H + 2, W + 2, P_p), bf16)],
        compiler_params=cp2, cost_estimate=ce2,
    )(y1, sc1, sh1, w2p)

    sc2, sh2 = _fold_bn(st2, p["g2"], p["b2"], M, P_p)

    # ---- pass 3: BN2+ReLU, conv3 (1x1), BN3 stats ---------------------------
    blk3 = (TM * P_p * 2 + 2 * 2 * P_p * 4 + P_p * C4_p * 2
            + TM * C4_p * 2 + 2 * C4_p * 4)
    cp3 = pltpu.CompilerParams(dimension_semantics=("parallel",),
                               vmem_limit_bytes=_vmem_limit(blk3))
    ce3 = pl.CostEstimate(
        flops=2 * M * P_p * C4_p, transcendentals=0,
        bytes_accessed=M * P_p * 2 + P_p * C4_p * 2 + M * C4_p * 2)
    y3, st3 = pl.pallas_call(
        _conv3_stats_kernel,
        grid=(G,),
        in_specs=[pl.BlockSpec((TM, P_p), lambda i: (i, 0)),
                  pl.BlockSpec((1, P_p), lambda i: (0, 0)),
                  pl.BlockSpec((1, P_p), lambda i: (0, 0)),
                  pl.BlockSpec((P_p, C4_p), lambda i: (0, 0))],
        out_specs=[pl.BlockSpec((TM, C4_p), lambda i: (i, 0)),
                   pl.BlockSpec((1, 2, C4_p), lambda i: (i, 0, 0))],
        out_shape=[jax.ShapeDtypeStruct((M, C4_p), bf16),
                   jax.ShapeDtypeStruct((G, 2, C4_p), f32)],
        compiler_params=cp3, cost_estimate=ce3,
    )(y2, sc2, sh2, w3p)

    sc3, sh3 = _fold_bn(st3, p["g3"], p["b3"], M, C4_p)

    # ---- pass 4: BN3 + recomputed downsample + BNd + add + ReLU -------------
    blk4 = (TM * C4_p * 2 + TM * Cin * 2 + Cin * C4_p * 2 + 4 * C4_p * 4
            + TM * C4_p * 4)
    cp4 = pltpu.CompilerParams(dimension_semantics=("parallel",),
                               vmem_limit_bytes=_vmem_limit(blk4))
    ce4 = pl.CostEstimate(
        flops=2 * M * Cin * C4_p, transcendentals=0,
        bytes_accessed=(M * C4_p * 2 + M * Cin * 2 + Cin * C4_p * 2
                        + M * C4_p * 4))
    outp = pl.pallas_call(
        _tail_kernel,
        grid=(G,),
        in_specs=[pl.BlockSpec((TM, C4_p), lambda i: (i, 0)),
                  pl.BlockSpec((TM, Cin), lambda i: (i, 0)),
                  pl.BlockSpec((Cin, C4_p), lambda i: (0, 0)),
                  pl.BlockSpec((1, C4_p), lambda i: (0, 0)),
                  pl.BlockSpec((1, C4_p), lambda i: (0, 0)),
                  pl.BlockSpec((1, C4_p), lambda i: (0, 0)),
                  pl.BlockSpec((1, C4_p), lambda i: (0, 0))],
        out_specs=pl.BlockSpec((TM, C4_p), lambda i: (i, 0)),
        out_shape=jax.ShapeDtypeStruct((M, C4_p), f32),
        compiler_params=cp4, cost_estimate=ce4,
    )(y3, x2d, wdp, sc3, sh3, scd, shd)

    out = outp[:, :C4].reshape(N, H, W, C4)
    return jnp.transpose(out, (0, 3, 1, 2))          # back to NCHW


# ----------------------------------------------------------------------------
# Pure-JAX references.
#   mimic_bf16=True : mimics the kernel exactly (bf16 MXU operands, bf16
#                     inter-pass intermediates, stats from the f32 accumulator)
#   mimic_bf16=False: full f32 everywhere (module reference numerics)
# ----------------------------------------------------------------------------
def reference_forward(x_nchw, p, mimic_bf16=True):
    f32 = jnp.float32
    rnd = (lambda a: a.astype(jnp.bfloat16)) if mimic_bf16 else (lambda a: a)

    def fold(y, g, b):
        m = y.mean(axis=(0, 1, 2))
        v = jnp.maximum((y * y).mean(axis=(0, 1, 2)) - m * m, 0.0)
        scale = g * jax.lax.rsqrt(v + EPS)
        return scale, b - m * scale

    def conv1x1(a, w):
        return jnp.einsum('nhwc,cd->nhwd', rnd(a), rnd(w),
                          preferred_element_type=f32)

    x = jnp.transpose(x_nchw, (0, 2, 3, 1)).astype(f32)
    N, H, W, _ = x.shape

    y1 = conv1x1(x, p["w1"])
    sc1, sh1 = fold(y1, p["g1"], p["b1"])
    h1 = jnp.maximum(rnd(y1).astype(f32) * sc1 + sh1, 0.0)

    hp = jnp.pad(rnd(h1), ((0, 0), (1, 1), (1, 1), (0, 0)))
    y2 = 0.0
    for t in range(9):
        dy, dx = divmod(t, 3)
        y2 = y2 + jnp.einsum('nhwc,cd->nhwd', hp[:, dy:dy + H, dx:dx + W, :],
                             rnd(p["w2"][t]), preferred_element_type=f32)
    sc2, sh2 = fold(y2, p["g2"], p["b2"])
    h2 = jnp.maximum(rnd(y2).astype(f32) * sc2 + sh2, 0.0)

    y3 = conv1x1(h2, p["w3"])
    sc3, sh3 = fold(y3, p["g3"], p["b3"])

    yd = conv1x1(x, p["wd"])
    scd, shd = fold(yd, p["gd"], p["bd"])

    z = rnd(y3).astype(f32) * sc3 + sh3
    r = yd * scd + shd
    return jnp.maximum(z + r, 0.0).transpose(0, 3, 1, 2)


def make_params(key, in_places, places, expansion=4):
    c4 = places * expansion
    ks = jax.random.split(key, 12)

    # PyTorch layout (Cout, Cin, kh, kw), rearranged for channel-last matmuls.
    w1_t = 0.1 * jax.random.normal(ks[0], (places, in_places, 1, 1), jnp.float32)
    w2_t = 0.1 * jax.random.normal(ks[1], (places, places, 3, 3), jnp.float32)
    w3_t = 0.1 * jax.random.normal(ks[2], (c4, places, 1, 1), jnp.float32)
    wd_t = 0.1 * jax.random.normal(ks[3], (c4, in_places, 1, 1), jnp.float32)

    def bn_params(kg, kb, c):
        g = 1.0 + 0.1 * jax.random.normal(kg, (c,), jnp.float32)
        b = 0.1 * jax.random.normal(kb, (c,), jnp.float32)
        return g, b

    g1, b1 = bn_params(ks[4], ks[5], places)
    g2, b2 = bn_params(ks[6], ks[7], places)
    g3, b3 = bn_params(ks[8], ks[9], c4)
    gd, bd = bn_params(ks[10], ks[11], c4)

    return {
        "w1": jnp.transpose(w1_t[:, :, 0, 0], (1, 0)),                        # (Cin, P)
        "w2": jnp.transpose(w2_t, (2, 3, 1, 0)).reshape(9, places, places),   # (tap, Cin, Cout)
        "w3": jnp.transpose(w3_t[:, :, 0, 0], (1, 0)),                        # (P, 4P)
        "wd": jnp.transpose(wd_t[:, :, 0, 0], (1, 0)),                        # (Cin, 4P)
        "g1": g1, "b1": b1, "g2": g2, "b2": b2,
        "g3": g3, "b3": b3, "gd": gd, "bd": bd,
    }


if __name__ == "__main__":
    # Bottleneck(in_places=8, places=8, stride=1, downsampling=True, expansion=4)
    N, Cin, H, W = 2, 8, 16, 16
    places, expansion = 8, 4

    key = jax.random.PRNGKey(0)
    kx, kp = jax.random.split(key)
    x = jax.random.normal(kx, (N, Cin, H, W), jnp.float32)   # NCHW, like PyTorch
    params = make_params(kp, Cin, places, expansion)

    out = jax.block_until_ready(bottleneck_forward(x, params))
    assert out.shape == (N, places * expansion, H, W), out.shape

    # Tight check vs a reference that mimics the kernel numerics exactly
    # (bf16 operands + bf16 intermediates, stats from f32 accumulators).
    ref_bf16 = jax.block_until_ready(reference_forward(x, params, mimic_bf16=True))
    err = float(jnp.max(jnp.abs(out - ref_bf16)))
    assert jnp.allclose(out, ref_bf16, rtol=5e-3, atol=5e-3), err

    # Loose sanity check vs the full-f32 reference (differences are only the
    # bf16 rounding of MXU operands / inter-pass intermediates).
    ref_f32 = jax.block_until_ready(reference_forward(x, params, mimic_bf16=False))
    err32 = float(jnp.max(jnp.abs(out - ref_f32)))
    assert jnp.allclose(out, ref_f32, rtol=2e-1, atol=2e-1), err32

    print("KERNEL_OK")
</pallas_src>

<mosaic_0001>
module attributes {stable_mosaic.version = 11 : i64} {
  func.func @_conv2_stats_kernel(%arg0: i32, %arg1: memref<256x128xbf16, #tpu.memory_space<vmem>>, %arg2: memref<1x128xf32, #tpu.memory_space<vmem>>, %arg3: memref<1x128xf32, #tpu.memory_space<vmem>>, %arg4: memref<9x128x128xbf16, #tpu.memory_space<vmem>>, %arg5: memref<256x128xbf16, #tpu.memory_space<vmem>>, %arg6: memref<1x2x128xf32, #tpu.memory_space<vmem>>, %arg7: memref<18x18x128xbf16, #tpu.memory_space<vmem>>) attributes {dimension_semantics = [#tpu.dimension_semantics<parallel>], iteration_bounds = array<i64: 2>, scalar_prefetch = 0 : i64, scratch_operands = 1 : i64, tpu.core_type = #tpu.core_type<tc>, window_params = [{transform_indices = @transform_0, window_bounds = array<i64: 256, 128>}, {pipeline_mode = #tpu.pipeline_mode<synchronous>, transform_indices = @transform_1, window_bounds = array<i64: 1, 128>}, {pipeline_mode = #tpu.pipeline_mode<synchronous>, transform_indices = @transform_2, window_bounds = array<i64: 1, 128>}, {pipeline_mode = #tpu.pipeline_mode<synchronous>, transform_indices = @transform_3, window_bounds = array<i64: 9, 128, 128>}, {transform_indices = @transform_4, window_bounds = array<i64: 256, 128>}, {transform_indices = @transform_5, window_bounds = array<i64: 1, 2, 128>}]} {
    %c0 = arith.constant 0 : index
    %c0_0 = arith.constant 0 : index
    %0 = vector.load %arg1[%c0, %c0_0] : memref<256x128xbf16, #tpu.memory_space<vmem>>, vector<256x128xbf16>
    %1 = arith.extf %0 : vector<256x128xbf16> to vector<256x128xf32>
    %c0_1 = arith.constant 0 : index
    %c0_2 = arith.constant 0 : index
    %2 = vector.load %arg2[%c0_1, %c0_2] : memref<1x128xf32, #tpu.memory_space<vmem>>, vector<1x128xf32>
    %3 = vector.broadcast %2 : vector<1x128xf32> to vector<256x128xf32>
    %4 = arith.mulf %1, %3 : vector<256x128xf32>
    %c0_3 = arith.constant 0 : index
    %c0_4 = arith.constant 0 : index
    %5 = vector.load %arg3[%c0_3, %c0_4] : memref<1x128xf32, #tpu.memory_space<vmem>>, vector<1x128xf32>
    %6 = vector.broadcast %5 : vector<1x128xf32> to vector<256x128xf32>
    %7 = arith.addf %4, %6 : vector<256x128xf32>
    %cst = arith.constant 0.000000e+00 : f32
    %8 = vector.broadcast %cst : f32 to vector<256x128xf32>
    %9 = arith.maximumf %7, %8 : vector<256x128xf32>
    %cst_5 = arith.constant 0.000000e+00 : bf16
    %10 = vector.broadcast %cst_5 : bf16 to vector<1x18x128xbf16>
    %c0_6 = arith.constant 0 : index
    %c0_7 = arith.constant 0 : index
    %c0_8 = arith.constant 0 : index
    %11 = vector.load %arg7[%c0_6, %c0_7, %c0_8] : memref<18x18x128xbf16, #tpu.memory_space<vmem>>, vector<1x18x128xbf16>
    tpu.vector_store %arg7[%c0_6, %c0_7, %c0_8], %10 {strides = array<i32>} : memref<18x18x128xbf16, #tpu.memory_space<vmem>>, vector<1x18x128xbf16>,
    %c17 = arith.constant 17 : index
    %c0_9 = arith.constant 0 : index
    %c0_10 = arith.constant 0 : index
    %12 = vector.load %arg7[%c17, %c0_9, %c0_10] : memref<18x18x128xbf16, #tpu.memory_space<vmem>>, vector<1x18x128xbf16>
    tpu.vector_store %arg7[%c17, %c0_9, %c0_10], %10 {strides = array<i32>} : memref<18x18x128xbf16, #tpu.memory_space<vmem>>, vector<1x18x128xbf16>,
    %cst_11 = arith.constant 0.000000e+00 : bf16
    %13 = vector.broadcast %cst_11 : bf16 to vector<16x1x128xbf16>
    %c1 = arith.constant 1 : index
    %c0_12 = arith.constant 0 : index
    %c0_13 = arith.constant 0 : index
    %14 = vector.load %arg7[%c1, %c0_12, %c0_13] : memref<18x18x128xbf16, #tpu.memory_space<vmem>>, vector<16x1x128xbf16>
    tpu.vector_store %arg7[%c1, %c0_12, %c0_13], %13 {strides = array<i32>} : memref<18x18x128xbf16, #tpu.memory_space<vmem>>, vector<16x1x128xbf16>,
    %c1_14 = arith.constant 1 : index
    %c17_15 = arith.constant 17 : index
    %c0_16 = arith.constant 0 : index
    %15 = vector.load %arg7[%c1_14, %c17_15, %c0_16] : memref<18x18x128xbf16, #tpu.memory_space<vmem>>, vector<16x1x128xbf16>
    tpu.vector_store %arg7[%c1_14, %c17_15, %c0_16], %13 {strides = array<i32>} : memref<18x18x128xbf16, #tpu.memory_space<vmem>>, vector<16x1x128xbf16>,
    %16 = arith.truncf %9 : vector<256x128xf32> to vector<256x128xbf16>
    %17 = vector.shape_cast %16 : vector<256x128xbf16> to vector<16x16x128xbf16>
    %c1_17 = arith.constant 1 : index
    %c1_18 = arith.constant 1 : index
    %c0_19 = arith.constant 0 : index
    %18 = vector.load %arg7[%c1_17, %c1_18, %c0_19] : memref<18x18x128xbf16, #tpu.memory_space<vmem>>, vector<16x16x128xbf16>
    tpu.vector_store %arg7[%c1_17, %c1_18, %c0_19], %17 {strides = array<i32>} : memref<18x18x128xbf16, #tpu.memory_space<vmem>>, vector<16x16x128xbf16>,
    %cst_20 = arith.constant 0.000000e+00 : f32
    %19 = vector.broadcast %cst_20 : f32 to vector<256x128xf32>
    %c0_21 = arith.constant 0 : index
    %c0_22 = arith.constant 0 : index
    %c0_23 = arith.constant 0 : index
    %20 = vector.load %arg7[%c0_21, %c0_22, %c0_23] : memref<18x18x128xbf16, #tpu.memory_space<vmem>>, vector<16x16x128xbf16>
    %21 = vector.shape_cast %20 : vector<16x16x128xbf16> to vector<256x128xbf16>
    %c0_24 = arith.constant 0 : index
    %c0_25 = arith.constant 0 : index
    %c0_26 = arith.constant 0 : index
    %22 = vector.load %arg4[%c0_24, %c0_25, %c0_26] : memref<9x128x128xbf16, #tpu.memory_space<vmem>>, vector<1x128x128xbf16>
    %23 = vector.shape_cast %22 : vector<1x128x128xbf16> to vector<128x128xbf16>
    %cst_27 = arith.constant dense<0.000000e+00> : vector<256x128xf32>
    %24 = tpu.matmul %21, %23, %cst_27 {dimension_numbers = #tpu.dot_dimension_numbers<[1], [0], [0], [1], [0, 0, 1, 1], [], []>} : vector<256x128xbf16>, vector<128x128xbf16>, vector<256x128xf32> -> vector<256x128xf32>
    %25 = arith.addf %19, %24 : vector<256x128xf32>
    %c0_28 = arith.constant 0 : index
    %c1_29 = arith.constant 1 : index
    %c0_30 = arith.constant 0 : index
    %26 = vector.load %arg7[%c0_28, %c1_29, %c0_30] : memref<18x18x128xbf16, #tpu.memory_space<vmem>>, vector<16x16x128xbf16>
    %27 = vector.shape_cast %26 : vector<16x16x128xbf16> to vector<256x128xbf16>
    %c1_31 = arith.constant 1 : index
    %c0_32 = arith.constant 0 : index
    %c0_33 = arith.constant 0 : index
    %28 = vector.load %arg4[%c1_31, %c0_32, %c0_33] : memref<9x128x128xbf16, #tpu.memory_space<vmem>>, vector<1x128x128xbf16>
    %29 = vector.shape_cast %28 : vector<1x128x128xbf16> to vector<128x128xbf16>
    %cst_34 = arith.constant dense<0.000000e+00> : vector<256x128xf32>
    %30 = tpu.matmul %27, %29, %cst_34 {dimension_numbers = #tpu.dot_dimension_numbers<[1], [0], [0], [1], [0, 0, 1, 1], [], []>} : vector<256x128xbf16>, vector<128x128xbf16>, vector<256x128xf32> -> vector<256x128xf32>
    %31 = arith.addf %25, %30 : vector<256x128xf32>
    %c0_35 = arith.constant 0 : index
    %c2 = arith.constant 2 : index
    %c0_36 = arith.constant 0 : index
    %32 = vector.load %arg7[%c0_35, %c2, %c0_36] : memref<18x18x128xbf16, #tpu.memory_space<vmem>>, vector<16x16x128xbf16>
    %33 = vector.shape_cast %32 : vector<16x16x128xbf16> to vector<256x128xbf16>
    %c2_37 = arith.constant 2 : index
    %c0_38 = arith.constant 0 : index
    %c0_39 = arith.constant 0 : index
    %34 = vector.load %arg4[%c2_37, %c0_38, %c0_39] : memref<9x128x128xbf16, #tpu.memory_space<vmem>>, vector<1x128x128xbf16>
    %35 = vector.shape_cast %34 : vector<1x128x128xbf16> to vector<128x128xbf16>
    %cst_40 = arith.constant dense<0.000000e+00> : vector<256x128xf32>
    %36 = tpu.matmul %33, %35, %cst_40 {dimension_numbers = #tpu.dot_dimension_numbers<[1], [0], [0], [1], [0, 0, 1, 1], [], []>} : vector<256x128xbf16>, vector<128x128xbf16>, vector<256x128xf32> -> vector<256x128xf32>
    %37 = arith.addf %31, %36 : vector<256x128xf32>
    %c1_41 = arith.constant 1 : index
    %c0_42 = arith.constant 0 : index
    %c0_43 = arith.constant 0 : index
    %38 = vector.load %arg7[%c1_41, %c0_42, %c0_43] : memref<18x18x128xbf16, #tpu.memory_space<vmem>>, vector<16x16x128xbf16>
    %39 = vector.shape_cast %38 : vector<16x16x128xbf16> to vector<256x128xbf16>
    %c3 = arith.constant 3 : index
    %c0_44 = arith.constant 0 : index
    %c0_45 = arith.constant 0 : index
    %40 = vector.load %arg4[%c3, %c0_44, %c0_45] : memref<9x128x128xbf16, #tpu.memory_space<vmem>>, vector<1x128x128xbf16>
    %41 = vector.shape_cast %40 : vector<1x128x128xbf16> to vector<128x128xbf16>
    %cst_46 = arith.constant dense<0.000000e+00> : vector<256x128xf32>
    %42 = tpu.matmul %39, %41, %cst_46 {dimension_numbers = #tpu.dot_dimension_numbers<[1], [0], [0], [1], [0, 0, 1, 1], [], []>} : vector<256x128xbf16>, vector<128x128xbf16>, vector<256x128xf32> -> vector<256x128xf32>
    %43 = arith.addf %37, %42 : vector<256x128xf32>
    %c1_47 = arith.constant 1 : index
    %c1_48 = arith.constant 1 : index
    %c0_49 = arith.constant 0 : index
    %44 = vector.load %arg7[%c1_47, %c1_48, %c0_49] : memref<18x18x128xbf16, #tpu.memory_space<vmem>>, vector<16x16x128xbf16>
    %45 = vector.shape_cast %44 : vector<16x16x128xbf16> to vector<256x128xbf16>
    %c4 = arith.constant 4 : index
    %c0_50 = arith.constant 0 : index
    %c0_51 = arith.constant 0 : index
    %46 = vector.load %arg4[%c4, %c0_50, %c0_51] : memref<9x128x128xbf16, #tpu.memory_space<vmem>>, vector<1x128x128xbf16>
    %47 = vector.shape_cast %46 : vector<1x128x128xbf16> to vector<128x128xbf16>
    %cst_52 = arith.constant dense<0.000000e+00> : vector<256x128xf32>
    %48 = tpu.matmul %45, %47, %cst_52 {dimension_numbers = #tpu.dot_dimension_numbers<[1], [0], [0], [1], [0, 0, 1, 1], [], []>} : vector<256x128xbf16>, vector<128x128xbf16>, vector<256x128xf32> -> vector<256x128xf32>
    %49 = arith.addf %43, %48 : vector<256x128xf32>
    %c1_53 = arith.constant 1 : index
    %c2_54 = arith.constant 2 : index
    %c0_55 = arith.constant 0 : index
    %50 = vector.load %arg7[%c1_53, %c2_54, %c0_55] : memref<18x18x128xbf16, #tpu.memory_space<vmem>>, vector<16x16x128xbf16>
    %51 = vector.shape_cast %50 : vector<16x16x128xbf16> to vector<256x128xbf16>
    %c5 = arith.constant 5 : index
    %c0_56 = arith.constant 0 : index
    %c0_57 = arith.constant 0 : index
    %52 = vector.load %arg4[%c5, %c0_56, %c0_57] : memref<9x128x128xbf16, #tpu.memory_space<vmem>>, vector<1x128x128xbf16>
    %53 = vector.shape_cast %52 : vector<1x128x128xbf16> to vector<128x128xbf16>
    %cst_58 = arith.constant dense<0.000000e+00> : vector<256x128xf32>
    %54 = tpu.matmul %51, %53, %cst_58 {dimension_numbers = #tpu.dot_dimension_numbers<[1], [0], [0], [1], [0, 0, 1, 1], [], []>} : vector<256x128xbf16>, vector<128x128xbf16>, vector<256x128xf32> -> vector<256x128xf32>
    %55 = arith.addf %49, %54 : vector<256x128xf32>
    %c2_59 = arith.constant 2 : index
    %c0_60 = arith.constant 0 : index
    %c0_61 = arith.constant 0 : index
    %56 = vector.load %arg7[%c2_59, %c0_60, %c0_61] : memref<18x18x128xbf16, #tpu.memory_space<vmem>>, vector<16x16x128xbf16>
    %57 = vector.shape_cast %56 : vector<16x16x128xbf16> to vector<256x128xbf16>
    %c6 = arith.constant 6 : index
    %c0_62 = arith.constant 0 : index
    %c0_63 = arith.constant 0 : index
    %58 = vector.load %arg4[%c6, %c0_62, %c0_63] : memref<9x128x128xbf16, #tpu.memory_space<vmem>>, vector<1x128x128xbf16>
    %59 = vector.shape_cast %58 : vector<1x128x128xbf16> to vector<128x128xbf16>
    %cst_64 = arith.constant dense<0.000000e+00> : vector<256x128xf32>
    %60 = tpu.matmul %57, %59, %cst_64 {dimension_numbers = #tpu.dot_dimension_numbers<[1], [0], [0], [1], [0, 0, 1, 1], [], []>} : vector<256x128xbf16>, vector<128x128xbf16>, vector<256x128xf32> -> vector<256x128xf32>
    %61 = arith.addf %55, %60 : vector<256x128xf32>
    %c2_65 = arith.constant 2 : index
    %c1_66 = arith.constant 1 : index
    %c0_67 = arith.constant 0 : index
    %62 = vector.load %arg7[%c2_65, %c1_66, %c0_67] : memref<18x18x128xbf16, #tpu.memory_space<vmem>>, vector<16x16x128xbf16>
    %63 = vector.shape_cast %62 : vector<16x16x128xbf16> to vector<256x128xbf16>
    %c7 = arith.constant 7 : index
    %c0_68 = arith.constant 0 : index
    %c0_69 = arith.constant 0 : index
    %64 = vector.load %arg4[%c7, %c0_68, %c0_69] : memref<9x128x128xbf16, #tpu.memory_space<vmem>>, vector<1x128x128xbf16>
    %65 = vector.shape_cast %64 : vector<1x128x128xbf16> to vector<128x128xbf16>
    %cst_70 = arith.constant dense<0.000000e+00> : vector<256x128xf32>
    %66 = tpu.matmul %63, %65, %cst_70 {dimension_numbers = #tpu.dot_dimension_numbers<[1], [0], [0], [1], [0, 0, 1, 1], [], []>} : vector<256x128xbf16>, vector<128x128xbf16>, vector<256x128xf32> -> vector<256x128xf32>
    %67 = arith.addf %61, %66 : vector<256x128xf32>
    %c2_71 = arith.constant 2 : index
    %c2_72 = arith.constant 2 : index
    %c0_73 = arith.constant 0 : index
    %68 = vector.load %arg7[%c2_71, %c2_72, %c0_73] : memref<18x18x128xbf16, #tpu.memory_space<vmem>>, vector<16x16x128xbf16>
    %69 = vector.shape_cast %68 : vector<16x16x128xbf16> to vector<256x128xbf16>
    %c8 = arith.constant 8 : index
    %c0_74 = arith.constant 0 : index
    %c0_75 = arith.constant 0 : index
    %70 = vector.load %arg4[%c8, %c0_74, %c0_75] : memref<9x128x128xbf16, #tpu.memory_space<vmem>>, vector<1x128x128xbf16>
    %71 = vector.shape_cast %70 : vector<1x128x128xbf16> to vector<128x128xbf16>
    %cst_76 = arith.constant dense<0.000000e+00> : vector<256x128xf32>
    %72 = tpu.matmul %69, %71, %cst_76 {dimension_numbers = #tpu.dot_dimension_numbers<[1], [0], [0], [1], [0, 0, 1, 1], [], []>} : vector<256x128xbf16>, vector<128x128xbf16>, vector<256x128xf32> -> vector<256x128xf32>
    %73 = arith.addf %67, %72 : vector<256x128xf32>
    %74 = arith.truncf %73 : vector<256x128xf32> to vector<256x128xbf16>
    %c0_77 = arith.constant 0 : index
    %c0_78 = arith.constant 0 : index
    %75 = vector.load %arg5[%c0_77, %c0_78] : memref<256x128xbf16, #tpu.memory_space<vmem>>, vector<256x128xbf16>
    tpu.vector_store %arg5[%c0_77, %c0_78], %74 {strides = array<i32>} : memref<256x128xbf16, #tpu.memory_space<vmem>>, vector<256x128xbf16>,
    %cst_79 = arith.constant dense<0.000000e+00> : vector<128xf32>
    %76 = vector.multi_reduction <add>, %73, %cst_79 [0] : vector<256x128xf32> to vector<128xf32>
    %77 = vector.shape_cast %76 : vector<128xf32> to vector<1x128xf32>
    %78 = arith.mulf %73, %73 : vector<256x128xf32>
    %cst_80 = arith.constant dense<0.000000e+00> : vector<128xf32>
    %79 = vector.multi_reduction <add>, %78, %cst_80 [0] : vector<256x128xf32> to vector<128xf32>
    %80 = vector.shape_cast %79 : vector<128xf32> to vector<1x128xf32>
    %81 = tpu.concatenate %77, %80 in 0 : vector<1x128xf32>, vector<1x128xf32> -> vector<2x128xf32>
    %82 = vector.shape_cast %81 : vector<2x128xf32> to vector<1x2x128xf32>
    %c0_81 = arith.constant 0 : index
    %c0_82 = arith.constant 0 : index
    %c0_83 = arith.constant 0 : index
    %83 = vector.load %arg6[%c0_81, %c0_82, %c0_83] : memref<1x2x128xf32, #tpu.memory_space<vmem>>, vector<1x2x128xf32>
    tpu.vector_store %arg6[%c0_81, %c0_82, %c0_83], %82 {strides = array<i32>} : memref<1x2x128xf32, #tpu.memory_space<vmem>>, vector<1x2x128xf32>,
    return
  }
  func.func @transform_0(%arg0: i32) -> (i32, i32) {
    %c0_i32 = arith.constant 0 : i32
    %c0_i32_0 = arith.constant 0 : i32
    return %arg0, %c0_i32 : i32, i32
  }
  func.func @transform_1(%arg0: i32) -> (i32, i32) {
    %c0_i32 = arith.constant 0 : i32
    %c0_i32_0 = arith.constant 0 : i32
    %c0_i32_1 = arith.constant 0 : i32
    return %c0_i32, %c0_i32_0 : i32, i32
  }
  func.func @transform_2(%arg0: i32) -> (i32, i32) {
    %c0_i32 = arith.constant 0 : i32
    %c0_i32_0 = arith.constant 0 : i32
    %c0_i32_1 = arith.constant 0 : i32
    return %c0_i32, %c0_i32_0 : i32, i32
  }
  func.func @transform_3(%arg0: i32) -> (i32, i32, i32) {
    %c0_i32 = arith.constant 0 : i32
    %c0_i32_0 = arith.constant 0 : i32
    %c0_i32_1 = arith.constant 0 : i32
    %c0_i32_2 = arith.constant 0 : i32
    return %c0_i32, %c0_i32_0, %c0_i32_1 : i32, i32, i32
  }
  func.func @transform_4(%arg0: i32) -> (i32, i32) {
    %c0_i32 = arith.constant 0 : i32
    %c0_i32_0 = arith.constant 0 : i32
    return %arg0, %c0_i32 : i32, i32
  }
  func.func @transform_5(%arg0: i32) -> (i32, i32, i32) {
    %c0_i32 = arith.constant 0 : i32
    %c0_i32_0 = arith.constant 0 : i32
    %c0_i32_1 = arith.constant 0 : i32
    return %arg0, %c0_i32, %c0_i32_0 : i32, i32, i32
  }
}

module attributes {stable_mosaic.version = 11 : i64} {
  func.func @_conv1_stats_kernel(%arg0: i32, %arg1: memref<512x8xbf16, #tpu.memory_space<vmem>>, %arg2: memref<8x256xbf16, #tpu.memory_space<vmem>>, %arg3: memref<512x128xbf16, #tpu.memory_space<vmem>>, %arg4: memref<1x2x128xf32, #tpu.memory_space<vmem>>, %arg5: memref<1x2x128xf32, #tpu.memory_space<vmem>>) attributes {dimension_semantics = [#tpu.dimension_semantics<parallel>], iteration_bounds = array<i64: 1>, scalar_prefetch = 0 : i64, scratch_operands = 0 : i64, tpu.core_type = #tpu.core_type<tc>, window_params = [{transform_indices = @transform_0, window_bounds = array<i64: 512, 8>}, {pipeline_mode = #tpu.pipeline_mode<synchronous>, transform_indices = @transform_1, window_bounds = array<i64: 8, 256>}, {transform_indices = @transform_2, window_bounds = array<i64: 512, 128>}, {transform_indices = @transform_3, window_bounds = array<i64: 1, 2, 128>}, {transform_indices = @transform_4, window_bounds = array<i64: 1, 2, 128>}]} {
    %c0 = arith.constant 0 : index
    %c0_0 = arith.constant 0 : index
    %0 = vector.load %arg1[%c0, %c0_0] : memref<512x8xbf16, #tpu.memory_space<vmem>>, vector<512x8xbf16>
    %c0_1 = arith.constant 0 : index
    %c0_2 = arith.constant 0 : index
    %1 = vector.load %arg2[%c0_1, %c0_2] : memref<8x256xbf16, #tpu.memory_space<vmem>>, vector<8x256xbf16>
    %cst = arith.constant dense<0.000000e+00> : vector<512x256xf32>
    %2 = tpu.matmul %0, %1, %cst {dimension_numbers = #tpu.dot_dimension_numbers<[1], [0], [0], [1], [0, 0, 1, 1], [], []>} : vector<512x8xbf16>, vector<8x256xbf16>, vector<512x256xf32> -> vector<512x256xf32>
    %3 = vector.extract_strided_slice %2 {offsets = [0, 0], sizes = [512, 128], strides = [1, 1]} : vector<512x256xf32> to vector<512x128xf32>
    %4 = vector.extract_strided_slice %2 {offsets = [0, 128], sizes = [512, 128], strides = [1, 1]} : vector<512x256xf32> to vector<512x128xf32>
    %5 = arith.truncf %3 : vector<512x128xf32> to vector<512x128xbf16>
    %c0_3 = arith.constant 0 : index
    %c0_4 = arith.constant 0 : index
    %6 = vector.load %arg3[%c0_3, %c0_4] : memref<512x128xbf16, #tpu.memory_space<vmem>>, vector<512x128xbf16>
    tpu.vector_store %arg3[%c0_3, %c0_4], %5 {strides = array<i32>} : memref<512x128xbf16, #tpu.memory_space<vmem>>, vector<512x128xbf16>,
    %cst_5 = arith.constant dense<0.000000e+00> : vector<128xf32>
    %7 = vector.multi_reduction <add>, %3, %cst_5 [0] : vector<512x128xf32> to vector<128xf32>
    %8 = vector.shape_cast %7 : vector<128xf32> to vector<1x128xf32>
    %9 = arith.mulf %3, %3 : vector<512x128xf32>
    %cst_6 = arith.constant dense<0.000000e+00> : vector<128xf32>
    %10 = vector.multi_reduction <add>, %9, %cst_6 [0] : vector<512x128xf32> to vector<128xf32>
    %11 = vector.shape_cast %10 : vector<128xf32> to vector<1x128xf32>
    %12 = tpu.concatenate %8, %11 in 0 : vector<1x128xf32>, vector<1x128xf32> -> vector<2x128xf32>
    %13 = vector.shape_cast %12 : vector<2x128xf32> to vector<1x2x128xf32>
    %c0_7 = arith.constant 0 : index
    %c0_8 = arith.constant 0 : index
    %c0_9 = arith.constant 0 : index
    %14 = vector.load %arg4[%c0_7, %c0_8, %c0_9] : memref<1x2x128xf32, #tpu.memory_space<vmem>>, vector<1x2x128xf32>
    tpu.vector_store %arg4[%c0_7, %c0_8, %c0_9], %13 {strides = array<i32>} : memref<1x2x128xf32, #tpu.memory_space<vmem>>, vector<1x2x128xf32>,
    %cst_10 = arith.constant dense<0.000000e+00> : vector<128xf32>
    %15 = vector.multi_reduction <add>, %4, %cst_10 [0] : vector<512x128xf32> to vector<128xf32>
    %16 = vector.shape_cast %15 : vector<128xf32> to vector<1x128xf32>
    %17 = arith.mulf %4, %4 : vector<512x128xf32>
    %cst_11 = arith.constant dense<0.000000e+00> : vector<128xf32>
    %18 = vector.multi_reduction <add>, %17, %cst_11 [0] : vector<512x128xf32> to vector<128xf32>
    %19 = vector.shape_cast %18 : vector<128xf32> to vector<1x128xf32>
    %20 = tpu.concatenate %16, %19 in 0 : vector<1x128xf32>, vector<1x128xf32> -> vector<2x128xf32>
    %21 = vector.shape_cast %20 : vector<2x128xf32> to vector<1x2x128xf32>
    %c0_12 = arith.constant 0 : index
    %c0_13 = arith.constant 0 : index
    %c0_14 = arith.constant 0 : index
    %22 = vector.load %arg5[%c0_12, %c0_13, %c0_14] : memref<1x2x128xf32, #tpu.memory_space<vmem>>, vector<1x2x128xf32>
    tpu.vector_store %arg5[%c0_12, %c0_13, %c0_14], %21 {strides = array<i32>} : memref<1x2x128xf32, #tpu.memory_space<vmem>>, vector<1x2x128xf32>,
    return
  }
  func.func @transform_0(%arg0: i32) -> (i32, i32) {
    %c0_i32 = arith.constant 0 : i32
    %c0_i32_0 = arith.constant 0 : i32
    return %arg0, %c0_i32 : i32, i32
  }
  func.func @transform_1(%arg0: i32) -> (i32, i32) {
    %c0_i32 = arith.constant 0 : i32
    %c0_i32_0 = arith.constant 0 : i32
    %c0_i32_1 = arith.constant 0 : i32
    return %c0_i32, %c0_i32_0 : i32, i32
  }
  func.func @transform_2(%arg0: i32) -> (i32, i32) {
    %c0_i32 = arith.constant 0 : i32
    %c0_i32_0 = arith.constant 0 : i32
    return %arg0, %c0_i32 : i32, i32
  }
  func.func @transform_3(%arg0: i32) -> (i32, i32, i32) {
    %c0_i32 = arith.constant 0 : i32
    %c0_i32_0 = arith.constant 0 : i32
    %c0_i32_1 = arith.constant 0 : i32
    return %arg0, %c0_i32, %c0_i32_0 : i32, i32, i32
  }
  func.func @transform_4(%arg0: i32) -> (i32, i32, i32) {
    %c0_i32 = arith.constant 0 : i32
    %c0_i32_0 = arith.constant 0 : i32
    %c0_i32_1 = arith.constant 0 : i32
    return %arg0, %c0_i32, %c0_i32_0 : i32, i32, i32
  }
}

module attributes {stable_mosaic.version = 11 : i64} {
  func.func @_conv3_stats_kernel(%arg0: i32, %arg1: memref<512x128xbf16, #tpu.memory_space<vmem>>, %arg2: memref<1x128xf32, #tpu.memory_space<vmem>>, %arg3: memref<1x128xf32, #tpu.memory_space<vmem>>, %arg4: memref<128x128xbf16, #tpu.memory_space<vmem>>, %arg5: memref<512x128xbf16, #tpu.memory_space<vmem>>, %arg6: memref<1x2x128xf32, #tpu.memory_space<vmem>>) attributes {dimension_semantics = [#tpu.dimension_semantics<parallel>], iteration_bounds = array<i64: 1>, scalar_prefetch = 0 : i64, scratch_operands = 0 : i64, tpu.core_type = #tpu.core_type<tc>, window_params = [{transform_indices = @transform_0, window_bounds = array<i64: 512, 128>}, {pipeline_mode = #tpu.pipeline_mode<synchronous>, transform_indices = @transform_1, window_bounds = array<i64: 1, 128>}, {pipeline_mode = #tpu.pipeline_mode<synchronous>, transform_indices = @transform_2, window_bounds = array<i64: 1, 128>}, {pipeline_mode = #tpu.pipeline_mode<synchronous>, transform_indices = @transform_3, window_bounds = array<i64: 128, 128>}, {transform_indices = @transform_4, window_bounds = array<i64: 512, 128>}, {transform_indices = @transform_5, window_bounds = array<i64: 1, 2, 128>}]} {
    %c0 = arith.constant 0 : index
    %c0_0 = arith.constant 0 : index
    %0 = vector.load %arg1[%c0, %c0_0] : memref<512x128xbf16, #tpu.memory_space<vmem>>, vector<512x128xbf16>
    %1 = arith.extf %0 : vector<512x128xbf16> to vector<512x128xf32>
    %c0_1 = arith.constant 0 : index
    %c0_2 = arith.constant 0 : index
    %2 = vector.load %arg2[%c0_1, %c0_2] : memref<1x128xf32, #tpu.memory_space<vmem>>, vector<1x128xf32>
    %3 = vector.broadcast %2 : vector<1x128xf32> to vector<512x128xf32>
    %4 = arith.mulf %1, %3 : vector<512x128xf32>
    %c0_3 = arith.constant 0 : index
    %c0_4 = arith.constant 0 : index
    %5 = vector.load %arg3[%c0_3, %c0_4] : memref<1x128xf32, #tpu.memory_space<vmem>>, vector<1x128xf32>
    %6 = vector.broadcast %5 : vector<1x128xf32> to vector<512x128xf32>
    %7 = arith.addf %4, %6 : vector<512x128xf32>
    %cst = arith.constant 0.000000e+00 : f32
    %8 = vector.broadcast %cst : f32 to vector<512x128xf32>
    %9 = arith.maximumf %7, %8 : vector<512x128xf32>
    %10 = arith.truncf %9 : vector<512x128xf32> to vector<512x128xbf16>
    %c0_5 = arith.constant 0 : index
    %c0_6 = arith.constant 0 : index
    %11 = vector.load %arg4[%c0_5, %c0_6] : memref<128x128xbf16, #tpu.memory_space<vmem>>, vector<128x128xbf16>
    %cst_7 = arith.constant dense<0.000000e+00> : vector<512x128xf32>
    %12 = tpu.matmul %10, %11, %cst_7 {dimension_numbers = #tpu.dot_dimension_numbers<[1], [0], [0], [1], [0, 0, 1, 1], [], []>} : vector<512x128xbf16>, vector<128x128xbf16>, vector<512x128xf32> -> vector<512x128xf32>
    %13 = arith.truncf %12 : vector<512x128xf32> to vector<512x128xbf16>
    %c0_8 = arith.constant 0 : index
    %c0_9 = arith.constant 0 : index
    %14 = vector.load %arg5[%c0_8, %c0_9] : memref<512x128xbf16, #tpu.memory_space<vmem>>, vector<512x128xbf16>
    tpu.vector_store %arg5[%c0_8, %c0_9], %13 {strides = array<i32>} : memref<512x128xbf16, #tpu.memory_space<vmem>>, vector<512x128xbf16>,
    %cst_10 = arith.constant dense<0.000000e+00> : vector<128xf32>
    %15 = vector.multi_reduction <add>, %12, %cst_10 [0] : vector<512x128xf32> to vector<128xf32>
    %16 = vector.shape_cast %15 : vector<128xf32> to vector<1x128xf32>
    %17 = arith.mulf %12, %12 : vector<512x128xf32>
    %cst_11 = arith.constant dense<0.000000e+00> : vector<128xf32>
    %18 = vector.multi_reduction <add>, %17, %cst_11 [0] : vector<512x128xf32> to vector<128xf32>
    %19 = vector.shape_cast %18 : vector<128xf32> to vector<1x128xf32>
    %20 = tpu.concatenate %16, %19 in 0 : vector<1x128xf32>, vector<1x128xf32> -> vector<2x128xf32>
    %21 = vector.shape_cast %20 : vector<2x128xf32> to vector<1x2x128xf32>
    %c0_12 = arith.constant 0 : index
    %c0_13 = arith.constant 0 : index
    %c0_14 = arith.constant 0 : index
    %22 = vector.load %arg6[%c0_12, %c0_13, %c0_14] : memref<1x2x128xf32, #tpu.memory_space<vmem>>, vector<1x2x128xf32>
    tpu.vector_store %arg6[%c0_12, %c0_13, %c0_14], %21 {strides = array<i32>} : memref<1x2x128xf32, #tpu.memory_space<vmem>>, vector<1x2x128xf32>,
    return
  }
  func.func @transform_0(%arg0: i32) -> (i32, i32) {
    %c0_i32 = arith.constant 0 : i32
    %c0_i32_0 = arith.constant 0 : i32
    return %arg0, %c0_i32 : i32, i32
  }
  func.func @transform_1(%arg0: i32) -> (i32, i32) {
    %c0_i32 = arith.constant 0 : i32
    %c0_i32_0 = arith.constant 0 : i32
    %c0_i32_1 = arith.constant 0 : i32
    return %c0_i32, %c0_i32_0 : i32, i32
  }
  func.func @transform_2(%arg0: i32) -> (i32, i32) {
    %c0_i32 = arith.constant 0 : i32
    %c0_i32_0 = arith.constant 0 : i32
    %c0_i32_1 = arith.constant 0 : i32
    return %c0_i32, %c0_i32_0 : i32, i32
  }
  func.func @transform_3(%arg0: i32) -> (i32, i32) {
    %c0_i32 = arith.constant 0 : i32
    %c0_i32_0 = arith.constant 0 : i32
    %c0_i32_1 = arith.constant 0 : i32
    return %c0_i32, %c0_i32_0 : i32, i32
  }
  func.func @transform_4(%arg0: i32) -> (i32, i32) {
    %c0_i32 = arith.constant 0 : i32
    %c0_i32_0 = arith.constant 0 : i32
    return %arg0, %c0_i32 : i32, i32
  }
  func.func @transform_5(%arg0: i32) -> (i32, i32, i32) {
    %c0_i32 = arith.constant 0 : i32
    %c0_i32_0 = arith.constant 0 : i32
    %c0_i32_1 = arith.constant 0 : i32
    return %arg0, %c0_i32, %c0_i32_0 : i32, i32, i32
  }
}

module attributes {stable_mosaic.version = 11 : i64} {
  func.func @_tail_kernel(%arg0: i32, %arg1: memref<512x128xbf16, #tpu.memory_space<vmem>>, %arg2: memref<512x8xbf16, #tpu.memory_space<vmem>>, %arg3: memref<8x128xbf16, #tpu.memory_space<vmem>>, %arg4: memref<1x128xf32, #tpu.memory_space<vmem>>, %arg5: memref<1x128xf32, #tpu.memory_space<vmem>>, %arg6: memref<1x128xf32, #tpu.memory_space<vmem>>, %arg7: memref<1x128xf32, #tpu.memory_space<vmem>>, %arg8: memref<512x128xf32, #tpu.memory_space<vmem>>) attributes {dimension_semantics = [#tpu.dimension_semantics<parallel>], iteration_bounds = array<i64: 1>, scalar_prefetch = 0 : i64, scratch_operands = 0 : i64, tpu.core_type = #tpu.core_type<tc>, window_params = [{transform_indices = @transform_0, window_bounds = array<i64: 512, 128>}, {transform_indices = @transform_1, window_bounds = array<i64: 512, 8>}, {pipeline_mode = #tpu.pipeline_mode<synchronous>, transform_indices = @transform_2, window_bounds = array<i64: 8, 128>}, {pipeline_mode = #tpu.pipeline_mode<synchronous>, transform_indices = @transform_3, window_bounds = array<i64: 1, 128>}, {pipeline_mode = #tpu.pipeline_mode<synchronous>, transform_indices = @transform_4, window_bounds = array<i64: 1, 128>}, {pipeline_mode = #tpu.pipeline_mode<synchronous>, transform_indices = @transform_5, window_bounds = array<i64: 1, 128>}, {pipeline_mode = #tpu.pipeline_mode<synchronous>, transform_indices = @transform_6, window_bounds = array<i64: 1, 128>}, {transform_indices = @transform_7, window_bounds = array<i64: 512, 128>}]} {
    %c0 = arith.constant 0 : index
    %c0_0 = arith.constant 0 : index
    %0 = vector.load %arg2[%c0, %c0_0] : memref<512x8xbf16, #tpu.memory_space<vmem>>, vector<512x8xbf16>
    %c0_1 = arith.constant 0 : index
    %c0_2 = arith.constant 0 : index
    %1 = vector.load %arg3[%c0_1, %c0_2] : memref<8x128xbf16, #tpu.memory_space<vmem>>, vector<8x128xbf16>
    %cst = arith.constant dense<0.000000e+00> : vector<512x128xf32>
    %2 = tpu.matmul %0, %1, %cst {dimension_numbers = #tpu.dot_dimension_numbers<[1], [0], [0], [1], [0, 0, 1, 1], [], []>} : vector<512x8xbf16>, vector<8x128xbf16>, vector<512x128xf32> -> vector<512x128xf32>
    %c0_3 = arith.constant 0 : index
    %c0_4 = arith.constant 0 : index
    %3 = vector.load %arg1[%c0_3, %c0_4] : memref<512x128xbf16, #tpu.memory_space<vmem>>, vector<512x128xbf16>
    %4 = arith.extf %3 : vector<512x128xbf16> to vector<512x128xf32>
    %c0_5 = arith.constant 0 : index
    %c0_6 = arith.constant 0 : index
    %5 = vector.load %arg4[%c0_5, %c0_6] : memref<1x128xf32, #tpu.memory_space<vmem>>, vector<1x128xf32>
    %6 = vector.broadcast %5 : vector<1x128xf32> to vector<512x128xf32>
    %7 = arith.mulf %4, %6 : vector<512x128xf32>
    %c0_7 = arith.constant 0 : index
    %c0_8 = arith.constant 0 : index
    %8 = vector.load %arg5[%c0_7, %c0_8] : memref<1x128xf32, #tpu.memory_space<vmem>>, vector<1x128xf32>
    %9 = vector.broadcast %8 : vector<1x128xf32> to vector<512x128xf32>
    %10 = arith.addf %7, %9 : vector<512x128xf32>
    %c0_9 = arith.constant 0 : index
    %c0_10 = arith.constant 0 : index
    %11 = vector.load %arg6[%c0_9, %c0_10] : memref<1x128xf32, #tpu.memory_space<vmem>>, vector<1x128xf32>
    %12 = vector.broadcast %11 : vector<1x128xf32> to vector<512x128xf32>
    %13 = arith.mulf %2, %12 : vector<512x128xf32>
    %c0_11 = arith.constant 0 : index
    %c0_12 = arith.constant 0 : index
    %14 = vector.load %arg7[%c0_11, %c0_12] : memref<1x128xf32, #tpu.memory_space<vmem>>, vector<1x128xf32>
    %15 = vector.broadcast %14 : vector<1x128xf32> to vector<512x128xf32>
    %16 = arith.addf %13, %15 : vector<512x128xf32>
    %17 = arith.addf %10, %16 : vector<512x128xf32>
    %cst_13 = arith.constant 0.000000e+00 : f32
    %18 = vector.broadcast %cst_13 : f32 to vector<512x128xf32>
    %19 = arith.maximumf %17, %18 : vector<512x128xf32>
    %c0_14 = arith.constant 0 : index
    %c0_15 = arith.constant 0 : index
    %20 = vector.load %arg8[%c0_14, %c0_15] : memref<512x128xf32, #tpu.memory_space<vmem>>, vector<512x128xf32>
    tpu.vector_store %arg8[%c0_14, %c0_15], %19 {strides = array<i32>} : memref<512x128xf32, #tpu.memory_space<vmem>>, vector<512x128xf32>,
    return
  }
  func.func @transform_0(%arg0: i32) -> (i32, i32) {
    %c0_i32 = arith.constant 0 : i32
    %c0_i32_0 = arith.constant 0 : i32
    return %arg0, %c0_i32 : i32, i32
  }
  func.func @transform_1(%arg0: i32) -> (i32, i32) {
    %c0_i32 = arith.constant 0 : i32
    %c0_i32_0 = arith.constant 0 : i32
    return %arg0, %c0_i32 : i32, i32
  }
  func.func @transform_2(%arg0: i32) -> (i32, i32) {
    %c0_i32 = arith.constant 0 : i32
    %c0_i32_0 = arith.constant 0 : i32
    %c0_i32_1 = arith.constant 0 : i32
    return %c0_i32, %c0_i32_0 : i32, i32
  }
  func.func @transform_3(%arg0: i32) -> (i32, i32) {
    %c0_i32 = arith.constant 0 : i32
    %c0_i32_0 = arith.constant 0 : i32
    %c0_i32_1 = arith.constant 0 : i32
    return %c0_i32, %c0_i32_0 : i32, i32
  }
  func.func @transform_4(%arg0: i32) -> (i32, i32) {
    %c0_i32 = arith.constant 0 : i32
    %c0_i32_0 = arith.constant 0 : i32
    %c0_i32_1 = arith.constant 0 : i32
    return %c0_i32, %c0_i32_0 : i32, i32
  }
  func.func @transform_5(%arg0: i32) -> (i32, i32) {
    %c0_i32 = arith.constant 0 : i32
    %c0_i32_0 = arith.constant 0 : i32
    %c0_i32_1 = arith.constant 0 : i32
    return %c0_i32, %c0_i32_0 : i32, i32
  }
  func.func @transform_6(%arg0: i32) -> (i32, i32) {
    %c0_i32 = arith.constant 0 : i32
    %c0_i32_0 = arith.constant 0 : i32
    %c0_i32_1 = arith.constant 0 : i32
    return %c0_i32, %c0_i32_0 : i32, i32
  }
  func.func @transform_7(%arg0: i32) -> (i32, i32) {
    %c0_i32 = arith.constant 0 : i32
    %c0_i32_0 = arith.constant 0 : i32
    return %arg0, %c0_i32 : i32, i32
  }
}

</mosaic_0001>

<bundles_post_ra>
// kernel: bottleneck_forward.4
= control target key start
LH: loop header
LB: loop body
LE: loop exit
PB: predicated region body
PF: predicated region fallthrough
CT: control target
= control target key end

     0   :  { %vm342_vm0 = vcmask 1043456   ;;  %v1866_v1 = vmov 0   ;;  %vm245_vm1 = vcmask 64512   ;;  %vm1224_vm2 = vcmask 1040384   ;;  %s2779_s1 = inlined_call_operand.vmem [shape: bf16[8,256], index: 1, kind: input, shape index: {}]   ;;  %s2780_s0 = inlined_call_operand.vmem [shape: bf16[512,8], index: 0, kind: input, shape index: {}]   ;;  %s2781_s2 = inlined_call_operand.vmem [shape: bf16[512,128], index: 2, kind: output, shape index: {0}]   ;;  %s2782_s3 = inlined_call_operand.vmem [shape: f32[1,2,128], index: 3, kind: output, shape index: {1}]   ;;  %s2783_s4 = inlined_call_operand.vmem [shape: f32[1,2,128], index: 4, kind: output, shape index: {2}]  }
   0x1   :  { %v79_v0 = vld [vmem:[%s2779_s1] sm:$0xff]  ;;  %381 = vmatprep.mubr.bf16.mxu0 %v1866_v1  ;;  %541 = vmatprep.mubr.bf16.mxu1 %v1866_v1  ;;  %v1835_v7 = vld [vmem:[%s2780_s0 + $0x8] sm:$0xff]   ;;  %v1836_v9 = vld [vmem:[%s2780_s0 + $0x10] sm:$0xff]  }
   0x2   :  { %v1476_v2 = vcombine.high %v79_v0, %v79_v0  ;;  %v1475_v3 = vcombine.low %v79_v0, %v79_v0  ;;  %v1834_v5 = vld [vmem:[%s2780_s0] sm:$0xff]   ;;  %v1844_v8 = vld [vmem:[%s2780_s0 + $0x88] sm:$0xff]   ;;  %v1846_v10 = vld [vmem:[%s2780_s0 + $0x90] sm:$0xff]  }
   0x3   :  { %v1842_v6 = vld [vmem:[%s2780_s0 + $0x80] sm:$0xff]   ;;  %v1837_v11 = vld [vmem:[%s2780_s0 + $0x18] sm:$0xff]   ;;  %v1839_v15 = vld [vmem:[%s2780_s0 + $0x28] sm:$0xff]  }
   0x4   :  { %1477 = vmatprep.subr.msk.bf16.mxu0 %vm342_vm0, %v1476_v2  ;;  %v344_v4 = vsel %vm342_vm0, %v1475_v3, 0  ;;  %1829 = vmatprep.subr.msk.bf16.mxu1 %vm342_vm0, %v1476_v2  ;;  %v1848_v12 = vld [vmem:[%s2780_s0 + $0x98] sm:$0xff]   ;;  %v1838_v13 = vld [vmem:[%s2780_s0 + $0x20] sm:$0xff]   ;;  %v1852_v16 = vld [vmem:[%s2780_s0 + $0xa8] sm:$0xff]  }
   0x5   :  { %364 = vmatpush1.bf16.msra.mxu0 %v344_v4  ;;  %1830 = vmatpush1.bf16.msra.mxu1 %v344_v4  ;;  %v1850_v14 = vld [vmem:[%s2780_s0 + $0xa0] sm:$0xff]   ;;  %v1840_v17 = vld [vmem:[%s2780_s0 + $0x30] sm:$0xff]   ;;  %v1841_v19 = vld [vmem:[%s2780_s0 + $0x38] sm:$0xff]  }
   0x6   :  { %v1854_v18 = vld [vmem:[%s2780_s0 + $0xb0] sm:$0xff]   ;;  %v1856_v20 = vld [vmem:[%s2780_s0 + $0xb8] sm:$0xff]   ;;  %v1843_v21 = vld [vmem:[%s2780_s0 + $0x40] sm:$0xff]  }
   0x7   :  { %v1858_v22 = vld [vmem:[%s2780_s0 + $0xc0] sm:$0xff]   ;;  %v1845_v23 = vld [vmem:[%s2780_s0 + $0x48] sm:$0xff]   ;;  %v1847_v25 = vld [vmem:[%s2780_s0 + $0x50] sm:$0xff]  }
   0x8   :  { %1478 = vmatmul.mubr.msk.bf16.vlgmr.msra.gmra.mxu0 %vm245_vm1, %v1834_v5  ;;  %1494 = vmatmul.mubr.msk.bf16.vlgmr.msra.gmra.mxu1 %vm245_vm1, %v1842_v6  ;;  %v1859_v24 = vld [vmem:[%s2780_s0 + $0xc8] sm:$0xff]   ;;  %v1860_v26 = vld [vmem:[%s2780_s0 + $0xd0] sm:$0xff]   ;;  %v1849_v27 = vld [vmem:[%s2780_s0 + $0x58] sm:$0xff]  }
   0x9   :  { %391 = vmatprep.mubr.bf16.mxu0 %v1866_v1  ;;  %551 = vmatprep.mubr.bf16.mxu1 %v1866_v1  ;;  %v1861_v28 = vld [vmem:[%s2780_s0 + $0xd8] sm:$0xff]   ;;  %v1851_v29 = vld [vmem:[%s2780_s0 + $0x60] sm:$0xff]   ;;  %v1853_v31 = vld [vmem:[%s2780_s0 + $0x68] sm:$0xff]  }
   0xa   :  { %v1862_v30 = vld [vmem:[%s2780_s0 + $0xe0] sm:$0xff]   ;;  %v1863_v32 = vld [vmem:[%s2780_s0 + $0xe8] sm:$0xff]   ;;  %v1855_v33 = vld [vmem:[%s2780_s0 + $0x70] sm:$0xff]  }
   0xb   :  { %v1864_v34 = vld [vmem:[%s2780_s0 + $0xf0] sm:$0xff]   ;;  %v1857_v35 = vld [vmem:[%s2780_s0 + $0x78] sm:$0xff]  }
   0xc   :  { %v1865_v36 = vld [vmem:[%s2780_s0 + $0xf8] sm:$0xff]  }
  0x10   :  { %1479 = vmatmul.mubr.msk.bf16.gmra.mxu0 %vm245_vm1, %v1835_v7  ;;  %1495 = vmatmul.mubr.msk.bf16.gmra.mxu1 %vm245_vm1, %v1844_v8 }
  0x11   :  { %401 = vmatprep.mubr.bf16.mxu0 %v1866_v1  ;;  %561 = vmatprep.mubr.bf16.mxu1 %v1866_v1 }
  0x18   :  { %1480 = vmatmul.mubr.msk.bf16.gmra.mxu0 %vm245_vm1, %v1836_v9  ;;  %1496 = vmatmul.mubr.msk.bf16.gmra.mxu1 %vm245_vm1, %v1846_v10 }
  0x19   :  { %411 = vmatprep.mubr.bf16.mxu0 %v1866_v1  ;;  %571 = vmatprep.mubr.bf16.mxu1 %v1866_v1 }
  0x20   :  { %1481 = vmatmul.mubr.msk.bf16.gmra.mxu0 %vm245_vm1, %v1837_v11  ;;  %1497 = vmatmul.mubr.msk.bf16.gmra.mxu1 %vm245_vm1, %v1848_v12 }
  0x21   :  { %421 = vmatprep.mubr.bf16.mxu0 %v1866_v1  ;;  %581 = vmatprep.mubr.bf16.mxu1 %v1866_v1 }
  0x28   :  { %1482 = vmatmul.mubr.msk.bf16.gmra.mxu0 %vm245_vm1, %v1838_v13  ;;  %1498 = vmatmul.mubr.msk.bf16.gmra.mxu1 %vm245_vm1, %v1850_v14 }
  0x29   :  { %431 = vmatprep.mubr.bf16.mxu0 %v1866_v1  ;;  %591 = vmatprep.mubr.bf16.mxu1 %v1866_v1 }
  0x30   :  { %1483 = vmatmul.mubr.msk.bf16.gmra.mxu0 %vm245_vm1, %v1839_v15  ;;  %1499 = vmatmul.mubr.msk.bf16.gmra.mxu1 %vm245_vm1, %v1852_v16 }
  0x31   :  { %441 = vmatprep.mubr.bf16.mxu0 %v1866_v1  ;;  %601 = vmatprep.mubr.bf16.mxu1 %v1866_v1 }
  0x38   :  { %1484 = vmatmul.mubr.msk.bf16.gmra.mxu0 %vm245_vm1, %v1840_v17  ;;  %1500 = vmatmul.mubr.msk.bf16.gmra.mxu1 %vm245_vm1, %v1854_v18 }
  0x39   :  { %451 = vmatprep.mubr.bf16.mxu0 %v1866_v1  ;;  %611 = vmatprep.mubr.bf16.mxu1 %v1866_v1 }
  0x40   :  { %1485 = vmatmul.mubr.msk.bf16.gmra.mxu0 %vm245_vm1, %v1841_v19  ;;  %1501 = vmatmul.mubr.msk.bf16.gmra.mxu1 %vm245_vm1, %v1856_v20 }
  0x41   :  { %461 = vmatprep.mubr.bf16.mxu0 %v1866_v1  ;;  %621 = vmatprep.mubr.bf16.mxu1 %v1866_v1 }
  0x48   :  { %1486 = vmatmul.mubr.msk.bf16.gmra.mxu0 %vm245_vm1, %v1843_v21  ;;  %1502 = vmatmul.mubr.msk.bf16.gmra.mxu1 %vm245_vm1, %v1858_v22 }
  0x49   :  { %471 = vmatprep.mubr.bf16.mxu0 %v1866_v1  ;;  %631 = vmatprep.mubr.bf16.mxu1 %v1866_v1 }
  0x50   :  { %1487 = vmatmul.mubr.msk.bf16.gmra.mxu0 %vm245_vm1, %v1845_v23  ;;  %1503 = vmatmul.mubr.msk.bf16.gmra.mxu1 %vm245_vm1, %v1859_v24 }
  0x51   :  { %481 = vmatprep.mubr.bf16.mxu0 %v1866_v1  ;;  %641 = vmatprep.mubr.bf16.mxu1 %v1866_v1 }
  0x58   :  { %1488 = vmatmul.mubr.msk.bf16.gmra.mxu0 %vm245_vm1, %v1847_v25  ;;  %1504 = vmatmul.mubr.msk.bf16.gmra.mxu1 %vm245_vm1, %v1860_v26 }
  0x59   :  { %491 = vmatprep.mubr.bf16.mxu0 %v1866_v1  ;;  %651 = vmatprep.mubr.bf16.mxu1 %v1866_v1 }
  0x60   :  { %1489 = vmatmul.mubr.msk.bf16.gmra.mxu0 %vm245_vm1, %v1849_v27  ;;  %1505 = vmatmul.mubr.msk.bf16.gmra.mxu1 %vm245_vm1, %v1861_v28 }
  0x61   :  { %501 = vmatprep.mubr.bf16.mxu0 %v1866_v1  ;;  %661 = vmatprep.mubr.bf16.mxu1 %v1866_v1 }
  0x68   :  { %1490 = vmatmul.mubr.msk.bf16.gmra.mxu0 %vm245_vm1, %v1851_v29  ;;  %1506 = vmatmul.mubr.msk.bf16.gmra.mxu1 %vm245_vm1, %v1862_v30 }
  0x69   :  { %511 = vmatprep.mubr.bf16.mxu0 %v1866_v1  ;;  %671 = vmatprep.mubr.bf16.mxu1 %v1866_v1 }
  0x70   :  { %1491 = vmatmul.mubr.msk.bf16.gmra.mxu0 %vm245_vm1, %v1853_v31  ;;  %1507 = vmatmul.mubr.msk.bf16.gmra.mxu1 %vm245_vm1, %v1863_v32 }
  0x71   :  { %521 = vmatprep.mubr.bf16.mxu0 %v1866_v1  ;;  %681 = vmatprep.mubr.bf16.mxu1 %v1866_v1 }
  0x78   :  { %1492 = vmatmul.mubr.msk.bf16.gmra.mxu0 %vm245_vm1, %v1855_v33  ;;  %1508 = vmatmul.mubr.msk.bf16.gmra.mxu1 %vm245_vm1, %v1864_v34 }
  0x79   :  { %531 = vmatprep.mubr.bf16.mxu0 %v1866_v1  ;;  %691 = vmatprep.mubr.bf16.mxu1 %v1866_v1 }
  0x80   :  { %1493 = vmatmul.mubr.msk.bf16.gmra.mxu0 %vm245_vm1, %v1857_v35  ;;  %1509 = vmatmul.mubr.msk.bf16.gmra.mxu1 %vm245_vm1, %v1865_v36 }
  0xc8   :  { %v2055_v37 = vpop.f32.mrf.mxu0  ;;  %v2061_v40 = vpop.f32.mrf.mxu1 }
  0xca   :  { %v2057_v38 = vpop.f32.mrf.mxu0  ;;  %v2067_v43 = vpop.f32.mrf.mxu1 }
  0xcc   :  { %v2059_v39 = vpop.f32.mrf.mxu0  ;;  %v2074_v45 = vpop.f32.mrf.mxu1 }
  0xcd   :  { %v1641_v41 = vpack.c.bf16 %v2059_v39, %v2055_v37  ;;  %v1721_v46 = vpack.c.bf16 %v2074_v45, %v2061_v40 }
  0xce   :  { %v2065_v42 = vpop.f32.mrf.mxu0  ;;  %v2080_v48 = vpop.f32.mrf.mxu1 }
  0xcf   :  { %1642 = vst [vmem:[%s2781_s2] sm:$0xff] %v1641_v41   ;;  %1813 = vst [vmem:[%s2781_s2 + $0x80] sm:$0xff] %v1721_v46  }
  0xd0   :  { %v2072_v44 = vpop.f32.mrf.mxu0  ;;  %v2087_v50 = vpop.f32.mrf.mxu1 }
  0xd2   :  { %v2078_v47 = vpop.f32.mrf.mxu0  ;;  %v2093_v53 = vpop.f32.mrf.mxu1 }
  0xd4   :  { %v2085_v49 = vpop.f32.mrf.mxu0  ;;  %v2100_v55 = vpop.f32.mrf.mxu1 }
  0xd5   :  { %v1646_v51 = vpack.c.bf16 %v2085_v49, %v2072_v44  ;;  %v1726_v56 = vpack.c.bf16 %v2100_v55, %v2087_v50 }
  0xd6   :  { %v2091_v52 = vpop.f32.mrf.mxu0  ;;  %v2106_v58 = vpop.f32.mrf.mxu1 }
  0xd7   :  { %1798 = vst [vmem:[%s2781_s2 + $0x8] sm:$0xff] %v1646_v51   ;;  %1814 = vst [vmem:[%s2781_s2 + $0x88] sm:$0xff] %v1726_v56  }
  0xd8   :  { %v2098_v54 = vpop.f32.mrf.mxu0  ;;  %v2113_v60 = vpop.f32.mrf.mxu1 }
  0xda   :  { %v2104_v57 = vpop.f32.mrf.mxu0  ;;  %v2119_v63 = vpop.f32.mrf.mxu1 }
  0xdc   :  { %v2111_v59 = vpop.f32.mrf.mxu0  ;;  %v2126_v1 = vpop.f32.mrf.mxu1 }
  0xdd   :  { %v1651_v61 = vpack.c.bf16 %v2111_v59, %v2098_v54  ;;  %v1731_v2 = vpack.c.bf16 %v2126_v1, %v2113_v60 }
  0xde   :  { %v2117_v62 = vpop.f32.mrf.mxu0  ;;  %v2132_v4 = vpop.f32.mrf.mxu1 }
  0xdf   :  { %1799 = vst [vmem:[%s2781_s2 + $0x10] sm:$0xff] %v1651_v61   ;;  %1815 = vst [vmem:[%s2781_s2 + $0x90] sm:$0xff] %v1731_v2  }
  0xe0   :  { %v2124_v0 = vpop.f32.mrf.mxu0  ;;  %v2139_v6 = vpop.f32.mrf.mxu1 }
  0xe2   :  { %v2130_v3 = vpop.f32.mrf.mxu0  ;;  %v2145_v9 = vpop.f32.mrf.mxu1 }
  0xe4   :  { %v2137_v5 = vpop.f32.mrf.mxu0  ;;  %v2152_v11 = vpop.f32.mrf.mxu1 }
  0xe5   :  { %v1656_v7 = vpack.c.bf16 %v2137_v5, %v2124_v0  ;;  %v1736_v12 = vpack.c.bf16 %v2152_v11, %v2139_v6 }
  0xe6   :  { %v2143_v8 = vpop.f32.mrf.mxu0  ;;  %v2158_v14 = vpop.f32.mrf.mxu1 }
  0xe7   :  { %1800 = vst [vmem:[%s2781_s2 + $0x18] sm:$0xff] %v1656_v7   ;;  %2817 = vst [vmem:[#allocation2_spill] sm:$0xff] %v2158_v14 }
  0xe8   :  { %v2150_v10 = vpop.f32.mrf.mxu0  ;;  %1816 = vst [vmem:[%s2781_s2 + $0x98] sm:$0xff] %v1736_v12   ;;  %v2165_v16 = vpop.f32.mrf.mxu1 }
  0xe9   :  { %2818 = vst [vmem:[#allocation3_spill] sm:$0xff] %v2165_v16 }
  0xea   :  { %v2156_v13 = vpop.f32.mrf.mxu0  ;;  %v2171_v19 = vpop.f32.mrf.mxu1 }
  0xeb   :  { %2819 = vst [vmem:[#allocation4_spill] sm:$0xff] %v2171_v19 }
  0xec   :  { %v2163_v15 = vpop.f32.mrf.mxu0  ;;  %v2178_v21 = vpop.f32.mrf.mxu1 }
  0xed   :  { %v1661_v17 = vpack.c.bf16 %v2163_v15, %v2150_v10  ;;  %2820 = vst [vmem:[#allocation5_spill] sm:$0xff] %v2178_v21  ;;  %v1741_v22 = vpack.c.bf16 %v2178_v21, %v2165_v16 }
  0xee   :  { %v2169_v18 = vpop.f32.mrf.mxu0  ;;  %v2184_v24 = vpop.f32.mrf.mxu1 }
  0xef   :  { %1801 = vst [vmem:[%s2781_s2 + $0x20] sm:$0xff] %v1661_v17   ;;  %2821 = vst [vmem:[#allocation6_spill] sm:$0xff] %v2184_v24  ;;  %v1094_v24 = vmul.f32 %v2085_v49, %v2085_v49 }
  0xf0   :  { %v2176_v20 = vpop.f32.mrf.mxu0  ;;  %1817 = vst [vmem:[%s2781_s2 + $0xa0] sm:$0xff] %v1741_v22   ;;  %v2191_v26 = vpop.f32.mrf.mxu1 }
  0xf1   :  { %2822 = vst [vmem:[#allocation7_spill] sm:$0xff] %v2191_v26 }
  0xf2   :  { %v2182_v23 = vpop.f32.mrf.mxu0  ;;  %v2197_v29 = vpop.f32.mrf.mxu1 }
  0xf3   :  { %2823 = vst [vmem:[#allocation8_spill] sm:$0xff] %v2197_v29 }
  0xf4   :  { %v2189_v25 = vpop.f32.mrf.mxu0  ;;  %v2204_v31 = vpop.f32.mrf.mxu1 }
  0xf5   :  { %v1666_v27 = vpack.c.bf16 %v2189_v25, %v2176_v20  ;;  %2824 = vst [vmem:[#allocation9_spill] sm:$0xff] %v2204_v31  ;;  %v1746_v32 = vpack.c.bf16 %v2204_v31, %v2191_v26  ;;  %v1298_v26 = vmul.f32 %v2078_v47, %v2078_v47 }
  0xf6   :  { %v2195_v28 = vpop.f32.mrf.mxu0  ;;  %v2210_v34 = vpop.f32.mrf.mxu1 }
  0xf7   :  { %1802 = vst [vmem:[%s2781_s2 + $0x28] sm:$0xff] %v1666_v27   ;;  %2825 = vst [vmem:[#allocation10_spill] sm:$0xff] %v2210_v34 }
  0xf8   :  { %v2202_v30 = vpop.f32.mrf.mxu0  ;;  %1818 = vst [vmem:[%s2781_s2 + $0xa8] sm:$0xff] %v1746_v32   ;;  %v2217_v36 = vpop.f32.mrf.mxu1  ;;  %v1092_v32 = vmul.f32 %v2059_v39, %v2059_v39 }
  0xf9   :  { %2826 = vst [vmem:[#allocation11_spill] sm:$0xff] %v2217_v36 }
  0xfa   :  { %v2208_v33 = vpop.f32.mrf.mxu0  ;;  %v2223_v51 = vpop.f32.mrf.mxu1 }
  0xfb   :  { %2827 = vst [vmem:[#allocation12_spill] sm:$0xff] %v2223_v51  ;;  %v1093_v51 = vmul.f32 %v2072_v44, %v2072_v44 }
  0xfc   :  { %v2215_v35 = vpop.f32.mrf.mxu0  ;;  %v2230_v61 = vpop.f32.mrf.mxu1 }
  0xfd   :  { %v1671_v41 = vpack.c.bf16 %v2215_v35, %v2202_v30  ;;  %2828 = vst [vmem:[#allocation13_spill] sm:$0xff] %v2230_v61  ;;  %v1751_v2 = vpack.c.bf16 %v2230_v61, %v2217_v36 }
  0xfe   :  { %v2221_v46 = vpop.f32.mrf.mxu0  ;;  %v2236_v12 = vpop.f32.mrf.mxu1 }
  0xff   :  { %1803 = vst [vmem:[%s2781_s2 + $0x30] sm:$0xff] %v1671_v41   ;;  %2829 = vst [vmem:[#allocation14_spill] sm:$0xff] %v2236_v12  ;;  %v1297_v12 = vmul.f32 %v2065_v42, %v2065_v42 }
 0x100   :  { %v2228_v56 = vpop.f32.mrf.mxu0  ;;  %1819 = vst [vmem:[%s2781_s2 + $0xb0] sm:$0xff] %v1751_v2   ;;  %v2243_v22 = vpop.f32.mrf.mxu1  ;;  %v1091_v2 = vmul.f32 %v2055_v37, %v2055_v37 }
 0x101   :  { %2830 = vst [vmem:[#allocation15_spill] sm:$0xff] %v2243_v22 }
 0x102   :  { %v2234_v7 = vpop.f32.mrf.mxu0  ;;  %v2251_v61 = vpop.f32.mrf.mxu1  ;;  %v1155_v29 = vadd.f32 %v1092_v32, %v1091_v2 }
 0x103   :  { %2831 = vst [vmem:[#allocation16_spill] sm:$0xff] %v2251_v61  ;;  %v1022_v61 = vadd.f32 %v2059_v39, %v2055_v37  ;;  %v1227_v37 = vadd.f32 %v2065_v42, %v2057_v38 }
 0x104   :  { %v2241_v17 = vpop.f32.mrf.mxu0  ;;  %v2264_v34 = vpop.f32.mrf.mxu1  ;;  %v1156_v2 = vadd.f32 %v1155_v29, %v1093_v51  ;;  %v1300_v29 = vmul.f32 %v2104_v57, %v2104_v57  ;;  %v1096_v51 = vmul.f32 %v2111_v59, %v2111_v59 }
 0x105   :  { %v1676_v27 = vpack.c.bf16 %v2241_v17, %v2228_v56  ;;  %2832 = vst [vmem:[#allocation17_spill] sm:$0xff] %v2264_v34  ;;  %v1756_v31 = vpack.c.bf16 %v2264_v34, %v2243_v22  ;;  %v1023_v39 = vadd.f32 %v1022_v61, %v2072_v44  ;;  %v1299_v34 = vmul.f32 %v2091_v52, %v2091_v52 }
 0x106   :  { %v2249_v41 = vpop.f32.mrf.mxu0  ;;  %v2278_v19 = vpop.f32.mrf.mxu1  ;;  %v1095_v22 = vmul.f32 %v2098_v54, %v2098_v54  ;;  %v1157_v61 = vadd.f32 %v1156_v2, %v1094_v24 }
 0x107   :  { %1804 = vst [vmem:[%s2781_s2 + $0x38] sm:$0xff] %v1676_v27   ;;  %v1296_v27 = vmul.f32 %v2057_v38, %v2057_v38  ;;  %2833 = vst [vmem:[#allocation18_spill] sm:$0xff] %v2278_v19  ;;  %v1228_v38 = vadd.f32 %v1227_v37, %v2078_v47  ;;  %v1024_v42 = vadd.f32 %v1023_v39, %v2085_v49 }
 0x108   :  { %v2262_v36 = vpop.f32.mrf.mxu0  ;;  %1820 = vst [vmem:[%s2781_s2 + $0xb8] sm:$0xff] %v1756_v31   ;;  %v2292_v19 = vpop.f32.mrf.mxu1  ;;  %v1158_v24 = vadd.f32 %v1157_v61, %v1095_v22  ;;  %v1097_v37 = vmul.f32 %v2124_v0, %v2124_v0  ;;  %v1302_v22 = vmul.f32 %v2130_v3, %v2130_v3 }
 0x109   :  { %v1360_v32 = vadd.f32 %v1297_v12, %v1296_v27  ;;  %v1229_v14 = vadd.f32 %v1228_v38, %v2091_v52  ;;  %v1025_v47 = vadd.f32 %v1024_v42, %v2098_v54  ;;  %v1098_v42 = vmul.f32 %v2137_v5, %v2137_v5 }
 0x10a   :  { %v2276_v21 = vpop.f32.mrf.mxu0  ;;  %v2304_v27 = vpop.f32.mrf.mxu1 }
 0x10b   :  { %v1361_v31 = vadd.f32 %v1360_v32, %v1298_v26  ;;  %v1301_v26 = vmul.f32 %v2117_v62, %v2117_v62  ;;  %v1230_v52 = vadd.f32 %v1229_v14, %v2104_v57  ;;  %v1026_v54 = vadd.f32 %v1025_v47, %v2111_v59 }
 0x10c   :  { %v2290_v16 = vpop.f32.mrf.mxu0  ;;  %v2317_v32 = vpop.f32.mrf.mxu1 }
 0x10d   :  { %v1681_v44 = vpack.c.bf16 %v2290_v16, %v2262_v36  ;;  %v1362_v49 = vadd.f32 %v1361_v31, %v1299_v34  ;;  %v1761_v2 = vpack.c.bf16 %v2317_v32, %v2292_v19  ;;  %v1159_v34 = vadd.f32 %v1158_v24, %v1096_v51 }
 0x10e   :  { %v2302_v12 = vpop.f32.mrf.mxu0  ;;  %v2329_v31 = vpop.f32.mrf.mxu1  ;;  %v1231_v61 = vadd.f32 %v1230_v52, %v2117_v62  ;;  %v1027_v57 = vadd.f32 %v1026_v54, %v2124_v0  ;;  %v1099_v51 = vmul.f32 %v2150_v10, %v2150_v10  ;;  %v1100_v54 = vmul.f32 %v2163_v15, %v2163_v15 }
 0x10f   :  { %1805 = vst [vmem:[%s2781_s2 + $0x40] sm:$0xff] %v1681_v44   ;;  %v1363_v38 = vadd.f32 %v1362_v49, %v1300_v29  ;;  %1821 = vst [vmem:[%s2781_s2 + $0xc0] sm:$0xff] %v1761_v2   ;;  %v1160_v14 = vadd.f32 %v1159_v34, %v1097_v37  ;;  %v1303_v29 = vmul.f32 %v2143_v8, %v2143_v8 }
 0x110   :  { %v2315_v39 = vpop.f32.mrf.mxu0  ;;  %v2342_v49 = vpop.f32.mrf.mxu1  ;;  %v1232_v62 = vadd.f32 %v1231_v61, %v2130_v3  ;;  %v1028_v0 = vadd.f32 %v1027_v57, %v2137_v5  ;;  %v1304_v37 = vmul.f32 %v2156_v13, %v2156_v13  ;;  %v1101_v61 = vmul.f32 %v2176_v20, %v2176_v20 }
 0x111   :  { %v1364_v59 = vadd.f32 %v1363_v38, %v1301_v26  ;;  %v1161_v26 = vadd.f32 %v1160_v14, %v1098_v42  ;;  %v1305_v42 = vmul.f32 %v2169_v18, %v2169_v18 }
 0x112   :  { %v2327_v44 = vpop.f32.mrf.mxu0  ;;  %v2354_v38 = vpop.f32.mrf.mxu1  ;;  %v1233_v34 = vadd.f32 %v1232_v62, %v2143_v8  ;;  %v1029_v3 = vadd.f32 %v1028_v0, %v2150_v10  ;;  %v1102_v0 = vmul.f32 %v2189_v25, %v2189_v25 }
 0x113   :  { %v1365_v52 = vadd.f32 %v1364_v59, %v1302_v22  ;;  %v1162_v22 = vadd.f32 %v1161_v26, %v1099_v51  ;;  %v1306_v51 = vmul.f32 %v2182_v23, %v2182_v23 }
 0x114   :  { %v2340_v47 = vpop.f32.mrf.mxu0  ;;  %v2367_v59 = vpop.f32.mrf.mxu1  ;;  %v1234_v8 = vadd.f32 %v1233_v34, %v2156_v13  ;;  %v1030_v10 = vadd.f32 %v1029_v3, %v2163_v15  ;;  %v1103_v34 = vmul.f32 %v2202_v30, %v2202_v30 }
 0x115   :  { %v1686_v24 = vpack.c.bf16 %v2340_v47, %v2315_v39  ;;  %v1366_v5 = vadd.f32 %v1365_v52, %v1303_v29  ;;  %v1766_v14 = vpack.c.bf16 %v2367_v59, %v2342_v49  ;;  %v1163_v29 = vadd.f32 %v1162_v22, %v1100_v54 }
 0x116   :  { %v2352_v2 = vpop.f32.mrf.mxu0  ;;  %v2379_v52 = vpop.f32.mrf.mxu1  ;;  %v1235_v26 = vadd.f32 %v1234_v8, %v2169_v18  ;;  %v1031_v13 = vadd.f32 %v1030_v10, %v2176_v20  ;;  %v1307_v54 = vmul.f32 %v2195_v28, %v2195_v28  ;;  %v1104_v10 = vmul.f32 %v2215_v35, %v2215_v35 }
 0x117   :  { %1806 = vst [vmem:[%s2781_s2 + $0x48] sm:$0xff] %v1686_v24   ;;  %v1367_v62 = vadd.f32 %v1366_v5, %v1304_v37  ;;  %1822 = vst [vmem:[%s2781_s2 + $0xc8] sm:$0xff] %v1766_v14   ;;  %v1164_v37 = vadd.f32 %v1163_v29, %v1101_v61  ;;  %v1308_v61 = vmul.f32 %v2208_v33, %v2208_v33 }
 0x118   :  { %v2365_v57 = vpop.f32.mrf.mxu0  ;;  %v2392_v5 = vpop.f32.mrf.mxu1  ;;  %v1236_v18 = vadd.f32 %v1235_v26, %v2182_v23  ;;  %v1032_v20 = vadd.f32 %v1031_v13, %v2189_v25  ;;  %v1105_v26 = vmul.f32 %v2228_v56, %v2228_v56 }
 0x119   :  { %v1368_v15 = vadd.f32 %v1367_v62, %v1305_v42  ;;  %v1165_v42 = vadd.f32 %v1164_v37, %v1102_v0  ;;  %v1309_v0 = vmul.f32 %v2221_v46, %v2221_v46 }
 0x11a   :  { %v2377_v24 = vpop.f32.mrf.mxu0  ;;  %v2404_v62 = vpop.f32.mrf.mxu1  ;;  %v1237_v29 = vadd.f32 %v1236_v18, %v2195_v28  ;;  %v1033_v23 = vadd.f32 %v1032_v20, %v2202_v30  ;;  %v1106_v20 = vmul.f32 %v2241_v17, %v2241_v17 }
 0x11b   :  { %v1369_v8 = vadd.f32 %v1368_v15, %v1306_v51  ;;  %v1166_v51 = vadd.f32 %v1165_v42, %v1103_v34  ;;  %v1310_v34 = vmul.f32 %v2234_v7, %v2234_v7 }
 0x11c   :  { %v2390_v3 = vpop.f32.mrf.mxu0  ;;  %v2417_v15 = vpop.f32.mrf.mxu1  ;;  %v1238_v28 = vadd.f32 %v1237_v29, %v2208_v33  ;;  %v1034_v30 = vadd.f32 %v1033_v23, %v2215_v35  ;;  %v1107_v29 = vmul.f32 %v2262_v36, %v2262_v36 }
 0x11d   :  { %v1691_v22 = vpack.c.bf16 %v2390_v3, %v2365_v57  ;;  %v1370_v25 = vadd.f32 %v1369_v8, %v1307_v54  ;;  %v1771_v37 = vpack.c.bf16 %v2417_v15, %v2392_v5  ;;  %v1167_v54 = vadd.f32 %v1166_v51, %v1104_v10 }
 0x11e   :  { %v2402_v14 = vpop.f32.mrf.mxu0  ;;  %v2429_v8 = vpop.f32.mrf.mxu1  ;;  %v1239_v42 = vadd.f32 %v1238_v28, %v2221_v46  ;;  %v1035_v33 = vadd.f32 %v1034_v30, %v2228_v56  ;;  %v1311_v10 = vmul.f32 %v2249_v41, %v2249_v41  ;;  %v1108_v30 = vmul.f32 %v2290_v16, %v2290_v16 }
 0x11f   :  { %1807 = vst [vmem:[%s2781_s2 + $0x50] sm:$0xff] %v1691_v22   ;;  %v1371_v18 = vadd.f32 %v1370_v25, %v1308_v61  ;;  %1823 = vst [vmem:[%s2781_s2 + $0xd0] sm:$0xff] %v1771_v37   ;;  %v1168_v61 = vadd.f32 %v1167_v54, %v1105_v26  ;;  %v1312_v26 = vmul.f32 %v2276_v21, %v2276_v21 }
 0x120   :  { %v2415_v13 = vpop.f32.mrf.mxu0  ;;  %v2442_v25 = vpop.f32.mrf.mxu1  ;;  %v1240_v46 = vadd.f32 %v1239_v42, %v2234_v7  ;;  %v1036_v56 = vadd.f32 %v1035_v33, %v2241_v17  ;;  %v1109_v42 = vmul.f32 %v2315_v39, %v2315_v39 }
 0x121   :  { %v1372_v35 = vadd.f32 %v1371_v18, %v1309_v0  ;;  %v1169_v0 = vadd.f32 %v1168_v61, %v1106_v20  ;;  %v1313_v20 = vmul.f32 %v2302_v12, %v2302_v12 }
 0x122   :  { %v2427_v22 = vpop.f32.mrf.mxu0  ;;  %v2454_v18 = vpop.f32.mrf.mxu1  ;;  %v1241_v54 = vadd.f32 %v1240_v46, %v2249_v41  ;;  %v1037_v7 = vadd.f32 %v1036_v56, %v2262_v36  ;;  %v1110_v56 = vmul.f32 %v2340_v47, %v2340_v47 }
 0x123   :  { %v1373_v28 = vadd.f32 %v1372_v35, %v1310_v34  ;;  %v1170_v34 = vadd.f32 %v1169_v0, %v1107_v29  ;;  %v1314_v29 = vmul.f32 %v2327_v44, %v2327_v44 }
 0x124   :  { %v2440_v23 = vpop.f32.mrf.mxu0  ;;  %v2467_v35 = vpop.f32.mrf.mxu1  ;;  %v1242_v41 = vadd.f32 %v1241_v54, %v2276_v21  ;;  %v1038_v36 = vadd.f32 %v1037_v7, %v2290_v16  ;;  %v1111_v54 = vmul.f32 %v2365_v57, %v2365_v57 }
 0x125   :  { %v1696_v51 = vpack.c.bf16 %v2440_v23, %v2415_v13  ;;  %v1374_v17 = vadd.f32 %v1373_v28, %v1311_v10  ;;  %v1776_v61 = vpack.c.bf16 %v2467_v35, %v2442_v25  ;;  %v1171_v10 = vadd.f32 %v1170_v34, %v1108_v30 }
 0x126   :  { %v2452_v37 = vpop.f32.mrf.mxu0  ;;  %v2479_v28 = vpop.f32.mrf.mxu1  ;;  %v1243_v0 = vadd.f32 %v1242_v41, %v2302_v12  ;;  %v1039_v21 = vadd.f32 %v1038_v36, %v2315_v39  ;;  %v1315_v30 = vmul.f32 %v2352_v2, %v2352_v2 }
 0x127   :  { %1808 = vst [vmem:[%s2781_s2 + $0x58] sm:$0xff] %v1696_v51   ;;  %v1375_v46 = vadd.f32 %v1374_v17, %v1312_v26  ;;  %2834 = vst [vmem:[#allocation19_spill] sm:$0xff] %v2479_v28  ;;  %v1172_v26 = vadd.f32 %v1171_v10, %v1109_v42  ;;  %v1112_v42 = vmul.f32 %v2390_v3, %v2390_v3 }
 0x128   :  { %v2465_v33 = vpop.f32.mrf.mxu0  ;;  %1824 = vst [vmem:[%s2781_s2 + $0xd8] sm:$0xff] %v1776_v61   ;;  %v2490_v17 = vpop.f32.mrf.mxu1  ;;  %v1244_v34 = vadd.f32 %v1243_v0, %v2327_v44  ;;  %v1040_v12 = vadd.f32 %v1039_v21, %v2340_v47 }
 0x129   :  { %v1376_v16 = vadd.f32 %v1375_v46, %v1313_v20  ;;  %v1173_v36 = vadd.f32 %v1172_v26, %v1110_v56  ;;  %v1316_v20 = vmul.f32 %v2377_v24, %v2377_v24  ;;  %v1113_v56 = vmul.f32 %v2415_v13, %v2415_v13 }
 0x12a   :  { %v2477_v51 = vpop.f32.mrf.mxu0  ;;  %v2499_v46 = vpop.f32.mrf.mxu1  ;;  %v1245_v10 = vadd.f32 %v1244_v34, %v2352_v2  ;;  %v1041_v28 = vadd.f32 %v1040_v12, %v2365_v57 }
 0x12b   :  { %v1377_v41 = vadd.f32 %v1376_v16, %v1314_v29  ;;  %v1174_v47 = vadd.f32 %v1173_v36, %v1111_v54  ;;  %v1317_v29 = vmul.f32 %v2402_v14, %v2402_v14  ;;  %v1114_v54 = vmul.f32 %v2440_v23, %v2440_v23 }
 0x12c   :  { %v507_v7 = vpop.f32.mrf.mxu0  ;;  %v2510_v21 = vpop.f32.mrf.mxu1  ;;  %v1246_v16 = vadd.f32 %v1245_v10, %v2377_v24  ;;  %v1042_v2 = vadd.f32 %v1041_v28, %v2390_v3  ;;  %v1319_v36 = vmul.f32 %v2452_v37, %v2452_v37 }
 0x12d   :  { %v1701_v39 = vpack.c.bf16 %v507_v7, %v2465_v33  ;;  %v1378_v44 = vadd.f32 %v1377_v41, %v1315_v30  ;;  %2835 = vst [vmem:[#allocation20_spill] sm:$0xff] %v2510_v21  ;;  %v1781_v57 = vpack.c.bf16 %v2510_v21, %v2490_v17  ;;  %v1175_v34 = vadd.f32 %v1174_v47, %v1112_v42 }
 0x12e   :  { %v509_v61 = vpop.f32.mrf.mxu0  ;;  %v1318_v30 = vmul.f32 %v2427_v22, %v2427_v22  ;;  %v1247_v41 = vadd.f32 %v1246_v16, %v2402_v14  ;;  %v1043_v24 = vadd.f32 %v1042_v2, %v2415_v13 }
 0x12f   :  { %1809 = vst [vmem:[%s2781_s2 + $0x60] sm:$0xff] %v1701_v39   ;;  %v1379_v26 = vadd.f32 %v1378_v44, %v1316_v20  ;;  %v2520_v39 = vpop.f32.mrf.mxu1  ;;  %1825 = vst [vmem:[%s2781_s2 + $0xe0] sm:$0xff] %v1781_v57   ;;  %v1176_v28 = vadd.f32 %v1175_v34, %v1113_v56  ;;  %v1115_v20 = vmul.f32 %v2465_v33, %v2465_v33 }
 0x130   :  { %v513_v0 = vpop.f32.mrf.mxu0  ;;  %2836 = vst [vmem:[#allocation21_spill] sm:$0xff] %v2520_v39  ;;  %v1248_v44 = vadd.f32 %v1247_v41, %v2427_v22  ;;  %v1044_v14 = vadd.f32 %v1043_v24, %v2440_v23  ;;  %v1116_v56 = vmul.f32 %v507_v7, %v507_v7  ;;  %v1321_v41 = vmul.f32 %v509_v61, %v509_v61 }
 0x131   :  { %v1380_v3 = vadd.f32 %v1379_v26, %v1317_v29  ;;  %v2531_v10 = vpop.f32.mrf.mxu1  ;;  %v1177_v16 = vadd.f32 %v1176_v28, %v1114_v54  ;;  %v1320_v29 = vmul.f32 %v2477_v51, %v2477_v51 }
 0x132   :  { %v515_v12 = vpop.f32.mrf.mxu0  ;;  %v1249_v26 = vadd.f32 %v1248_v44, %v2452_v37  ;;  %v1045_v34 = vadd.f32 %v1044_v14, %v2465_v33 }
 0x133   :  { %v1381_v47 = vadd.f32 %v1380_v3, %v1318_v30  ;;  %v2537_v57 = vpop.f32.mrf.mxu1  ;;  %v1178_v23 = vadd.f32 %v1177_v16, %v1115_v20  ;;  %v1117_v30 = vmul.f32 %v513_v0, %v513_v0  ;;  %v1322_v33 = vmul.f32 %v515_v12, %v515_v12 }
 0x134   :  { %v517_v42 = vpop.f32.mrf.mxu0  ;;  %2837 = vst [vmem:[#allocation22_spill] sm:$0xff] %v2537_v57  ;;  %v1250_v3 = vadd.f32 %v1249_v26, %v2477_v51  ;;  %v1046_v28 = vadd.f32 %v1045_v34, %v507_v7 }
 0x135   :  { %v1706_v13 = vpack.c.bf16 %v517_v42, %v513_v0  ;;  %v1382_v22 = vadd.f32 %v1381_v47, %v1319_v36  ;;  %v2544_v24 = vpop.f32.mrf.mxu1  ;;  %v1179_v44 = vadd.f32 %v1178_v23, %v1116_v56  ;;  %v1118_v14 = vmul.f32 %v517_v42, %v517_v42 }
 0x136   :  { %v519_v2 = vpop.f32.mrf.mxu0  ;;  %2838 = vst [vmem:[#allocation23_spill] sm:$0xff] %v2544_v24  ;;  %v1786_v57 = vpack.c.bf16 %v2544_v24, %v2531_v10  ;;  %v1251_v36 = vadd.f32 %v1250_v3, %v509_v61  ;;  %v1047_v20 = vadd.f32 %v1046_v28, %v513_v0 }
 0x137   :  { %1810 = vst [vmem:[%s2781_s2 + $0x68] sm:$0xff] %v1706_v13   ;;  %v1383_v37 = vadd.f32 %v1382_v22, %v1320_v29  ;;  %v2549_v21 = vpop.f32.mrf.mxu1  ;;  %v1180_v47 = vadd.f32 %v1179_v44, %v1117_v30  ;;  %v1323_v51 = vmul.f32 %v519_v2, %v519_v2 }
 0x138   :  { %v523_v54 = vpop.f32.mrf.mxu0  ;;  %2839 = vst [vmem:[#allocation24_spill] sm:$0xff] %v2549_v21  ;;  %1826 = vst [vmem:[%s2781_s2 + $0xe8] sm:$0xff] %v1786_v57   ;;  %v1252_v29 = vadd.f32 %v1251_v36, %v515_v12  ;;  %v1048_v56 = vadd.f32 %v1047_v20, %v517_v42 }
 0x139   :  { %v1384_v13 = vadd.f32 %v1383_v37, %v1321_v41  ;;  %v1119_v7 = vmul.f32 %v523_v54, %v523_v54  ;;  %v2554_v26 = vpop.f32.mrf.mxu1  ;;  %v1181_v23 = vadd.f32 %v1180_v47, %v1118_v14 }
 0x13a   :  { %v525_v39 = vpop.f32.mrf.mxu0  ;;  %v1253_v3 = vadd.f32 %v1252_v29, %v519_v2  ;;  %v1049_v28 = vadd.f32 %v1048_v56, %v523_v54 }
 0x13b   :  { %v1385_v22 = vadd.f32 %v1384_v13, %v1322_v33  ;;  %v1324_v24 = vmul.f32 %v525_v39, %v525_v39  ;;  %v2556_v0 = vpop.f32.mrf.mxu1  ;;  %v1182_v41 = vadd.f32 %v1181_v23, %v1119_v7 }
 0x13c   :  { %v527_v16 = vpop.f32.mrf.mxu0  ;;  %v1254_v42 = vadd.f32 %v1253_v3, %v525_v39 }
 0x13d   :  { %v1711_v34 = vpack.c.bf16 %v527_v16, %v523_v54  ;;  %v1120_v21 = vmul.f32 %v527_v16, %v527_v16  ;;  %v1386_v57 = vadd.f32 %v1385_v22, %v1323_v51  ;;  %v2561_v12 = vpop.f32.mrf.mxu1  ;;  %v1050_v44 = vadd.f32 %v1049_v28, %v527_v16 }
 0x13e   :  { %v529_v61 = vpop.f32.mrf.mxu0  ;;  %v1791_v14 = vpack.c.bf16 %v2561_v12, %v2554_v26 }
 0x13f   :  { %1811 = vst [vmem:[%s2781_s2 + $0x70] sm:$0xff] %v1711_v34   ;;  %v1325_v30 = vmul.f32 %v529_v61, %v529_v61  ;;  %v1387_v36 = vadd.f32 %v1386_v57, %v1324_v24  ;;  %v1183_v20 = vadd.f32 %v1182_v41, %v1120_v21  ;;  %v2565_v54 = vpop.f32.mrf.mxu1  ;;  %v1255_v13 = vadd.f32 %v1254_v42, %v529_v61 }
 0x140   :  { %v533_v37 = vpop.f32.mrf.mxu0  ;;  %1827 = vst [vmem:[%s2781_s2 + $0xf0] sm:$0xff] %v1791_v14   ;;  %v1123_v21 = vmul.f32 %v2061_v40, %v2061_v40  ;;  %v1124_v42 = vmul.f32 %v2074_v45, %v2074_v45 }
 0x141   :  { %v1121_v33 = vmul.f32 %v533_v37, %v533_v37  ;;  %v1051_v47 = vadd.f32 %v1050_v44, %v533_v37  ;;  %v1388_v51 = vadd.f32 %v1387_v36, %v1325_v30  ;;  %v2570_v16 = vpop.f32.mrf.mxu1 }
 0x142   :  { %v535_v2 = vpop.f32.mrf.mxu0 }
 0x143   :  { %v1326_v29 = vmul.f32 %v535_v2, %v535_v2  ;;  %v1184_v7 = vadd.f32 %v1183_v20, %v1121_v33  ;;  %v1256_v56 = vadd.f32 %v1255_v13, %v535_v2  ;;  %v2574_v3 = vpop.f32.mrf.mxu1  ;;  %v1125_v2 = vmul.f32 %v2087_v50, %v2087_v50 }
 0x144   :  { %v537_v39 = vpop.f32.mrf.mxu0 }
 0x145   :  { %v1716_v34 = vpack.c.bf16 %v537_v39, %v533_v37  ;;  %v1052_v22 = vadd.f32 %v1051_v47, %v537_v39  ;;  %v1122_v24 = vmul.f32 %v537_v39, %v537_v39  ;;  %v1389_v23 = vadd.f32 %v1388_v51, %v1326_v29  ;;  %v2586_v20 = vpop.f32.mrf.mxu1 }
 0x146   :  { %v539_v61 = vpop.f32.mrf.mxu0  ;;  %v1328_v37 = vmul.f32 %v2067_v43, %v2067_v43  ;;  %v1796_v13 = vpack.c.bf16 %v2586_v20, %v2570_v16 }
 0x147   :  { %1812 = vst [vmem:[%s2781_s2 + $0x78] sm:$0xff] %v1716_v34   ;;  %v1053_v28 = vadd.f32 %v1052_v22, %v2061_v40  ;;  %v1185_v57 = vadd.f32 %v1184_v7, %v1122_v24  ;;  %v1257_v41 = vadd.f32 %v1256_v56, %v539_v61  ;;  %v1327_v30 = vmul.f32 %v539_v61, %v539_v61 }
 0x148   :  { %v1329_v40 = vmul.f32 %v2080_v48, %v2080_v48  ;;  %v1126_v7 = vmul.f32 %v2100_v55, %v2100_v55  ;;  %1828 = vst [vmem:[%s2781_s2 + $0xf8] sm:$0xff] %v1796_v13   ;;  %v1127_v22 = vmul.f32 %v2113_v60, %v2113_v60  ;;  %v2840_v13 = vld [vmem:[#allocation2_spill] sm:$0xff] }
 0x149   :  { %v1054_v44 = vadd.f32 %v1053_v28, %v2074_v45  ;;  %v1186_v33 = vadd.f32 %v1185_v57, %v1123_v21  ;;  %v1258_v14 = vadd.f32 %v1257_v41, %v2067_v43  ;;  %v1390_v36 = vadd.f32 %v1389_v23, %v1327_v30 }
 0x14a   :  { %v1330_v43 = vmul.f32 %v2093_v53, %v2093_v53  ;;  %v1332_v28 = vmul.f32 %v2119_v63, %v2119_v63 }
 0x14b   :  { %v1055_v47 = vadd.f32 %v1054_v44, %v2087_v50  ;;  %v1187_v29 = vadd.f32 %v1186_v33, %v1124_v42  ;;  %v1259_v45 = vadd.f32 %v1258_v14, %v2080_v48  ;;  %v1391_v51 = vadd.f32 %v1390_v36, %v1328_v37 }
 0x14c   :  { %v1331_v48 = vmul.f32 %v2106_v58, %v2106_v58  ;;  %v1333_v37 = vmul.f32 %v2132_v4, %v2132_v4  ;;  %v1334_v14 = vmul.f32 %v2145_v9, %v2145_v9 }
 0x14d   :  { %v1056_v39 = vadd.f32 %v1055_v47, %v2100_v55  ;;  %v1188_v56 = vadd.f32 %v1187_v29, %v1125_v2  ;;  %v1260_v34 = vadd.f32 %v1259_v45, %v2093_v53  ;;  %v1392_v50 = vadd.f32 %v1391_v51, %v1329_v40 }
 0x14e   :  { %v1128_v55 = vmul.f32 %v2126_v1, %v2126_v1  ;;  %v1335_v47 = vmul.f32 %v2840_v13, %v2840_v13 }
 0x14f   :  { %v1057_v24 = vadd.f32 %v1056_v39, %v2113_v60  ;;  %v1189_v21 = vadd.f32 %v1188_v56, %v1126_v7  ;;  %v1261_v23 = vadd.f32 %v1260_v34, %v2106_v58  ;;  %v1393_v61 = vadd.f32 %v1392_v50, %v1330_v43  ;;  %v2842_v7 = vld [vmem:[#allocation4_spill] sm:$0xff] }
 0x150   :  { %v1129_v60 = vmul.f32 %v2139_v6, %v2139_v6  ;;  %v1336_v39 = vmul.f32 %v2842_v7, %v2842_v7 }
 0x151   :  { %v1058_v53 = vadd.f32 %v1057_v24, %v2126_v1  ;;  %v1190_v57 = vadd.f32 %v1189_v21, %v1127_v22  ;;  %v1262_v41 = vadd.f32 %v1261_v23, %v2119_v63  ;;  %v1394_v30 = vadd.f32 %v1393_v61, %v1331_v48  ;;  %v2844_v22 = vld [vmem:[#allocation6_spill] sm:$0xff]  ;;  %v2845_v21 = vld [vmem:[#allocation7_spill] sm:$0xff] }
 0x152   :  { %v1130_v1 = vmul.f32 %v2152_v11, %v2152_v11  ;;  %v1337_v24 = vmul.f32 %v2844_v22, %v2844_v22  ;;  %v1133_v23 = vmul.f32 %v2845_v21, %v2845_v21 }
 0x153   :  { %v1059_v58 = vadd.f32 %v1058_v53, %v2139_v6  ;;  %v1191_v42 = vadd.f32 %v1190_v57, %v1128_v55  ;;  %v1263_v44 = vadd.f32 %v1262_v41, %v2132_v4  ;;  %v1395_v33 = vadd.f32 %v1394_v30, %v1332_v28  ;;  %v2841_v6 = vld [vmem:[#allocation3_spill] sm:$0xff]  ;;  %v2846_v57 = vld [vmem:[#allocation8_spill] sm:$0xff]  ;;  %v2847_v30 = vld [vmem:[#allocation9_spill] sm:$0xff] }
 0x154   :  { %v1131_v29 = vmul.f32 %v2841_v6, %v2841_v6  ;;  %v1338_v41 = vmul.f32 %v2846_v57, %v2846_v57 }
 0x155   :  { %v1060_v63 = vadd.f32 %v1059_v58, %v2152_v11  ;;  %v1192_v36 = vadd.f32 %v1191_v42, %v1129_v60  ;;  %v1264_v40 = vadd.f32 %v1263_v44, %v2145_v9  ;;  %v1396_v2 = vadd.f32 %v1395_v33, %v1333_v37  ;;  %v2843_v11 = vld [vmem:[#allocation5_spill] sm:$0xff]  ;;  %v2848_v33 = vld [vmem:[#allocation10_spill] sm:$0xff] }
 0x156   :  { %v1132_v56 = vmul.f32 %v2843_v11, %v2843_v11  ;;  %v1134_v37 = vmul.f32 %v2847_v30, %v2847_v30 }
 0x157   :  { %v1193_v4 = vadd.f32 %v1192_v36, %v1130_v1  ;;  %v1265_v45 = vadd.f32 %v1264_v40, %v2840_v13  ;;  %v1397_v51 = vadd.f32 %v1396_v2, %v1334_v14  ;;  %v1061_v43 = vadd.f32 %v1060_v63, %v2841_v6  ;;  %v2849_v1 = vld [vmem:[#allocation11_spill] sm:$0xff] }
 0x158   :  { %v1339_v14 = vmul.f32 %v2848_v33, %v2848_v33  ;;  %v1135_v63 = vmul.f32 %v2849_v1, %v2849_v1 }
 0x159   :  { %v1266_v9 = vadd.f32 %v1265_v45, %v2842_v7  ;;  %v1398_v34 = vadd.f32 %v1397_v51, %v1335_v47  ;;  %v1062_v50 = vadd.f32 %v1061_v43, %v2843_v11  ;;  %v1194_v48 = vadd.f32 %v1193_v4, %v1131_v29  ;;  %v2850_v47 = vld [vmem:[#allocation12_spill] sm:$0xff]  ;;  %v2851_v29 = vld [vmem:[#allocation13_spill] sm:$0xff] }
 0x15a   :  { %v1340_v6 = vmul.f32 %v2850_v47, %v2850_v47  ;;  %v1136_v4 = vmul.f32 %v2851_v29, %v2851_v29 }
 0x15b   :  { %v1399_v61 = vadd.f32 %v1398_v34, %v1336_v39  ;;  %v1063_v28 = vadd.f32 %v1062_v50, %v2845_v21  ;;  %v1195_v55 = vadd.f32 %v1194_v48, %v1132_v56  ;;  %v1267_v53 = vadd.f32 %v1266_v9, %v2844_v22  ;;  %v2852_v39 = vld [vmem:[#allocation14_spill] sm:$0xff]  ;;  %v2853_v56 = vld [vmem:[#allocation15_spill] sm:$0xff] }
 0x15c   :  { %v1341_v11 = vmul.f32 %v2852_v39, %v2852_v39  ;;  %v1137_v9 = vmul.f32 %v2853_v56, %v2853_v56 }
 0x15d   :  { %v1064_v60 = vadd.f32 %v1063_v28, %v2847_v30  ;;  %v1196_v58 = vadd.f32 %v1195_v55, %v1133_v23  ;;  %v1268_v42 = vadd.f32 %v1267_v53, %v2846_v57  ;;  %v1400_v44 = vadd.f32 %v1399_v61, %v1337_v24  ;;  %v2854_v24 = vld [vmem:[#allocation16_spill] sm:$0xff]  ;;  %v2855_v23 = vld [vmem:[#allocation17_spill] sm:$0xff] }
 0x15e   :  { %v1342_v21 = vmul.f32 %v2854_v24, %v2854_v24  ;;  %v1138_v61 = vmul.f32 %v2855_v23, %v2855_v23 }
 0x15f   :  { %v1065_v36 = vadd.f32 %v1064_v60, %v2849_v1  ;;  %v1197_v40 = vadd.f32 %v1196_v58, %v1134_v37  ;;  %v1269_v2 = vadd.f32 %v1268_v42, %v2848_v33  ;;  %v1401_v13 = vadd.f32 %v1400_v44, %v1338_v41  ;;  %v2856_v41 = vld [vmem:[#allocation18_spill] sm:$0xff] }
 0x160   :  { %v1343_v30 = vmul.f32 %v2856_v41, %v2856_v41  ;;  %v1139_v37 = vmul.f32 %v2292_v19, %v2292_v19  ;;  %v1344_v33 = vmul.f32 %v2304_v27, %v2304_v27 }
 0x161   :  { %v1066_v45 = vadd.f32 %v1065_v36, %v2851_v29  ;;  %v1198_v51 = vadd.f32 %v1197_v40, %v1135_v63  ;;  %v1270_v43 = vadd.f32 %v1269_v2, %v2850_v47  ;;  %v1402_v7 = vadd.f32 %v1401_v13, %v1339_v14 }
 0x162   :  { %v1140_v14 = vmul.f32 %v2317_v32, %v2317_v32  ;;  %v1345_v2 = vmul.f32 %v2329_v31, %v2329_v31 }
 0x163   :  { %v1067_v34 = vadd.f32 %v1066_v45, %v2853_v56  ;;  %v1199_v50 = vadd.f32 %v1198_v51, %v1136_v4  ;;  %v1271_v48 = vadd.f32 %v1270_v43, %v2852_v39  ;;  %v1403_v22 = vadd.f32 %v1402_v7, %v1340_v6 }
 0x164   :  { %v1346_v4 = vmul.f32 %v2354_v38, %v2354_v38  ;;  %v1347_v7 = vmul.f32 %v2379_v52, %v2379_v52 }
 0x165   :  { %v1068_v28 = vadd.f32 %v1067_v34, %v2855_v23  ;;  %v1200_v55 = vadd.f32 %v1199_v50, %v1137_v9  ;;  %v1272_v53 = vadd.f32 %v1271_v48, %v2854_v24  ;;  %v1404_v57 = vadd.f32 %v1403_v22, %v1341_v11 }
 0x166   :  { %v1348_v9 = vmul.f32 %v2404_v62, %v2404_v62  ;;  %v1349_v22 = vmul.f32 %v2429_v8, %v2429_v8 }
 0x167   :  { %v1069_v60 = vadd.f32 %v1068_v28, %v2292_v19  ;;  %v1201_v58 = vadd.f32 %v1200_v55, %v1138_v61  ;;  %v1273_v42 = vadd.f32 %v1272_v53, %v2856_v41  ;;  %v1405_v44 = vadd.f32 %v1404_v57, %v1342_v21  ;;  %v2857_v57 = vld [vmem:[#allocation19_spill] sm:$0xff] }
 0x168   :  { %v1141_v19 = vmul.f32 %v2342_v49, %v2342_v49  ;;  %v1350_v61 = vmul.f32 %v2454_v18, %v2454_v18  ;;  %v1351_v41 = vmul.f32 %v2857_v57, %v2857_v57 }
 0x169   :  { %v1070_v1 = vadd.f32 %v1069_v60, %v2317_v32  ;;  %v1202_v63 = vadd.f32 %v1201_v58, %v1139_v37  ;;  %v1274_v36 = vadd.f32 %v1273_v42, %v2304_v27  ;;  %v1406_v40 = vadd.f32 %v1405_v44, %v1343_v30  ;;  %v2858_v42 = vld [vmem:[#allocation20_spill] sm:$0xff] }
 0x16a   :  { %v1142_v32 = vmul.f32 %v2367_v59, %v2367_v59  ;;  %v1352_v58 = vmul.f32 %v2499_v46, %v2499_v46 }
 0x16b   :  { %v1203_v13 = vadd.f32 %v1202_v63, %v1140_v14  ;;  %v1275_v47 = vadd.f32 %v1274_v36, %v2329_v31  ;;  %v1407_v6 = vadd.f32 %v1406_v40, %v1344_v33  ;;  %v1071_v29 = vadd.f32 %v1070_v1, %v2342_v49  ;;  %v2859_v1 = vld [vmem:[#allocation21_spill] sm:$0xff] }
 0x16c   :  { %v1143_v31 = vmul.f32 %v2392_v5, %v2392_v5  ;;  %v1353_v63 = vmul.f32 %v2859_v1, %v2859_v1  ;;  %v1149_v36 = vmul.f32 %v2531_v10, %v2531_v10 }
 0x16d   :  { %v1408_v27 = vadd.f32 %v1407_v6, %v1345_v2  ;;  %v1204_v45 = vadd.f32 %v1203_v13, %v1141_v19  ;;  %v1276_v51 = vadd.f32 %v1275_v47, %v2354_v38  ;;  %v1072_v43 = vadd.f32 %v1071_v29, %v2367_v59  ;;  %v2860_v13 = vld [vmem:[#allocation22_spill] sm:$0xff]  ;;  %v2861_v6 = vld [vmem:[#allocation23_spill] sm:$0xff] }
 0x16e   :  { %v1144_v38 = vmul.f32 %v2417_v15, %v2417_v15  ;;  %v1354_v47 = vmul.f32 %v2860_v13, %v2860_v13 }
 0x16f   :  { %v1409_v39 = vadd.f32 %v1408_v27, %v1346_v4  ;;  %v1205_v49 = vadd.f32 %v1204_v45, %v1142_v32  ;;  %v1277_v11 = vadd.f32 %v1276_v51, %v2379_v52  ;;  %v1073_v56 = vadd.f32 %v1072_v43, %v2392_v5  ;;  %v2862_v45 = vld [vmem:[#allocation24_spill] sm:$0xff] }
 0x170   :  { %v1145_v52 = vmul.f32 %v2442_v25, %v2442_v25  ;;  %v1355_v51 = vmul.f32 %v2862_v45, %v2862_v45  ;;  %v1151_v43 = vmul.f32 %v2554_v26, %v2554_v26 }
 0x171   :  { %v1410_v34 = vadd.f32 %v1409_v39, %v1347_v7  ;;  %v1206_v59 = vadd.f32 %v1205_v49, %v1143_v31  ;;  %v1278_v50 = vadd.f32 %v1277_v11, %v2404_v62  ;;  %v1074_v48 = vadd.f32 %v1073_v56, %v2417_v15 }
 0x172   :  { %v1146_v62 = vmul.f32 %v2467_v35, %v2467_v35  ;;  %v1356_v49 = vmul.f32 %v2556_v0, %v2556_v0  ;;  %v1152_v11 = vmul.f32 %v2561_v12, %v2561_v12 }
 0x173   :  { %v1411_v24 = vadd.f32 %v1410_v34, %v1348_v9  ;;  %v1207_v5 = vadd.f32 %v1206_v59, %v1144_v38  ;;  %v1279_v21 = vadd.f32 %v1278_v50, %v2429_v8  ;;  %v1075_v23 = vadd.f32 %v1074_v48, %v2442_v25 }
 0x174   :  { %v1147_v8 = vmul.f32 %v2490_v17, %v2490_v17  ;;  %v1357_v59 = vmul.f32 %v2565_v54, %v2565_v54  ;;  %v1153_v50 = vmul.f32 %v2570_v16, %v2570_v16 }
 0x175   :  { %v1412_v28 = vadd.f32 %v1411_v24, %v1349_v22  ;;  %v1208_v15 = vadd.f32 %v1207_v5, %v1145_v52  ;;  %v1280_v55 = vadd.f32 %v1279_v21, %v2454_v18  ;;  %v1076_v53 = vadd.f32 %v1075_v23, %v2467_v35  ;;  %v699_v24 = vpop.f32.mrf.mxu1 }
 0x176   :  { %v1148_v18 = vmul.f32 %v2858_v42, %v2858_v42  ;;  %v1358_v5 = vmul.f32 %v2574_v3, %v2574_v3 }
 0x177   :  { %v1413_v30 = vadd.f32 %v1412_v28, %v1350_v61  ;;  %v1209_v25 = vadd.f32 %v1208_v15, %v1146_v62  ;;  %v1281_v37 = vadd.f32 %v1280_v55, %v2857_v57  ;;  %v1077_v60 = vadd.f32 %v1076_v53, %v2490_v17 }
 0x178   :  { %v1359_v62 = vmul.f32 %v699_v24, %v699_v24 }
 0x179   :  { %v1414_v44 = vadd.f32 %v1413_v30, %v1351_v41  ;;  %v1210_v35 = vadd.f32 %v1209_v25, %v1147_v8  ;;  %v1282_v33 = vadd.f32 %v1281_v37, %v2499_v46  ;;  %v1078_v14 = vadd.f32 %v1077_v60, %v2858_v42 }
 0x17a   :  { %v1150_v46 = vmul.f32 %v2861_v6, %v2861_v6 }
 0x17b   :  { %v1415_v40 = vadd.f32 %v1414_v44, %v1352_v58  ;;  %v1211_v17 = vadd.f32 %v1210_v35, %v1148_v18  ;;  %v1283_v2 = vadd.f32 %v1282_v33, %v2859_v1  ;;  %v1079_v19 = vadd.f32 %v1078_v14, %v2531_v10 }
 0x17d   :  { %v1416_v29 = vadd.f32 %v1415_v40, %v1353_v63  ;;  %v1212_v4 = vadd.f32 %v1211_v17, %v1149_v36  ;;  %v1284_v32 = vadd.f32 %v1283_v2, %v2860_v13  ;;  %v1080_v27 = vadd.f32 %v1079_v19, %v2861_v6 }
 0x17f   :  { %v1417_v7 = vadd.f32 %v1416_v29, %v1354_v47  ;;  %v1213_v10 = vadd.f32 %v1212_v4, %v1150_v46  ;;  %v1285_v31 = vadd.f32 %v1284_v32, %v2862_v45  ;;  %v1081_v39 = vadd.f32 %v1080_v27, %v2554_v26 }
 0x181   :  { %v1418_v56 = vadd.f32 %v1417_v7, %v1355_v51  ;;  %v1214_v9 = vadd.f32 %v1213_v10, %v1151_v43  ;;  %v1286_v38 = vadd.f32 %v1285_v31, %v2556_v0  ;;  %v1082_v34 = vadd.f32 %v1081_v39, %v2561_v12 }
 0x182   :  { %v1154_v0 = vmul.f32 %v2586_v20, %v2586_v20 }
 0x183   :  { %v1419_v48 = vadd.f32 %v1418_v56, %v1356_v49  ;;  %v1215_v26 = vadd.f32 %v1214_v9, %v1152_v11  ;;  %v1287_v22 = vadd.f32 %v1286_v38, %v2565_v54  ;;  %v1083_v52 = vadd.f32 %v1082_v34, %v2570_v16 }
 0x185   :  { %v1420_v12 = vadd.f32 %v1419_v48, %v1357_v59  ;;  %v1216_v21 = vadd.f32 %v1215_v26, %v1153_v50  ;;  %v1288_v23 = vadd.f32 %v1287_v22, %v2574_v3  ;;  %v1084_v61 = vadd.f32 %v1083_v52, %v2586_v20 }
 0x187   :  { %v1421_v28 = vadd.f32 %v1420_v12, %v1358_v5  ;;  %v1085_v15 = vrot.slane %v1084_v61, 4  ;;  %v1217_v55 = vadd.f32 %v1216_v21, %v1154_v0  ;;  %v1289_v54 = vadd.f32 %v1288_v23, %v699_v24 }
 0x189   :  { %v1086_v53 = vadd.f32 %v1085_v15, %v1084_v61  ;;  %v1218_v16 = vrot.slane %v1217_v55, 4  ;;  %v1290_v57 = vrot.slane %v1289_v54, 4  ;;  %v1422_v41 = vadd.f32 %v1421_v28, %v1359_v62 }
 0x18b   :  { %v1087_v8 = vrot.slane %v1086_v53, 2  ;;  %v1219_v30 = vadd.f32 %v1218_v16, %v1217_v55  ;;  %v1291_v25 = vadd.f32 %v1290_v57, %v1289_v54  ;;  %v1423_v37 = vrot.slane %v1422_v41, 4 }
 0x18d   :  { %v1088_v60 = vadd.f32 %v1087_v8, %v1086_v53  ;;  %v1220_v58 = vrot.slane %v1219_v30, 2  ;;  %v1292_v42 = vrot.slane %v1291_v25, 2  ;;  %v1424_v18 = vadd.f32 %v1423_v37, %v1422_v41 }
 0x18f   :  { %v1089_v3 = vrot.slane %v1088_v60, 1  ;;  %v1221_v44 = vadd.f32 %v1220_v58, %v1219_v30  ;;  %v1293_v20 = vadd.f32 %v1292_v42, %v1291_v25  ;;  %v1425_v35 = vrot.slane %v1424_v18, 2 }
 0x191   :  { %v1222_v33 = vrot.slane %v1221_v44, 1  ;;  %v1294_v14 = vrot.slane %v1293_v20, 1  ;;  %v1426_v1 = vadd.f32 %v1425_v35, %v1424_v18  ;;  %v1090_v63 = vadd.f32 %v1089_v3, %v1088_v60 }
 0x193   :  { %v1223_v36 = vadd.f32 %v1222_v33, %v1221_v44  ;;  %v1427_v40 = vrot.slane %v1426_v1, 1  ;;  %v1295_v2 = vadd.f32 %v1294_v14, %v1293_v20 }
 0x195   :  { %v1225_v17 = vsel %vm1224_vm2, %v1090_v63, %v1223_v36  ;;  %v1428_v19 = vadd.f32 %v1427_v40, %v1426_v1 }
 0x196   :  { %1226 = vst [vmem:[%s2782_s3] sm:$0x3] %v1225_v17 }
 0x197   :  { %v1429_v13 = vsel %vm1224_vm2, %v1295_v2, %v1428_v19 }
 0x198   :  { %1430 = vst [vmem:[%s2783_s4] sm:$0x3] %v1429_v13 }

// kernel: bottleneck_forward.6
= control target key start
LH: loop header
LB: loop body
LE: loop exit
PB: predicated region body
PF: predicated region fallthrough
CT: control target
= control target key end

     0   :  { %vm1261_vm0 = vcmask 1040384   ;;  %s2517_s3 = inlined_call_operand.vmem [shape: bf16[128,128], index: 3, kind: input, shape index: {}]   ;;  %s2518_s0 = inlined_call_operand.vmem [shape: bf16[512,128], index: 0, kind: input, shape index: {}]   ;;  %s2519_s1 = inlined_call_operand.vmem [shape: f32[1,128], index: 1, kind: input, shape index: {}]   ;;  %s2520_s2 = inlined_call_operand.vmem [shape: f32[1,128], index: 2, kind: input, shape index: {}]   ;;  %s2521_s4 = inlined_call_operand.vmem [shape: bf16[512,128], index: 4, kind: output, shape index: {0}]   ;;  %s2522_s5 = inlined_call_operand.vmem [shape: f32[1,2,128], index: 5, kind: output, shape index: {1}]  }
   0x1   :  { %v1896_v0 = vld [vmem:[%s2517_s3 + $0x38] sm:$0xff]   ;;  %v1897_v1 = vld [vmem:[%s2517_s3 + $0x30] sm:$0xff]   ;;  %v1898_v2 = vld [vmem:[%s2517_s3 + $0x28] sm:$0xff]  }
   0x2   :  { %1800 = vmatprep.subr.bf16.mxu0 %v1896_v0  ;;  %1880 = vmatprep.subr.bf16.mxu1 %v1896_v0  ;;  %v1899_v3 = vld [vmem:[%s2517_s3 + $0x20] sm:$0xff]   ;;  %v1698_v8 = vld [vmem:[%s2518_s0 + $0x8] sm:$0xff]   ;;  %v1699_v9 = vld [vmem:[%s2518_s0 + $0x10] sm:$0xff]  }
   0x3   :  { %1801 = vmatpush3.bf16.msra.mxu0 %v1896_v0  ;;  %1888 = vmatpush3.bf16.msra.mxu1 %v1896_v0  ;;  %v1411_v4 = vld [vmem:[%s2518_s0] sm:$0xff]   ;;  %v1900_v13 = vld [vmem:[%s2517_s3 + $0x18] sm:$0xff]   ;;  %v1416_v14 = vunpack.c.l.bf16 %v1698_v8  ;;  %v1417_v15 = vunpack.c.h.bf16 %v1698_v8  ;;  %v1420_v16 = vunpack.c.l.bf16 %v1699_v9  ;;  %v1421_v19 = vunpack.c.h.bf16 %v1699_v9  ;;  %v1901_v22 = vld [vmem:[%s2517_s3 + $0x10] sm:$0xff]  }
   0x4   :  { %1802 = vmatprep.subr.bf16.mxu0 %v1897_v1  ;;  %1881 = vmatprep.subr.bf16.mxu1 %v1897_v1  ;;  %v1952_v5 = vld [vmem:[%s2519_s1] ss:$0 sm:$0xff]  ;;  %v1412_v6 = vunpack.c.l.bf16 %v1411_v4  ;;  %v1413_v7 = vunpack.c.h.bf16 %v1411_v4  ;;  %v1700_v26 = vld [vmem:[%s2518_s0 + $0x18] sm:$0xff]   ;;  %v1902_v31 = vld [vmem:[%s2517_s3 + $0x8] sm:$0xff]  }
   0x5   :  { %v1963_v10 = vld [vmem:[%s2520_s2] ss:$0 sm:$0xff]  ;;  %v157_v23 = vmul.f32 %v1416_v14, %v1952_v5  ;;  %v158_v24 = vmul.f32 %v1417_v15, %v1952_v5  ;;  %v159_v25 = vmul.f32 %v1420_v16, %v1952_v5  ;;  %v160_v28 = vmul.f32 %v1421_v19, %v1952_v5  ;;  %v1702_v38 = vld [vmem:[%s2518_s0 + $0x28] sm:$0xff]   ;;  %v1703_v41 = vld [vmem:[%s2518_s0 + $0x30] sm:$0xff]  }
   0x6   :  { %v155_v11 = vmul.f32 %v1412_v6, %v1952_v5  ;;  %v156_v12 = vmul.f32 %v1413_v7, %v1952_v5  ;;  %v1701_v29 = vld [vmem:[%s2518_s0 + $0x20] sm:$0xff]   ;;  %v1424_v30 = vunpack.c.l.bf16 %v1700_v26  ;;  %v1425_v35 = vunpack.c.h.bf16 %v1700_v26  ;;  %v1704_v42 = vld [vmem:[%s2518_s0 + $0x38] sm:$0xff]   ;;  %v1706_v63 = vld [vmem:[%s2518_s0 + $0x48] sm:$0xff]  }
   0x7   :  { %1803 = vmatpush3.bf16.msra.mxu0 %v1897_v1  ;;  %1889 = vmatpush3.bf16.msra.mxu1 %v1897_v1  ;;  %v228_v32 = vadd.f32 %v1963_v10, %v157_v23  ;;  %v229_v33 = vadd.f32 %v1963_v10, %v158_v24  ;;  %v230_v34 = vadd.f32 %v1963_v10, %v159_v25  ;;  %v1428_v37 = vunpack.c.l.bf16 %v1701_v29  ;;  %v1903_v43 = vld [vmem:[%s2517_s3] sm:$0xff]   ;;  %v1707_v4 = vld [vmem:[%s2518_s0 + $0x50] sm:$0xff]   ;;  %v1708_v23 = vld [vmem:[%s2518_s0 + $0x58] sm:$0xff]  }
   0x8   :  { %1804 = vmatprep.subr.bf16.mxu0 %v1898_v2  ;;  %1882 = vmatprep.subr.bf16.mxu1 %v1898_v2  ;;  %v226_v17 = vadd.f32 %v1963_v10, %v155_v11  ;;  %v227_v18 = vadd.f32 %v1963_v10, %v156_v12  ;;  %v231_v36 = vadd.f32 %v1963_v10, %v160_v28  ;;  %v1429_v40 = vunpack.c.h.bf16 %v1701_v29  ;;  %v1705_v48 = vld [vmem:[%s2518_s0 + $0x40] sm:$0xff]  }
   0x9   :  { %v161_v39 = vmul.f32 %v1424_v30, %v1952_v5  ;;  %v292_v44 = vmax.f32 %v228_v32, 0.0  ;;  %v293_v45 = vmax.f32 %v229_v33, 0.0  ;;  %v294_v46 = vmax.f32 %v230_v34, 0.0 }
   0xa   :  { %v290_v20 = vmax.f32 %v226_v17, 0.0  ;;  %v291_v21 = vmax.f32 %v227_v18, 0.0  ;;  %v162_v47 = vmul.f32 %v1425_v35, %v1952_v5  ;;  %v295_v49 = vmax.f32 %v231_v36, 0.0 }
   0xb   :  { %1805 = vmatpush3.bf16.msra.mxu0 %v1898_v2  ;;  %1890 = vmatpush3.bf16.msra.mxu1 %v1898_v2  ;;  %v163_v50 = vmul.f32 %v1428_v37, %v1952_v5  ;;  %v1432_v51 = vunpack.c.l.bf16 %v1702_v38  ;;  %v1433_v52 = vunpack.c.h.bf16 %v1702_v38  ;;  %v1436_v53 = vunpack.c.l.bf16 %v1703_v41 }
   0xc   :  { %1806 = vmatprep.subr.bf16.mxu0 %v1899_v3  ;;  %1883 = vmatprep.subr.bf16.mxu1 %v1899_v3  ;;  %v354_v27 = vpack.c.bf16 %v291_v21, %v290_v20  ;;  %v1437_v54 = vunpack.c.h.bf16 %v1703_v41  ;;  %v1440_v55 = vunpack.c.l.bf16 %v1704_v42  ;;  %v1441_v56 = vunpack.c.h.bf16 %v1704_v42 }
   0xd   :  { %v164_v57 = vmul.f32 %v1429_v40, %v1952_v5  ;;  %v1444_v58 = vunpack.c.l.bf16 %v1705_v48  ;;  %v1445_v59 = vunpack.c.h.bf16 %v1705_v48  ;;  %v355_v60 = vpack.c.bf16 %v293_v45, %v292_v44  ;;  %v1713_v44 = vld [vmem:[%s2518_s0 + $0x80] sm:$0xff]  }
   0xe   :  { %1816 = vmatprep.mubr.bf16.mxu0 %v354_v27  ;;  %v232_v61 = vadd.f32 %v1963_v10, %v161_v39  ;;  %v233_v62 = vadd.f32 %v1963_v10, %v162_v47  ;;  %v356_v0 = vpack.c.bf16 %v295_v49, %v294_v46  ;;  %v234_v1 = vadd.f32 %v1963_v10, %v163_v50 }
   0xf   :  { %1807 = vmatpush3.bf16.msra.mxu0 %v1899_v3  ;;  %1891 = vmatpush3.bf16.msra.mxu1 %v1899_v3  ;;  %v165_v2 = vmul.f32 %v1432_v51, %v1952_v5  ;;  %v166_v3 = vmul.f32 %v1433_v52, %v1952_v5  ;;  %v167_v6 = vmul.f32 %v1436_v53, %v1952_v5  ;;  %v1448_v14 = vunpack.c.l.bf16 %v1706_v63  ;;  %v2056_v52 = vld [vmem:[%s2518_s0 + $0x60] sm:$0xff]  }
  0x10   :  { %1808 = vmatprep.subr.bf16.mxu0 %v1900_v13  ;;  %1884 = vmatprep.subr.bf16.mxu1 %v1900_v13  ;;  %v168_v7 = vmul.f32 %v1437_v54, %v1952_v5  ;;  %v169_v8 = vmul.f32 %v1440_v55, %v1952_v5  ;;  %v170_v9 = vmul.f32 %v1441_v56, %v1952_v5  ;;  %v296_v15 = vmax.f32 %v232_v61, 0.0 }
  0x11   :  { %v235_v11 = vadd.f32 %v1963_v10, %v164_v57  ;;  %v171_v12 = vmul.f32 %v1444_v58, %v1952_v5  ;;  %v297_v16 = vmax.f32 %v233_v62, 0.0  ;;  %v1449_v17 = vunpack.c.h.bf16 %v1706_v63 }
  0x12   :  { %v1452_v18 = vunpack.c.l.bf16 %v1707_v4  ;;  %v298_v19 = vmax.f32 %v234_v1, 0.0  ;;  %v236_v20 = vadd.f32 %v1963_v10, %v165_v2  ;;  %v237_v21 = vadd.f32 %v1963_v10, %v166_v3 }
  0x13   :  { %1809 = vmatpush3.bf16.msra.mxu0 %v1900_v13  ;;  %1892 = vmatpush3.bf16.msra.mxu1 %v1900_v13  ;;  %v172_v13 = vmul.f32 %v1445_v59, %v1952_v5  ;;  %v238_v24 = vadd.f32 %v1963_v10, %v167_v6  ;;  %v239_v25 = vadd.f32 %v1963_v10, %v168_v7  ;;  %v299_v28 = vmax.f32 %v235_v11, 0.0  ;;  %v1714_v59 = vld [vmem:[%s2518_s0 + $0x88] sm:$0xff]   ;;  %v1716_v11 = vld [vmem:[%s2518_s0 + $0x98] sm:$0xff]  }
  0x14   :  { %1810 = vmatprep.subr.bf16.mxu0 %v1901_v22  ;;  %1885 = vmatprep.subr.bf16.mxu1 %v1901_v22  ;;  %v240_v26 = vadd.f32 %v1963_v10, %v169_v8  ;;  %v241_v27 = vadd.f32 %v1963_v10, %v170_v9  ;;  %v242_v29 = vadd.f32 %v1963_v10, %v171_v12  ;;  %v1456_v35 = vunpack.c.l.bf16 %v1708_v23 }
  0x15   :  { %v243_v30 = vadd.f32 %v1963_v10, %v172_v13  ;;  %v357_v32 = vpack.c.bf16 %v297_v16, %v296_v15  ;;  %v174_v33 = vmul.f32 %v1449_v17, %v1952_v5  ;;  %v175_v34 = vmul.f32 %v1452_v18, %v1952_v5 }
  0x16   :  { %v300_v36 = vmax.f32 %v236_v20, 0.0  ;;  %v301_v37 = vmax.f32 %v237_v21, 0.0  ;;  %v1457_v39 = vunpack.c.h.bf16 %v1708_v23  ;;  %v302_v40 = vmax.f32 %v238_v24, 0.0  ;;  %v1717_v24 = vld [vmem:[%s2518_s0 + $0xa0] sm:$0xff]  }
  0x17   :  { %1811 = vmatpush3.bf16.msra.mxu0 %v1901_v22  ;;  %1893 = vmatpush3.bf16.msra.mxu1 %v1901_v22  ;;  %v1453_v22 = vunpack.c.h.bf16 %v1707_v4  ;;  %v303_v41 = vmax.f32 %v239_v25, 0.0  ;;  %v304_v42 = vmax.f32 %v240_v26, 0.0  ;;  %v358_v45 = vpack.c.bf16 %v299_v28, %v298_v19 }
  0x18   :  { %1812 = vmatprep.subr.bf16.mxu0 %v1902_v31  ;;  %1886 = vmatprep.subr.bf16.mxu1 %v1902_v31  ;;  %v306_v46 = vmax.f32 %v242_v29, 0.0  ;;  %v307_v47 = vmax.f32 %v243_v30, 0.0  ;;  %v245_v49 = vadd.f32 %v1963_v10, %v174_v33  ;;  %v2050_v50 = vadd.f32 %v1963_v10, %v175_v34  ;;  %v1718_v33 = vld [vmem:[%s2518_s0 + $0xa8] sm:$0xff]  }
  0x19   :  { %v176_v38 = vmul.f32 %v1453_v22, %v1952_v5  ;;  %v177_v51 = vmul.f32 %v1456_v35, %v1952_v5  ;;  %v178_v54 = vmul.f32 %v1457_v39, %v1952_v5  ;;  %v1476_v55 = vunpack.c.l.bf16 %v1713_v44 }
  0x1a   :  { %v359_v56 = vpack.c.bf16 %v301_v37, %v300_v36  ;;  %v360_v57 = vpack.c.bf16 %v303_v41, %v302_v40  ;;  %v1460_v62 = vunpack.c.l.bf16 %v2056_v52  ;;  %v1477_v63 = vunpack.c.h.bf16 %v1713_v44 }
  0x1b   :  { %1813 = vmatpush3.bf16.msra.mxu0 %v1902_v31  ;;  %1894 = vmatpush3.bf16.msra.mxu1 %v1902_v31  ;;  %v173_v31 = vmul.f32 %v1448_v14, %v1952_v5  ;;  %v2059_v53 = vadd.f32 %v1963_v10, %v176_v38  ;;  %v309_v1 = vmax.f32 %v245_v49, 0.0  ;;  %v310_v2 = vmax.f32 %v2050_v50, 0.0 }
  0x1c   :  { %1814 = vmatprep.subr.bf16.mxu0 %v1903_v43  ;;  %1887 = vmatprep.subr.bf16.mxu1 %v1903_v43  ;;  %v2075_v3 = vadd.f32 %v1963_v10, %v177_v51  ;;  %v187_v4 = vmul.f32 %v1476_v55, %v1952_v5  ;;  %v2080_v7 = vadd.f32 %v1963_v10, %v178_v54  ;;  %v1480_v9 = vunpack.c.l.bf16 %v1714_v59 }
  0x1d   :  { %v244_v48 = vadd.f32 %v1963_v10, %v173_v31  ;;  %v311_v6 = vmax.f32 %v2059_v53, 0.0  ;;  %v188_v8 = vmul.f32 %v1477_v63, %v1952_v5  ;;  %v1461_v12 = vunpack.c.h.bf16 %v2056_v52 }
  0x1e   :  { %v258_v13 = vadd.f32 %v1963_v10, %v187_v4  ;;  %v1481_v14 = vunpack.c.h.bf16 %v1714_v59  ;;  %v2089_v16 = vmul.f32 %v1460_v62, %v1952_v5  ;;  %v189_v18 = vmul.f32 %v1480_v9, %v1952_v5 }
  0x1f   :  { %1815 = vmatpush3.bf16.msra.mxu0 %v1903_v43  ;;  %1895 = vmatpush3.bf16.msra.mxu1 %v1903_v43  ;;  %v305_v43 = vmax.f32 %v241_v27, 0.0  ;;  %v308_v61 = vmax.f32 %v244_v48, 0.0  ;;  %v259_v17 = vadd.f32 %v1963_v10, %v188_v8  ;;  %v1488_v23 = vunpack.c.l.bf16 %v1716_v11 }
  0x20   :  { %v322_v20 = vmax.f32 %v258_v13, 0.0  ;;  %v190_v21 = vmul.f32 %v1481_v14, %v1952_v5  ;;  %v260_v27 = vadd.f32 %v1963_v10, %v189_v18  ;;  %v1489_v31 = vunpack.c.h.bf16 %v1716_v11  ;;  %v1721_v18 = vld [vmem:[%s2518_s0 + $0xc0] sm:$0xff]  }
  0x21   :  { %v2062_v58 = vpack.c.bf16 %v305_v43, %v304_v42  ;;  %v2098_v25 = vpack.c.bf16 %v309_v1, %v308_v61  ;;  %v323_v26 = vmax.f32 %v259_v17, 0.0  ;;  %v1492_v37 = vunpack.c.l.bf16 %v1717_v24  ;;  %v1720_v1 = vld [vmem:[%s2518_s0 + $0xb8] sm:$0xff]  }
  0x22   :  { %1817 = vmatmul.mubr.bf16.vlgmr.msra.gmra.mxu0 %v355_v60  ;;  %v2067_v60 = vpack.c.bf16 %v307_v47, %v306_v46  ;;  %v261_v29 = vadd.f32 %v1963_v10, %v190_v21  ;;  %v324_v35 = vmax.f32 %v260_v27, 0.0  ;;  %v194_v40 = vmul.f32 %v1489_v31, %v1952_v5  ;;  %v1719_v46 = vld [vmem:[%s2518_s0 + $0xb0] sm:$0xff]   ;;  %v1710_v47 = vld [vmem:[%s2518_s0 + $0x68] sm:$0xff]  }
  0x23   :  { %1820 = vmatprep.mubr.bf16.mxu0 %v356_v0  ;;  %v1715_v0 = vld [vmem:[%s2518_s0 + $0x90] sm:$0xff]   ;;  %v370_v34 = vpack.c.bf16 %v323_v26, %v322_v20  ;;  %v1493_v43 = vunpack.c.h.bf16 %v1717_v24  ;;  %v195_v44 = vmul.f32 %v1492_v37, %v1952_v5  ;;  %v1497_v54 = vunpack.c.h.bf16 %v1718_v33 }
  0x24   :  { %v1484_v15 = vunpack.c.l.bf16 %v1715_v0  ;;  %v1485_v19 = vunpack.c.h.bf16 %v1715_v0  ;;  %v325_v38 = vmax.f32 %v261_v29, 0.0  ;;  %v265_v49 = vadd.f32 %v1963_v10, %v194_v40  ;;  %v1723_v40 = vld [vmem:[%s2518_s0 + $0xd0] sm:$0xff]  }
  0x25   :  { %1848 = vmatprep.mubr.bf16.mxu1 %v370_v34  ;;  %v198_v62 = vmul.f32 %v1497_v54, %v1952_v5  ;;  %v1500_v63 = vunpack.c.l.bf16 %v1719_v46  ;;  %v1501_v0 = vunpack.c.h.bf16 %v1719_v46  ;;  %v312_v4 = vmax.f32 %v2075_v3, 0.0 }
  0x26   :  { %v191_v22 = vmul.f32 %v1484_v15, %v1952_v5  ;;  %v192_v28 = vmul.f32 %v1485_v19, %v1952_v5  ;;  %v371_v48 = vpack.c.bf16 %v325_v38, %v324_v35  ;;  %v329_v61 = vmax.f32 %v265_v49, 0.0 }
  0x27   :  { %v1464_v8 = vunpack.c.l.bf16 %v1710_v47  ;;  %v313_v13 = vmax.f32 %v2080_v7, 0.0  ;;  %v1465_v14 = vunpack.c.h.bf16 %v1710_v47  ;;  %v199_v15 = vmul.f32 %v1500_v63, %v1952_v5 }
  0x28   :  { %v262_v30 = vadd.f32 %v1963_v10, %v191_v22  ;;  %v263_v36 = vadd.f32 %v1963_v10, %v192_v28  ;;  %1849 = vmatmul.mubr.bf16.vlgmr.msra.gmra.mxu1 %v371_v48  ;;  %v200_v17 = vmul.f32 %v1501_v0, %v1952_v5  ;;  %v180_v3 = vmul.f32 %v1461_v12, %v1952_v5 }
  0x29   :  { %v1504_v19 = vunpack.c.l.bf16 %v1720_v1  ;;  %v1505_v20 = vunpack.c.h.bf16 %v1720_v1  ;;  %v270_v24 = vadd.f32 %v1963_v10, %v199_v15  ;;  %v1508_v27 = vunpack.c.l.bf16 %v1721_v18  ;;  %v1724_v15 = vld [vmem:[%s2518_s0 + $0xd8] sm:$0xff]  }
  0x2a   :  { %1821 = vmatmul.mubr.bf16.gmra.mxu0 %v357_v32  ;;  %v193_v32 = vmul.f32 %v1488_v23, %v1952_v5  ;;  %v326_v39 = vmax.f32 %v262_v30, 0.0  ;;  %v327_v42 = vmax.f32 %v263_v36, 0.0  ;;  %v269_v23 = vadd.f32 %v1963_v10, %v198_v62 }
  0x2b   :  { %1824 = vmatprep.mubr.bf16.mxu0 %v358_v45  ;;  %v1496_v45 = vunpack.c.l.bf16 %v1718_v33  ;;  %v1509_v52 = vunpack.c.h.bf16 %v1721_v18  ;;  %v364_v12 = vpack.c.bf16 %v311_v6, %v310_v2  ;;  %v250_v28 = vadd.f32 %v1963_v10, %v2089_v16  ;;  %v1712_v33 = vld [vmem:[%s2518_s0 + $0x78] sm:$0xff]   ;;  %v1722_v16 = vld [vmem:[%s2518_s0 + $0xc8] sm:$0xff]  }
  0x2c   :  { %v264_v41 = vadd.f32 %v1963_v10, %v193_v32  ;;  %v372_v55 = vpack.c.bf16 %v327_v42, %v326_v39  ;;  %v251_v31 = vadd.f32 %v1963_v10, %v180_v3  ;;  %v181_v32 = vmul.f32 %v1464_v8, %v1952_v5 }
  0x2d   :  { %v197_v59 = vmul.f32 %v1496_v45, %v1952_v5  ;;  %v201_v34 = vmul.f32 %v1504_v19, %v1952_v5  ;;  %v202_v50 = vmul.f32 %v1505_v20, %v1952_v5  ;;  %v365_v35 = vpack.c.bf16 %v313_v13, %v312_v4 }
  0x2e   :  { %v328_v51 = vmax.f32 %v264_v41, 0.0  ;;  %1852 = vmatprep.mubr.bf16.mxu1 %v372_v55  ;;  %v182_v53 = vmul.f32 %v1465_v14, %v1952_v5  ;;  %v333_v6 = vmax.f32 %v269_v23, 0.0  ;;  %v334_v36 = vmax.f32 %v270_v24, 0.0 }
  0x2f   :  { %v268_v22 = vadd.f32 %v1963_v10, %v197_v59  ;;  %v203_v38 = vmul.f32 %v1508_v27, %v1952_v5  ;;  %v204_v39 = vmul.f32 %v1509_v52, %v1952_v5  ;;  %v314_v41 = vmax.f32 %v250_v28, 0.0 }
  0x30   :  { %v373_v21 = vpack.c.bf16 %v329_v61, %v328_v51  ;;  %v315_v45 = vmax.f32 %v251_v31, 0.0  ;;  %v272_v46 = vadd.f32 %v1963_v10, %v201_v34  ;;  %v273_v47 = vadd.f32 %v1963_v10, %v202_v50 }
  0x31   :  { %v332_v2 = vmax.f32 %v268_v22, 0.0  ;;  %v1512_v48 = vunpack.c.l.bf16 %v1722_v16  ;;  %v1513_v51 = vunpack.c.h.bf16 %v1722_v16  ;;  %v1516_v54 = vunpack.c.l.bf16 %v1723_v40 }
  0x32   :  { %1825 = vmatmul.mubr.bf16.gmra.mxu0 %v359_v56  ;;  %v196_v56 = vmul.f32 %v1493_v43, %v1952_v5  ;;  %1853 = vmatmul.mubr.bf16.gmra.mxu1 %v373_v21  ;;  %v1517_v55 = vunpack.c.h.bf16 %v1723_v40  ;;  %v275_v59 = vadd.f32 %v1963_v10, %v204_v39  ;;  %v253_v61 = vadd.f32 %v1963_v10, %v182_v53  ;;  %v1725_v21 = vld [vmem:[%s2518_s0 + $0xe0] sm:$0xff]  }
  0x33   :  { %1828 = vmatprep.mubr.bf16.mxu0 %v360_v57  ;;  %v266_v57 = vadd.f32 %v1963_v10, %v195_v44  ;;  %v1472_v44 = vunpack.c.l.bf16 %v1712_v33  ;;  %v375_v49 = vpack.c.bf16 %v333_v6, %v332_v2  ;;  %v1473_v0 = vunpack.c.h.bf16 %v1712_v33 }
  0x34   :  { %v267_v9 = vadd.f32 %v1963_v10, %v196_v56  ;;  %v252_v56 = vadd.f32 %v1963_v10, %v181_v32  ;;  %v366_v1 = vpack.c.bf16 %v315_v45, %v314_v41  ;;  %v336_v4 = vmax.f32 %v272_v46, 0.0  ;;  %v1727_v41 = vld [vmem:[%s2518_s0 + $0xf0] sm:$0xff]  }
  0x35   :  { %v330_v11 = vmax.f32 %v266_v57, 0.0  ;;  %v274_v57 = vadd.f32 %v1963_v10, %v203_v38  ;;  %v337_v8 = vmax.f32 %v273_v47, 0.0  ;;  %v207_v13 = vmul.f32 %v1516_v54, %v1952_v5 }
  0x36   :  { %v331_v7 = vmax.f32 %v267_v9, 0.0  ;;  %v205_v9 = vmul.f32 %v1512_v48, %v1952_v5  ;;  %v208_v14 = vmul.f32 %v1517_v55, %v1952_v5  ;;  %v339_v3 = vmax.f32 %v275_v59, 0.0 }
  0x37   :  { %v338_v18 = vmax.f32 %v274_v57, 0.0  ;;  %v186_v20 = vmul.f32 %v1473_v0, %v1952_v5  ;;  %v377_v23 = vpack.c.bf16 %v337_v8, %v336_v4  ;;  %v278_v27 = vadd.f32 %v1963_v10, %v207_v13 }
  0x38   :  { %v374_v26 = vpack.c.bf16 %v331_v7, %v330_v11  ;;  %v206_v11 = vmul.f32 %v1513_v51, %v1952_v5  ;;  %v317_v7 = vmax.f32 %v253_v61, 0.0  ;;  %v276_v24 = vadd.f32 %v1963_v10, %v205_v9 }
  0x39   :  { %v279_v52 = vadd.f32 %v1963_v10, %v208_v14  ;;  %v378_v28 = vpack.c.bf16 %v339_v3, %v338_v18  ;;  %v257_v33 = vadd.f32 %v1963_v10, %v186_v20  ;;  %v342_v2 = vmax.f32 %v278_v27, 0.0 }
  0x3a   :  { %1829 = vmatmul.mubr.bf16.gmra.mxu0 %v2062_v58  ;;  %v1711_v58 = vld [vmem:[%s2518_s0 + $0x70] sm:$0xff]   ;;  %1856 = vmatprep.mubr.bf16.mxu1 %v374_v26  ;;  %v1520_v26 = vunpack.c.l.bf16 %v1724_v15  ;;  %v340_v50 = vmax.f32 %v276_v24, 0.0  ;;  %v1532_v51 = vunpack.c.l.bf16 %v1727_v41  ;;  %v1533_v54 = vunpack.c.h.bf16 %v1727_v41 }
  0x3b   :  { %1832 = vmatprep.mubr.bf16.mxu0 %v2067_v60  ;;  %v271_v60 = vadd.f32 %v1963_v10, %v200_v17  ;;  %v1468_v29 = vunpack.c.l.bf16 %v1711_v58  ;;  %v1469_v30 = vunpack.c.h.bf16 %v1711_v58  ;;  %1857 = vmatmul.mubr.bf16.gmra.mxu1 %v375_v49  ;;  %v185_v17 = vmul.f32 %v1472_v44, %v1952_v5 }
  0x3c   :  { %v316_v58 = vmax.f32 %v252_v56, 0.0  ;;  %v343_v6 = vmax.f32 %v279_v52, 0.0  ;;  %v321_v40 = vmax.f32 %v257_v33, 0.0  ;;  %v216_v0 = vmul.f32 %v1533_v54, %v1952_v5 }
  0x3d   :  { %v335_v37 = vmax.f32 %v271_v60, 0.0  ;;  %v183_v42 = vmul.f32 %v1468_v29, %v1952_v5  ;;  %v184_v43 = vmul.f32 %v1469_v30, %v1952_v5  ;;  %v277_v60 = vadd.f32 %v1963_v10, %v206_v11 }
  0x3e   :  { %v1524_v29 = vunpack.c.l.bf16 %v1725_v21  ;;  %v1525_v30 = vunpack.c.h.bf16 %v1725_v21  ;;  %v367_v31 = vpack.c.bf16 %v317_v7, %v316_v58  ;;  %v256_v32 = vadd.f32 %v1963_v10, %v185_v17 }
  0x3f   :  { %v254_v62 = vadd.f32 %v1963_v10, %v183_v42  ;;  %v255_v63 = vadd.f32 %v1963_v10, %v184_v43  ;;  %v341_v53 = vmax.f32 %v277_v60, 0.0  ;;  %v380_v45 = vpack.c.bf16 %v343_v6, %v342_v2 }
  0x40   :  { %v212_v38 = vmul.f32 %v1525_v30, %v1952_v5  ;;  %v320_v39 = vmax.f32 %v256_v32, 0.0  ;;  %v287_v17 = vadd.f32 %v1963_v10, %v216_v0 }
  0x41   :  { %v318_v19 = vmax.f32 %v254_v62, 0.0  ;;  %v319_v22 = vmax.f32 %v255_v63, 0.0  ;;  %v379_v44 = vpack.c.bf16 %v341_v53, %v340_v50  ;;  %v215_v63 = vmul.f32 %v1532_v51, %v1952_v5 }
  0x42   :  { %1833 = vmatmul.mubr.bf16.gmra.mxu0 %v2098_v25  ;;  %v376_v25 = vpack.c.bf16 %v335_v37, %v334_v36  ;;  %v1726_v36 = vld [vmem:[%s2518_s0 + $0xe8] sm:$0xff]   ;;  %v211_v37 = vmul.f32 %v1524_v29, %v1952_v5  ;;  %v283_v49 = vadd.f32 %v1963_v10, %v212_v38  ;;  %v369_v55 = vpack.c.bf16 %v321_v40, %v320_v39 }
  0x43   :  { %1836 = vmatprep.mubr.bf16.mxu0 %v364_v12  ;;  %v1521_v12 = vunpack.c.h.bf16 %v1724_v15  ;;  %v368_v34 = vpack.c.bf16 %v319_v22, %v318_v19  ;;  %v1528_v43 = vunpack.c.l.bf16 %v1726_v36  ;;  %v1529_v47 = vunpack.c.h.bf16 %v1726_v36 }
  0x44   :  { %1860 = vmatprep.mubr.bf16.mxu1 %v376_v25  ;;  %v282_v48 = vadd.f32 %v1963_v10, %v211_v37  ;;  %v347_v62 = vmax.f32 %v283_v49, 0.0  ;;  %v286_v15 = vadd.f32 %v1963_v10, %v215_v63  ;;  %v351_v20 = vmax.f32 %v287_v17, 0.0 }
  0x45   :  { %1861 = vmatmul.mubr.bf16.gmra.mxu1 %v377_v23  ;;  %v210_v16 = vmul.f32 %v1521_v12, %v1952_v5  ;;  %v213_v56 = vmul.f32 %v1528_v43, %v1952_v5  ;;  %v214_v59 = vmul.f32 %v1529_v47, %v1952_v5 }
  0x46   :  { %1864 = vmatprep.mubr.bf16.mxu1 %v378_v28  ;;  %v346_v61 = vmax.f32 %v282_v48, 0.0  ;;  %v350_v19 = vmax.f32 %v286_v15, 0.0 }
  0x47   :  { %v281_v46 = vadd.f32 %v1963_v10, %v210_v16  ;;  %v284_v4 = vadd.f32 %v1963_v10, %v213_v56  ;;  %v285_v9 = vadd.f32 %v1963_v10, %v214_v59 }
  0x48   :  { %v382_v14 = vpack.c.bf16 %v347_v62, %v346_v61  ;;  %v384_v24 = vpack.c.bf16 %v351_v20, %v350_v19 }
  0x49   :  { %v345_v57 = vmax.f32 %v281_v46, 0.0  ;;  %v348_v18 = vmax.f32 %v284_v4, 0.0  ;;  %v349_v3 = vmax.f32 %v285_v9, 0.0 }
  0x4a   :  { %1837 = vmatmul.mubr.bf16.gmra.mxu0 %v365_v35  ;;  %v209_v35 = vmul.f32 %v1520_v26, %v1952_v5 }
  0x4b   :  { %1840 = vmatprep.mubr.bf16.mxu0 %v366_v1  ;;  %v1728_v1 = vld [vmem:[%s2518_s0 + $0xf8] sm:$0xff]   ;;  %v383_v21 = vpack.c.bf16 %v349_v3, %v348_v18 }
  0x4c   :  { %v280_v42 = vadd.f32 %v1963_v10, %v209_v35  ;;  %v1536_v11 = vunpack.c.l.bf16 %v1728_v1  ;;  %v1537_v13 = vunpack.c.h.bf16 %v1728_v1 }
  0x4d   :  { %1865 = vmatmul.mubr.bf16.gmra.mxu1 %v379_v44 }
  0x4e   :  { %v344_v25 = vmax.f32 %v280_v42, 0.0  ;;  %1868 = vmatprep.mubr.bf16.mxu1 %v380_v45  ;;  %v217_v58 = vmul.f32 %v1536_v11, %v1952_v5  ;;  %v218_v7 = vmul.f32 %v1537_v13, %v1952_v5 }
  0x50   :  { %v381_v8 = vpack.c.bf16 %v345_v57, %v344_v25  ;;  %v288_v22 = vadd.f32 %v1963_v10, %v217_v58  ;;  %v289_v23 = vadd.f32 %v1963_v10, %v218_v7 }
  0x52   :  { %1841 = vmatmul.mubr.bf16.gmra.mxu0 %v367_v31  ;;  %v352_v26 = vmax.f32 %v288_v22, 0.0  ;;  %v353_v60 = vmax.f32 %v289_v23, 0.0 }
  0x53   :  { %1844 = vmatprep.mubr.bf16.mxu0 %v368_v34 }
  0x54   :  { %v385_v27 = vpack.c.bf16 %v353_v60, %v352_v26 }
  0x55   :  { %1869 = vmatmul.mubr.bf16.gmra.mxu1 %v381_v8 }
  0x56   :  { %1872 = vmatprep.mubr.bf16.mxu1 %v382_v14 }
  0x5a   :  { %1845 = vmatmul.mubr.bf16.gmra.mxu0 %v369_v55 }
  0x5d   :  { %1873 = vmatmul.mubr.bf16.gmra.mxu1 %v383_v21 }
  0x5e   :  { %1876 = vmatprep.mubr.bf16.mxu1 %v384_v24 }
  0x65   :  { %1877 = vmatmul.mubr.bf16.gmra.mxu1 %v385_v27 }
  0xe2   :  { %v1818_v52 = vpop.f32.mrf.mxu0 }
  0xe3   :  { %v1130_v34 = vmul.f32 %v1818_v52, %v1818_v52 }
  0xe4   :  { %v484_v12 = vpop.f32.mrf.mxu0 }
  0xe5   :  { %v1128_v30 = vmul.f32 %v484_v12, %v484_v12 }
  0xe6   :  { %v1819_v28 = vpop.f32.mrf.mxu0 }
  0xe7   :  { %v1546_v29 = vpack.c.bf16 %v1819_v28, %v1818_v52  ;;  %v1131_v2 = vmul.f32 %v1819_v28, %v1819_v28 }
  0xe8   :  { %v487_v5 = vpop.f32.mrf.mxu0  ;;  %v2238_v0 = vpop.f32.mrf.mxu1 }
  0xe9   :  { %1729 = vst [vmem:[%s2521_s4 + $0x8] sm:$0xff] %v1546_v29   ;;  %v1541_v31 = vpack.c.bf16 %v487_v5, %v484_v12  ;;  %v1059_v32 = vadd.f32 %v487_v5, %v484_v12  ;;  %v1129_v10 = vmul.f32 %v487_v5, %v487_v5 }
  0xea   :  { %v1822_v33 = vpop.f32.mrf.mxu0  ;;  %v2243_v13 = vpop.f32.mrf.mxu1 }
  0xeb   :  { %1542 = vst [vmem:[%s2521_s4] sm:$0xff] %v1541_v31   ;;  %v1060_v50 = vadd.f32 %v1818_v52, %v1059_v32  ;;  %v1192_v35 = vadd.f32 %v1129_v10, %v1128_v30  ;;  %v1134_v47 = vmul.f32 %v1822_v33, %v1822_v33 }
  0xec   :  { %v500_v53 = vpop.f32.mrf.mxu0  ;;  %v2248_v3 = vpop.f32.mrf.mxu1 }
  0xed   :  { %v1193_v6 = vadd.f32 %v1192_v35, %v1130_v34  ;;  %v1061_v16 = vadd.f32 %v1819_v28, %v1060_v50  ;;  %v1132_v38 = vmul.f32 %v500_v53, %v500_v53  ;;  %v1626_v20 = vpack.c.bf16 %v2248_v3, %v2238_v0 }
  0xee   :  { %v1823_v36 = vpop.f32.mrf.mxu0  ;;  %v2252_v22 = vpop.f32.mrf.mxu1 }
  0xef   :  { %v1062_v37 = vadd.f32 %v1061_v16, %v500_v53  ;;  %v1194_v39 = vadd.f32 %v1193_v6, %v1131_v2  ;;  %v1556_v40 = vpack.c.bf16 %v1823_v36, %v1822_v33  ;;  %v1135_v54 = vmul.f32 %v1823_v36, %v1823_v36  ;;  %1745 = vst [vmem:[%s2521_s4 + $0x88] sm:$0xff] %v1626_v20  }
  0xf0   :  { %v503_v41 = vpop.f32.mrf.mxu0  ;;  %v1621_v52 = vpack.c.bf16 %v2252_v22, %v2243_v13 }
  0xf1   :  { %v1195_v42 = vadd.f32 %v1194_v39, %v1132_v38  ;;  %1731 = vst [vmem:[%s2521_s4 + $0x18] sm:$0xff] %v1556_v40   ;;  %v1551_v43 = vpack.c.bf16 %v503_v41, %v500_v53  ;;  %v1063_v44 = vadd.f32 %v1062_v37, %v503_v41  ;;  %v1133_v45 = vmul.f32 %v503_v41, %v503_v41 }
  0xf2   :  { %v1826_v46 = vpop.f32.mrf.mxu0  ;;  %v2259_v12 = vpop.f32.mrf.mxu1  ;;  %1744 = vst [vmem:[%s2521_s4 + $0x80] sm:$0xff] %v1621_v52  }
  0xf3   :  { %1730 = vst [vmem:[%s2521_s4 + $0x10] sm:$0xff] %v1551_v43   ;;  %v1064_v48 = vadd.f32 %v1822_v33, %v1063_v44  ;;  %v1196_v49 = vadd.f32 %v1195_v42, %v1133_v45  ;;  %v1138_v14 = vmul.f32 %v1826_v46, %v1826_v46 }
  0xf4   :  { %v516_v51 = vpop.f32.mrf.mxu0  ;;  %v2267_v32 = vpop.f32.mrf.mxu1 }
  0xf5   :  { %v1197_v55 = vadd.f32 %v1196_v49, %v1134_v47  ;;  %v1065_v56 = vadd.f32 %v1823_v36, %v1064_v48  ;;  %v1136_v59 = vmul.f32 %v516_v51, %v516_v51 }
  0xf6   :  { %v1827_v25 = vpop.f32.mrf.mxu0  ;;  %v2272_v35 = vpop.f32.mrf.mxu1 }
  0xf7   :  { %v1066_v57 = vadd.f32 %v1065_v56, %v516_v51  ;;  %v1198_v61 = vadd.f32 %v1197_v55, %v1135_v54  ;;  %v1566_v62 = vpack.c.bf16 %v1827_v25, %v1826_v46  ;;  %v1139_v58 = vmul.f32 %v1827_v25, %v1827_v25 }
  0xf8   :  { %v519_v63 = vpop.f32.mrf.mxu0  ;;  %v1636_v16 = vpack.c.bf16 %v2272_v35, %v2259_v12  ;;  %v2276_v37 = vpop.f32.mrf.mxu1 }
  0xf9   :  { %v1199_v1 = vadd.f32 %v1198_v61, %v1136_v59  ;;  %1733 = vst [vmem:[%s2521_s4 + $0x28] sm:$0xff] %v1566_v62   ;;  %v1561_v4 = vpack.c.bf16 %v519_v63, %v516_v51  ;;  %v1067_v8 = vadd.f32 %v1066_v57, %v519_v63  ;;  %v1137_v9 = vmul.f32 %v519_v63, %v519_v63 }
  0xfa   :  { %v1830_v11 = vpop.f32.mrf.mxu0  ;;  %1747 = vst [vmem:[%s2521_s4 + $0x98] sm:$0xff] %v1636_v16   ;;  %v1631_v43 = vpack.c.bf16 %v2276_v37, %v2267_v32 }
  0xfb   :  { %1732 = vst [vmem:[%s2521_s4 + $0x20] sm:$0xff] %v1561_v4   ;;  %v1068_v15 = vadd.f32 %v1826_v46, %v1067_v8  ;;  %v1200_v17 = vadd.f32 %v1199_v1, %v1137_v9  ;;  %v1142_v10 = vmul.f32 %v1830_v11, %v1830_v11  ;;  %v2283_v44 = vpop.f32.mrf.mxu1 }
  0xfc   :  { %v532_v18 = vpop.f32.mrf.mxu0  ;;  %1746 = vst [vmem:[%s2521_s4 + $0x90] sm:$0xff] %v1631_v43  }
  0xfd   :  { %v1201_v7 = vadd.f32 %v1200_v17, %v1138_v14  ;;  %v1069_v19 = vadd.f32 %v1827_v25, %v1068_v15  ;;  %v1140_v24 = vmul.f32 %v532_v18, %v532_v18  ;;  %v2291_v51 = vpop.f32.mrf.mxu1 }
  0xfe   :  { %v1831_v21 = vpop.f32.mrf.mxu0 }
  0xff   :  { %v1070_v23 = vadd.f32 %v1069_v19, %v532_v18  ;;  %v1202_v26 = vadd.f32 %v1201_v7, %v1139_v58  ;;  %v1576_v60 = vpack.c.bf16 %v1831_v21, %v1830_v11  ;;  %v1143_v53 = vmul.f32 %v1831_v21, %v1831_v21  ;;  %v2296_v57 = vpop.f32.mrf.mxu1 }
 0x100   :  { %v535_v27 = vpop.f32.mrf.mxu0  ;;  %v1646_v63 = vpack.c.bf16 %v2296_v57, %v2283_v44 }
 0x101   :  { %v1203_v28 = vadd.f32 %v1202_v26, %v1140_v24  ;;  %1735 = vst [vmem:[%s2521_s4 + $0x38] sm:$0xff] %v1576_v60   ;;  %v1571_v29 = vpack.c.bf16 %v535_v27, %v532_v18  ;;  %v1071_v5 = vadd.f32 %v1070_v23, %v535_v27  ;;  %v1141_v30 = vmul.f32 %v535_v27, %v535_v27  ;;  %v2300_v4 = vpop.f32.mrf.mxu1 }
 0x102   :  { %v1834_v31 = vpop.f32.mrf.mxu0  ;;  %1749 = vst [vmem:[%s2521_s4 + $0xa8] sm:$0xff] %v1646_v63   ;;  %v1641_v17 = vpack.c.bf16 %v2300_v4, %v2291_v51 }
 0x103   :  { %1734 = vst [vmem:[%s2521_s4 + $0x30] sm:$0xff] %v1571_v29   ;;  %v1072_v33 = vadd.f32 %v1830_v11, %v1071_v5  ;;  %v1204_v34 = vadd.f32 %v1203_v28, %v1141_v30  ;;  %v1146_v54 = vmul.f32 %v1834_v31, %v1834_v31 }
 0x104   :  { %v548_v50 = vpop.f32.mrf.mxu0  ;;  %1748 = vst [vmem:[%s2521_s4 + $0xa0] sm:$0xff] %v1641_v17  }
 0x105   :  { %v1205_v2 = vadd.f32 %v1204_v34, %v1142_v10  ;;  %v1073_v6 = vadd.f32 %v1831_v21, %v1072_v33  ;;  %v1144_v39 = vmul.f32 %v548_v50, %v548_v50  ;;  %v2307_v18 = vpop.f32.mrf.mxu1 }
 0x106   :  { %v1835_v36 = vpop.f32.mrf.mxu0 }
 0x107   :  { %v1074_v38 = vadd.f32 %v1073_v6, %v548_v50  ;;  %v1206_v40 = vadd.f32 %v1205_v2, %v1143_v53  ;;  %v1586_v41 = vpack.c.bf16 %v1835_v36, %v1834_v31  ;;  %v1147_v59 = vmul.f32 %v1835_v36, %v1835_v36  ;;  %v2315_v23 = vpop.f32.mrf.mxu1 }
 0x108   :  { %v551_v42 = vpop.f32.mrf.mxu0 }
 0x109   :  { %v1207_v45 = vadd.f32 %v1206_v40, %v1144_v39  ;;  %1737 = vst [vmem:[%s2521_s4 + $0x48] sm:$0xff] %v1586_v41   ;;  %v1581_v46 = vpack.c.bf16 %v551_v42, %v548_v50  ;;  %v1075_v47 = vadd.f32 %v1074_v38, %v551_v42  ;;  %v1145_v48 = vmul.f32 %v551_v42, %v551_v42  ;;  %v2320_v52 = vpop.f32.mrf.mxu1 }
 0x10a   :  { %v1838_v49 = vpop.f32.mrf.mxu0  ;;  %v1656_v30 = vpack.c.bf16 %v2320_v52, %v2307_v18 }
 0x10b   :  { %1736 = vst [vmem:[%s2521_s4 + $0x40] sm:$0xff] %v1581_v46   ;;  %v1076_v55 = vadd.f32 %v1834_v31, %v1075_v47  ;;  %v1208_v56 = vadd.f32 %v1207_v45, %v1145_v48  ;;  %v1150_v24 = vmul.f32 %v1838_v49, %v1838_v49  ;;  %v2324_v10 = vpop.f32.mrf.mxu1 }
 0x10c   :  { %v564_v25 = vpop.f32.mrf.mxu0  ;;  %1751 = vst [vmem:[%s2521_s4 + $0xb8] sm:$0xff] %v1656_v30   ;;  %v1651_v6 = vpack.c.bf16 %v2324_v10, %v2315_v23 }
 0x10d   :  { %v1209_v61 = vadd.f32 %v1208_v56, %v1146_v54  ;;  %v1077_v62 = vadd.f32 %v1835_v36, %v1076_v55  ;;  %v1148_v9 = vmul.f32 %v564_v25, %v564_v25  ;;  %v2331_v16 = vpop.f32.mrf.mxu1 }
 0x10e   :  { %v1839_v1 = vpop.f32.mrf.mxu0  ;;  %1750 = vst [vmem:[%s2521_s4 + $0xb0] sm:$0xff] %v1651_v6   ;;  %v1162_v6 = vmul.f32 %v2238_v0, %v2238_v0 }
 0x10f   :  { %v1078_v8 = vadd.f32 %v1077_v62, %v564_v25  ;;  %v1210_v11 = vadd.f32 %v1209_v61, %v1147_v59  ;;  %v1596_v14 = vpack.c.bf16 %v1839_v1, %v1838_v49  ;;  %v1151_v28 = vmul.f32 %v1839_v1, %v1839_v1  ;;  %v2339_v42 = vpop.f32.mrf.mxu1 }
 0x110   :  { %v567_v15 = vpop.f32.mrf.mxu0 }
 0x111   :  { %v1211_v58 = vadd.f32 %v1210_v11, %v1148_v9  ;;  %1739 = vst [vmem:[%s2521_s4 + $0x58] sm:$0xff] %v1596_v14   ;;  %v1591_v7 = vpack.c.bf16 %v567_v15, %v564_v25  ;;  %v1079_v19 = vadd.f32 %v1078_v8, %v567_v15  ;;  %v1149_v20 = vmul.f32 %v567_v15, %v567_v15  ;;  %v2344_v48 = vpop.f32.mrf.mxu1 }
 0x112   :  { %v1842_v21 = vpop.f32.mrf.mxu0  ;;  %v1666_v56 = vpack.c.bf16 %v2344_v48, %v2331_v16 }
 0x113   :  { %1738 = vst [vmem:[%s2521_s4 + $0x50] sm:$0xff] %v1591_v7   ;;  %v1080_v26 = vadd.f32 %v1838_v49, %v1079_v19  ;;  %v1212_v60 = vadd.f32 %v1211_v58, %v1149_v20  ;;  %v1154_v43 = vmul.f32 %v1842_v21, %v1842_v21  ;;  %v2348_v59 = vpop.f32.mrf.mxu1 }
 0x114   :  { %v580_v27 = vpop.f32.mrf.mxu0  ;;  %1753 = vst [vmem:[%s2521_s4 + $0xc8] sm:$0xff] %v1666_v56   ;;  %v1661_v9 = vpack.c.bf16 %v2348_v59, %v2339_v42  ;;  %v1165_v56 = vmul.f32 %v2276_v37, %v2276_v37 }
 0x115   :  { %v1213_v29 = vadd.f32 %v1212_v60, %v1150_v24  ;;  %v1081_v5 = vadd.f32 %v1839_v1, %v1080_v26  ;;  %v1152_v34 = vmul.f32 %v580_v27, %v580_v27  ;;  %v2355_v11 = vpop.f32.mrf.mxu1 }
 0x116   :  { %v1843_v31 = vpop.f32.mrf.mxu0  ;;  %1752 = vst [vmem:[%s2521_s4 + $0xc0] sm:$0xff] %v1661_v9  }
 0x117   :  { %v1082_v33 = vadd.f32 %v1081_v5, %v580_v27  ;;  %v1214_v50 = vadd.f32 %v1213_v29, %v1151_v28  ;;  %v1606_v53 = vpack.c.bf16 %v1843_v31, %v1842_v21  ;;  %v1155_v49 = vmul.f32 %v1843_v31, %v1843_v31  ;;  %v2363_v7 = vpop.f32.mrf.mxu1 }
 0x118   :  { %v583_v2 = vpop.f32.mrf.mxu0  ;;  %v1160_v5 = vmul.f32 %v2243_v13, %v2243_v13 }
 0x119   :  { %v1215_v36 = vadd.f32 %v1214_v50, %v1152_v34  ;;  %1741 = vst [vmem:[%s2521_s4 + $0x68] sm:$0xff] %v1606_v53   ;;  %v1601_v38 = vpack.c.bf16 %v583_v2, %v580_v27  ;;  %v1083_v39 = vadd.f32 %v1082_v33, %v583_v2  ;;  %v1153_v40 = vmul.f32 %v583_v2, %v583_v2  ;;  %v2368_v24 = vpop.f32.mrf.mxu1 }
 0x11a   :  { %v1846_v41 = vpop.f32.mrf.mxu0  ;;  %v1676_v28 = vpack.c.bf16 %v2368_v24, %v2355_v11  ;;  %v1161_v53 = vmul.f32 %v2252_v22, %v2252_v22 }
 0x11b   :  { %1740 = vst [vmem:[%s2521_s4 + $0x60] sm:$0xff] %v1601_v38   ;;  %v1084_v45 = vadd.f32 %v1842_v21, %v1083_v39  ;;  %v1216_v46 = vadd.f32 %v1215_v36, %v1153_v40  ;;  %v1158_v19 = vmul.f32 %v1846_v41, %v1846_v41  ;;  %v2372_v29 = vpop.f32.mrf.mxu1  ;;  %v1163_v40 = vmul.f32 %v2248_v3, %v2248_v3 }
 0x11c   :  { %v596_v47 = vpop.f32.mrf.mxu0  ;;  %1755 = vst [vmem:[%s2521_s4 + $0xd8] sm:$0xff] %v1676_v28   ;;  %v1671_v33 = vpack.c.bf16 %v2372_v29, %v2363_v7 }
 0x11d   :  { %v1217_v54 = vadd.f32 %v1216_v46, %v1154_v43  ;;  %v1085_v55 = vadd.f32 %v1843_v31, %v1084_v45  ;;  %v1156_v62 = vmul.f32 %v596_v47, %v596_v47  ;;  %v2382_v34 = vpop.f32.mrf.mxu1 }
 0x11e   :  { %v1847_v25 = vpop.f32.mrf.mxu0  ;;  %1754 = vst [vmem:[%s2521_s4 + $0xd0] sm:$0xff] %v1671_v33  }
 0x11f   :  { %v1086_v61 = vadd.f32 %v1085_v55, %v596_v47  ;;  %v1218_v63 = vadd.f32 %v1217_v54, %v1155_v49  ;;  %v1616_v1 = vpack.c.bf16 %v1847_v25, %v1846_v41  ;;  %v1159_v26 = vmul.f32 %v1847_v25, %v1847_v25 }
 0x120   :  { %v599_v8 = vpop.f32.mrf.mxu0 }
 0x121   :  { %v1219_v14 = vadd.f32 %v1218_v63, %v1156_v62  ;;  %1743 = vst [vmem:[%s2521_s4 + $0x78] sm:$0xff] %v1616_v1   ;;  %v1611_v15 = vpack.c.bf16 %v599_v8, %v596_v47  ;;  %v1087_v17 = vadd.f32 %v1086_v61, %v599_v8  ;;  %v1157_v58 = vmul.f32 %v599_v8, %v599_v8 }
 0x122   :  { %v1164_v47 = vmul.f32 %v2267_v32, %v2267_v32  ;;  %v1167_v1 = vmul.f32 %v2272_v35, %v2272_v35 }
 0x123   :  { %1742 = vst [vmem:[%s2521_s4 + $0x70] sm:$0xff] %v1611_v15   ;;  %v1088_v20 = vadd.f32 %v1846_v41, %v1087_v17  ;;  %v1220_v21 = vadd.f32 %v1219_v14, %v1157_v58  ;;  %v1168_v17 = vmul.f32 %v2291_v51, %v2291_v51 }
 0x125   :  { %v1089_v60 = vadd.f32 %v1847_v25, %v1088_v20  ;;  %v1221_v27 = vadd.f32 %v1220_v21, %v1158_v19  ;;  %v1166_v25 = vmul.f32 %v2259_v12, %v2259_v12  ;;  %v1169_v20 = vmul.f32 %v2300_v4, %v2300_v4 }
 0x127   :  { %v1222_v30 = vadd.f32 %v1221_v27, %v1159_v26  ;;  %v1090_v31 = vadd.f32 %v1089_v60, %v2243_v13  ;;  %v2390_v13 = vpop.f32.mrf.mxu1  ;;  %v1171_v60 = vmul.f32 %v2296_v57, %v2296_v57 }
 0x129   :  { %v1091_v50 = vadd.f32 %v1090_v31, %v2252_v22  ;;  %v1223_v2 = vadd.f32 %v1222_v30, %v1160_v5  ;;  %v2395_v39 = vpop.f32.mrf.mxu1 }
 0x12a   :  { %v1686_v43 = vpack.c.bf16 %v2395_v39, %v2382_v34 }
 0x12b   :  { %v1092_v36 = vadd.f32 %v2238_v0, %v1091_v50  ;;  %v1224_v38 = vadd.f32 %v1223_v2, %v1161_v53  ;;  %v2402_v45 = vpop.f32.mrf.mxu1  ;;  %v1173_v50 = vmul.f32 %v2324_v10, %v2324_v10 }
 0x12c   :  { %1757 = vst [vmem:[%s2521_s4 + $0xe8] sm:$0xff] %v1686_v43   ;;  %v1681_v49 = vpack.c.bf16 %v2402_v45, %v2390_v13 }
 0x12d   :  { %v1225_v41 = vadd.f32 %v1224_v38, %v1162_v6  ;;  %v1093_v22 = vadd.f32 %v2248_v3, %v1092_v36  ;;  %v2412_v54 = vpop.f32.mrf.mxu1  ;;  %v1176_v38 = vmul.f32 %v2339_v42, %v2339_v42 }
 0x12e   :  { %1756 = vst [vmem:[%s2521_s4 + $0xe0] sm:$0xff] %v1681_v49   ;;  %v1180_v49 = vmul.f32 %v2363_v7, %v2363_v7 }
 0x12f   :  { %v1094_v46 = vadd.f32 %v1093_v22, %v2267_v32  ;;  %v1226_v0 = vadd.f32 %v1225_v41, %v1163_v40  ;;  %v2420_v32 = vpop.f32.mrf.mxu1  ;;  %v1177_v22 = vmul.f32 %v2348_v59, %v2348_v59 }
 0x131   :  { %v1227_v3 = vadd.f32 %v1226_v0, %v1164_v47  ;;  %v1095_v55 = vadd.f32 %v1094_v46, %v2276_v37  ;;  %v2425_v63 = vpop.f32.mrf.mxu1 }
 0x132   :  { %v1696_v9 = vpack.c.bf16 %v2425_v63, %v2412_v54 }
 0x133   :  { %v1096_v61 = vadd.f32 %v2259_v12, %v1095_v55  ;;  %v1228_v62 = vadd.f32 %v1227_v3, %v1165_v56  ;;  %v2432_v14 = vpop.f32.mrf.mxu1  ;;  %v1181_v56 = vmul.f32 %v2372_v29, %v2372_v29 }
 0x134   :  { %1759 = vst [vmem:[%s2521_s4 + $0xf8] sm:$0xff] %v1696_v9   ;;  %v1691_v58 = vpack.c.bf16 %v2432_v14, %v2420_v32 }
 0x135   :  { %v1229_v8 = vadd.f32 %v1228_v62, %v1166_v25  ;;  %v1097_v37 = vadd.f32 %v2272_v35, %v1096_v61 }
 0x136   :  { %1758 = vst [vmem:[%s2521_s4 + $0xf0] sm:$0xff] %v1691_v58  }
 0x137   :  { %v1098_v15 = vadd.f32 %v1097_v37, %v2291_v51  ;;  %v1230_v12 = vadd.f32 %v1229_v8, %v1167_v1  ;;  %v1170_v51 = vmul.f32 %v2283_v44, %v2283_v44  ;;  %v1184_v8 = vmul.f32 %v2390_v13, %v2390_v13 }
 0x139   :  { %v1231_v19 = vadd.f32 %v1230_v12, %v1168_v17  ;;  %v1099_v35 = vadd.f32 %v1098_v15, %v2300_v4  ;;  %v1172_v4 = vmul.f32 %v2315_v23, %v2315_v23  ;;  %v1185_v15 = vmul.f32 %v2402_v45, %v2402_v45 }
 0x13b   :  { %v1100_v21 = vadd.f32 %v2283_v44, %v1099_v35  ;;  %v1232_v26 = vadd.f32 %v1231_v19, %v1169_v20  ;;  %v1174_v44 = vmul.f32 %v2307_v18, %v2307_v18  ;;  %v1188_v35 = vmul.f32 %v2420_v32, %v2420_v32 }
 0x13d   :  { %v1233_v27 = vadd.f32 %v1232_v26, %v1170_v51  ;;  %v1101_v28 = vadd.f32 %v2296_v57, %v1100_v21  ;;  %v1175_v57 = vmul.f32 %v2320_v52, %v2320_v52  ;;  %v1189_v21 = vmul.f32 %v2432_v14, %v2432_v14 }
 0x13f   :  { %v1102_v5 = vadd.f32 %v1101_v28, %v2315_v23  ;;  %v1234_v30 = vadd.f32 %v1233_v27, %v1171_v60 }
 0x141   :  { %v1235_v31 = vadd.f32 %v1234_v30, %v1172_v4  ;;  %v1103_v33 = vadd.f32 %v1102_v5, %v2324_v10 }
 0x143   :  { %v1104_v53 = vadd.f32 %v2307_v18, %v1103_v33  ;;  %v1236_v2 = vadd.f32 %v1235_v31, %v1173_v50  ;;  %v1178_v18 = vmul.f32 %v2331_v16, %v2331_v16 }
 0x145   :  { %v1237_v6 = vadd.f32 %v1236_v2, %v1174_v44  ;;  %v1105_v36 = vadd.f32 %v2320_v52, %v1104_v53  ;;  %v1179_v52 = vmul.f32 %v2344_v48, %v2344_v48 }
 0x147   :  { %v1106_v23 = vadd.f32 %v1105_v36, %v2339_v42  ;;  %v1238_v40 = vadd.f32 %v1237_v6, %v1175_v57 }
 0x149   :  { %v1239_v41 = vadd.f32 %v1238_v40, %v1176_v38  ;;  %v1107_v10 = vadd.f32 %v1106_v23, %v2348_v59 }
 0x14b   :  { %v1108_v43 = vadd.f32 %v2331_v16, %v1107_v10  ;;  %v1240_v46 = vadd.f32 %v1239_v41, %v1177_v22  ;;  %v1182_v16 = vmul.f32 %v2355_v11, %v2355_v11 }
 0x14d   :  { %v1241_v47 = vadd.f32 %v1240_v46, %v1178_v18  ;;  %v1109_v0 = vadd.f32 %v2344_v48, %v1108_v43  ;;  %v1183_v48 = vmul.f32 %v2368_v24, %v2368_v24 }
 0x14f   :  { %v1110_v42 = vadd.f32 %v1109_v0, %v2363_v7  ;;  %v1242_v3 = vadd.f32 %v1241_v47, %v1179_v52 }
 0x151   :  { %v1243_v55 = vadd.f32 %v1242_v3, %v1180_v49  ;;  %v1111_v59 = vadd.f32 %v1110_v42, %v2372_v29 }
 0x153   :  { %v1112_v25 = vadd.f32 %v2355_v11, %v1111_v59  ;;  %v1244_v61 = vadd.f32 %v1243_v55, %v1181_v56  ;;  %v1186_v11 = vmul.f32 %v2382_v34, %v2382_v34 }
 0x155   :  { %v1245_v62 = vadd.f32 %v1244_v61, %v1182_v16  ;;  %v1113_v1 = vadd.f32 %v2368_v24, %v1112_v25  ;;  %v1187_v24 = vmul.f32 %v2395_v39, %v2395_v39 }
 0x157   :  { %v1114_v7 = vadd.f32 %v1113_v1, %v2390_v13  ;;  %v1246_v37 = vadd.f32 %v1245_v62, %v1183_v48 }
 0x159   :  { %v1247_v9 = vadd.f32 %v1246_v37, %v1184_v8  ;;  %v1115_v29 = vadd.f32 %v1114_v7, %v2402_v45 }
 0x15b   :  { %v1116_v17 = vadd.f32 %v2382_v34, %v1115_v29  ;;  %v1248_v12 = vadd.f32 %v1247_v9, %v1185_v15  ;;  %v1190_v34 = vmul.f32 %v2412_v54, %v2412_v54 }
 0x15d   :  { %v1249_v58 = vadd.f32 %v1248_v12, %v1186_v11  ;;  %v1117_v19 = vadd.f32 %v2395_v39, %v1116_v17  ;;  %v1191_v39 = vmul.f32 %v2425_v63, %v2425_v63 }
 0x15f   :  { %v1118_v13 = vadd.f32 %v1117_v19, %v2420_v32  ;;  %v1250_v20 = vadd.f32 %v1249_v58, %v1187_v24 }
 0x161   :  { %v1251_v51 = vadd.f32 %v1250_v20, %v1188_v35  ;;  %v1119_v45 = vadd.f32 %v1118_v13, %v2432_v14 }
 0x163   :  { %v1120_v26 = vadd.f32 %v2412_v54, %v1119_v45  ;;  %v1252_v60 = vadd.f32 %v1251_v51, %v1189_v21 }
 0x165   :  { %v1121_v27 = vadd.f32 %v2425_v63, %v1120_v26  ;;  %v1253_v28 = vadd.f32 %v1252_v60, %v1190_v34 }
 0x167   :  { %v1122_v32 = vrot.slane %v1121_v27, 4  ;;  %v1254_v5 = vadd.f32 %v1253_v28, %v1191_v39 }
 0x169   :  { %v1123_v4 = vadd.f32 %v1122_v32, %v1121_v27  ;;  %v1255_v30 = vrot.slane %v1254_v5, 4 }
 0x16b   :  { %v1124_v31 = vrot.slane %v1123_v4, 2  ;;  %v1256_v33 = vadd.f32 %v1255_v30, %v1254_v5 }
 0x16d   :  { %v1125_v50 = vadd.f32 %v1124_v31, %v1123_v4  ;;  %v1257_v14 = vrot.slane %v1256_v33, 2 }
 0x16f   :  { %v1126_v44 = vrot.slane %v1125_v50, 1  ;;  %v1258_v53 = vadd.f32 %v1257_v14, %v1256_v33 }
 0x171   :  { %v1259_v2 = vrot.slane %v1258_v53, 1  ;;  %v1127_v54 = vadd.f32 %v1126_v44, %v1125_v50 }
 0x173   :  { %v1260_v57 = vadd.f32 %v1259_v2, %v1258_v53 }
 0x175   :  { %v1262_v6 = vsel %vm1261_vm0, %v1127_v54, %v1260_v57 }
 0x176   :  { %1263 = vst [vmem:[%s2522_s5] sm:$0x3] %v1262_v6 }

// kernel: bottleneck_forward.7
= control target key start
LH: loop header
LB: loop body
LE: loop exit
PB: predicated region body
PF: predicated region fallthrough
CT: control target
= control target key end

     0   :  { %vm350_vm0 = vcmask 1043456   ;;  %vm253_vm1 = vcmask 64512   ;;  %s2391_s0 = inlined_call_operand.vmem [shape: bf16[512,128], index: 0, kind: input, shape index: {}]   ;;  %s2392_s1 = inlined_call_operand.vmem [shape: bf16[512,8], index: 1, kind: input, shape index: {}]   ;;  %s2393_s2 = inlined_call_operand.vmem [shape: bf16[8,128], index: 2, kind: input, shape index: {}]   ;;  %s2394_s3 = inlined_call_operand.vmem [shape: f32[1,128], index: 3, kind: input, shape index: {}]   ;;  %s2395_s4 = inlined_call_operand.vmem [shape: f32[1,128], index: 4, kind: input, shape index: {}]   ;;  %s2396_s5 = inlined_call_operand.vmem [shape: f32[1,128], index: 5, kind: input, shape index: {}]   ;;  %s2397_s6 = inlined_call_operand.vmem [shape: f32[1,128], index: 6, kind: input, shape index: {}]   ;;  %s2398_s7 = inlined_call_operand.hbm [shape: f32[512,128], index: 7, kind: output, shape index: {}]  }
   0x1   :  { %v92_v0 = vld [vmem:[%s2393_s2] sm:$0xf]  ;;  %v1598_v4 = vld [vmem:[%s2392_s1 + $0x8] sm:$0xff]   ;;  %v1600_v6 = vld [vmem:[%s2392_s1 + $0x10] sm:$0xff]  }
   0x2   :  { %v1596_v1 = vld [vmem:[%s2392_s1] sm:$0xff]   ;;  %1591 = vmatprep.subr.msk.bf16.mxu0 %vm350_vm0, %v92_v0  ;;  %1592 = vmatprep.subr.msk.bf16.mxu1 %vm350_vm0, %v92_v0  ;;  %v352_v2 = vsel %vm350_vm0, %v92_v0, 0  ;;  %v1599_v5 = vld [vmem:[%s2392_s1 + $0x88] sm:$0xff]   ;;  %v1601_v7 = vld [vmem:[%s2392_s1 + $0x90] sm:$0xff]  }
   0x3   :  { %1524 = vmatpush3.bf16.msra.mxu0 %v352_v2  ;;  %1590 = vmatpush3.bf16.msra.mxu1 %v352_v2  ;;  %v1597_v3 = vld [vmem:[%s2392_s1 + $0x80] sm:$0xff]   ;;  %v1602_v8 = vld [vmem:[%s2392_s1 + $0x18] sm:$0xff]   ;;  %v1606_v12 = vld [vmem:[%s2392_s1 + $0x28] sm:$0xff]  }
   0x4   :  { %1525 = vmatprep.mubr.msk.bf16.mxu0 %vm253_vm1, %v1596_v1  ;;  %1557 = vmatprep.mubr.msk.bf16.mxu1 %vm253_vm1, %v1597_v3  ;;  %v1603_v9 = vld [vmem:[%s2392_s1 + $0x98] sm:$0xff]   ;;  %v1604_v10 = vld [vmem:[%s2392_s1 + $0x20] sm:$0xff]   ;;  %v1607_v13 = vld [vmem:[%s2392_s1 + $0xa8] sm:$0xff]  }
   0x5   :  { %v1605_v11 = vld [vmem:[%s2392_s1 + $0xa0] sm:$0xff]   ;;  %v1608_v14 = vld [vmem:[%s2392_s1 + $0x30] sm:$0xff]   ;;  %v1610_v16 = vld [vmem:[%s2392_s1 + $0x38] sm:$0xff]  }
   0x6   :  { %1526 = vmatmul.mubr.msk.bf16.vlgmr.msra.gmra.mxu0 %vm253_vm1, %v1598_v4  ;;  %1558 = vmatmul.mubr.msk.bf16.vlgmr.msra.gmra.mxu1 %vm253_vm1, %v1599_v5  ;;  %v1609_v15 = vld [vmem:[%s2392_s1 + $0xb0] sm:$0xff]   ;;  %v1611_v17 = vld [vmem:[%s2392_s1 + $0xb8] sm:$0xff]   ;;  %v1612_v18 = vld [vmem:[%s2392_s1 + $0x40] sm:$0xff]  }
   0x7   :  { %1529 = vmatprep.mubr.msk.bf16.mxu0 %vm253_vm1, %v1600_v6  ;;  %1561 = vmatprep.mubr.msk.bf16.mxu1 %vm253_vm1, %v1601_v7  ;;  %v1613_v19 = vld [vmem:[%s2392_s1 + $0xc0] sm:$0xff]  }
   0xe   :  { %1530 = vmatmul.mubr.msk.bf16.gmra.mxu0 %vm253_vm1, %v1602_v8  ;;  %1562 = vmatmul.mubr.msk.bf16.gmra.mxu1 %vm253_vm1, %v1603_v9 }
   0xf   :  { %1533 = vmatprep.mubr.msk.bf16.mxu0 %vm253_vm1, %v1604_v10  ;;  %1565 = vmatprep.mubr.msk.bf16.mxu1 %vm253_vm1, %v1605_v11 }
  0x16   :  { %1534 = vmatmul.mubr.msk.bf16.gmra.mxu0 %vm253_vm1, %v1606_v12  ;;  %1566 = vmatmul.mubr.msk.bf16.gmra.mxu1 %vm253_vm1, %v1607_v13 }
  0x17   :  { %1537 = vmatprep.mubr.msk.bf16.mxu0 %vm253_vm1, %v1608_v14  ;;  %1569 = vmatprep.mubr.msk.bf16.mxu1 %vm253_vm1, %v1609_v15 }
  0x1e   :  { %1538 = vmatmul.mubr.msk.bf16.gmra.mxu0 %vm253_vm1, %v1610_v16  ;;  %1570 = vmatmul.mubr.msk.bf16.gmra.mxu1 %vm253_vm1, %v1611_v17 }
  0x1f   :  { %1541 = vmatprep.mubr.msk.bf16.mxu0 %vm253_vm1, %v1612_v18  ;;  %1573 = vmatprep.mubr.msk.bf16.mxu1 %vm253_vm1, %v1613_v19 }
  0x20   :  { %12 = vsyncpa [#allocation3], 0  ;;  %v1614_v20 = vld [vmem:[%s2392_s1 + $0x48] sm:$0xff]   ;;  %v1616_v22 = vld [vmem:[%s2392_s1 + $0x50] sm:$0xff]  }
  0x21   :  { %v1615_v21 = vld [vmem:[%s2392_s1 + $0xc8] sm:$0xff]   ;;  %v1617_v23 = vld [vmem:[%s2392_s1 + $0xd0] sm:$0xff]   ;;  %v1618_v24 = vld [vmem:[%s2392_s1 + $0x58] sm:$0xff]  }
  0x22   :  { %v1619_v25 = vld [vmem:[%s2392_s1 + $0xd8] sm:$0xff]   ;;  %v1620_v26 = vld [vmem:[%s2392_s1 + $0x60] sm:$0xff]   ;;  %v1622_v28 = vld [vmem:[%s2392_s1 + $0x68] sm:$0xff]  }
  0x23   :  { %v1621_v27 = vld [vmem:[%s2392_s1 + $0xe0] sm:$0xff]   ;;  %v1623_v29 = vld [vmem:[%s2392_s1 + $0xe8] sm:$0xff]   ;;  %v1624_v30 = vld [vmem:[%s2392_s1 + $0x70] sm:$0xff]  }
  0x24   :  { %v1625_v31 = vld [vmem:[%s2392_s1 + $0xf0] sm:$0xff]   ;;  %v1626_v32 = vld [vmem:[%s2392_s1 + $0x78] sm:$0xff]   ;;  %v1459_v34 = vld [vmem:[%s2391_s0 + $0x8] sm:$0xff]  }
  0x25   :  { %v1627_v33 = vld [vmem:[%s2392_s1 + $0xf8] sm:$0xff]   ;;  %v1475_v35 = vld [vmem:[%s2391_s0 + $0x88] sm:$0xff]   ;;  %v1332_v36 = vld [vmem:[%s2391_s0] sm:$0xff]   ;;  %v1337_v38 = vunpack.c.l.bf16 %v1459_v34  ;;  %v1338_v45 = vunpack.c.h.bf16 %v1459_v34 }
  0x26   :  { %1542 = vmatmul.mubr.msk.bf16.gmra.mxu0 %vm253_vm1, %v1614_v20  ;;  %1574 = vmatmul.mubr.msk.bf16.gmra.mxu1 %vm253_vm1, %v1615_v21  ;;  %v1474_v37 = vld [vmem:[%s2391_s0 + $0x80] sm:$0xff]   ;;  %v1401_v39 = vunpack.c.l.bf16 %v1475_v35  ;;  %v1333_v41 = vunpack.c.l.bf16 %v1332_v36  ;;  %v1461_v43 = vld [vmem:[%s2391_s0 + $0x18] sm:$0xff]   ;;  %v1402_v46 = vunpack.c.h.bf16 %v1475_v35  ;;  %v1460_v47 = vld [vmem:[%s2391_s0 + $0x10] sm:$0xff]   ;;  %v1334_v51 = vunpack.c.h.bf16 %v1332_v36 }
  0x27   :  { %1545 = vmatprep.mubr.msk.bf16.mxu0 %vm253_vm1, %v1616_v22  ;;  %1577 = vmatprep.mubr.msk.bf16.mxu1 %vm253_vm1, %v1617_v23  ;;  %v1839_v40 = vld [vmem:[%s2394_s3] ss:$0 sm:$0xff]  ;;  %v1397_v42 = vunpack.c.l.bf16 %v1474_v37  ;;  %v1477_v44 = vld [vmem:[%s2391_s0 + $0x98] sm:$0xff]   ;;  %v1476_v48 = vld [vmem:[%s2391_s0 + $0x90] sm:$0xff]   ;;  %v1398_v52 = vunpack.c.h.bf16 %v1474_v37  ;;  %v1345_v54 = vunpack.c.l.bf16 %v1461_v43  ;;  %v1341_v58 = vunpack.c.l.bf16 %v1460_v47 }
  0x28   :  { %v780_v49 = vmul.f32 %v1337_v38, %v1839_v40  ;;  %v812_v50 = vmul.f32 %v1401_v39, %v1839_v40  ;;  %v1858_v53 = vld [vmem:[%s2395_s4] ss:$0 sm:$0xff]  ;;  %v1409_v55 = vunpack.c.l.bf16 %v1477_v44  ;;  %v778_v56 = vmul.f32 %v1333_v41, %v1839_v40  ;;  %v1463_v8 = vld [vmem:[%s2391_s0 + $0x28] sm:$0xff]   ;;  %v1464_v38 = vld [vmem:[%s2391_s0 + $0x30] sm:$0xff]  }
  0x29   :  { %v810_v57 = vmul.f32 %v1397_v42, %v1839_v40  ;;  %v1405_v59 = vunpack.c.l.bf16 %v1476_v48  ;;  %v781_v60 = vmul.f32 %v1338_v45, %v1839_v40  ;;  %v813_v61 = vmul.f32 %v1402_v46, %v1839_v40  ;;  %v1479_v9 = vld [vmem:[%s2391_s0 + $0xa8] sm:$0xff]   ;;  %v1462_v18 = vld [vmem:[%s2391_s0 + $0x20] sm:$0xff]   ;;  %v1480_v39 = vld [vmem:[%s2391_s0 + $0xb0] sm:$0xff]  }
  0x2a   :  { %v1346_v62 = vunpack.c.h.bf16 %v1461_v43  ;;  %v1410_v63 = vunpack.c.h.bf16 %v1477_v44  ;;  %v1865_v0 = vadd.f32 %v1858_v53, %v780_v49  ;;  %v1868_v1 = vadd.f32 %v1858_v53, %v812_v50  ;;  %v1478_v19 = vld [vmem:[%s2391_s0 + $0xa0] sm:$0xff]  }
  0x2b   :  { %v779_v2 = vmul.f32 %v1334_v51, %v1839_v40  ;;  %v811_v3 = vmul.f32 %v1398_v52, %v1839_v40  ;;  %v784_v4 = vmul.f32 %v1345_v54, %v1839_v40  ;;  %v816_v5 = vmul.f32 %v1409_v55, %v1839_v40 }
  0x2c   :  { %v1342_v6 = vunpack.c.h.bf16 %v1460_v47  ;;  %v1406_v7 = vunpack.c.h.bf16 %v1476_v48  ;;  %v1881_v10 = vadd.f32 %v1858_v53, %v778_v56  ;;  %v1884_v11 = vadd.f32 %v1858_v53, %v810_v57 }
  0x2d   :  { %v782_v12 = vmul.f32 %v1341_v58, %v1839_v40  ;;  %v814_v13 = vmul.f32 %v1405_v59, %v1839_v40  ;;  %v1889_v14 = vadd.f32 %v1858_v53, %v781_v60  ;;  %v1892_v15 = vadd.f32 %v1858_v53, %v813_v61 }
  0x2e   :  { %1546 = vmatmul.mubr.msk.bf16.gmra.mxu0 %vm253_vm1, %v1618_v24  ;;  %1578 = vmatmul.mubr.msk.bf16.gmra.mxu1 %vm253_vm1, %v1619_v25  ;;  %v785_v16 = vmul.f32 %v1346_v62, %v1839_v40  ;;  %v817_v17 = vmul.f32 %v1410_v63, %v1839_v40  ;;  %v1903_v20 = vadd.f32 %v1858_v53, %v779_v2  ;;  %v1353_v22 = vunpack.c.l.bf16 %v1463_v8 }
  0x2f   :  { %1549 = vmatprep.mubr.msk.bf16.mxu0 %vm253_vm1, %v1620_v26  ;;  %1581 = vmatprep.mubr.msk.bf16.mxu1 %vm253_vm1, %v1621_v27  ;;  %v1906_v21 = vadd.f32 %v1858_v53, %v811_v3  ;;  %v1417_v23 = vunpack.c.l.bf16 %v1479_v9  ;;  %v1909_v24 = vadd.f32 %v1858_v53, %v784_v4  ;;  %v1912_v25 = vadd.f32 %v1858_v53, %v816_v5  ;;  %v1467_v4 = vld [vmem:[%s2391_s0 + $0x48] sm:$0xff]  }
  0x30   :  { %v783_v26 = vmul.f32 %v1342_v6, %v1839_v40  ;;  %v815_v27 = vmul.f32 %v1406_v7, %v1839_v40  ;;  %v1929_v34 = vadd.f32 %v1858_v53, %v785_v16  ;;  %v1932_v35 = vadd.f32 %v1858_v53, %v817_v17  ;;  %v1483_v5 = vld [vmem:[%s2391_s0 + $0xc8] sm:$0xff]  }
  0x31   :  { %v1354_v36 = vunpack.c.h.bf16 %v1463_v8  ;;  %v1418_v37 = vunpack.c.h.bf16 %v1479_v9  ;;  %v788_v41 = vmul.f32 %v1353_v22, %v1839_v40  ;;  %v820_v42 = vmul.f32 %v1417_v23, %v1839_v40 }
  0x32   :  { %v1350_v43 = vunpack.c.h.bf16 %v1462_v18  ;;  %v1414_v44 = vunpack.c.h.bf16 %v1478_v19  ;;  %v1943_v45 = vadd.f32 %v1858_v53, %v783_v26  ;;  %v1946_v46 = vadd.f32 %v1858_v53, %v815_v27 }
  0x33   :  { %v1357_v51 = vunpack.c.l.bf16 %v1464_v38  ;;  %v1421_v52 = vunpack.c.l.bf16 %v1480_v39  ;;  %v789_v54 = vmul.f32 %v1354_v36, %v1839_v40  ;;  %v821_v55 = vmul.f32 %v1418_v37, %v1839_v40 }
  0x34   :  { %v1953_v58 = vadd.f32 %v1858_v53, %v788_v41  ;;  %v1956_v59 = vadd.f32 %v1858_v53, %v820_v42  ;;  %v787_v60 = vmul.f32 %v1350_v43, %v1839_v40  ;;  %v819_v61 = vmul.f32 %v1414_v44, %v1839_v40  ;;  %v1469_v41 = vld [vmem:[%s2391_s0 + $0x58] sm:$0xff]  }
  0x35   :  { %v1358_v2 = vunpack.c.h.bf16 %v1464_v38  ;;  %v1422_v3 = vunpack.c.h.bf16 %v1480_v39  ;;  %v790_v8 = vmul.f32 %v1357_v51, %v1839_v40  ;;  %v822_v9 = vmul.f32 %v1421_v52, %v1839_v40  ;;  %v1485_v42 = vld [vmem:[%s2391_s0 + $0xd8] sm:$0xff]  }
  0x36   :  { %1550 = vmatmul.mubr.msk.bf16.gmra.mxu0 %vm253_vm1, %v1622_v28  ;;  %1582 = vmatmul.mubr.msk.bf16.gmra.mxu1 %vm253_vm1, %v1623_v29  ;;  %v1917_v28 = vadd.f32 %v1858_v53, %v782_v12  ;;  %v1920_v29 = vadd.f32 %v1858_v53, %v814_v13  ;;  %v1977_v12 = vadd.f32 %v1858_v53, %v789_v54  ;;  %v1369_v26 = vunpack.c.l.bf16 %v1467_v4 }
  0x37   :  { %1553 = vmatprep.mubr.msk.bf16.mxu0 %vm253_vm1, %v1624_v30  ;;  %1585 = vmatprep.mubr.msk.bf16.mxu1 %vm253_vm1, %v1625_v31  ;;  %v1349_v30 = vunpack.c.l.bf16 %v1462_v18  ;;  %v1413_v31 = vunpack.c.l.bf16 %v1478_v19  ;;  %v1980_v13 = vadd.f32 %v1858_v53, %v821_v55  ;;  %v1466_v18 = vld [vmem:[%s2391_s0 + $0x40] sm:$0xff]   ;;  %v1991_v22 = vadd.f32 %v1858_v53, %v787_v60 }
  0x38   :  { %v1482_v19 = vld [vmem:[%s2391_s0 + $0xc0] sm:$0xff]   ;;  %v1994_v23 = vadd.f32 %v1858_v53, %v819_v61  ;;  %v1433_v27 = vunpack.c.l.bf16 %v1483_v5  ;;  %v2005_v36 = vadd.f32 %v1858_v53, %v790_v8  ;;  %v2008_v37 = vadd.f32 %v1858_v53, %v822_v9 }
  0x39   :  { %v786_v49 = vmul.f32 %v1349_v30, %v1839_v40  ;;  %v818_v50 = vmul.f32 %v1413_v31, %v1839_v40  ;;  %v1365_v38 = vunpack.c.l.bf16 %v1466_v18  ;;  %v1429_v39 = vunpack.c.l.bf16 %v1482_v19 }
  0x3a   :  { %v796_v51 = vmul.f32 %v1369_v26, %v1839_v40  ;;  %v828_v52 = vmul.f32 %v1433_v27, %v1839_v40  ;;  %v1366_v54 = vunpack.c.h.bf16 %v1466_v18  ;;  %v1430_v55 = vunpack.c.h.bf16 %v1482_v19 }
  0x3b   :  { %v1969_v6 = vadd.f32 %v1858_v53, %v786_v49  ;;  %v1972_v7 = vadd.f32 %v1858_v53, %v818_v50  ;;  %v1468_v49 = vld [vmem:[%s2391_s0 + $0x50] sm:$0xff]   ;;  %v1377_v60 = vunpack.c.l.bf16 %v1469_v41  ;;  %v1441_v61 = vunpack.c.l.bf16 %v1485_v42 }
  0x3c   :  { %v1484_v50 = vld [vmem:[%s2391_s0 + $0xd0] sm:$0xff]   ;;  %v1378_v8 = vunpack.c.h.bf16 %v1469_v41  ;;  %v1442_v9 = vunpack.c.h.bf16 %v1485_v42  ;;  %v795_v18 = vmul.f32 %v1366_v54, %v1839_v40  ;;  %v827_v19 = vmul.f32 %v1430_v55, %v1839_v40  ;;  %v1470_v54 = vld [vmem:[%s2391_s0 + $0x60] sm:$0xff]  }
  0x3d   :  { %v800_v26 = vmul.f32 %v1377_v60, %v1839_v40  ;;  %v832_v27 = vmul.f32 %v1441_v61, %v1839_v40  ;;  %v1486_v55 = vld [vmem:[%s2391_s0 + $0xe0] sm:$0xff]  }
  0x3e   :  { %1554 = vmatmul.mubr.msk.bf16.gmra.mxu0 %vm253_vm1, %v1626_v32  ;;  %1586 = vmatmul.mubr.msk.bf16.gmra.mxu1 %vm253_vm1, %v1627_v33  ;;  %v1465_v32 = vld [vmem:[%s2391_s0 + $0x38] sm:$0xff]   ;;  %v2079_v60 = vadd.f32 %v1858_v53, %v795_v18  ;;  %v2082_v61 = vadd.f32 %v1858_v53, %v827_v19  ;;  %v1381_v18 = vunpack.c.l.bf16 %v1470_v54  ;;  %v1445_v19 = vunpack.c.l.bf16 %v1486_v55 }
  0x3f   :  { %v1481_v33 = vld [vmem:[%s2391_s0 + $0xb8] sm:$0xff]   ;;  %v1361_v47 = vunpack.c.l.bf16 %v1465_v32  ;;  %v1362_v56 = vunpack.c.h.bf16 %v1465_v32  ;;  %v791_v32 = vmul.f32 %v1358_v2, %v1839_v40  ;;  %v1373_v2 = vunpack.c.l.bf16 %v1468_v49 }
  0x40   :  { %v1425_v48 = vunpack.c.l.bf16 %v1481_v33  ;;  %v1426_v57 = vunpack.c.h.bf16 %v1481_v33  ;;  %v823_v33 = vmul.f32 %v1422_v3, %v1839_v40  ;;  %v1437_v3 = vunpack.c.l.bf16 %v1484_v50  ;;  %2401 = vst [vmem:[#allocation7_spill] sm:$0xff] %v2079_v60  ;;  %2402 = vst [vmem:[#allocation8_spill] sm:$0xff] %v2082_v61 }
  0x41   :  { %v792_v62 = vmul.f32 %v1361_v47, %v1839_v40  ;;  %v793_v16 = vmul.f32 %v1362_v56, %v1839_v40  ;;  %v1370_v47 = vunpack.c.h.bf16 %v1467_v4  ;;  %v2031_v56 = vadd.f32 %v1858_v53, %v791_v32 }
  0x42   :  { %v824_v63 = vmul.f32 %v1425_v48, %v1839_v40  ;;  %v825_v17 = vmul.f32 %v1426_v57, %v1839_v40  ;;  %v1434_v48 = vunpack.c.h.bf16 %v1483_v5  ;;  %v2034_v57 = vadd.f32 %v1858_v53, %v823_v33 }
  0x43   :  { %v1997_v30 = vadd.f32 %v1858_v53, %v792_v62  ;;  %v2017_v43 = vadd.f32 %v1858_v53, %v793_v16  ;;  %v794_v62 = vmul.f32 %v1365_v38, %v1839_v40  ;;  %v797_v4 = vmul.f32 %v1370_v47, %v1839_v40  ;;  %v1471_v38 = vld [vmem:[%s2391_s0 + $0x68] sm:$0xff]  }
  0x44   :  { %v2000_v31 = vadd.f32 %v1858_v53, %v824_v63  ;;  %v2020_v44 = vadd.f32 %v1858_v53, %v825_v17  ;;  %v826_v63 = vmul.f32 %v1429_v39, %v1839_v40  ;;  %v829_v5 = vmul.f32 %v1434_v48, %v1839_v40  ;;  %v1487_v39 = vld [vmem:[%s2391_s0 + $0xe8] sm:$0xff]  }
  0x45   :  { %v2041_v16 = vadd.f32 %v1858_v53, %v796_v51  ;;  %v2044_v17 = vadd.f32 %v1858_v53, %v828_v52  ;;  %v1374_v32 = vunpack.c.h.bf16 %v1468_v49  ;;  %v1438_v33 = vunpack.c.h.bf16 %v1484_v50 }
  0x46   :  { %v2057_v41 = vadd.f32 %v1858_v53, %v794_v62  ;;  %v2060_v42 = vadd.f32 %v1858_v53, %v826_v63  ;;  %v798_v47 = vmul.f32 %v1373_v2, %v1839_v40  ;;  %v830_v48 = vmul.f32 %v1437_v3, %v1839_v40 }
  0x47   :  { %v2065_v49 = vadd.f32 %v1858_v53, %v797_v4  ;;  %v2068_v50 = vadd.f32 %v1858_v53, %v829_v5  ;;  %v801_v51 = vmul.f32 %v1378_v8, %v1839_v40  ;;  %v833_v52 = vmul.f32 %v1442_v9, %v1839_v40 }
  0x48   :  { %v1385_v62 = vunpack.c.l.bf16 %v1471_v38  ;;  %v1449_v63 = vunpack.c.l.bf16 %v1487_v39  ;;  %v2085_v2 = vadd.f32 %v1858_v53, %v800_v26  ;;  %v2088_v3 = vadd.f32 %v1858_v53, %v832_v27  ;;  %v1473_v26 = vld [vmem:[%s2391_s0 + $0x78] sm:$0xff]  }
  0x49   :  { %2399 = vst [vmem:[#allocation5_spill] sm:$0xff] %v2065_v49  ;;  %2400 = vst [vmem:[#allocation6_spill] sm:$0xff] %v2068_v50  ;;  %v799_v4 = vmul.f32 %v1374_v32, %v1839_v40  ;;  %v831_v5 = vmul.f32 %v1438_v33, %v1839_v40  ;;  %v2093_v8 = vadd.f32 %v1858_v53, %v798_v47  ;;  %v1489_v27 = vld [vmem:[%s2391_s0 + $0xf8] sm:$0xff]   ;;  %v1386_v47 = vunpack.c.h.bf16 %v1471_v38 }
  0x4a   :  { %2403 = vst [vmem:[#allocation9_spill] sm:$0xff] %v2085_v2  ;;  %2404 = vst [vmem:[#allocation10_spill] sm:$0xff] %v2088_v3  ;;  %v2096_v9 = vadd.f32 %v1858_v53, %v830_v48  ;;  %v2105_v32 = vadd.f32 %v1858_v53, %v801_v51  ;;  %v2108_v33 = vadd.f32 %v1858_v53, %v833_v52  ;;  %v1472_v48 = vld [vmem:[%s2391_s0 + $0x70] sm:$0xff]   ;;  %v1382_v61 = vunpack.c.h.bf16 %v1470_v54 }
  0x4b   :  { %2405 = vst [vmem:[#allocation11_spill] sm:$0xff] %v2093_v8  ;;  %v1450_v8 = vunpack.c.h.bf16 %v1487_v39  ;;  %v804_v3 = vmul.f32 %v1385_v62, %v1839_v40  ;;  %v836_v2 = vmul.f32 %v1449_v63, %v1839_v40  ;;  %v1446_v51 = vunpack.c.h.bf16 %v1486_v55 }
  0x4c   :  { %2406 = vst [vmem:[#allocation12_spill] sm:$0xff] %v2096_v9  ;;  %2407 = vst [vmem:[#allocation13_spill] sm:$0xff] %v2105_v32  ;;  %v1488_v9 = vld [vmem:[%s2391_s0 + $0xf0] sm:$0xff]   ;;  %v2119_v32 = vadd.f32 %v1858_v53, %v799_v4  ;;  %v2122_v38 = vadd.f32 %v1858_v53, %v831_v5  ;;  %v1393_v39 = vunpack.c.l.bf16 %v1473_v26  ;;  %v1457_v52 = vunpack.c.l.bf16 %v1489_v27 }
  0x4d   :  { %2408 = vst [vmem:[#allocation14_spill] sm:$0xff] %v2108_v33  ;;  %v802_v33 = vmul.f32 %v1381_v18, %v1839_v40  ;;  %v834_v60 = vmul.f32 %v1445_v19, %v1839_v40  ;;  %v1389_v50 = vunpack.c.l.bf16 %v1472_v48  ;;  %v1453_v49 = vunpack.c.l.bf16 %v1488_v9  ;;  %v2136_v18 = vld [vmem:[%s2396_s5] ss:$0 sm:$0xff] }
  0x4e   :  { %2409 = vst [vmem:[#allocation15_spill] sm:$0xff] %v2119_v32  ;;  %2410 = vst [vmem:[#allocation16_spill] sm:$0xff] %v2122_v38  ;;  %v805_v62 = vmul.f32 %v1386_v47, %v1839_v40  ;;  %v837_v63 = vmul.f32 %v1450_v8, %v1839_v40  ;;  %v1394_v54 = vunpack.c.h.bf16 %v1473_v26  ;;  %v1458_v55 = vunpack.c.h.bf16 %v1489_v27 }
  0x4f   :  { %v2129_v4 = vadd.f32 %v1858_v53, %v804_v3  ;;  %v803_v5 = vmul.f32 %v1382_v61, %v1839_v40  ;;  %v835_v38 = vmul.f32 %v1446_v51, %v1839_v40  ;;  %v1390_v32 = vunpack.c.h.bf16 %v1472_v48 }
  0x50   :  { %v2139_v19 = vadd.f32 %v1858_v53, %v836_v2  ;;  %v808_v8 = vmul.f32 %v1393_v39, %v1839_v40  ;;  %v840_v26 = vmul.f32 %v1457_v52, %v1839_v40  ;;  %v1454_v27 = vunpack.c.h.bf16 %v1488_v9  ;;  %v2154_v2 = vld [vmem:[%s2397_s6] ss:$0 sm:$0xff]  ;;  %s1650_s6 = smov [#allocation2]  }
  0x51   :  { %v2144_v3 = vadd.f32 %v1858_v53, %v802_v33  ;;  %v2147_v61 = vadd.f32 %v1858_v53, %v834_v60  ;;  %v806_v47 = vmul.f32 %v1389_v50, %v1839_v40  ;;  %v838_v48 = vmul.f32 %v1453_v49, %v1839_v40  ;;  %s1252_s9 = sshll.u32 %s1650_s6, 4  ;;  %s1253_s9 = int_to_ptr.vmem [resolvable:$true] %s1252_s9 }
  0x52   :  { %v2157_v39 = vadd.f32 %v1858_v53, %v805_v62  ;;  %v2160_v9 = vadd.f32 %v1858_v53, %v837_v63  ;;  %v809_v33 = vmul.f32 %v1394_v54, %v1839_v40  ;;  %v841_v60 = vmul.f32 %v1458_v55, %v1839_v40  ;;  %s1628_s10 = scalar_lea.vmem %s1253_s9, 8192  ;;  %p1633_p1 = scmp.lt.s32.totalorder %s1253_s9, %s1253_s9 }
  0x53   :  { %2411 = vst [vmem:[#allocation17_spill] sm:$0xff] %v2144_v3  ;;  %2412 = vst [vmem:[#allocation18_spill] sm:$0xff] %v2147_v61  ;;  %v2166_v49 = vadd.f32 %v1858_v53, %v803_v5  ;;  %v2169_v61 = vadd.f32 %v1858_v53, %v835_v38  ;;  %v807_v3 = vmul.f32 %v1390_v32, %v1839_v40  ;;  %p1629_p0 = scmp.ne.s32.totalorder %s1253_s9, %s1628_s10  ;;  %p1634_p2 = scmp.lt.s32.totalorder %s1628_s10, %s1628_s10 }
  0x54   :  { %2413 = vst [vmem:[#allocation19_spill] sm:$0xff] %v2157_v39  ;;  %v2174_v63 = vadd.f32 %v1858_v53, %v808_v8  ;;  %v2177_v54 = vadd.f32 %v1858_v53, %v840_v26  ;;  %v839_v55 = vmul.f32 %v1454_v27, %v1839_v40  ;;  %v2183_v38 = vadd.f32 %v1858_v53, %v806_v47 }
  0x55   :  { %2414 = vst [vmem:[#allocation20_spill] sm:$0xff] %v2166_v49  ;;  %v2186_v32 = vadd.f32 %v1858_v53, %v838_v48  ;;  %v2191_v26 = vadd.f32 %v1858_v53, %v809_v33  ;;  %v2194_v40 = vadd.f32 %v1858_v53, %v841_v60  ;;  %v2200_v48 = vadd.f32 %v1858_v53, %v807_v3  ;;  %p1635_p3 = por %p1634_p2, %p1633_p1 }
  0x56   :  { %2415 = vst [vmem:[#allocation21_spill] sm:$0xff] %v2174_v63  ;;  %v2206_v60 = vadd.f32 %v1858_v53, %v839_v55 }
  0x57   :  { %2416 = vst [vmem:[#allocation22_spill] sm:$0xff] %v2191_v26  ;;  %2417 = vst [vmem:[#allocation23_spill] sm:$0xff] %v2194_v40  ;;  %p1636_p4 = pnand %p1635_p3, %p1629_p0 }
  0x58   :  { %2418 = vst [vmem:[#allocation24_spill] sm:$0xff] %v2200_v48 }
  0xc6   :  { %v1527_v51 = vpop.f32.mrf.mxu0  ;;  %v1559_v52 = vpop.f32.mrf.mxu1 }
  0xc7   :  { %v922_v50 = vmul.f32 %v1527_v51, %v2136_v18  ;;  %v954_v62 = vmul.f32 %v1559_v52, %v2136_v18 }
  0xc8   :  { %v388_v39 = vpop.f32.mrf.mxu0  ;;  %v516_v49 = vpop.f32.mrf.mxu1 }
  0xc9   :  { %v993_v51 = vadd.f32 %v2154_v2, %v922_v50  ;;  %v920_v5 = vmul.f32 %v2136_v18, %v388_v39  ;;  %v1025_v52 = vadd.f32 %v2154_v2, %v954_v62  ;;  %v952_v8 = vmul.f32 %v2136_v18, %v516_v49 }
  0xca   :  { %v1528_v63 = vpop.f32.mrf.mxu0  ;;  %v1560_v50 = vpop.f32.mrf.mxu1 }
  0xcb   :  { %v1057_v27 = vadd.f32 %v993_v51, %v1865_v0  ;;  %v991_v39 = vadd.f32 %v2154_v2, %v920_v5  ;;  %v923_v47 = vmul.f32 %v1528_v63, %v2136_v18  ;;  %v1089_v62 = vadd.f32 %v1025_v52, %v1868_v1 }
  0xcc   :  { %v1023_v49 = vadd.f32 %v2154_v2, %v952_v8  ;;  %v955_v33 = vmul.f32 %v1560_v50, %v2136_v18  ;;  %v391_v26 = vpop.f32.mrf.mxu0  ;;  %v519_v5 = vpop.f32.mrf.mxu1 }
  0xcd   :  { %v1121_v40 = vmax.f32 %v1057_v27, 0.0  ;;  %v1055_v0 = vadd.f32 %v991_v39, %v1881_v10  ;;  %v994_v51 = vadd.f32 %v2154_v2, %v923_v47  ;;  %v921_v63 = vmul.f32 %v2136_v18, %v391_v26 }
  0xce   :  { %v1153_v3 = vmax.f32 %v1089_v62, 0.0  ;;  %v1087_v48 = vadd.f32 %v1023_v49, %v1884_v11  ;;  %v1026_v1 = vadd.f32 %v2154_v2, %v955_v33  ;;  %v953_v52 = vmul.f32 %v2136_v18, %v519_v5  ;;  %v1531_v8 = vpop.f32.mrf.mxu0  ;;  %v1563_v27 = vpop.f32.mrf.mxu1 }
  0xcf   :  { %1185 = vst [vmem:[#allocation2 + $0x10] sm:$0xff] %v1121_v40  ;;  %v1119_v50 = vmax.f32 %v1055_v0, 0.0  ;;  %v1058_v53 = vadd.f32 %v994_v51, %v1889_v14  ;;  %v992_v55 = vadd.f32 %v2154_v2, %v921_v63  ;;  %v926_v10 = vmul.f32 %v1531_v8, %v2136_v18 }
  0xd0   :  { %1217 = vst [vmem:[#allocation2 + $0x110] sm:$0xff] %v1153_v3  ;;  %v1151_v26 = vmax.f32 %v1087_v48, 0.0  ;;  %v1090_v39 = vadd.f32 %v1026_v1, %v1892_v15  ;;  %v1024_v11 = vadd.f32 %v2154_v2, %v953_v52  ;;  %v958_v47 = vmul.f32 %v1563_v27, %v2136_v18  ;;  %v404_v62 = vpop.f32.mrf.mxu0  ;;  %v532_v0 = vpop.f32.mrf.mxu1 }
  0xd1   :  { %1183 = vst [vmem:[#allocation2] sm:$0xff] %v1119_v50  ;;  %v1122_v49 = vmax.f32 %v1058_v53, 0.0  ;;  %v1056_v40 = vadd.f32 %v992_v55, %v1903_v20  ;;  %v997_v14 = vadd.f32 %v2154_v2, %v926_v10  ;;  %v924_v33 = vmul.f32 %v2136_v18, %v404_v62 }
  0xd2   :  { %1215 = vst [vmem:[#allocation2 + $0x100] sm:$0xff] %v1151_v26  ;;  %v1154_v51 = vmax.f32 %v1090_v39, 0.0  ;;  %v1088_v48 = vadd.f32 %v1024_v11, %v1906_v21  ;;  %v1029_v15 = vadd.f32 %v2154_v2, %v958_v47  ;;  %v956_v63 = vmul.f32 %v2136_v18, %v532_v0  ;;  %v1532_v5 = vpop.f32.mrf.mxu0  ;;  %v1564_v8 = vpop.f32.mrf.mxu1 }
  0xd3   :  { %1186 = vst [vmem:[#allocation2 + $0x18] sm:$0xff] %v1122_v49  ;;  %v1120_v3 = vmax.f32 %v1056_v40, 0.0  ;;  %v1061_v1 = vadd.f32 %v997_v14, %v1909_v24  ;;  %v995_v20 = vadd.f32 %v2154_v2, %v924_v33  ;;  %v927_v52 = vmul.f32 %v1532_v5, %v2136_v18 }
  0xd4   :  { %1218 = vst [vmem:[#allocation2 + $0x118] sm:$0xff] %v1154_v51  ;;  %v1152_v50 = vmax.f32 %v1088_v48, 0.0  ;;  %v1093_v53 = vadd.f32 %v1029_v15, %v1912_v25  ;;  %v1027_v21 = vadd.f32 %v2154_v2, %v956_v63  ;;  %v959_v55 = vmul.f32 %v1564_v8, %v2136_v18  ;;  %v407_v10 = vpop.f32.mrf.mxu0  ;;  %v535_v11 = vpop.f32.mrf.mxu1 }
  0xd5   :  { %1184 = vst [vmem:[#allocation2 + $0x8] sm:$0xff] %v1120_v3  ;;  %v1125_v27 = vmax.f32 %v1061_v1, 0.0  ;;  %v1059_v26 = vadd.f32 %v995_v20, %v1917_v28  ;;  %v998_v24 = vadd.f32 %v2154_v2, %v927_v52  ;;  %v925_v39 = vmul.f32 %v2136_v18, %v407_v10 }
  0xd6   :  { %1216 = vst [vmem:[#allocation2 + $0x108] sm:$0xff] %v1152_v50  ;;  %v1157_v47 = vmax.f32 %v1093_v53, 0.0  ;;  %v1091_v62 = vadd.f32 %v1027_v21, %v1920_v29  ;;  %v1030_v25 = vadd.f32 %v2154_v2, %v959_v55  ;;  %v957_v49 = vmul.f32 %v2136_v18, %v535_v11  ;;  %v1535_v40 = vpop.f32.mrf.mxu0  ;;  %v1567_v51 = vpop.f32.mrf.mxu1 }
  0xd7   :  { %1189 = vst [vmem:[#allocation2 + $0x30] sm:$0xff] %v1125_v27  ;;  %v1123_v14 = vmax.f32 %v1059_v26, 0.0  ;;  %v1062_v33 = vadd.f32 %v998_v24, %v1929_v34  ;;  %v996_v28 = vadd.f32 %v2154_v2, %v925_v39  ;;  %v930_v0 = vmul.f32 %v1535_v40, %v2136_v18 }
  0xd8   :  { %1221 = vst [vmem:[#allocation2 + $0x130] sm:$0xff] %v1157_v47  ;;  %v1155_v48 = vmax.f32 %v1091_v62, 0.0  ;;  %v1094_v15 = vadd.f32 %v1030_v25, %v1932_v35  ;;  %v1028_v29 = vadd.f32 %v2154_v2, %v957_v49  ;;  %v962_v63 = vmul.f32 %v1567_v51, %v2136_v18  ;;  %v420_v5 = vpop.f32.mrf.mxu0  ;;  %v548_v52 = vpop.f32.mrf.mxu1 }
  0xd9   :  { %1187 = vst [vmem:[#allocation2 + $0x20] sm:$0xff] %v1123_v14  ;;  %v1126_v3 = vmax.f32 %v1062_v33, 0.0  ;;  %v1060_v1 = vadd.f32 %v996_v28, %v1943_v45  ;;  %v1001_v34 = vadd.f32 %v2154_v2, %v930_v0  ;;  %v928_v20 = vmul.f32 %v2136_v18, %v420_v5 }
  0xda   :  { %1219 = vst [vmem:[#allocation2 + $0x120] sm:$0xff] %v1155_v48  ;;  %v1158_v8 = vmax.f32 %v1094_v15, 0.0  ;;  %v1092_v50 = vadd.f32 %v1028_v29, %v1946_v46  ;;  %v1033_v35 = vadd.f32 %v2154_v2, %v962_v63  ;;  %v960_v53 = vmul.f32 %v2136_v18, %v548_v52  ;;  %v1536_v21 = vpop.f32.mrf.mxu0  ;;  %v1568_v26 = vpop.f32.mrf.mxu1 }
  0xdb   :  { %1190 = vst [vmem:[#allocation2 + $0x38] sm:$0xff] %v1126_v3  ;;  %v1124_v55 = vmax.f32 %v1060_v1, 0.0  ;;  %v1065_v10 = vadd.f32 %v1001_v34, %v1953_v58  ;;  %v999_v45 = vadd.f32 %v2154_v2, %v928_v20  ;;  %v931_v27 = vmul.f32 %v1536_v21, %v2136_v18 }
  0xdc   :  { %1222 = vst [vmem:[#allocation2 + $0x138] sm:$0xff] %v1158_v8  ;;  %v1156_v24 = vmax.f32 %v1092_v50, 0.0  ;;  %v1097_v39 = vadd.f32 %v1033_v35, %v1956_v59  ;;  %v1031_v46 = vadd.f32 %v2154_v2, %v960_v53  ;;  %v963_v11 = vmul.f32 %v1568_v26, %v2136_v18  ;;  %v423_v47 = vpop.f32.mrf.mxu0  ;;  %v551_v40 = vpop.f32.mrf.mxu1 }
  0xdd   :  { %1188 = vst [vmem:[#allocation2 + $0x28] sm:$0xff] %v1124_v55  ;;  %v1129_v62 = vmax.f32 %v1065_v10, 0.0  ;;  %v1063_v25 = vadd.f32 %v999_v45, %v1969_v6  ;;  %v1002_v58 = vadd.f32 %v2154_v2, %v931_v27  ;;  %v929_v49 = vmul.f32 %v2136_v18, %v423_v47 }
  0xde   :  { %1220 = vst [vmem:[#allocation2 + $0x128] sm:$0xff] %v1156_v24  ;;  %v1161_v14 = vmax.f32 %v1097_v39, 0.0  ;;  %v1095_v33 = vadd.f32 %v1031_v46, %v1972_v7  ;;  %v1034_v59 = vadd.f32 %v2154_v2, %v963_v11  ;;  %v961_v28 = vmul.f32 %v2136_v18, %v551_v40  ;;  %v1539_v0 = vpop.f32.mrf.mxu0  ;;  %v1571_v29 = vpop.f32.mrf.mxu1 }
  0xdf   :  { %1193 = vst [vmem:[#allocation2 + $0x50] sm:$0xff] %v1129_v62  ;;  %v1127_v51 = vmax.f32 %v1063_v25, 0.0  ;;  %v1066_v48 = vadd.f32 %v1002_v58, %v1977_v12  ;;  %v1000_v6 = vadd.f32 %v2154_v2, %v929_v49  ;;  %v934_v15 = vmul.f32 %v1539_v0, %v2136_v18 }
  0xe0   :  { %1225 = vst [vmem:[#allocation2 + $0x150] sm:$0xff] %v1161_v14  ;;  %v1159_v63 = vmax.f32 %v1095_v33, 0.0  ;;  %v1098_v5 = vadd.f32 %v1034_v59, %v1980_v13  ;;  %v1032_v7 = vadd.f32 %v2154_v2, %v961_v28  ;;  %v966_v3 = vmul.f32 %v1571_v29, %v2136_v18  ;;  %v436_v1 = vpop.f32.mrf.mxu0  ;;  %v564_v8 = vpop.f32.mrf.mxu1 }
  0xe1   :  { %1191 = vst [vmem:[#allocation2 + $0x40] sm:$0xff] %v1127_v51  ;;  %v1130_v34 = vmax.f32 %v1066_v48, 0.0  ;;  %v1064_v20 = vadd.f32 %v1000_v6, %v1991_v22  ;;  %v1005_v12 = vadd.f32 %v2154_v2, %v934_v15  ;;  %v932_v52 = vmul.f32 %v2136_v18, %v436_v1 }
  0xe2   :  { %1223 = vst [vmem:[#allocation2 + $0x140] sm:$0xff] %v1159_v63  ;;  %v1162_v50 = vmax.f32 %v1098_v5, 0.0  ;;  %v1096_v35 = vadd.f32 %v1032_v7, %v1994_v23  ;;  %v1037_v13 = vadd.f32 %v2154_v2, %v966_v3  ;;  %v964_v53 = vmul.f32 %v2136_v18, %v564_v8  ;;  %v1540_v21 = vpop.f32.mrf.mxu0  ;;  %v1572_v27 = vpop.f32.mrf.mxu1 }
  0xe3   :  { %1194 = vst [vmem:[#allocation2 + $0x58] sm:$0xff] %v1130_v34  ;;  %v1128_v55 = vmax.f32 %v1064_v20, 0.0  ;;  %v1069_v10 = vadd.f32 %v1005_v12, %v1997_v30  ;;  %v1003_v22 = vadd.f32 %v2154_v2, %v932_v52  ;;  %v935_v45 = vmul.f32 %v1540_v21, %v2136_v18 }
  0xe4   :  { %1226 = vst [vmem:[#allocation2 + $0x158] sm:$0xff] %v1162_v50  ;;  %v1160_v26 = vmax.f32 %v1096_v35, 0.0  ;;  %v1101_v24 = vadd.f32 %v1037_v13, %v2000_v31  ;;  %v1035_v23 = vadd.f32 %v2154_v2, %v964_v53  ;;  %v967_v39 = vmul.f32 %v1572_v27, %v2136_v18  ;;  %v439_v46 = vpop.f32.mrf.mxu0  ;;  %v567_v25 = vpop.f32.mrf.mxu1 }
  0xe5   :  { %1192 = vst [vmem:[#allocation2 + $0x48] sm:$0xff] %v1128_v55  ;;  %v1133_v11 = vmax.f32 %v1069_v10, 0.0  ;;  %v1067_v47 = vadd.f32 %v1003_v22, %v2005_v36  ;;  %v1006_v30 = vadd.f32 %v2154_v2, %v935_v45  ;;  %v933_v62 = vmul.f32 %v2136_v18, %v439_v46  ;;  %v2419_v46 = vld [vmem:[#allocation5_spill] sm:$0xff] }
  0xe6   :  { %1224 = vst [vmem:[#allocation2 + $0x148] sm:$0xff] %v1160_v26  ;;  %v1165_v58 = vmax.f32 %v1101_v24, 0.0  ;;  %v1099_v49 = vadd.f32 %v1035_v23, %v2008_v37  ;;  %v1038_v31 = vadd.f32 %v2154_v2, %v967_v39  ;;  %v965_v40 = vmul.f32 %v2136_v18, %v567_v25  ;;  %v1543_v14 = vpop.f32.mrf.mxu0  ;;  %v1575_v0 = vpop.f32.mrf.mxu1  ;;  %v2420_v25 = vld [vmem:[#allocation6_spill] sm:$0xff] }
  0xe7   :  { %1197 = vst [vmem:[#allocation2 + $0x70] sm:$0xff] %v1133_v11  ;;  %v1131_v33 = vmax.f32 %v1067_v47, 0.0  ;;  %v1070_v59 = vadd.f32 %v1006_v30, %v2017_v43  ;;  %v1004_v36 = vadd.f32 %v2154_v2, %v933_v62  ;;  %v938_v28 = vmul.f32 %v1543_v14, %v2136_v18  ;;  %v2421_v14 = vld [vmem:[#allocation7_spill] sm:$0xff] }
  0xe8   :  { %1229 = vst [vmem:[#allocation2 + $0x170] sm:$0xff] %v1165_v58  ;;  %v1163_v51 = vmax.f32 %v1099_v49, 0.0  ;;  %v1102_v48 = vadd.f32 %v1038_v31, %v2020_v44  ;;  %v1036_v37 = vadd.f32 %v2154_v2, %v965_v40  ;;  %v970_v6 = vmul.f32 %v1575_v0, %v2136_v18  ;;  %v452_v15 = vpop.f32.mrf.mxu0  ;;  %v580_v7 = vpop.f32.mrf.mxu1 }
  0xe9   :  { %1195 = vst [vmem:[#allocation2 + $0x60] sm:$0xff] %v1131_v33  ;;  %v1134_v29 = vmax.f32 %v1070_v59, 0.0  ;;  %v1068_v63 = vadd.f32 %v1004_v36, %v2031_v56  ;;  %v1009_v43 = vadd.f32 %v2154_v2, %v938_v28  ;;  %v936_v5 = vmul.f32 %v2136_v18, %v452_v15 }
  0xea   :  { %1227 = vst [vmem:[#allocation2 + $0x160] sm:$0xff] %v1163_v51  ;;  %v1166_v3 = vmax.f32 %v1102_v48, 0.0  ;;  %v1100_v1 = vadd.f32 %v1036_v37, %v2034_v57  ;;  %v1041_v44 = vadd.f32 %v2154_v2, %v970_v6  ;;  %v968_v34 = vmul.f32 %v2136_v18, %v580_v7  ;;  %v1544_v20 = vpop.f32.mrf.mxu0  ;;  %v1576_v50 = vpop.f32.mrf.mxu1  ;;  %v2422_v51 = vld [vmem:[#allocation8_spill] sm:$0xff] }
  0xeb   :  { %1198 = vst [vmem:[#allocation2 + $0x78] sm:$0xff] %v1134_v29  ;;  %v1132_v12 = vmax.f32 %v1068_v63, 0.0  ;;  %v1073_v52 = vadd.f32 %v1009_v43, %v2041_v16  ;;  %v1007_v56 = vadd.f32 %v2154_v2, %v936_v5  ;;  %v939_v8 = vmul.f32 %v1544_v20, %v2136_v18  ;;  %v2423_v63 = vld [vmem:[#allocation9_spill] sm:$0xff] }
  0xec   :  { %1230 = vst [vmem:[#allocation2 + $0x178] sm:$0xff] %v1166_v3  ;;  %v1164_v35 = vmax.f32 %v1100_v1, 0.0  ;;  %v1105_v13 = vadd.f32 %v1041_v44, %v2044_v17  ;;  %v1039_v57 = vadd.f32 %v2154_v2, %v968_v34  ;;  %v971_v53 = vmul.f32 %v1576_v50, %v2136_v18  ;;  %v455_v21 = vpop.f32.mrf.mxu0  ;;  %v583_v45 = vpop.f32.mrf.mxu1  ;;  %v2424_v44 = vld [vmem:[#allocation10_spill] sm:$0xff] }
  0xed   :  { %1196 = vst [vmem:[#allocation2 + $0x68] sm:$0xff] %v1132_v12  ;;  %v1137_v55 = vmax.f32 %v1073_v52, 0.0  ;;  %v1071_v10 = vadd.f32 %v1007_v56, %v2057_v41  ;;  %v1010_v16 = vadd.f32 %v2154_v2, %v939_v8  ;;  %v937_v22 = vmul.f32 %v2136_v18, %v455_v21  ;;  %v2425_v8 = vld [vmem:[#allocation11_spill] sm:$0xff]  ;;  %v2426_v21 = vld [vmem:[#allocation12_spill] sm:$0xff] }
  0xee   :  { %1228 = vst [vmem:[#allocation2 + $0x168] sm:$0xff] %v1164_v35  ;;  %v1169_v27 = vmax.f32 %v1105_v13, 0.0  ;;  %v1103_v26 = vadd.f32 %v1039_v57, %v2060_v42  ;;  %v1042_v17 = vadd.f32 %v2154_v2, %v971_v53  ;;  %v969_v24 = vmul.f32 %v2136_v18, %v583_v45  ;;  %v1547_v23 = vpop.f32.mrf.mxu0  ;;  %v1579_v30 = vpop.f32.mrf.mxu1 }
  0xef   :  { %1201 = vst [vmem:[#allocation2 + $0x90] sm:$0xff] %v1137_v55  ;;  %v1135_v39 = vmax.f32 %v1071_v10, 0.0  ;;  %v1074_v11 = vadd.f32 %v1010_v16, %v2419_v46  ;;  %v1008_v41 = vadd.f32 %v2154_v2, %v937_v22  ;;  %v942_v47 = vmul.f32 %v1547_v23, %v2136_v18  ;;  %v2428_v46 = vld [vmem:[#allocation14_spill] sm:$0xff] }
  0xf0   :  { %1233 = vst [vmem:[#allocation2 + $0x190] sm:$0xff] %v1169_v27  ;;  %v1167_v62 = vmax.f32 %v1103_v26, 0.0  ;;  %v1106_v58 = vadd.f32 %v1042_v17, %v2420_v25  ;;  %v1040_v42 = vadd.f32 %v2154_v2, %v969_v24  ;;  %v974_v49 = vmul.f32 %v1579_v30, %v2136_v18  ;;  %v468_v31 = vpop.f32.mrf.mxu0  ;;  %v596_v28 = vpop.f32.mrf.mxu1  ;;  %v2427_v27 = vld [vmem:[#allocation13_spill] sm:$0xff]  ;;  %v2429_v25 = vld [vmem:[#allocation15_spill] sm:$0xff] }
  0xf1   :  { %1199 = vst [vmem:[#allocation2 + $0x80] sm:$0xff] %v1135_v39  ;;  %v1138_v40 = vmax.f32 %v1074_v11, 0.0  ;;  %v1072_v33 = vadd.f32 %v1008_v41, %v2421_v14  ;;  %v1013_v59 = vadd.f32 %v2154_v2, %v942_v47  ;;  %v940_v36 = vmul.f32 %v2136_v18, %v468_v31  ;;  %v2430_v14 = vld [vmem:[#allocation16_spill] sm:$0xff] }
  0xf2   :  { %1231 = vst [vmem:[#allocation2 + $0x180] sm:$0xff] %v1167_v62  ;;  %v1170_v0 = vmax.f32 %v1106_v58, 0.0  ;;  %v1104_v48 = vadd.f32 %v1040_v42, %v2422_v51  ;;  %v1045_v37 = vadd.f32 %v2154_v2, %v974_v49  ;;  %v972_v6 = vmul.f32 %v2136_v18, %v596_v28  ;;  %v1548_v15 = vpop.f32.mrf.mxu0  ;;  %v1580_v3 = vpop.f32.mrf.mxu1 }
  0xf3   :  { %1202 = vst [vmem:[#allocation2 + $0x98] sm:$0xff] %v1138_v40  ;;  %v1136_v29 = vmax.f32 %v1072_v33, 0.0  ;;  %v1077_v43 = vadd.f32 %v1013_v59, %v2423_v63  ;;  %v1011_v5 = vadd.f32 %v2154_v2, %v940_v36  ;;  %v943_v7 = vmul.f32 %v1548_v15, %v2136_v18 }
  0xf4   :  { %1234 = vst [vmem:[#allocation2 + $0x198] sm:$0xff] %v1170_v0  ;;  %v1168_v1 = vmax.f32 %v1104_v48, 0.0  ;;  %v1109_v34 = vadd.f32 %v1045_v37, %v2424_v44  ;;  %v1043_v20 = vadd.f32 %v2154_v2, %v972_v6  ;;  %v975_v12 = vmul.f32 %v1580_v3, %v2136_v18  ;;  %v471_v52 = vpop.f32.mrf.mxu0  ;;  %v599_v57 = vpop.f32.mrf.mxu1  ;;  %v2431_v3 = vld [vmem:[#allocation17_spill] sm:$0xff] }
  0xf5   :  { %1200 = vst [vmem:[#allocation2 + $0x88] sm:$0xff] %v1136_v29  ;;  %v1141_v56 = vmax.f32 %v1077_v43, 0.0  ;;  %v1075_v50 = vadd.f32 %v1011_v5, %v2425_v8  ;;  %v1014_v35 = vadd.f32 %v2154_v2, %v943_v7  ;;  %v941_v13 = vmul.f32 %v2136_v18, %v471_v52 }
  0xf6   :  { %1232 = vst [vmem:[#allocation2 + $0x188] sm:$0xff] %v1168_v1  ;;  %v1173_v53 = vmax.f32 %v1109_v34, 0.0  ;;  %v1107_v55 = vadd.f32 %v1043_v20, %v2426_v21  ;;  %v1046_v10 = vadd.f32 %v2154_v2, %v975_v12  ;;  %v973_v16 = vmul.f32 %v2136_v18, %v599_v57  ;;  %v1551_v22 = vpop.f32.mrf.mxu0  ;;  %v1583_v23 = vpop.f32.mrf.mxu1  ;;  %v2432_v12 = vld [vmem:[#allocation18_spill] sm:$0xff] }
  0xf7   :  { %1205 = vst [vmem:[#allocation2 + $0xb0] sm:$0xff] %v1141_v56  ;;  %v1139_v45 = vmax.f32 %v1075_v50, 0.0  ;;  %v1078_v26 = vadd.f32 %v1014_v35, %v2427_v27  ;;  %v1012_v17 = vadd.f32 %v2154_v2, %v941_v13  ;;  %v946_v24 = vmul.f32 %v1551_v22, %v2136_v18  ;;  %v2433_v35 = vld [vmem:[#allocation19_spill] sm:$0xff] }
  0xf8   :  { %1237 = vst [vmem:[#allocation2 + $0x1b0] sm:$0xff] %v1173_v53  ;;  %v1171_v39 = vmax.f32 %v1107_v55, 0.0  ;;  %v1110_v11 = vadd.f32 %v1046_v10, %v2428_v46  ;;  %v1044_v41 = vadd.f32 %v2154_v2, %v973_v16  ;;  %v978_v47 = vmul.f32 %v1583_v23, %v2136_v18  ;;  %v484_v30 = vpop.f32.mrf.mxu0  ;;  %v612_v31 = vpop.f32.mrf.mxu1 }
  0xf9   :  { %1203 = vst [vmem:[#allocation2 + $0xa0] sm:$0xff] %v1139_v45  ;;  %v1142_v62 = vmax.f32 %v1078_v26, 0.0  ;;  %v1076_v58 = vadd.f32 %v1012_v17, %v2429_v25  ;;  %v1017_v42 = vadd.f32 %v2154_v2, %v946_v24  ;;  %v944_v49 = vmul.f32 %v2136_v18, %v484_v30  ;;  %v2434_v26 = vld [vmem:[#allocation20_spill] sm:$0xff] }
  0xfa   :  { %1235 = vst [vmem:[#allocation2 + $0x1a0] sm:$0xff] %v1171_v39  ;;  %v1174_v40 = vmax.f32 %v1110_v11, 0.0  ;;  %v1108_v33 = vadd.f32 %v1044_v41, %v2430_v14  ;;  %v1049_v59 = vadd.f32 %v2154_v2, %v978_v47  ;;  %v976_v36 = vmul.f32 %v2136_v18, %v612_v31  ;;  %v1552_v28 = vpop.f32.mrf.mxu0  ;;  %v1584_v6 = vpop.f32.mrf.mxu1 }
  0xfb   :  { %1206 = vst [vmem:[#allocation2 + $0xb8] sm:$0xff] %v1142_v62  ;;  %v1140_v0 = vmax.f32 %v1076_v58, 0.0  ;;  %v1081_v51 = vadd.f32 %v1017_v42, %v2129_v4  ;;  %v1015_v48 = vadd.f32 %v2154_v2, %v944_v49  ;;  %v947_v37 = vmul.f32 %v1552_v28, %v2136_v18  ;;  %v2435_v62 = vld [vmem:[#allocation21_spill] sm:$0xff] }
  0xfc   :  { %1238 = vst [vmem:[#allocation2 + $0x1b8] sm:$0xff] %v1174_v40  ;;  %v1172_v15 = vmax.f32 %v1108_v33, 0.0  ;;  %v1113_v29 = vadd.f32 %v1049_v59, %v2139_v19  ;;  %v1047_v63 = vadd.f32 %v2154_v2, %v976_v36  ;;  %v979_v43 = vmul.f32 %v1584_v6, %v2136_v18  ;;  %v487_v5 = vpop.f32.mrf.mxu0  ;;  %v615_v34 = vpop.f32.mrf.mxu1 }
  0xfd   :  { %1204 = vst [vmem:[#allocation2 + $0xa8] sm:$0xff] %v1140_v0  ;;  %v1145_v7 = vmax.f32 %v1081_v51, 0.0  ;;  %v1079_v1 = vadd.f32 %v1015_v48, %v2431_v3  ;;  %v1018_v4 = vadd.f32 %v2154_v2, %v947_v37  ;;  %v945_v44 = vmul.f32 %v2136_v18, %v487_v5  ;;  %v2437_v5 = vld [vmem:[#allocation23_spill] sm:$0xff] }
  0xfe   :  { %1236 = vst [vmem:[#allocation2 + $0x1a8] sm:$0xff] %v1172_v15  ;;  %v1177_v20 = vmax.f32 %v1113_v29, 0.0  ;;  %v1111_v52 = vadd.f32 %v1047_v63, %v2432_v12  ;;  %v1050_v19 = vadd.f32 %v2154_v2, %v979_v43  ;;  %v977_v56 = vmul.f32 %v2136_v18, %v615_v34  ;;  %v1555_v8 = vpop.f32.mrf.mxu0  ;;  %v1587_v21 = vpop.f32.mrf.mxu1  ;;  %v2436_v29 = vld [vmem:[#allocation22_spill] sm:$0xff] }
  0xff   :  { %1209 = vst [vmem:[#allocation2 + $0xd0] sm:$0xff] %v1145_v7  ;;  %v1143_v50 = vmax.f32 %v1079_v1, 0.0  ;;  %v1082_v13 = vadd.f32 %v1018_v4, %v2433_v35  ;;  %v1016_v57 = vadd.f32 %v2154_v2, %v945_v44  ;;  %v950_v53 = vmul.f32 %v1555_v8, %v2136_v18  ;;  %v2438_v1 = vld [vmem:[#allocation24_spill] sm:$0xff] }
 0x100   :  { %1241 = vst [vmem:[#allocation2 + $0x1d0] sm:$0xff] %v1177_v20  ;;  %v1175_v55 = vmax.f32 %v1111_v52, 0.0  ;;  %v1114_v10 = vadd.f32 %v1050_v19, %v2160_v9  ;;  %v1048_v16 = vadd.f32 %v2154_v2, %v977_v56  ;;  %v982_v22 = vmul.f32 %v1587_v21, %v2136_v18  ;;  %v500_v45 = vpop.f32.mrf.mxu0  ;;  %v628_v39 = vpop.f32.mrf.mxu1 }
 0x101   :  { %1207 = vst [vmem:[#allocation2 + $0xc0] sm:$0xff] %v1143_v50  ;;  %v1146_v27 = vmax.f32 %v1082_v13, 0.0  ;;  %v1080_v17 = vadd.f32 %v1016_v57, %v2434_v26  ;;  %v1021_v24 = vadd.f32 %v2154_v2, %v950_v53  ;;  %v948_v23 = vmul.f32 %v2136_v18, %v500_v45 }
 0x102   :  { %1239 = vst [vmem:[#allocation2 + $0x1c0] sm:$0xff] %v1175_v55  ;;  %v1178_v46 = vmax.f32 %v1114_v10, 0.0  ;;  %v1112_v11 = vadd.f32 %v1048_v16, %v2169_v61  ;;  %v1053_v9 = vadd.f32 %v2154_v2, %v982_v22  ;;  %v980_v41 = vmul.f32 %v2136_v18, %v628_v39  ;;  %v1556_v47 = vpop.f32.mrf.mxu0  ;;  %v1588_v49 = vpop.f32.mrf.mxu1 }
 0x103   :  { %1210 = vst [vmem:[#allocation2 + $0xd8] sm:$0xff] %v1146_v27  ;;  %v1144_v30 = vmax.f32 %v1080_v17, 0.0  ;;  %v1085_v25 = vadd.f32 %v1021_v24, %v2435_v62  ;;  %v1019_v58 = vadd.f32 %v2154_v2, %v948_v23  ;;  %v951_v42 = vmul.f32 %v1556_v47, %v2136_v18 }
 0x104   :  { %1242 = vst [vmem:[#allocation2 + $0x1d8] sm:$0xff] %v1178_v46  ;;  %v1176_v31 = vmax.f32 %v1112_v11, 0.0  ;;  %v1117_v40 = vadd.f32 %v1053_v9, %v2177_v54  ;;  %v1051_v61 = vadd.f32 %v2154_v2, %v980_v41  ;;  %v983_v14 = vmul.f32 %v1588_v49, %v2136_v18  ;;  %v503_v33 = vpop.f32.mrf.mxu0  ;;  %v631_v51 = vpop.f32.mrf.mxu1 }
 0x105   :  { %1208 = vst [vmem:[#allocation2 + $0xc8] sm:$0xff] %v1144_v30  ;;  %v1149_v59 = vmax.f32 %v1085_v25, 0.0  ;;  %v1083_v36 = vadd.f32 %v1019_v58, %v2183_v38  ;;  %v1022_v28 = vadd.f32 %v2154_v2, %v951_v42  ;;  %v949_v0 = vmul.f32 %v2136_v18, %v503_v33 }
 0x106   :  { %1240 = vst [vmem:[#allocation2 + $0x1c8] sm:$0xff] %v1176_v31  ;;  %v1181_v48 = vmax.f32 %v1117_v40, 0.0  ;;  %v1115_v37 = vadd.f32 %v1051_v61, %v2186_v32  ;;  %v1054_v54 = vadd.f32 %v2154_v2, %v983_v14  ;;  %v981_v6 = vmul.f32 %v2136_v18, %v631_v51 }
 0x107   :  { %1213 = vst [vmem:[#allocation2 + $0xf0] sm:$0xff] %v1149_v59  ;;  %v1147_v15 = vmax.f32 %v1083_v36, 0.0  ;;  %v1086_v63 = vadd.f32 %v1022_v28, %v2436_v29  ;;  %v1020_v43 = vadd.f32 %v2154_v2, %v949_v0 }
 0x108   :  { %1245 = vst [vmem:[#allocation2 + $0x1f0] sm:$0xff] %v1181_v48  ;;  %v1179_v38 = vmax.f32 %v1115_v37, 0.0  ;;  %v1118_v7 = vadd.f32 %v1054_v54, %v2437_v5  ;;  %v1052_v3 = vadd.f32 %v2154_v2, %v981_v6 }
 0x109   :  { %1211 = vst [vmem:[#allocation2 + $0xe0] sm:$0xff] %v1147_v15  ;;  %v1150_v32 = vmax.f32 %v1086_v63, 0.0  ;;  %v1084_v4 = vadd.f32 %v1020_v43, %v2438_v1 }
 0x10a   :  { %1243 = vst [vmem:[#allocation2 + $0x1e0] sm:$0xff] %v1179_v38  ;;  %v1182_v18 = vmax.f32 %v1118_v7, 0.0  ;;  %v1116_v44 = vadd.f32 %v1052_v3, %v2206_v60 }
 0x10b   :  { %1214 = vst [vmem:[#allocation2 + $0xf8] sm:$0xff] %v1150_v32  ;;  %v1148_v34 = vmax.f32 %v1084_v4, 0.0 }
 0x10c   :  { %1246 = vst [vmem:[#allocation2 + $0x1f8] sm:$0xff] %v1182_v18  ;;  %v1180_v20 = vmax.f32 %v1116_v44, 0.0 }
 0x10d   :  { %1212 = vst [vmem:[#allocation2 + $0xe8] sm:$0xff] %v1148_v34 }
 0x10e   :  { %1244 = vst [vmem:[#allocation2 + $0x1e8] sm:$0xff] %v1180_v20 }
 0x10f   :  { %1639 = shalt.err (!%p1636_p4)
}
 0x110   :  { %s1651_s3 = smov 128   ;;  %s1652_s11 = smov 8  }
 0x111   :  { %1258 = dma.vmem_to_hbm [thread:$0]  %s1253_s9, 8192, %s2398_s7, [#allocation3], %s1651_s3, %s1651_s3, %s1652_s11  }
 0x112   :  { %1648 = dma.done.wait [#allocation3], 8192  }
 0x113   :  { %1649 = vsyncadd [#allocation3], 4294959104 }
 0x114   :  { %1262 = vsyncpa [#allocation3], 1 }

// kernel: bottleneck_forward.5
= control target key start
LH: loop header
LB: loop body
LE: loop exit
PB: predicated region body
PF: predicated region fallthrough
CT: control target
= control target key end

     0   :  { %s7791_s18 = smov 0   ;;  %s10500_s0 = inlined_call_operand.vmem [shape: bf16[512,128], index: 0, kind: input, shape index: {}]   ;;  %s10501_s1 = inlined_call_operand.vmem [shape: f32[1,128], index: 1, kind: input, shape index: {}]   ;;  %s10502_s2 = inlined_call_operand.vmem [shape: f32[1,128], index: 2, kind: input, shape index: {}]   ;;  %s10503_s3 = inlined_call_operand.vmem [shape: bf16[9,128,128], index: 3, kind: input, shape index: {}]   ;;  %s10504_s4 = inlined_call_operand.vmem [shape: bf16[512,128], index: 4, kind: output, shape index: {0}]   ;;  %s10505_s5 = inlined_call_operand.vmem [shape: f32[2,2,128], index: 5, kind: output, shape index: {1}]  }
   0x1 LB: > { %s7797_s19 = sadd.s32 4294967295, %s7758_s18   ;;  %p6223_p0 = scmp.ge.s32.totalorder %s7758_s18, 1  ;;  %s7758_s18 = sphi %s7791_s18, %s16_s18  }
   0x2   : > { %p191_p1 = scmp.lt.s32.totalorder %s7758_s18, 3 }
   0x4   : > { %p192_p2 = pnand %p6223_p0, %p191_p1 }
   0x6   : > { %195 = sbr.rel (%p192_p2) target bundleno = 683 (0x2ab), region = 36 }
   0xb   : > { %v7600_v0 = vld [vmem:[%s10503_s3 + $0x78] sm:$0xff]   ;;  %v7601_v1 = vld [vmem:[%s10503_s3 + $0x70] sm:$0xff]   ;;  %v7760_v2 = vmov 0   ;;  %s6224_s24 = sshll.u32 %s7797_s19, 5  ;;  %v7602_v3 = vld [vmem:[%s10503_s3 + $0x68] sm:$0xff]   ;;  %vm422_vm2 = vcmask 1040384  }
   0xc   : > { %414 = vst [vmem:[#allocation2] sm:$0xf] %v7760_v2  ;;  %415 = vst [vmem:[#allocation2 + $0x4] sm:$0xf] %v7760_v2  ;;  %7143 = vmatprep.subr.bf16.mxu0 %v7600_v0  ;;  %7575 = vmatprep.subr.bf16.mxu1 %v7600_v0  ;;  %p224_p3 = scmp.lt.s32.totalorder %s6224_s24, 63  ;;  %v7603_v4 = vld [vmem:[%s10503_s3 + $0x60] sm:$0xff]  }
   0xd   : > { %416 = vst [vmem:[#allocation2 + $0x8] sm:$0x1] %v7760_v2  ;;  %418 = vst [vmem:[#allocation2 + $0xcc] sm:$0xf] %v7760_v2  ;;  %7144 = vmatpush3.bf16.msra.mxu0 %v7600_v0  ;;  %7583 = vmatpush3.bf16.msra.mxu1 %v7600_v0  ;;  %vm1119_vm0 = vsmask.f32 3328 }
   0xe   : > { %419 = vst [vmem:[#allocation2 + $0xd0] sm:$0xf] %v7760_v2  ;;  %420 = vst [vmem:[#allocation2 + $0xd4] sm:$0x1] %v7760_v2  ;;  %7145 = vmatprep.subr.bf16.mxu0 %v7601_v1  ;;  %7576 = vmatprep.subr.bf16.mxu1 %v7601_v1  ;;  %s10749_s24 = smov (!%p224_p3, %s6224_s24), 63  ;;  %v7604_v21 = vld [vmem:[%s10503_s3 + $0x58] sm:$0xff]  }
   0xf   : > { %s6225_s27 = sshll.u32 %s10749_s24, 2  ;;  %vm1120_vm1 = vsmask.f32 7440  ;;  %v7829_v19 = vld [vmem:[%s10501_s1] ss:$0 sm:$0xff]  ;;  %v10525_v29 = vmov 0 }
  0x10   : > { %s7822_s7 = scalar_lea.vmem %s10500_s0, %s6225_s27  ;;  %v7834_v20 = vld [vmem:[%s10502_s2] ss:$0 sm:$0xff]  ;;  %vm7841_vm3 = vmor %vm1119_vm0, %vm1120_vm1  ;;  %vm423_vm4 = vsmask.f32 256  ;;  %v425_v30 = vld [vmem:[#allocation2 + $0xc] sm:$0x1]  ;;  %s10362_s21 = scalar_lea.vmem %s10504_s4, %s6225_s27 }
  0x11   : > { %7146 = vmatpush3.bf16.msra.mxu0 %v7601_v1  ;;  %7584 = vmatpush3.bf16.msra.mxu1 %v7601_v1  ;;  %v6754_v13 = vld [vmem:[%s7822_s7] sm:$0xff]   ;;  %v6903_v14 = vld [vmem:[%s7822_s7 + $0x38] sm:$0xff]   ;;  %vm7849_vm5 = vmand %vm422_vm2, %vm423_vm4  ;;  %vm473_vm6 = vsmask.f32 7938  ;;  %vm941_vm7 = vcmask 1043456   ;;  %v10528_v35 = vmov 0 }
  0x12   : > { %7147 = vmatprep.subr.bf16.mxu0 %v7602_v3  ;;  %7577 = vmatprep.subr.bf16.mxu1 %v7602_v3  ;;  %v6755_v17 = vunpack.c.l.bf16 %v6754_v13  ;;  %v6756_v18 = vunpack.c.h.bf16 %v6754_v13  ;;  %v10526_v29 = vsel %vm7849_vm5, 4294967295, %v10525_v29  ;;  %v475_v31 = vld [vmem:[#allocation2 + $0x14] sm:$0x1]  ;;  %v426_v34 = vsel %vm7849_vm5, 0, %v425_v30  ;;  %vm7860_vm8 = vmand %vm422_vm2, %vm473_vm6  ;;  %v446_v37 = vld [vmem:[#allocation2 + $0x60] sm:$0x1] }
  0x13   : > { %v1055_v5 = vld [vmem:[#allocation2] sm:$0xf]  ;;  %v1056_v6 = vld [vmem:[#allocation2 + $0x4] sm:$0xf]  ;;  %10527 = vst [vmem:[#allocation3_spill] sm:$0xff] %v10526_v29  ;;  %v7605_v32 = vld [vmem:[%s10503_s3 + $0x50] sm:$0xff]   ;;  %v6783_v36 = vunpack.c.l.bf16 %v6903_v14  ;;  %v6784_v44 = vunpack.c.h.bf16 %v6903_v14 }
  0x14   : > { %v1103_v7 = vld [vmem:[#allocation2 + $0x8] sm:$0x1]  ;;  %v1123_v8 = vshrl.u32 %v1055_v5, 16  ;;  %v1126_v9 = vshll.u32 %v1055_v5, 16  ;;  %v1132_v10 = vshll.u32 %v1056_v6, 16  ;;  %v1136_v11 = vshrl.u32 %v1056_v6, 16  ;;  %vm7906_vm11 = vmand %vm941_vm7, %vm473_vm6 }
  0x15   : > { %v1142_v12 = vshll.u32 %v1103_v7, 16  ;;  %7148 = vmatpush3.bf16.msra.mxu0 %v7602_v3  ;;  %7585 = vmatpush3.bf16.msra.mxu1 %v7602_v3  ;;  %v311_v27 = vmul.f32 %v6755_v17, %v7829_v19  ;;  %v312_v28 = vmul.f32 %v6756_v18, %v7829_v19  ;;  %v10529_v35 = vsel %vm7860_vm8, 4294967295, %v10528_v35  ;;  %427 = vst [vmem:[#allocation2 + $0xc] sm:$0x1] %v426_v34  ;;  %v496_v42 = vld [vmem:[#allocation2 + $0x68] sm:$0x1] }
  0x16   : > { %v1125_v15 = vrot.slane %v1123_v8, 4  ;;  %v1128_v16 = vrot.slane %v1126_v9, 5  ;;  %7149 = vmatprep.subr.bf16.mxu0 %v7603_v4  ;;  %7578 = vmatprep.subr.bf16.mxu1 %v7603_v4  ;;  %v1134_v23 = vrot.slane %v1132_v10, 5  ;;  %v1138_v24 = vrot.slane %v1136_v11, 4  ;;  %10530 = vst [vmem:[#allocation4_spill] sm:$0xff] %v10529_v35  ;;  %v6904_v51 = vld [vmem:[%s7822_s7 + $0x40] sm:$0xff]  }
  0x17   : > { %v1144_v25 = vrot.slane %v1142_v12, 5  ;;  %vm619_vm9 = vsmask.f32 4368  ;;  %v350_v39 = vadd.f32 %v7834_v20, %v311_v27  ;;  %v351_v40 = vadd.f32 %v7834_v20, %v312_v28  ;;  %v449_v56 = vld [vmem:[#allocation2 + $0x6c] sm:$0x1]  ;;  %v7607_v12 = vld [vmem:[%s10503_s3 + $0x40] sm:$0xff]  }
  0x18   : > { %v1129_v26 = vor.u32 %v1128_v16, %v1125_v15  ;;  %v1139_v33 = vor.u32 %v1138_v24, %v1134_v23  ;;  %v476_v41 = vsel %vm7860_vm8, 0, %v475_v31  ;;  %v325_v45 = vmul.f32 %v6783_v36, %v7829_v19  ;;  %v499_v61 = vld [vmem:[#allocation2 + $0x74] sm:$0x1]  ;;  %v7606_v62 = vld [vmem:[%s10503_s3 + $0x48] sm:$0xff]   ;;  %vm7897_vm10 = vmor %vm423_vm4, %vm619_vm9  ;;  %p235_p4 = scmp.lt.s32.totalorder %s7797_s19, 1 }
  0x19   : > { %7150 = vmatpush3.bf16.msra.mxu0 %v7603_v4  ;;  %7586 = vmatpush3.bf16.msra.mxu1 %v7603_v4  ;;  %477 = vst [vmem:[#allocation2 + $0x14] sm:$0x1] %v476_v41  ;;  %v447_v46 = vsel %vm7849_vm5, 0, %v446_v37  ;;  %v382_v48 = vmax.f32 %v350_v39, 0.0  ;;  %v383_v49 = vmax.f32 %v351_v40, 0.0  ;;  %v497_v50 = vsel %vm7860_vm8, 0, %v496_v42 }
  0x1a   : > { %v1130_v38 = vrot.slane %v1129_v26, 4  ;;  %7151 = vmatprep.subr.bf16.mxu0 %v7604_v21  ;;  %7579 = vmatprep.subr.bf16.mxu1 %v7604_v21  ;;  %v1140_v43 = vrot.slane %v1139_v33, 4  ;;  %448 = vst [vmem:[#allocation2 + $0x60] sm:$0x1] %v447_v46  ;;  %v326_v53 = vmul.f32 %v6784_v44, %v7829_v19  ;;  %v364_v54 = vadd.f32 %v7834_v20, %v325_v45  ;;  %v7888_v3 = vld [vmem:[%s7822_s7 + $0x8] sm:$0xff]   ;;  %v7914_v37 = vld [vmem:[%s10503_s3 + $0x38] sm:$0xff]  }
  0x1b   : > { %498 = vst [vmem:[#allocation2 + $0x68] sm:$0x1] %v497_v50  ;;  %v6787_v55 = vunpack.c.l.bf16 %v6904_v51  ;;  %v6689_v58 = vpack.c.bf16 %v382_v48, %v382_v48  ;;  %v6690_v59 = vpack.c.bf16 %v383_v49, %v383_v49  ;;  %v6788_v60 = vunpack.c.h.bf16 %v6904_v51  ;;  %v428_v39 = vld [vmem:[#allocation2 + $0x18] sm:$0x1]  ;;  %s10751_s19 = smov (!%p235_p4, %s7797_s19), 1 }
  0x1c   : > { %v1135_v47 = vsel %vm7841_vm3, %v1130_v38, %v1134_v23  ;;  %v1145_v52 = vsel %vm7841_vm3, %v1140_v43, %v1144_v25  ;;  %v365_v63 = vadd.f32 %v7834_v20, %v326_v53  ;;  %v396_v0 = vmax.f32 %v364_v54, 0.0  ;;  %v7925_v44 = vld [vmem:[%s10503_s3 + $0xb8] sm:$0xff]   ;;  %s6228_s24 = sshll.u32 %s10751_s19, 1 }
  0x1d   : > { %7152 = vmatpush3.bf16.msra.mxu0 %v7604_v21  ;;  %7587 = vmatpush3.bf16.msra.mxu1 %v7604_v21  ;;  %v6279_v57 = vcombine.low %v1135_v47, %v1145_v52  ;;  %v327_v1 = vmul.f32 %v6787_v55, %v7829_v19  ;;  %v450_v2 = vsel %vm7849_vm5, 0, %v449_v56  ;;  %v622_v4 = vshrl.u32 %v6689_v58, 16  ;;  %v943_v21 = vld [vmem:[#allocation2 + $0xc] sm:$0xf]  ;;  %s238_s23 = scalar_lea.vmem %s10505_s5, %s6228_s24 }
  0x1e   : > { %7153 = vmatprep.subr.bf16.mxu0 %v7605_v32  ;;  %7580 = vmatprep.subr.bf16.mxu1 %v7605_v32  ;;  %v625_v5 = vshll.u32 %v6689_v58, 16  ;;  %v630_v6 = vshrl.u32 %v6690_v59, 16  ;;  %v633_v7 = vshll.u32 %v6690_v59, 16  ;;  %451 = vst [vmem:[#allocation2 + $0x6c] sm:$0x1] %v450_v2  ;;  %v397_v8 = vmax.f32 %v365_v63, 0.0 }
  0x1f   : > { %7159 = vmatprep.mubr.bf16.mxu0 %v6279_v57  ;;  %v6703_v9 = vpack.c.bf16 %v396_v0, %v396_v0  ;;  %v328_v10 = vmul.f32 %v6788_v60, %v7829_v19  ;;  %v366_v11 = vadd.f32 %v7834_v20, %v327_v1  ;;  %v10531_v13 = vmov 0  ;;  %v478_v59 = vld [vmem:[#allocation2 + $0x20] sm:$0x1]  ;;  %v7934_v60 = vld [vmem:[%s7822_s7 + $0x10] sm:$0xff]  }
  0x20   : > { %v10532_v13 = vsel %vm7897_vm10, 4294967295, %v10531_v13  ;;  %v624_v14 = vrot.slane %v622_v4, 7  ;;  %v632_v15 = vrot.slane %v630_v6, 7  ;;  %v500_v16 = vsel %vm7860_vm8, 0, %v499_v61  ;;  %v947_v23 = vld [vmem:[#allocation2 + $0x14] sm:$0x1] }
  0x21   : > { %7154 = vmatpush3.bf16.msra.mxu0 %v7605_v32  ;;  %7588 = vmatpush3.bf16.msra.mxu1 %v7605_v32  ;;  %10533 = vst [vmem:[#allocation5_spill] sm:$0xff] %v10532_v13  ;;  %v6759_v17 = vunpack.c.l.bf16 %v7888_v3  ;;  %v10534_v18 = vmov 0  ;;  %v6704_v24 = vpack.c.bf16 %v397_v8, %v397_v8  ;;  %v741_v25 = vshrl.u32 %v6703_v9, 16  ;;  %501 = vst [vmem:[#allocation2 + $0x74] sm:$0x1] %v500_v16 }
  0x22   : > { %7155 = vmatprep.subr.bf16.mxu0 %v7606_v62  ;;  %7581 = vmatprep.subr.bf16.mxu1 %v7606_v62  ;;  %v10535_v18 = vsel %vm7906_vm11, 4294967295, %v10534_v18  ;;  %v744_v26 = vshll.u32 %v6703_v9, 16  ;;  %v367_v27 = vadd.f32 %v7834_v20, %v328_v10  ;;  %v627_v28 = vor.u32 %v625_v5, %v624_v14  ;;  %v992_v43 = vld [vmem:[#allocation2 + $0x60] sm:$0xf]  ;;  %v996_v49 = vld [vmem:[#allocation2 + $0x68] sm:$0x1] }
  0x23   : > { %10536 = vst [vmem:[#allocation6_spill] sm:$0xff] %v10535_v18  ;;  %v628_v30 = vrot.slane %v624_v14, 4  ;;  %v635_v31 = vor.u32 %v633_v7, %v632_v15  ;;  %v637_v32 = vrot.slane %v632_v15, 4  ;;  %v743_v33 = vrot.slane %v741_v25, 7 }
  0x24   : > { %v749_v34 = vshrl.u32 %v6704_v24, 16  ;;  %v752_v36 = vshll.u32 %v6704_v24, 16  ;;  %v398_v38 = vmax.f32 %v366_v11, 0.0  ;;  %v944_v41 = vsel %vm7906_vm11, %v627_v28, %v943_v21  ;;  %v7949_v11 = vld [vmem:[%s7822_s7 + $0x48] sm:$0xff]  }
  0x25   : > { %7156 = vmatpush3.bf16.msra.mxu0 %v7606_v62  ;;  %7589 = vmatpush3.bf16.msra.mxu1 %v7606_v62  ;;  %v636_v40 = vsel %vm7897_vm10, %v628_v30, %v635_v31  ;;  %v948_v42 = vsel %vm7849_vm5, %v637_v32, %v947_v23  ;;  %v399_v45 = vmax.f32 %v367_v27, 0.0  ;;  %945 = vst [vmem:[#allocation2 + $0xc] sm:$0xf] %v944_v41  ;;  %v747_v47 = vrot.slane %v743_v33, 4  ;;  %v999_v28 = vld [vmem:[#allocation2 + $0x6c] sm:$0xf] }
  0x26   : > { %7157 = vmatprep.subr.bf16.mxu0 %v7607_v12  ;;  %7582 = vmatprep.subr.bf16.mxu1 %v7607_v12  ;;  %946 = vst [vmem:[#allocation2 + $0x10] sm:$0xf] %v636_v40  ;;  %949 = vst [vmem:[#allocation2 + $0x14] sm:$0x1] %v948_v42  ;;  %v746_v46 = vor.u32 %v744_v26, %v743_v33  ;;  %v751_v48 = vrot.slane %v749_v34, 7  ;;  %v6705_v50 = vpack.c.bf16 %v398_v38, %v398_v38  ;;  %vm2149_vm12 = vcmask 1042432  }
  0x27   : > { %v6706_v51 = vpack.c.bf16 %v399_v45, %v399_v45  ;;  %v6760_v52 = vunpack.c.h.bf16 %v7888_v3  ;;  %v313_v53 = vmul.f32 %v6759_v17, %v7829_v19  ;;  %v429_v54 = vsel %vm7849_vm5, 0, %v428_v39 }
  0x28   : > { %v754_v55 = vor.u32 %v752_v36, %v751_v48  ;;  %v756_v56 = vrot.slane %v751_v48, 4  ;;  %v993_v57 = vsel %vm7906_vm11, %v746_v46, %v992_v43  ;;  %v758_v58 = vshrl.u32 %v6705_v50, 16  ;;  %430 = vst [vmem:[#allocation2 + $0x18] sm:$0x1] %v429_v54  ;;  %v1003_v33 = vld [vmem:[#allocation2 + $0x74] sm:$0x1] }
  0x29   : > { %7158 = vmatpush3.bf16.msra.mxu0 %v7607_v12  ;;  %7590 = vmatpush3.bf16.msra.mxu1 %v7607_v12  ;;  %994 = vst [vmem:[#allocation2 + $0x60] sm:$0xf] %v993_v57  ;;  %v761_v61 = vshll.u32 %v6705_v50, 16  ;;  %v766_v62 = vshrl.u32 %v6706_v51, 16  ;;  %v769_v63 = vshll.u32 %v6706_v51, 16  ;;  %v314_v0 = vmul.f32 %v6760_v52, %v7829_v19 }
  0x2a   : > { %v755_v1 = vsel %vm7897_vm10, %v747_v47, %v754_v55  ;;  %v997_v2 = vsel %vm7849_vm5, %v756_v56, %v996_v49  ;;  %7191 = vmatprep.subr.bf16.mxu1 %v7914_v37  ;;  %7239 = vmatprep.subr.bf16.mxu0 %v7925_v44  ;;  %v760_v3 = vrot.slane %v758_v58, 7  ;;  %v352_v4 = vadd.f32 %v7834_v20, %v313_v53 }
  0x2b   : > { %995 = vst [vmem:[#allocation2 + $0x64] sm:$0xf] %v755_v1  ;;  %998 = vst [vmem:[#allocation2 + $0x68] sm:$0x1] %v997_v2  ;;  %v768_v5 = vrot.slane %v766_v62, 7  ;;  %v479_v6 = vsel %vm7860_vm8, 0, %v478_v59  ;;  %v6763_v7 = vunpack.c.l.bf16 %v7934_v60  ;;  %v353_v9 = vadd.f32 %v7834_v20, %v314_v0 }
  0x2c   : > { %v764_v8 = vrot.slane %v760_v3, 4  ;;  %v384_v10 = vmax.f32 %v352_v4, 0.0  ;;  %480 = vst [vmem:[#allocation2 + $0x20] sm:$0x1] %v479_v6  ;;  %v1057_v12 = vld [vmem:[#allocation2 + $0xc] sm:$0xf]  ;;  %v763_v16 = vor.u32 %v761_v61, %v760_v3  ;;  %v6764_v21 = vunpack.c.h.bf16 %v7934_v60 }
  0x2d   : > { %v1058_v14 = vld [vmem:[#allocation2 + $0x10] sm:$0xf]  ;;  %v1104_v15 = vld [vmem:[#allocation2 + $0x14] sm:$0x1]  ;;  %v771_v17 = vor.u32 %v769_v63, %v768_v5  ;;  %v7953_v23 = vmul.f32 %v6763_v7, %v7829_v19  ;;  %v1147_v24 = vshrl.u32 %v1057_v12, 16  ;;  %v1150_v25 = vshll.u32 %v1057_v12, 16 }
  0x2e   : > { %v1156_v26 = vshll.u32 %v1058_v14, 16  ;;  %v1160_v27 = vshrl.u32 %v1058_v14, 16  ;;  %v1166_v30 = vshll.u32 %v1104_v15, 16  ;;  %v773_v32 = vrot.slane %v768_v5, 4  ;;  %v7611_v5 = vld [vmem:[%s10503_s3 + $0xb0] sm:$0xff]  }
  0x2f   : > { %v772_v31 = vsel %vm7897_vm10, %v764_v8, %v771_v17  ;;  %v6791_v34 = vunpack.c.l.bf16 %v7949_v11  ;;  %v1149_v36 = vrot.slane %v1147_v24, 4  ;;  %v1152_v38 = vrot.slane %v1150_v25, 5  ;;  %v950_v24 = vld [vmem:[#allocation2 + $0x18] sm:$0xf]  ;;  %v2972_v18 = vld [vmem:[#allocation2 + $0xc] sm:$0xf] }
  0x30   : > { %v1158_v39 = vrot.slane %v1156_v26, 5  ;;  %v1162_v40 = vrot.slane %v1160_v27, 4  ;;  %v1071_v41 = vld [vmem:[#allocation2 + $0x60] sm:$0xf]  ;;  %1002 = vst [vmem:[#allocation2 + $0x70] sm:$0xf] %v772_v31  ;;  %v1000_v46 = vsel %vm7906_vm11, %v763_v16, %v999_v28  ;;  %v1004_v51 = vsel %vm7849_vm5, %v773_v32, %v1003_v33 }
  0x31   : > { %v1168_v42 = vrot.slane %v1166_v30, 5  ;;  %v1315_v43 = vshrl.u32 %v1071_v41, 16  ;;  %v1318_v45 = vshll.u32 %v1071_v41, 16  ;;  %v1153_v47 = vor.u32 %v1152_v38, %v1149_v36  ;;  %1001 = vst [vmem:[#allocation2 + $0x6c] sm:$0xf] %v1000_v46  ;;  %v7613_v46 = vld [vmem:[%s10503_s3 + $0xa8] sm:$0xff]  }
  0x32   : > { %v1163_v48 = vor.u32 %v1162_v40, %v1158_v39  ;;  %v1072_v49 = vld [vmem:[#allocation2 + $0x64] sm:$0xf]  ;;  %v1111_v50 = vld [vmem:[#allocation2 + $0x68] sm:$0x1]  ;;  %v385_v52 = vmax.f32 %v353_v9, 0.0  ;;  %v6792_v61 = vunpack.c.h.bf16 %v7949_v11  ;;  %v6691_v1 = vpack.c.bf16 %v384_v10, %v384_v10 }
  0x33   : > { %v1317_v53 = vrot.slane %v1315_v43, 4  ;;  %v1320_v54 = vrot.slane %v1318_v45, 5  ;;  %v1324_v55 = vshll.u32 %v1072_v49, 16  ;;  %v1328_v56 = vshrl.u32 %v1072_v49, 16  ;;  %1005 = vst [vmem:[#allocation2 + $0x74] sm:$0x1] %v1004_v51 }
  0x34   : > { %v1154_v57 = vrot.slane %v1153_v47, 4  ;;  %v1164_v58 = vrot.slane %v1163_v48, 4  ;;  %v1334_v59 = vshll.u32 %v1111_v50, 16  ;;  %v6692_v6 = vpack.c.bf16 %v385_v52, %v385_v52  ;;  %v431_v31 = vld [vmem:[#allocation2 + $0x24] sm:$0x1] }
  0x35   : > { %v1321_v62 = vor.u32 %v1320_v54, %v1317_v53  ;;  %v1326_v63 = vrot.slane %v1324_v55, 5  ;;  %v1330_v0 = vrot.slane %v1328_v56, 4  ;;  %v639_v14 = vshrl.u32 %v6691_v1, 16  ;;  %v481_v45 = vld [vmem:[#allocation2 + $0x2c] sm:$0x1] }
  0x36   : > { %v1159_v2 = vsel %vm7841_vm3, %v1154_v57, %v1158_v39  ;;  %v1169_v3 = vsel %vm7841_vm3, %v1164_v58, %v1168_v42  ;;  %v1336_v4 = vrot.slane %v1334_v59, 5  ;;  %v642_v10 = vshll.u32 %v6691_v1, 16  ;;  %v954_v56 = vld [vmem:[#allocation2 + $0x20] sm:$0x1]  ;;  %v2974_v35 = vld [vmem:[#allocation2 + $0x14] sm:$0x1] }
  0x37   : > { %v6280_v7 = vcombine.low %v1159_v2, %v1169_v3  ;;  %v1322_v8 = vrot.slane %v1321_v62, 4  ;;  %v1331_v9 = vor.u32 %v1330_v0, %v1326_v63  ;;  %v1074_v12 = vld [vmem:[#allocation2 + $0x70] sm:$0xf]  ;;  %v647_v17 = vshrl.u32 %v6692_v6, 16  ;;  %v7615_v0 = vld [vmem:[%s10503_s3 + $0xa0] sm:$0xff]  }
  0x38   : > { %v1348_v15 = vshll.u32 %v1074_v12, 16  ;;  %v1352_v16 = vshrl.u32 %v1074_v12, 16  ;;  %v1073_v27 = vld [vmem:[#allocation2 + $0x6c] sm:$0xf]  ;;  %v641_v28 = vrot.slane %v639_v14, 7  ;;  %v650_v30 = vshll.u32 %v6692_v6, 16 }
  0x39   : > { %7160 = vmatmul.mubr.bf16.vlgmr.msra.gmra.mxu0 %v6280_v7  ;;  %v1327_v25 = vsel %vm7841_vm3, %v1322_v8, %v1326_v63  ;;  %v1332_v26 = vrot.slane %v1331_v9, 4  ;;  %v1339_v33 = vshrl.u32 %v1073_v27, 16  ;;  %v1342_v36 = vshll.u32 %v1073_v27, 16  ;;  %v6906_v9 = vld [vmem:[%s7822_s7 + $0x50] sm:$0xff]  }
  0x3a   : > { %v1112_v32 = vld [vmem:[#allocation2 + $0x74] sm:$0x1]  ;;  %v1350_v38 = vrot.slane %v1348_v15, 5  ;;  %v1354_v39 = vrot.slane %v1352_v16, 4  ;;  %7240 = vmatpush3.bf16.msra.mxu0 %v7925_v44  ;;  %v644_v42 = vor.u32 %v642_v10, %v641_v28  ;;  %v645_v43 = vrot.slane %v641_v28, 4 }
  0x3b   : > { %v1337_v40 = vsel %vm7841_vm3, %v1332_v26, %v1336_v4  ;;  %v1358_v41 = vshll.u32 %v1112_v32, 16  ;;  %7241 = vmatprep.subr.bf16.mxu0 %v7611_v5  ;;  %v1341_v48 = vrot.slane %v1339_v33, 4  ;;  %v1344_v49 = vrot.slane %v1342_v36, 5  ;;  %v502_v4 = vld [vmem:[#allocation2 + $0x80] sm:$0x1] }
  0x3c   : > { %v6287_v47 = vcombine.low %v1327_v25, %v1337_v40  ;;  %v1355_v50 = vor.u32 %v1354_v39, %v1350_v38  ;;  %v649_v52 = vrot.slane %v647_v17, 7  ;;  %v951_v44 = vsel %vm7906_vm11, %v644_v42, %v950_v24  ;;  %v7617_v24 = vld [vmem:[%s10503_s3 + $0x98] sm:$0xff]   ;;  %v7612_v42 = vld [vmem:[%s10503_s3 + $0x28] sm:$0xff]  }
  0x3d   : > { %v1360_v51 = vrot.slane %v1358_v41, 5  ;;  %v316_v53 = vmul.f32 %v6764_v21, %v7829_v19  ;;  %v1345_v54 = vor.u32 %v1344_v49, %v1341_v48  ;;  %952 = vst [vmem:[#allocation2 + $0x18] sm:$0xf] %v951_v44  ;;  %v354_v57 = vadd.f32 %v7834_v20, %v7953_v23  ;;  %v452_v21 = vld [vmem:[#allocation2 + $0x78] sm:$0x1] }
  0x3e   : > { %7175 = vmatprep.mubr.bf16.mxu1 %v6287_v47  ;;  %v1356_v55 = vrot.slane %v1355_v50, 4  ;;  %7242 = vmatpush3.bf16.msra.mxu0 %v7611_v5  ;;  %v432_v58 = vsel %vm7849_vm5, 0, %v431_v31  ;;  %v652_v59 = vor.u32 %v650_v30, %v649_v52  ;;  %v654_v62 = vrot.slane %v649_v52, 4 }
  0x3f   : > { %v355_v63 = vadd.f32 %v7834_v20, %v316_v53  ;;  %433 = vst [vmem:[#allocation2 + $0x24] sm:$0x1] %v432_v58  ;;  %v482_v60 = vsel %vm7860_vm8, 0, %v481_v45  ;;  %7243 = vmatprep.subr.bf16.mxu0 %v7613_v46  ;;  %v1346_v1 = vrot.slane %v1345_v54, 4  ;;  %v386_v2 = vmax.f32 %v354_v57, 0.0 }
  0x40   : > { %v1361_v23 = vsel %vm7841_vm3, %v1356_v55, %v1360_v51  ;;  %483 = vst [vmem:[#allocation2 + $0x2c] sm:$0x1] %v482_v60  ;;  %v329_v3 = vmul.f32 %v6791_v34, %v7829_v19  ;;  %v653_v5 = vsel %vm7897_vm10, %v645_v43, %v652_v59  ;;  %v955_v6 = vsel %vm7849_vm5, %v654_v62, %v954_v56  ;;  %v7610_v34 = vld [vmem:[%s10503_s3 + $0x30] sm:$0xff]  }
  0x41   : > { %v387_v7 = vmax.f32 %v355_v63, 0.0  ;;  %v330_v8 = vmul.f32 %v6792_v61, %v7829_v19  ;;  %v1351_v12 = vsel %vm7841_vm3, %v1346_v1, %v1350_v38  ;;  %953 = vst [vmem:[#allocation2 + $0x1c] sm:$0xf] %v653_v5  ;;  %956 = vst [vmem:[#allocation2 + $0x20] sm:$0x1] %v955_v6  ;;  %v6693_v14 = vpack.c.bf16 %v386_v2, %v386_v2  ;;  %v7614_v1 = vld [vmem:[%s10503_s3 + $0x20] sm:$0xff]  }
  0x42   : > { %v368_v15 = vadd.f32 %v7834_v20, %v329_v3  ;;  %v453_v16 = vsel %vm7849_vm5, 0, %v452_v21  ;;  %7244 = vmatpush3.bf16.msra.mxu0 %v7613_v46  ;;  %v6288_v10 = vcombine.low %v1351_v12, %v1361_v23  ;;  %v503_v17 = vsel %vm7860_vm8, 0, %v502_v4  ;;  %v455_v21 = vld [vmem:[#allocation2 + $0x84] sm:$0x1]  ;;  %v8042_v5 = vld [vmem:[%s7822_s7 + $0x18] sm:$0xff]   ;;  %v7621_v6 = vld [vmem:[%s10503_s3 + $0x88] sm:$0xff]  }
  0x43   : > { %v6694_v11 = vpack.c.bf16 %v387_v7, %v387_v7  ;;  %v369_v61 = vadd.f32 %v7834_v20, %v330_v8  ;;  %454 = vst [vmem:[#allocation2 + $0x78] sm:$0x1] %v453_v16  ;;  %7245 = vmatprep.subr.bf16.mxu0 %v7615_v0  ;;  %v656_v25 = vshrl.u32 %v6693_v14, 16  ;;  %v659_v26 = vshll.u32 %v6693_v14, 16  ;;  %504 = vst [vmem:[#allocation2 + $0x80] sm:$0x1] %v503_v17 }
  0x44   : > { %v400_v27 = vmax.f32 %v368_v15, 0.0  ;;  %v6795_v28 = vunpack.c.l.bf16 %v6906_v9  ;;  %7176 = vmatmul.mubr.bf16.vlgmr.msra.gmra.mxu1 %v6288_v10  ;;  %v1059_v30 = vld [vmem:[#allocation2 + $0x18] sm:$0xf]  ;;  %v6796_v36 = vunpack.c.h.bf16 %v6906_v9  ;;  %vm2150_vm13 = vcmask 1046532  }
  0x45   : > { %v664_v31 = vshrl.u32 %v6694_v11, 16  ;;  %v667_v32 = vshll.u32 %v6694_v11, 16  ;;  %v401_v33 = vmax.f32 %v369_v61, 0.0  ;;  %7192 = vmatpush3.bf16.msra.mxu1 %v7914_v37  ;;  %v1171_v38 = vshrl.u32 %v1059_v30, 16  ;;  %v7619_v37 = vld [vmem:[%s10503_s3 + $0x90] sm:$0xff]   ;;  %vm8318_vm14 = vmor %vm2149_vm12, %vm2150_vm13 }
  0x46   : > { %v1174_v39 = vshll.u32 %v1059_v30, 16  ;;  %v658_v40 = vrot.slane %v656_v25, 7  ;;  %v6707_v41 = vpack.c.bf16 %v400_v27, %v400_v27  ;;  %7246 = vmatpush3.bf16.msra.mxu0 %v7615_v0  ;;  %7193 = vmatprep.subr.bf16.mxu1 %v7610_v34  ;;  %v957_v45 = vld [vmem:[#allocation2 + $0x24] sm:$0xf]  ;;  %v331_v48 = vmul.f32 %v6795_v28, %v7829_v19  ;;  %v505_v0 = vld [vmem:[#allocation2 + $0x8c] sm:$0x1] }
  0x47   : > { %v666_v43 = vrot.slane %v664_v31, 7  ;;  %v961_v46 = vld [vmem:[#allocation2 + $0x2c] sm:$0x1]  ;;  %v8024_v47 = vpack.c.bf16 %v401_v33, %v401_v33  ;;  %v332_v49 = vmul.f32 %v6796_v36, %v7829_v19  ;;  %7247 = vmatprep.subr.bf16.mxu0 %v7617_v24  ;;  %v1173_v50 = vrot.slane %v1171_v38, 4 }
  0x48   : > { %v1176_v51 = vrot.slane %v1174_v39, 5  ;;  %v661_v52 = vor.u32 %v659_v26, %v658_v40  ;;  %v662_v44 = vrot.slane %v658_v40, 4  ;;  %v1060_v53 = vld [vmem:[#allocation2 + $0x1c] sm:$0xf]  ;;  %v1105_v54 = vld [vmem:[#allocation2 + $0x20] sm:$0x1]  ;;  %v370_v58 = vadd.f32 %v7834_v20, %v331_v48 }
  0x49   : > { %v669_v55 = vor.u32 %v667_v32, %v666_v43  ;;  %v671_v56 = vrot.slane %v666_v43, 4  ;;  %v775_v57 = vshrl.u32 %v6707_v41, 16  ;;  %7194 = vmatpush3.bf16.msra.mxu1 %v7610_v34  ;;  %v1180_v62 = vshll.u32 %v1060_v53, 16  ;;  %v7616_v26 = vld [vmem:[%s10503_s3 + $0x18] sm:$0xff]   ;;  %v7623_v32 = vld [vmem:[%s10503_s3 + $0x80] sm:$0xff]  }
  0x4a   : > { %v1177_v59 = vor.u32 %v1176_v51, %v1173_v50  ;;  %v1184_v63 = vshrl.u32 %v1060_v53, 16  ;;  %v1190_v60 = vshll.u32 %v1105_v54, 16  ;;  %7248 = vmatpush3.bf16.msra.mxu0 %v7617_v24  ;;  %v958_v2 = vsel %vm7906_vm11, %v661_v52, %v957_v45  ;;  %7195 = vmatprep.subr.bf16.mxu1 %v7612_v42  ;;  %v1006_v61 = vld [vmem:[#allocation2 + $0x78] sm:$0xf]  ;;  %v1010_v17 = vld [vmem:[#allocation2 + $0x80] sm:$0x1] }
  0x4b   : > { %v670_v23 = vsel %vm7897_vm10, %v662_v44, %v669_v55  ;;  %v962_v3 = vsel %vm7849_vm5, %v671_v56, %v961_v46  ;;  %v777_v4 = vrot.slane %v775_v57, 7  ;;  %7249 = vmatprep.subr.bf16.mxu0 %v7619_v37  ;;  %v1182_v8 = vrot.slane %v1180_v62, 5  ;;  %959 = vst [vmem:[#allocation2 + $0x24] sm:$0xf] %v958_v2  ;;  %v7618_v45 = vld [vmem:[%s10503_s3 + $0x10] sm:$0xff]   ;;  %v7627_v46 = vld [vmem:[%s10503_s3 + $0x138] sm:$0xff]  }
  0x4c   : > { %v1178_v7 = vrot.slane %v1177_v59, 4  ;;  %v1186_v9 = vrot.slane %v1184_v63, 4  ;;  %v1192_v12 = vrot.slane %v1190_v60, 5  ;;  %960 = vst [vmem:[#allocation2 + $0x28] sm:$0xf] %v670_v23  ;;  %v778_v34 = vshll.u32 %v6707_v41, 16 }
  0x4d   : > { %963 = vst [vmem:[#allocation2 + $0x2c] sm:$0x1] %v962_v3  ;;  %v781_v14 = vrot.slane %v777_v4, 4  ;;  %v783_v15 = vshrl.u32 %v8024_v47, 16  ;;  %v786_v16 = vshll.u32 %v8024_v47, 16  ;;  %v371_v24 = vadd.f32 %v7834_v20, %v332_v49  ;;  %7196 = vmatpush3.bf16.msra.mxu1 %v7612_v42 }
  0x4e   : > { %v1183_v10 = vsel %vm7841_vm3, %v1178_v7, %v1182_v8  ;;  %v1187_v11 = vor.u32 %v1186_v9, %v1182_v8  ;;  %v402_v25 = vmax.f32 %v370_v58, 0.0  ;;  %7250 = vmatpush3.bf16.msra.mxu0 %v7619_v37  ;;  %v780_v27 = vor.u32 %v778_v34, %v777_v4  ;;  %7197 = vmatprep.subr.bf16.mxu1 %v7614_v1  ;;  %v7620_v9 = vld [vmem:[%s10503_s3 + $0x8] sm:$0xff]  }
  0x4f   : > { %v785_v28 = vrot.slane %v783_v15, 7  ;;  %v456_v30 = vsel %vm7849_vm5, 0, %v455_v21  ;;  %v506_v31 = vsel %vm7860_vm8, 0, %v505_v0  ;;  %7251 = vmatprep.subr.bf16.mxu0 %v7621_v6  ;;  %v403_v36 = vmax.f32 %v371_v24, 0.0  ;;  %v434_v0 = vld [vmem:[#allocation2 + $0x30] sm:$0x1] }
  0x50   : > { %v1188_v33 = vrot.slane %v1187_v11, 4  ;;  %457 = vst [vmem:[#allocation2 + $0x84] sm:$0x1] %v456_v30  ;;  %507 = vst [vmem:[#allocation2 + $0x8c] sm:$0x1] %v506_v31  ;;  %v6709_v38 = vpack.c.bf16 %v402_v25, %v402_v25  ;;  %v6767_v39 = vunpack.c.l.bf16 %v8042_v5  ;;  %v1007_v42 = vsel %vm7906_vm11, %v780_v27, %v1006_v61  ;;  %v6900_v31 = vld [vmem:[%s7822_s7 + $0x20] sm:$0xff]  }
  0x51   : > { %v788_v40 = vor.u32 %v786_v16, %v785_v28  ;;  %v790_v41 = vrot.slane %v785_v28, 4  ;;  %v6768_v43 = vunpack.c.h.bf16 %v8042_v5  ;;  %1008 = vst [vmem:[#allocation2 + $0x78] sm:$0xf] %v1007_v42  ;;  %v6710_v48 = vpack.c.bf16 %v403_v36, %v403_v36  ;;  %7198 = vmatpush3.bf16.msra.mxu1 %v7614_v1  ;;  %v484_v25 = vld [vmem:[#allocation2 + $0x38] sm:$0x1] }
  0x52   : > { %v1193_v47 = vsel %vm7841_vm3, %v1188_v33, %v1192_v12  ;;  %v792_v49 = vshrl.u32 %v6709_v38, 16  ;;  %v795_v37 = vshll.u32 %v6709_v38, 16  ;;  %7252 = vmatpush3.bf16.msra.mxu0 %v7621_v6  ;;  %v1061_v51 = vld [vmem:[#allocation2 + $0x24] sm:$0xf]  ;;  %v317_v55 = vmul.f32 %v6767_v39, %v7829_v19  ;;  %7199 = vmatprep.subr.bf16.mxu1 %v7616_v26 }
  0x53   : > { %v6281_v50 = vcombine.low %v1183_v10, %v1193_v47  ;;  %v1062_v52 = vld [vmem:[#allocation2 + $0x28] sm:$0xf]  ;;  %v789_v53 = vsel %vm7897_vm10, %v781_v14, %v788_v40  ;;  %v1011_v54 = vsel %vm7849_vm5, %v790_v41, %v1010_v17  ;;  %v1195_v56 = vshrl.u32 %v1061_v51, 16  ;;  %7253 = vmatprep.subr.bf16.mxu0 %v7623_v32  ;;  %v7622_v40 = vld [vmem:[%s10503_s3] sm:$0xff]  }
  0x54   : > { %v1106_v44 = vld [vmem:[#allocation2 + $0x2c] sm:$0x1]  ;;  %v1198_v57 = vshll.u32 %v1061_v51, 16  ;;  %v1204_v58 = vshll.u32 %v1062_v52, 16  ;;  %v1208_v59 = vshrl.u32 %v1062_v52, 16  ;;  %v794_v63 = vrot.slane %v792_v49, 7 }
  0x55   : > { %1009 = vst [vmem:[#allocation2 + $0x7c] sm:$0xf] %v789_v53  ;;  %1012 = vst [vmem:[#allocation2 + $0x80] sm:$0x1] %v1011_v54  ;;  %7163 = vmatprep.mubr.bf16.mxu0 %v6281_v50  ;;  %v1214_v62 = vshll.u32 %v1106_v44, 16  ;;  %v800_v60 = vshrl.u32 %v6710_v48, 16  ;;  %7200 = vmatpush3.bf16.msra.mxu1 %v7616_v26  ;;  %v318_v15 = vmul.f32 %v6768_v43, %v7829_v19 }
  0x56   : > { %v803_v21 = vshll.u32 %v6710_v48, 16  ;;  %v1197_v1 = vrot.slane %v1195_v56, 4  ;;  %v1200_v23 = vrot.slane %v1198_v57, 5  ;;  %v1206_v2 = vrot.slane %v1204_v58, 5  ;;  %7254 = vmatpush3.bf16.msra.mxu0 %v7623_v32  ;;  %7201 = vmatprep.subr.bf16.mxu1 %v7618_v45  ;;  %v7625_v56 = vld [vmem:[%s10503_s3 + $0xf8] sm:$0xff]  }
  0x57   : > { %v1210_v3 = vrot.slane %v1208_v59, 4  ;;  %v1216_v4 = vrot.slane %v1214_v62, 5  ;;  %v797_v5 = vor.u32 %v795_v37, %v794_v63  ;;  %v798_v6 = vrot.slane %v794_v63, 4  ;;  %v1013_v8 = vld [vmem:[#allocation2 + $0x84] sm:$0xf]  ;;  %7335 = vmatprep.subr.bf16.mxu0 %v7627_v46 }
  0x58   : > { %v802_v7 = vrot.slane %v800_v60, 7  ;;  %v1201_v12 = vor.u32 %v1200_v23, %v1197_v1  ;;  %v1017_v14 = vld [vmem:[#allocation2 + $0x8c] sm:$0x1]  ;;  %v356_v16 = vadd.f32 %v7834_v20, %v317_v55  ;;  %v1075_v10 = vld [vmem:[#allocation2 + $0x78] sm:$0xf]  ;;  %v435_v24 = vsel %vm7849_vm5, 0, %v434_v0 }
  0x59   : > { %v1211_v34 = vor.u32 %v1210_v3, %v1206_v2  ;;  %v1014_v17 = vsel %vm7906_vm11, %v797_v5, %v1013_v8  ;;  %v1363_v28 = vshrl.u32 %v1075_v10, 16  ;;  %v1366_v30 = vshll.u32 %v1075_v10, 16  ;;  %436 = vst [vmem:[#allocation2 + $0x30] sm:$0x1] %v435_v24  ;;  %7202 = vmatpush3.bf16.msra.mxu1 %v7618_v45  ;;  %v437_v46 = vld [vmem:[#allocation2 + $0x3c] sm:$0x1] }
  0x5a   : > { %v805_v11 = vor.u32 %v803_v21, %v802_v7  ;;  %v807_v61 = vrot.slane %v802_v7, 4  ;;  %v1202_v26 = vrot.slane %v1201_v12, 4  ;;  %1015 = vst [vmem:[#allocation2 + $0x84] sm:$0xf] %v1014_v17  ;;  %v357_v38 = vadd.f32 %v7834_v20, %v318_v15  ;;  %7203 = vmatprep.subr.bf16.mxu1 %v7620_v9  ;;  %v8109_v0 = vld [vmem:[%s10501_s1] ss:$0 sm:$0xff] }
  0x5b   : > { %v1212_v27 = vrot.slane %v1211_v34, 4  ;;  %v388_v39 = vmax.f32 %v356_v16, 0.0  ;;  %v1365_v43 = vrot.slane %v1363_v28, 4  ;;  %v1368_v45 = vrot.slane %v1366_v30, 5  ;;  %v6907_v17 = vld [vmem:[%s7822_s7 + $0x58] sm:$0xff]  }
  0x5c   : > { %v1076_v19 = vld [vmem:[#allocation2 + $0x7c] sm:$0xf]  ;;  %v1113_v32 = vld [vmem:[#allocation2 + $0x80] sm:$0x1]  ;;  %v806_v33 = vsel %vm7897_vm10, %v798_v6, %v805_v11  ;;  %v1018_v36 = vsel %vm7849_vm5, %v807_v61, %v1017_v14  ;;  %v1207_v41 = vsel %vm7841_vm3, %v1202_v26, %v1206_v2  ;;  %v389_v50 = vmax.f32 %v357_v38, 0.0 }
  0x5d   : > { %v1217_v42 = vsel %vm7841_vm3, %v1212_v27, %v1216_v4  ;;  %1016 = vst [vmem:[#allocation2 + $0x88] sm:$0xf] %v806_v33  ;;  %1019 = vst [vmem:[#allocation2 + $0x8c] sm:$0x1] %v1018_v36  ;;  %v1372_v48 = vshll.u32 %v1076_v19, 16  ;;  %v1376_v20 = vshrl.u32 %v1076_v19, 16  ;;  %v1369_v37 = vor.u32 %v1368_v45, %v1365_v43  ;;  %7204 = vmatpush3.bf16.msra.mxu1 %v7620_v9 }
  0x5e   : > { %v6282_v47 = vcombine.low %v1207_v41, %v1217_v42  ;;  %v1382_v49 = vshll.u32 %v1113_v32, 16  ;;  %v485_v51 = vsel %vm7860_vm8, 0, %v484_v25  ;;  %v6695_v52 = vpack.c.bf16 %v388_v39, %v388_v39  ;;  %7205 = vmatprep.subr.bf16.mxu1 %v7622_v40  ;;  %v8120_v14 = vld [vmem:[%s10502_s2] ss:$0 sm:$0xff]  ;;  %v487_v32 = vld [vmem:[#allocation2 + $0x44] sm:$0x1] }
  0x5f   : > { %v1374_v44 = vrot.slane %v1372_v48, 5  ;;  %v1378_v53 = vrot.slane %v1376_v20, 4  ;;  %486 = vst [vmem:[#allocation2 + $0x38] sm:$0x1] %v485_v51  ;;  %v6771_v55 = vunpack.c.l.bf16 %v6900_v31  ;;  %v1370_v57 = vrot.slane %v1369_v37, 4 }
  0x60   : > { %7164 = vmatmul.mubr.bf16.gmra.mxu0 %v6282_v47  ;;  %v1384_v54 = vrot.slane %v1382_v49, 5  ;;  %v6696_v58 = vpack.c.bf16 %v389_v50, %v389_v50  ;;  %v673_v59 = vshrl.u32 %v6695_v52, 16  ;;  %v676_v62 = vshll.u32 %v6695_v52, 16  ;;  %v964_v6 = vld [vmem:[#allocation2 + $0x30] sm:$0xf] }
  0x61   : > { %v1379_v63 = vor.u32 %v1378_v53, %v1374_v44  ;;  %v1077_v60 = vld [vmem:[#allocation2 + $0x84] sm:$0xf]  ;;  %v6772_v21 = vunpack.c.h.bf16 %v6900_v31  ;;  %v319_v1 = vmul.f32 %v8109_v0, %v6771_v55  ;;  %v438_v23 = vsel %vm7849_vm5, 0, %v437_v46  ;;  %7206 = vmatpush3.bf16.msra.mxu1 %v7622_v40  ;;  %v458_v46 = vld [vmem:[#allocation2 + $0x90] sm:$0x1] }
  0x62   : > { %v1375_v2 = vsel %vm7841_vm3, %v1370_v57, %v1374_v44  ;;  %v1387_v3 = vshrl.u32 %v1077_v60, 16  ;;  %v1390_v4 = vshll.u32 %v1077_v60, 16  ;;  %v675_v5 = vrot.slane %v673_v59, 7  ;;  %439 = vst [vmem:[#allocation2 + $0x3c] sm:$0x1] %v438_v23  ;;  %7287 = vmatprep.subr.bf16.mxu1 %v7625_v56  ;;  %v6908_v53 = vld [vmem:[%s7822_s7 + $0x60] sm:$0xff]  }
  0x63   : > { %v1380_v7 = vrot.slane %v1379_v63, 4  ;;  %v681_v12 = vshrl.u32 %v6696_v58, 16  ;;  %v320_v34 = vmul.f32 %v8109_v0, %v6772_v21  ;;  %v358_v15 = vadd.f32 %v8120_v14, %v319_v1  ;;  %v508_v37 = vld [vmem:[#allocation2 + $0x98] sm:$0x1] }
  0x64   : > { %v1078_v8 = vld [vmem:[#allocation2 + $0x88] sm:$0xf]  ;;  %v1114_v9 = vld [vmem:[#allocation2 + $0x8c] sm:$0x1]  ;;  %v1389_v16 = vrot.slane %v1387_v3, 4  ;;  %v1392_v10 = vrot.slane %v1390_v4, 5  ;;  %v678_v26 = vor.u32 %v676_v62, %v675_v5  ;;  %v6799_v49 = vunpack.c.l.bf16 %v6907_v17 }
  0x65   : > { %v1396_v11 = vshll.u32 %v1078_v8, 16  ;;  %v1400_v61 = vshrl.u32 %v1078_v8, 16  ;;  %v1385_v24 = vsel %vm7841_vm3, %v1380_v7, %v1384_v54  ;;  %v1406_v25 = vshll.u32 %v1114_v9, 16 }
  0x66   : > { %v679_v27 = vrot.slane %v675_v5, 4  ;;  %v6289_v28 = vcombine.low %v1375_v2, %v1385_v24  ;;  %v1393_v30 = vor.u32 %v1392_v10, %v1389_v16  ;;  %v683_v36 = vrot.slane %v681_v12, 7  ;;  %v968_v42 = vld [vmem:[#allocation2 + $0x38] sm:$0x1] }
  0x67   : > { %v1398_v31 = vrot.slane %v1396_v11, 5  ;;  %v1402_v19 = vrot.slane %v1400_v61, 4  ;;  %v1408_v33 = vrot.slane %v1406_v25, 5  ;;  %v684_v38 = vshll.u32 %v6696_v58, 16 }
  0x68   : > { %v965_v39 = vsel %vm7906_vm11, %v678_v26, %v964_v6  ;;  %7179 = vmatprep.mubr.bf16.mxu1 %v6289_v28  ;;  %v1394_v40 = vrot.slane %v1393_v30, 4  ;;  %v359_v43 = vadd.f32 %v8120_v14, %v320_v34  ;;  %v390_v45 = vmax.f32 %v358_v15, 0.0 }
  0x69   : > { %v1403_v41 = vor.u32 %v1402_v19, %v1398_v31  ;;  %966 = vst [vmem:[#allocation2 + $0x30] sm:$0xf] %v965_v39  ;;  %v686_v47 = vor.u32 %v684_v38, %v683_v36  ;;  %v688_v48 = vrot.slane %v683_v36, 4  ;;  %v488_v20 = vsel %vm7860_vm8, 0, %v487_v32  ;;  %v971_v7 = vld [vmem:[#allocation2 + $0x3c] sm:$0xf] }
  0x6a   : > { %v1399_v50 = vsel %vm7841_vm3, %v1394_v40, %v1398_v31  ;;  %v391_v52 = vmax.f32 %v359_v43, 0.0  ;;  %489 = vst [vmem:[#allocation2 + $0x44] sm:$0x1] %v488_v20  ;;  %v6697_v44 = vpack.c.bf16 %v390_v45, %v390_v45  ;;  %v6800_v56 = vunpack.c.h.bf16 %v6907_v17  ;;  %v461_v45 = vld [vmem:[#allocation2 + $0x9c] sm:$0x1] }
  0x6b   : > { %v1404_v51 = vrot.slane %v1403_v41, 4  ;;  %v687_v54 = vsel %vm7897_vm10, %v679_v27, %v686_v47  ;;  %v969_v55 = vsel %vm7849_vm5, %v688_v48, %v968_v42  ;;  %v333_v57 = vmul.f32 %v8109_v0, %v6799_v49  ;;  %v511_v49 = vld [vmem:[#allocation2 + $0xa4] sm:$0x1] }
  0x6c   : > { %967 = vst [vmem:[#allocation2 + $0x34] sm:$0xf] %v687_v54  ;;  %970 = vst [vmem:[#allocation2 + $0x38] sm:$0x1] %v969_v55  ;;  %v6698_v59 = vpack.c.bf16 %v391_v52, %v391_v52  ;;  %v690_v62 = vshrl.u32 %v6697_v44, 16  ;;  %v693_v63 = vshll.u32 %v6697_v44, 16  ;;  %v334_v21 = vmul.f32 %v8109_v0, %v6800_v56 }
  0x6d   : > { %v1409_v58 = vsel %vm7841_vm3, %v1404_v51, %v1408_v33  ;;  %v372_v1 = vadd.f32 %v8120_v14, %v333_v57  ;;  %v459_v23 = vsel %vm7849_vm5, 0, %v458_v46  ;;  %v509_v5 = vsel %vm7860_vm8, 0, %v508_v37  ;;  %v6901_v57 = vld [vmem:[%s7822_s7 + $0x28] sm:$0xff]  }
  0x6e   : > { %v6290_v60 = vcombine.low %v1399_v50, %v1409_v58  ;;  %v692_v2 = vrot.slane %v690_v62, 7  ;;  %v698_v3 = vshrl.u32 %v6698_v59, 16  ;;  %v701_v4 = vshll.u32 %v6698_v59, 16  ;;  %460 = vst [vmem:[#allocation2 + $0x90] sm:$0x1] %v459_v23 }
  0x6f   : > { %v373_v8 = vadd.f32 %v8120_v14, %v334_v21  ;;  %v404_v9 = vmax.f32 %v372_v1, 0.0  ;;  %510 = vst [vmem:[#allocation2 + $0x98] sm:$0x1] %v509_v5  ;;  %v6803_v12 = vunpack.c.l.bf16 %v6908_v53  ;;  %v6804_v34 = vunpack.c.h.bf16 %v6908_v53 }
  0x70   : > { %7180 = vmatmul.mubr.bf16.gmra.mxu1 %v6290_v60  ;;  %v1063_v6 = vld [vmem:[#allocation2 + $0x30] sm:$0xf]  ;;  %v695_v10 = vor.u32 %v693_v63, %v692_v2  ;;  %v696_v11 = vrot.slane %v692_v2, 4  ;;  %v700_v61 = vrot.slane %v698_v3, 7  ;;  %v462_v1 = vsel %vm7849_vm5, 0, %v461_v45 }
  0x71   : > { %v1219_v15 = vshrl.u32 %v1063_v6, 16  ;;  %v1222_v16 = vshll.u32 %v1063_v6, 16  ;;  %v975_v17 = vld [vmem:[#allocation2 + $0x44] sm:$0x1]  ;;  %v405_v24 = vmax.f32 %v373_v8, 0.0  ;;  %v6711_v25 = vpack.c.bf16 %v404_v9, %v404_v9 }
  0x72   : > { %v335_v26 = vmul.f32 %v8109_v0, %v6803_v12  ;;  %v972_v30 = vsel %vm7906_vm11, %v695_v10, %v971_v7  ;;  %v336_v31 = vmul.f32 %v8109_v0, %v6804_v34  ;;  %v703_v33 = vor.u32 %v701_v4, %v700_v61  ;;  %463 = vst [vmem:[#allocation2 + $0x9c] sm:$0x1] %v462_v1 }
  0x73   : > { %v1221_v27 = vrot.slane %v1219_v15, 4  ;;  %v1224_v28 = vrot.slane %v1222_v16, 5  ;;  %v8152_v19 = vld [vmem:[#allocation2 + $0x34] sm:$0xf]  ;;  %v8154_v32 = vld [vmem:[#allocation2 + $0x38] sm:$0x1]  ;;  %v6712_v38 = vpack.c.bf16 %v405_v24, %v405_v24  ;;  %v6775_v6 = vunpack.c.l.bf16 %v6901_v57 }
  0x74   : > { %v705_v36 = vrot.slane %v700_v61, 4  ;;  %973 = vst [vmem:[#allocation2 + $0x3c] sm:$0xf] %v972_v30  ;;  %v809_v39 = vshrl.u32 %v6711_v25, 16  ;;  %v1228_v41 = vshll.u32 %v8152_v19, 16  ;;  %v1232_v42 = vshrl.u32 %v8152_v19, 16 }
  0x75   : > { %v1225_v40 = vor.u32 %v1224_v28, %v1221_v27  ;;  %v1238_v43 = vshll.u32 %v8154_v32, 16  ;;  %v704_v46 = vsel %vm7897_vm10, %v696_v11, %v703_v33  ;;  %v812_v20 = vshll.u32 %v6711_v25, 16  ;;  %v1020_v44 = vld [vmem:[#allocation2 + $0x90] sm:$0xf] }
  0x76   : > { %v976_v47 = vsel %vm7849_vm5, %v705_v36, %v975_v17  ;;  %v811_v48 = vrot.slane %v809_v39, 7  ;;  %v1230_v50 = vrot.slane %v1228_v41, 5  ;;  %v1234_v51 = vrot.slane %v1232_v42, 4  ;;  %974 = vst [vmem:[#allocation2 + $0x40] sm:$0xf] %v704_v46 }
  0x77   : > { %v1226_v37 = vrot.slane %v1225_v40, 4  ;;  %v1240_v52 = vrot.slane %v1238_v43, 5  ;;  %977 = vst [vmem:[#allocation2 + $0x44] sm:$0x1] %v976_v47  ;;  %v817_v55 = vshrl.u32 %v6712_v38, 16  ;;  %v820_v56 = vshll.u32 %v6712_v38, 16 }
  0x78   : > { %v814_v53 = vor.u32 %v812_v20, %v811_v48  ;;  %v815_v54 = vrot.slane %v811_v48, 4  ;;  %v1235_v59 = vor.u32 %v1234_v51, %v1230_v50  ;;  %v374_v62 = vadd.f32 %v8120_v14, %v335_v26  ;;  %v1024_v34 = vld [vmem:[#allocation2 + $0x98] sm:$0x1] }
  0x79   : > { %v1231_v58 = vsel %vm7841_vm3, %v1226_v37, %v1230_v50  ;;  %v375_v63 = vadd.f32 %v8120_v14, %v336_v31  ;;  %v819_v60 = vrot.slane %v817_v55, 7  ;;  %v512_v23 = vsel %vm7860_vm8, 0, %v511_v49 }
  0x7a   : > { %v1021_v21 = vsel %vm7906_vm11, %v814_v53, %v1020_v44  ;;  %v1236_v2 = vrot.slane %v1235_v59, 4  ;;  %v406_v4 = vmax.f32 %v374_v62, 0.0  ;;  %513 = vst [vmem:[#allocation2 + $0xa4] sm:$0x1] %v512_v23  ;;  %v6776_v11 = vunpack.c.h.bf16 %v6901_v57 }
  0x7b   : > { %v8174_v3 = vld [vmem:[#allocation2 + $0x3c] sm:$0xf]  ;;  %1022 = vst [vmem:[#allocation2 + $0x90] sm:$0xf] %v1021_v21  ;;  %v407_v5 = vmax.f32 %v375_v63, 0.0  ;;  %v822_v9 = vor.u32 %v820_v56, %v819_v60  ;;  %v824_v12 = vrot.slane %v819_v60, 4  ;;  %v321_v49 = vmul.f32 %v8109_v0, %v6775_v6 }
  0x7c   : > { %v1243_v7 = vshrl.u32 %v8174_v3, 16  ;;  %v1246_v8 = vshll.u32 %v8174_v3, 16  ;;  %v1241_v15 = vsel %vm7841_vm3, %v1236_v2, %v1240_v52  ;;  %v6713_v16 = vpack.c.bf16 %v406_v4, %v406_v4  ;;  %v1027_v52 = vld [vmem:[#allocation2 + $0x9c] sm:$0xf]  ;;  %v440_v4 = vld [vmem:[#allocation2 + $0x48] sm:$0x1] }
  0x7d   : > { %v6714_v10 = vpack.c.bf16 %v407_v5, %v407_v5  ;;  %v6283_v61 = vcombine.low %v1231_v58, %v1241_v15  ;;  %v8180_v17 = vld [vmem:[#allocation2 + $0x40] sm:$0xf]  ;;  %v823_v27 = vsel %vm7897_vm10, %v815_v54, %v822_v9  ;;  %v1025_v33 = vsel %vm7849_vm5, %v824_v12, %v1024_v34  ;;  %v490_v12 = vld [vmem:[#allocation2 + $0x50] sm:$0x1] }
  0x7e   : > { %v8182_v24 = vld [vmem:[#allocation2 + $0x44] sm:$0x1]  ;;  %v1245_v25 = vrot.slane %v1243_v7, 4  ;;  %v1248_v26 = vrot.slane %v1246_v8, 5  ;;  %v1252_v28 = vshll.u32 %v8180_v17, 16  ;;  %v1256_v30 = vshrl.u32 %v8180_v17, 16 }
  0x7f   : > { %v1262_v31 = vshll.u32 %v8182_v24, 16  ;;  %1023 = vst [vmem:[#allocation2 + $0x94] sm:$0xf] %v823_v27  ;;  %7167 = vmatprep.mubr.bf16.mxu0 %v6283_v61  ;;  %1026 = vst [vmem:[#allocation2 + $0x98] sm:$0x1] %v1025_v33  ;;  %v826_v38 = vshrl.u32 %v6713_v16, 16  ;;  %v322_v44 = vmul.f32 %v8109_v0, %v6776_v11  ;;  %v360_v23 = vadd.f32 %v8120_v14, %v321_v49 }
  0x80   : > { %v1249_v36 = vor.u32 %v1248_v26, %v1245_v25  ;;  %v829_v39 = vshll.u32 %v6713_v16, 16  ;;  %v834_v40 = vshrl.u32 %v6714_v10, 16  ;;  %v1254_v41 = vrot.slane %v1252_v28, 5  ;;  %v6902_v11 = vld [vmem:[%s7822_s7 + $0x30] sm:$0xff]  }
  0x81   : > { %v1258_v42 = vrot.slane %v1256_v30, 4  ;;  %v1264_v43 = vrot.slane %v1262_v31, 5  ;;  %v837_v45 = vshll.u32 %v6714_v10, 16  ;;  %v828_v48 = vrot.slane %v826_v38, 7  ;;  %v1031_v63 = vld [vmem:[#allocation2 + $0xa4] sm:$0x1] }
  0x82   : > { %v1250_v46 = vrot.slane %v1249_v36, 4  ;;  %v8191_v47 = vld [vmem:[#allocation2 + $0x90] sm:$0xf]  ;;  %v836_v20 = vrot.slane %v834_v40, 7  ;;  %v361_v2 = vadd.f32 %v8120_v14, %v322_v44  ;;  %v392_v10 = vmax.f32 %v360_v23, 0.0 }
  0x83   : > { %v1259_v37 = vor.u32 %v1258_v42, %v1254_v41  ;;  %v1411_v50 = vshrl.u32 %v8191_v47, 16  ;;  %v1414_v51 = vshll.u32 %v8191_v47, 16  ;;  %v831_v54 = vor.u32 %v829_v39, %v828_v48  ;;  %v443_v28 = vld [vmem:[#allocation2 + $0x54] sm:$0x1]  ;;  %v493_v42 = vld [vmem:[#allocation2 + $0x5c] sm:$0x1] }
  0x84   : > { %v1255_v53 = vsel %vm7841_vm3, %v1250_v46, %v1254_v41  ;;  %v832_v55 = vrot.slane %v828_v48, 4  ;;  %v839_v56 = vor.u32 %v837_v45, %v836_v20  ;;  %v841_v62 = vrot.slane %v836_v20, 4 }
  0x85   : > { %v1260_v57 = vrot.slane %v1259_v37, 4  ;;  %v1413_v58 = vrot.slane %v1411_v50, 4  ;;  %v1416_v59 = vrot.slane %v1414_v51, 5  ;;  %v1028_v1 = vsel %vm7906_vm11, %v831_v54, %v1027_v52 }
  0x86   : > { %v8199_v60 = vld [vmem:[#allocation2 + $0x94] sm:$0xf]  ;;  %v840_v21 = vsel %vm7897_vm10, %v832_v55, %v839_v56  ;;  %v8209_v6 = vld [vmem:[#allocation2 + $0x98] sm:$0x1]  ;;  %1029 = vst [vmem:[#allocation2 + $0x9c] sm:$0xf] %v1028_v1  ;;  %v1032_v16 = vsel %vm7849_vm5, %v841_v62, %v1031_v63  ;;  %v6699_v36 = vpack.c.bf16 %v392_v10, %v392_v10  ;;  %v6779_v41 = vunpack.c.l.bf16 %v6902_v11 }
  0x87   : > { %v1265_v5 = vsel %vm7841_vm3, %v1260_v57, %v1264_v43  ;;  %v1417_v7 = vor.u32 %v1416_v59, %v1413_v58  ;;  %v1420_v8 = vshll.u32 %v8199_v60, 16  ;;  %v1424_v9 = vshrl.u32 %v8199_v60, 16  ;;  %1030 = vst [vmem:[#allocation2 + $0xa0] sm:$0xf] %v840_v21  ;;  %1033 = vst [vmem:[#allocation2 + $0xa4] sm:$0x1] %v1032_v16 }
  0x88   : > { %v6284_v34 = vcombine.low %v1255_v53, %v1265_v5  ;;  %v1430_v15 = vshll.u32 %v8209_v6, 16  ;;  %v393_v27 = vmax.f32 %v361_v2, 0.0  ;;  %v441_v31 = vsel %vm7849_vm5, 0, %v440_v4  ;;  %v6909_v43 = vld [vmem:[%s7822_s7 + $0x68] sm:$0xff]  }
  0x89   : > { %v1418_v61 = vrot.slane %v1417_v7, 4  ;;  %v1422_v25 = vrot.slane %v1420_v8, 5  ;;  %v1426_v26 = vrot.slane %v1424_v9, 4  ;;  %v491_v33 = vsel %vm7860_vm8, 0, %v490_v12  ;;  %442 = vst [vmem:[#allocation2 + $0x48] sm:$0x1] %v441_v31 }
  0x8a   : > { %7168 = vmatmul.mubr.bf16.gmra.mxu0 %v6284_v34  ;;  %v1432_v30 = vrot.slane %v1430_v15, 5  ;;  %492 = vst [vmem:[#allocation2 + $0x50] sm:$0x1] %v491_v33  ;;  %v6700_v40 = vpack.c.bf16 %v393_v27, %v393_v27  ;;  %v707_v45 = vshrl.u32 %v6699_v36, 16  ;;  %v710_v46 = vshll.u32 %v6699_v36, 16 }
  0x8b   : > { %v1423_v38 = vsel %vm7841_vm3, %v1418_v61, %v1422_v25  ;;  %v1427_v39 = vor.u32 %v1426_v26, %v1422_v25  ;;  %v6780_v48 = vunpack.c.h.bf16 %v6902_v11  ;;  %v444_v20 = vsel %vm7849_vm5, 0, %v443_v28 }
  0x8c   : > { %v715_v37 = vshrl.u32 %v6700_v40, 16  ;;  %v718_v50 = vshll.u32 %v6700_v40, 16  ;;  %v323_v51 = vmul.f32 %v8109_v0, %v6779_v41  ;;  %445 = vst [vmem:[#allocation2 + $0x54] sm:$0x1] %v444_v20  ;;  %v709_v53 = vrot.slane %v707_v45, 7 }
  0x8d   : > { %v1428_v49 = vrot.slane %v1427_v39, 4  ;;  %v8227_v52 = vld [vmem:[#allocation2 + $0x9c] sm:$0xf]  ;;  %v324_v54 = vmul.f32 %v8109_v0, %v6780_v48  ;;  %v494_v55 = vsel %vm7860_vm8, 0, %v493_v42  ;;  %v6807_v56 = vunpack.c.l.bf16 %v6909_v43  ;;  %v464_v40 = vld [vmem:[#allocation2 + $0xa8] sm:$0x1] }
  0x8e   : > { %v8229_v44 = vld [vmem:[#allocation2 + $0xa0] sm:$0xf]  ;;  %v1435_v58 = vshrl.u32 %v8227_v52, 16  ;;  %v1438_v59 = vshll.u32 %v8227_v52, 16  ;;  %495 = vst [vmem:[#allocation2 + $0x5c] sm:$0x1] %v494_v55  ;;  %v712_v23 = vor.u32 %v710_v46, %v709_v53  ;;  %v362_v15 = vadd.f32 %v8120_v14, %v323_v51 }
  0x8f   : > { %v1433_v57 = vsel %vm7841_vm3, %v1428_v49, %v1432_v30  ;;  %v1444_v62 = vshll.u32 %v8229_v44, 16  ;;  %v8239_v21 = vld [vmem:[#allocation2 + $0xa4] sm:$0x1]  ;;  %v1448_v1 = vshrl.u32 %v8229_v44, 16  ;;  %v713_v2 = vrot.slane %v709_v53, 4  ;;  %v8254_v48 = vld [vmem:[%s7822_s7 + $0x70] sm:$0xff]  }
  0x90   : > { %v6291_v63 = vcombine.low %v1423_v38, %v1433_v57  ;;  %v1437_v4 = vrot.slane %v1435_v58, 4  ;;  %v1440_v5 = vrot.slane %v1438_v59, 5  ;;  %v1454_v8 = vshll.u32 %v8239_v21, 16  ;;  %v978_v34 = vld [vmem:[#allocation2 + $0x48] sm:$0xf] }
  0x91   : > { %v1446_v7 = vrot.slane %v1444_v62, 5  ;;  %v1450_v9 = vrot.slane %v1448_v1, 4  ;;  %v717_v12 = vrot.slane %v715_v37, 7  ;;  %v363_v16 = vadd.f32 %v8120_v14, %v324_v54  ;;  %v982_v25 = vld [vmem:[#allocation2 + $0x50] sm:$0x1] }
  0x92   : > { %7183 = vmatprep.mubr.bf16.mxu1 %v6291_v63  ;;  %v1441_v10 = vor.u32 %v1440_v5, %v1437_v4  ;;  %v1456_v11 = vrot.slane %v1454_v8, 5  ;;  %v979_v61 = vsel %vm7906_vm11, %v712_v23, %v978_v34  ;;  %v6808_v26 = vunpack.c.h.bf16 %v6909_v43  ;;  %v514_v46 = vld [vmem:[#allocation2 + $0xb0] sm:$0x1] }
  0x93   : > { %v1451_v27 = vor.u32 %v1450_v9, %v1446_v7  ;;  %v720_v28 = vor.u32 %v718_v50, %v717_v12  ;;  %v722_v30 = vrot.slane %v717_v12, 4  ;;  %980 = vst [vmem:[#allocation2 + $0x48] sm:$0xf] %v979_v61  ;;  %v394_v31 = vmax.f32 %v362_v15, 0.0 }
  0x94   : > { %v1442_v33 = vrot.slane %v1441_v10, 4  ;;  %v395_v36 = vmax.f32 %v363_v16, 0.0  ;;  %v337_v38 = vmul.f32 %v8109_v0, %v6807_v56  ;;  %v338_v39 = vmul.f32 %v8109_v0, %v6808_v26  ;;  %v467_v56 = vld [vmem:[#allocation2 + $0xb4] sm:$0x1] }
  0x95   : > { %v1452_v41 = vrot.slane %v1451_v27, 4  ;;  %v721_v42 = vsel %vm7897_vm10, %v713_v2, %v720_v28  ;;  %v983_v43 = vsel %vm7849_vm5, %v722_v30, %v982_v25  ;;  %v6701_v45 = vpack.c.bf16 %v394_v31, %v394_v31  ;;  %v989_v25 = vld [vmem:[#allocation2 + $0x5c] sm:$0x1] }
  0x96   : > { %v1447_v20 = vsel %vm7841_vm3, %v1442_v33, %v1446_v7  ;;  %981 = vst [vmem:[#allocation2 + $0x4c] sm:$0xf] %v721_v42  ;;  %984 = vst [vmem:[#allocation2 + $0x50] sm:$0x1] %v983_v43  ;;  %v6702_v49 = vpack.c.bf16 %v395_v36, %v395_v36  ;;  %v376_v37 = vadd.f32 %v8120_v14, %v337_v38  ;;  %v465_v55 = vsel %vm7849_vm5, 0, %v464_v40 }
  0x97   : > { %v377_v50 = vadd.f32 %v8120_v14, %v338_v39  ;;  %v1457_v51 = vsel %vm7841_vm3, %v1452_v41, %v1456_v11  ;;  %v724_v53 = vshrl.u32 %v6701_v45, 16  ;;  %v727_v54 = vshll.u32 %v6701_v45, 16  ;;  %466 = vst [vmem:[#allocation2 + $0xa8] sm:$0x1] %v465_v55  ;;  %v985_v7 = vld [vmem:[#allocation2 + $0x54] sm:$0xf] }
  0x98   : > { %v6292_v57 = vcombine.low %v1447_v20, %v1457_v51  ;;  %v732_v58 = vshrl.u32 %v6702_v49, 16  ;;  %v735_v59 = vshll.u32 %v6702_v49, 16  ;;  %v408_v62 = vmax.f32 %v376_v37, 0.0  ;;  %v517_v49 = vld [vmem:[#allocation2 + $0xbc] sm:$0x1] }
  0x99   : > { %v726_v63 = vrot.slane %v724_v53, 7  ;;  %v409_v1 = vmax.f32 %v377_v50, 0.0  ;;  %v515_v23 = vsel %vm7860_vm8, 0, %v514_v46  ;;  %v6811_v2 = vunpack.c.l.bf16 %v8254_v48 }
  0x9a   : > { %7184 = vmatmul.mubr.bf16.gmra.mxu1 %v6292_v57  ;;  %v8267_v4 = vld [vmem:[#allocation2 + $0x48] sm:$0xf]  ;;  %v734_v5 = vrot.slane %v732_v58, 7  ;;  %516 = vst [vmem:[#allocation2 + $0xb0] sm:$0x1] %v515_v23  ;;  %v6715_v8 = vpack.c.bf16 %v408_v62, %v408_v62  ;;  %v6812_v9 = vunpack.c.h.bf16 %v8254_v48  ;;  %v468_v12 = vsel %vm7849_vm5, 0, %v467_v56 }
  0x9b   : > { %v1267_v34 = vshrl.u32 %v8267_v4, 16  ;;  %v1270_v15 = vshll.u32 %v8267_v4, 16  ;;  %v729_v16 = vor.u32 %v727_v54, %v726_v63  ;;  %v730_v10 = vrot.slane %v726_v63, 4  ;;  %469 = vst [vmem:[#allocation2 + $0xb4] sm:$0x1] %v468_v12 }
  0x9c   : > { %v737_v11 = vor.u32 %v735_v59, %v734_v5  ;;  %v739_v61 = vrot.slane %v734_v5, 4  ;;  %v6716_v26 = vpack.c.bf16 %v409_v1, %v409_v1  ;;  %v843_v27 = vshrl.u32 %v6715_v8, 16  ;;  %v2101_v1 = vld [vmem:[#allocation2] sm:$0xe] }
  0x9d   : > { %v8274_v28 = vld [vmem:[#allocation2 + $0x4c] sm:$0xf]  ;;  %v8276_v30 = vld [vmem:[#allocation2 + $0x50] sm:$0x1]  ;;  %v1269_v31 = vrot.slane %v1267_v34, 4  ;;  %v1272_v33 = vrot.slane %v1270_v15, 5  ;;  %v986_v36 = vsel %vm7906_vm11, %v729_v16, %v985_v7  ;;  %v339_v38 = vmul.f32 %v8109_v0, %v6811_v2 }
  0x9e   : > { %v1276_v39 = vshll.u32 %v8274_v28, 16  ;;  %v1280_v40 = vshrl.u32 %v8274_v28, 16  ;;  %v1286_v41 = vshll.u32 %v8276_v30, 16  ;;  %v738_v42 = vsel %vm7897_vm10, %v730_v10, %v737_v11  ;;  %987 = vst [vmem:[#allocation2 + $0x54] sm:$0xf] %v986_v36 }
  0x9f   : > { %v1273_v43 = vor.u32 %v1272_v33, %v1269_v31  ;;  %988 = vst [vmem:[#allocation2 + $0x58] sm:$0xf] %v738_v42  ;;  %v990_v45 = vsel %vm7849_vm5, %v739_v61, %v989_v25  ;;  %v845_v46 = vrot.slane %v843_v27, 7  ;;  %v846_v48 = vshll.u32 %v6715_v8, 16  ;;  %v1034_v20 = vld [vmem:[#allocation2 + $0xa8] sm:$0xf] }
  0xa0   : > { %v1278_v37 = vrot.slane %v1276_v39, 5  ;;  %v1282_v50 = vrot.slane %v1280_v40, 4  ;;  %v1288_v51 = vrot.slane %v1286_v41, 5  ;;  %991 = vst [vmem:[#allocation2 + $0x5c] sm:$0x1] %v990_v45  ;;  %v851_v53 = vshrl.u32 %v6716_v26, 16 }
  0xa1   : > { %v1274_v54 = vrot.slane %v1273_v43, 4  ;;  %v848_v55 = vor.u32 %v846_v48, %v845_v46  ;;  %v849_v56 = vrot.slane %v845_v46, 4  ;;  %v854_v57 = vshll.u32 %v6716_v26, 16  ;;  %v1038_v5 = vld [vmem:[#allocation2 + $0xb0] sm:$0x1] }
  0xa2   : > { %v1283_v58 = vor.u32 %v1282_v50, %v1278_v37  ;;  %v853_v59 = vrot.slane %v851_v53, 7  ;;  %v340_v62 = vmul.f32 %v8109_v0, %v6812_v9  ;;  %v378_v63 = vadd.f32 %v8120_v14, %v339_v38  ;;  %v8299_v10 = vld [vmem:[#allocation2 + $0x4] sm:$0xf]  ;;  %v7723_v46 = vld [vmem:[#allocation2 + $0x8] sm:$0x1] }
  0xa3   : > { %v1279_v23 = vsel %vm7841_vm3, %v1274_v54, %v1278_v37  ;;  %v1035_v2 = vsel %vm7906_vm11, %v848_v55, %v1034_v20  ;;  %v518_v7 = vsel %vm7860_vm8, 0, %v517_v49  ;;  %v6327_v16 = vrot.slane %v2101_v1, 9 }
  0xa4   : > { %v1284_v8 = vrot.slane %v1283_v58, 4  ;;  %v856_v12 = vor.u32 %v854_v57, %v853_v59  ;;  %v858_v34 = vrot.slane %v853_v59, 4  ;;  %1036 = vst [vmem:[#allocation2 + $0xa8] sm:$0xf] %v1035_v2  ;;  %v379_v0 = vadd.f32 %v8120_v14, %v340_v62  ;;  %519 = vst [vmem:[#allocation2 + $0xbc] sm:$0x1] %v518_v7 }
  0xa5   : > { %v8297_v9 = vld [vmem:[#allocation2 + $0x54] sm:$0xf]  ;;  %v410_v15 = vmax.f32 %v378_v63, 0.0  ;;  %v2154_v11 = vrot.slane %v8299_v10, 5  ;;  %v2157_v48 = vrot.slane %v7723_v46, 5  ;;  %v3024_v29 = vshll.u32 %v2972_v18, 16 }
  0xa6   : > { %v1289_v61 = vsel %vm7841_vm3, %v1284_v8, %v1288_v51  ;;  %v8304_v25 = vld [vmem:[#allocation2 + $0x58] sm:$0xf]  ;;  %v1291_v26 = vshrl.u32 %v8297_v9, 16  ;;  %v1294_v27 = vshll.u32 %v8297_v9, 16  ;;  %v857_v14 = vsel %vm7897_vm10, %v849_v56, %v856_v12  ;;  %v1041_v8 = vld [vmem:[#allocation2 + $0xb4] sm:$0xf] }
  0xa7   : > { %v6285_v31 = vcombine.low %v1279_v23, %v1289_v61  ;;  %v8310_v33 = vld [vmem:[#allocation2 + $0x5c] sm:$0x1]  ;;  %v1300_v36 = vshll.u32 %v8304_v25, 16  ;;  %v1304_v38 = vshrl.u32 %v8304_v25, 16  ;;  %1037 = vst [vmem:[#allocation2 + $0xac] sm:$0xf] %v857_v14  ;;  %v1039_v39 = vsel %vm7849_vm5, %v858_v34, %v1038_v5 }
  0xa8   : > { %v1293_v41 = vrot.slane %v1291_v26, 4  ;;  %v1296_v42 = vrot.slane %v1294_v27, 5  ;;  %v1310_v43 = vshll.u32 %v8310_v33, 16  ;;  %1040 = vst [vmem:[#allocation2 + $0xb0] sm:$0x1] %v1039_v39  ;;  %v411_v45 = vmax.f32 %v379_v0, 0.0 }
  0xa9   : > { %7171 = vmatprep.mubr.bf16.mxu0 %v6285_v31  ;;  %v1302_v20 = vrot.slane %v1300_v36, 5  ;;  %v1306_v49 = vrot.slane %v1304_v38, 4  ;;  %v6717_v37 = vpack.c.bf16 %v410_v15, %v410_v15  ;;  %v2155_v53 = vsel %vm8318_vm14, %v6327_v16, %v2154_v11  ;;  %v2102_v61 = vld [vmem:[#allocation2 + $0xc] sm:$0xe] }
  0xaa   : > { %v1297_v50 = vor.u32 %v1296_v42, %v1293_v41  ;;  %v6718_v51 = vpack.c.bf16 %v411_v45, %v411_v45  ;;  %v2156_v54 = vrot.slane %v2154_v11, 4  ;;  %v1312_v56 = vrot.slane %v1310_v43, 5 }
  0xab   : > { %v1307_v55 = vor.u32 %v1306_v49, %v1302_v20  ;;  %v8325_v57 = vld [vmem:[#allocation2 + $0xa8] sm:$0xf]  ;;  %v860_v58 = vshrl.u32 %v6717_v37, 16  ;;  %v863_v59 = vshll.u32 %v6717_v37, 16  ;;  %v1045_v43 = vld [vmem:[#allocation2 + $0xbc] sm:$0x1] }
  0xac   : > { %10539 = vst [vmem:[#allocation7_spill] sm:$0xff] %v8325_v57  ;;  %v1298_v62 = vrot.slane %v1297_v50, 4  ;;  %v1459_v63 = vshrl.u32 %v8325_v57, 16  ;;  %v1462_v1 = vshll.u32 %v8325_v57, 16  ;;  %v868_v23 = vshrl.u32 %v6718_v51, 16 }
  0xad   : > { %v1308_v2 = vrot.slane %v1307_v55, 4  ;;  %v862_v5 = vrot.slane %v860_v58, 7  ;;  %v871_v7 = vshll.u32 %v6718_v51, 16  ;;  %v2158_v12 = vsel %vm8318_vm14, %v2156_v54, %v2157_v48  ;;  %v2103_v49 = vld [vmem:[#allocation2 + $0x18] sm:$0xe] }
  0xae   : > { %v1303_v34 = vsel %vm7841_vm3, %v1298_v62, %v1302_v20  ;;  %v8333_v0 = vld [vmem:[#allocation2 + $0xac] sm:$0xf]  ;;  %v1461_v15 = vrot.slane %v1459_v63, 4  ;;  %v1464_v16 = vrot.slane %v1462_v1, 5  ;;  %v870_v11 = vrot.slane %v868_v23, 7 }
  0xaf   : > { %10540 = vst [vmem:[#allocation8_spill] sm:$0xff] %v8333_v0  ;;  %v1313_v26 = vsel %vm7841_vm3, %v1308_v2, %v1312_v56  ;;  %v8337_v27 = vld [vmem:[#allocation2 + $0xb0] sm:$0x1]  ;;  %v1468_v14 = vshll.u32 %v8333_v0, 16  ;;  %v1472_v31 = vshrl.u32 %v8333_v0, 16  ;;  %v865_v36 = vor.u32 %v863_v59, %v862_v5 }
  0xb0   : > { %v6286_v38 = vcombine.low %v1303_v34, %v1313_v26  ;;  %v1465_v39 = vor.u32 %v1464_v16, %v1461_v15  ;;  %v1478_v41 = vshll.u32 %v8337_v27, 16  ;;  %v866_v42 = vrot.slane %v862_v5, 4  ;;  %v2104_v62 = vld [vmem:[#allocation2 + $0x24] sm:$0xe]  ;;  %v7724_v63 = vld [vmem:[#allocation2 + $0x14] sm:$0x1] }
  0xb1   : > { %v1470_v45 = vrot.slane %v1468_v14, 5  ;;  %v1474_v46 = vrot.slane %v1472_v31, 4  ;;  %v873_v48 = vor.u32 %v871_v7, %v870_v11  ;;  %v875_v20 = vrot.slane %v870_v11, 4  ;;  %v8348_v23 = vld [vmem:[#allocation2 + $0x10] sm:$0xf] }
  0xb2   : > { %7172 = vmatmul.mubr.bf16.gmra.mxu0 %v6286_v38  ;;  %v1466_v37 = vrot.slane %v1465_v39, 4  ;;  %v1480_v50 = vrot.slane %v1478_v41, 5  ;;  %v1042_v51 = vsel %vm7906_vm11, %v865_v36, %v1041_v8  ;;  %v6359_v54 = vcombine.low %v2155_v53, %v2158_v12  ;;  %v2105_v5 = vld [vmem:[#allocation2 + $0x30] sm:$0xe]  ;;  %v8353_v12 = vld [vmem:[#allocation2 + $0x1c] sm:$0xf] }
  0xb3   : > { %v1475_v55 = vor.u32 %v1474_v46, %v1470_v45  ;;  %v874_v56 = vsel %vm7897_vm10, %v866_v42, %v873_v48  ;;  %1043 = vst [vmem:[#allocation2 + $0xb4] sm:$0xf] %v1042_v51  ;;  %v1046_v58 = vsel %vm7849_vm5, %v875_v20, %v1045_v43  ;;  %v6328_v59 = vrot.slane %v2102_v61, 9  ;;  %v7727_v15 = vld [vmem:[#allocation2 + $0x20] sm:$0x1] }
  0xb4   : > { %v2164_v1 = vrot.slane %v7724_v63, 5  ;;  %1044 = vst [vmem:[#allocation2 + $0xb8] sm:$0xf] %v874_v56  ;;  %1047 = vst [vmem:[#allocation2 + $0xbc] sm:$0x1] %v1046_v58  ;;  %7255 = vmatprep.mubr.bf16.mxu0 %v6359_v54  ;;  %v2161_v2 = vrot.slane %v8348_v23, 5  ;;  %v1471_v7 = vsel %vm7841_vm3, %v1466_v37, %v1470_v45 }
  0xb5   : > { %v6329_v53 = vrot.slane %v2103_v49, 9  ;;  %v1476_v8 = vrot.slane %v1475_v55, 4  ;;  %v2168_v34 = vrot.slane %v8353_v12, 5  ;;  %v2171_v16 = vrot.slane %v7727_v15, 5  ;;  %v8358_v14 = vld [vmem:[#allocation2 + $0x28] sm:$0xf] }
  0xb6   : > { %v2162_v11 = vsel %vm8318_vm14, %v6328_v59, %v2161_v2  ;;  %v2163_v61 = vrot.slane %v2161_v2, 4  ;;  %v6330_v26 = vrot.slane %v2104_v62, 9  ;;  %v2175_v31 = vrot.slane %v8358_v14, 5  ;;  %v7729_v41 = vld [vmem:[#allocation2 + $0x2c] sm:$0x1]  ;;  %v7631_v49 = vld [vmem:[%s10503_s3 + $0x130] sm:$0xff]  }
  0xb7   : > { %v1481_v36 = vsel %vm7841_vm3, %v1476_v8, %v1480_v50  ;;  %v2169_v38 = vsel %vm8318_vm14, %v6329_v53, %v2168_v34  ;;  %v2170_v39 = vrot.slane %v2168_v34, 4  ;;  %v2178_v42 = vrot.slane %v7729_v41, 5  ;;  %v2106_v56 = vld [vmem:[#allocation2 + $0x3c] sm:$0xe]  ;;  %v8386_v53 = vld [vmem:[#allocation2 + $0x68] sm:$0x1] }
  0xb8   : > { %v6293_v43 = vcombine.low %v1471_v7, %v1481_v36  ;;  %v2165_v45 = vsel %vm8318_vm14, %v2163_v61, %v2164_v1  ;;  %v2177_v46 = vrot.slane %v2175_v31, 4  ;;  %v6331_v37 = vrot.slane %v2105_v5, 9  ;;  %v7731_v34 = vld [vmem:[%s10503_s3 + $0x138] sm:$0xff]   ;;  %v2107_v15 = vld [vmem:[#allocation2 + $0x48] sm:$0xe] }
  0xb9   : > { %v6360_v48 = vcombine.low %v2162_v11, %v2165_v45  ;;  %v2172_v20 = vsel %vm8318_vm14, %v2170_v39, %v2171_v16  ;;  %v2182_v54 = vrot.slane %v8152_v19, 5  ;;  %v2185_v55 = vrot.slane %v8154_v32, 5 }
  0xba   : > { %7187 = vmatprep.mubr.bf16.mxu1 %v6293_v43  ;;  %v8372_v50 = vld [vmem:[#allocation2 + $0xb4] sm:$0xf]  ;;  %v6361_v51 = vcombine.low %v2169_v38, %v2172_v20  ;;  %v2176_v1 = vsel %vm8318_vm14, %v6330_v26, %v2175_v31  ;;  %v2179_v2 = vsel %vm8318_vm14, %v2177_v46, %v2178_v42  ;;  %v2213_v32 = vrot.slane %v8386_v53, 5  ;;  %v7635_v31 = vld [vmem:[%s10503_s3 + $0x128] sm:$0xff]  }
  0xbb   : > { %10541 = vst [vmem:[#allocation9_spill] sm:$0xff] %v8372_v50  ;;  %v8376_v58 = vld [vmem:[#allocation2 + $0xb8] sm:$0xf]  ;;  %v8378_v59 = vld [vmem:[#allocation2 + $0xbc] sm:$0x1]  ;;  %v1483_v62 = vshrl.u32 %v8372_v50, 16  ;;  %7256 = vmatmul.mubr.bf16.vlgmr.msra.gmra.mxu0 %v6360_v48  ;;  %v2183_v61 = vsel %vm8318_vm14, %v6331_v37, %v2182_v54  ;;  %v6362_v39 = vcombine.low %v2176_v1, %v2179_v2 }
  0xbc   : > { %10542 = vst [vmem:[#allocation10_spill] sm:$0xff] %v8376_v58  ;;  %v1486_v63 = vshll.u32 %v8372_v50, 16  ;;  %v1492_v5 = vshll.u32 %v8376_v58, 16  ;;  %v1496_v7 = vshrl.u32 %v8376_v58, 16  ;;  %v1502_v8 = vshll.u32 %v8378_v59, 16  ;;  %7336 = vmatpush3.bf16.msra.mxu0 %v7731_v34  ;;  %7259 = vmatprep.mubr.bf16.mxu0 %v6361_v51  ;;  %v7639_v48 = vld [vmem:[%s10503_s3 + $0x120] sm:$0xff]  }
  0xbd   : > { %v1485_v16 = vrot.slane %v1483_v62, 4  ;;  %7337 = vmatprep.subr.bf16.mxu0 %v7631_v49  ;;  %v2184_v26 = vrot.slane %v2182_v54, 4  ;;  %v2189_v41 = vrot.slane %v8180_v17, 5  ;;  %v6332_v45 = vrot.slane %v2106_v56, 9  ;;  %v2108_v62 = vld [vmem:[#allocation2 + $0x54] sm:$0xe] }
  0xbe   : > { %v1488_v11 = vrot.slane %v1486_v63, 5  ;;  %v1494_v36 = vrot.slane %v1492_v5, 5  ;;  %v1498_v38 = vrot.slane %v1496_v7, 4  ;;  %v2192_v46 = vrot.slane %v8182_v24, 5  ;;  %v2109_v63 = vld [vmem:[#allocation2 + $0x60] sm:$0xe] }
  0xbf   : > { %v2186_v43 = vsel %vm8318_vm14, %v2184_v26, %v2185_v55  ;;  %v1504_v37 = vrot.slane %v1502_v8, 5  ;;  %v2191_v54 = vrot.slane %v2189_v41, 4  ;;  %v6333_v2 = vrot.slane %v2107_v15, 9  ;;  %v7732_v24 = vld [vmem:[#allocation2] sm:$0xf] }
  0xc0   : > { %v1489_v42 = vor.u32 %v1488_v11, %v1485_v16  ;;  %v1499_v20 = vor.u32 %v1498_v38, %v1494_v36  ;;  %7338 = vmatpush3.bf16.msra.mxu0 %v7631_v49  ;;  %v6363_v51 = vcombine.low %v2183_v61, %v2186_v43  ;;  %v2196_v5 = vrot.slane %v8274_v28, 5  ;;  %v8410_v34 = vld [vmem:[#allocation2 + $0xc] sm:$0xf]  ;;  %v8429_v43 = vld [vmem:[#allocation2 + $0x64] sm:$0xf] }
  0xc1   : > { %7339 = vmatprep.subr.bf16.mxu0 %v7635_v31  ;;  %v2199_v55 = vrot.slane %v8276_v30, 5  ;;  %v6303_v7 = vcombine.low %v7732_v24, %v8299_v10  ;;  %v6304_v49 = vcombine.low %v8410_v34, %v8348_v23  ;;  %v2190_v15 = vsel %vm8318_vm14, %v6332_v45, %v2189_v41  ;;  %v8447_v24 = vld [vmem:[#allocation2 + $0x30] sm:$0xf]  ;;  %v7748_v23 = vld [vmem:[%s10503_s3 + $0xf8] sm:$0xff]   ;;  %v8627_v50 = vld [vmem:[#allocation2 + $0x28] sm:$0xf] }
  0xc2   : > { %v1490_v1 = vrot.slane %v1489_v42, 4  ;;  %v1500_v56 = vrot.slane %v1499_v20, 4  ;;  %v2193_v30 = vsel %vm8318_vm14, %v2191_v54, %v2192_v46  ;;  %v2198_v11 = vrot.slane %v2196_v5, 4  ;;  %v8435_v46 = vld [vmem:[#allocation2 + $0x18] sm:$0xf] }
  0xc3   : > { %7260 = vmatmul.mubr.bf16.gmra.mxu0 %v6362_v39  ;;  %v2197_v61 = vsel %vm8318_vm14, %v6333_v2, %v2196_v5  ;;  %v6334_v26 = vrot.slane %v2108_v62, 9  ;;  %v2203_v38 = vrot.slane %v8304_v25, 5  ;;  %v6335_v42 = vrot.slane %v2109_v63, 9  ;;  %v8444_v5 = vld [vmem:[#allocation2 + $0x70] sm:$0xf] }
  0xc4   : > { %v1495_v16 = vsel %vm7841_vm3, %v1490_v1, %v1494_v36  ;;  %v1505_v10 = vsel %vm7841_vm3, %v1500_v56, %v1504_v37  ;;  %7263 = vmatprep.mubr.bf16.mxu0 %v6363_v51  ;;  %7340 = vmatpush3.bf16.msra.mxu0 %v7635_v31  ;;  %v2110_v36 = vld [vmem:[#allocation2 + $0x6c] sm:$0xe]  ;;  %v2200_v41 = vsel %vm8318_vm14, %v2198_v11, %v2199_v55  ;;  %v2210_v45 = vrot.slane %v8429_v43, 5  ;;  %v7643_v31 = vld [vmem:[%s10503_s3 + $0x118] sm:$0xff]   ;;  %v8439_v37 = vld [vmem:[#allocation2 + $0x24] sm:$0xf] }
  0xc5   : > { %v6294_v39 = vcombine.low %v1495_v16, %v1505_v10  ;;  %7341 = vmatprep.subr.bf16.mxu0 %v7639_v48  ;;  %v2205_v54 = vrot.slane %v2203_v38, 4  ;;  %v2206_v62 = vrot.slane %v8310_v33, 5  ;;  %v6364_v63 = vcombine.low %v2190_v15, %v2193_v30  ;;  %v2111_v56 = vld [vmem:[#allocation2 + $0x78] sm:$0xe]  ;;  %v7739_v33 = vld [vmem:[#allocation2 + $0x74] sm:$0x1] }
  0xc6   : > { %v2212_v1 = vrot.slane %v2210_v45, 4  ;;  %v6336_v2 = vrot.slane %v2110_v36, 9  ;;  %v2217_v55 = vrot.slane %v8444_v5, 5  ;;  %v6365_v10 = vcombine.low %v2197_v61, %v2200_v41  ;;  %v2112_v30 = vld [vmem:[#allocation2 + $0x84] sm:$0xe] }
  0xc7   : > { %7188 = vmatmul.mubr.bf16.gmra.mxu1 %v6294_v39  ;;  %v2220_v15 = vrot.slane %v7739_v33, 5  ;;  %v8455_v36 = vsel %vm8318_vm14, %v6334_v26, %v2203_v38  ;;  %v8461_v39 = vsel %vm8318_vm14, %v6335_v42, %v2210_v45  ;;  %v8468_v61 = vsel %vm8318_vm14, %v2205_v54, %v2206_v62  ;;  %v8476_v41 = vld [vmem:[#allocation2 + $0x7c] sm:$0xf]  ;;  %v7741_v62 = vld [vmem:[#allocation2 + $0x80] sm:$0x1] }
  0xc8   : > { %7207 = vmatprep.mubr.bf16.mxu1 %v6303_v7  ;;  %7342 = vmatpush3.bf16.msra.mxu0 %v7639_v48  ;;  %v2219_v8 = vrot.slane %v2217_v55, 4  ;;  %v7647_v48 = vld [vmem:[%s10503_s3 + $0x110] sm:$0xff]   ;;  %v8474_v26 = vsel %vm8318_vm14, %v2212_v1, %v2213_v32  ;;  %v6337_v38 = vrot.slane %v2111_v56, 9  ;;  %v2224_v42 = vrot.slane %v8476_v41, 5  ;;  %v8487_v33 = vld [vmem:[#allocation2 + $0x88] sm:$0xf] }
  0xc9   : > { %7343 = vmatprep.subr.bf16.mxu0 %v7643_v31  ;;  %v8481_v45 = vsel %vm8318_vm14, %v6336_v2, %v2217_v55  ;;  %v2227_v53 = vrot.slane %v7741_v62, 5  ;;  %v2231_v32 = vrot.slane %v8487_v33, 5  ;;  %v8490_v1 = vld [vmem:[#allocation2 + $0x60] sm:$0xf]  ;;  %v6338_v2 = vrot.slane %v2112_v30, 9 }
  0xca   : > { %v8485_v54 = vsel %vm8318_vm14, %v2219_v8, %v2220_v15  ;;  %v2226_v56 = vrot.slane %v2224_v42, 4  ;;  %v7744_v55 = vld [vmem:[#allocation2 + $0x8c] sm:$0x1]  ;;  %v2113_v11 = vld [vmem:[#allocation2 + $0x90] sm:$0xe]  ;;  %v6366_v15 = vcombine.low %v8455_v36, %v8468_v61  ;;  %v8513_v61 = vsel %vm8318_vm14, %v6337_v38, %v2224_v42 }
  0xcb   : > { %7264 = vmatmul.mubr.bf16.gmra.mxu0 %v6364_v63  ;;  %v2234_v7 = vrot.slane %v7744_v55, 5  ;;  %v7629_v8 = vld [vmem:[%s10503_s3 + $0xf0] sm:$0xff]   ;;  %v8499_v62 = vld [vmem:[#allocation2 + $0x6c] sm:$0xf]  ;;  %v2233_v16 = vrot.slane %v2231_v32, 4  ;;  %v6367_v63 = vcombine.low %v8461_v39, %v8474_v26  ;;  %v6339_v51 = vrot.slane %v2113_v11, 9 }
  0xcc   : > { %7267 = vmatprep.mubr.bf16.mxu0 %v6365_v10  ;;  %7344 = vmatpush3.bf16.msra.mxu0 %v7643_v31  ;;  %v2238_v31 = vrot.slane %v8199_v60, 5  ;;  %v2114_v30 = vld [vmem:[#allocation2 + $0x9c] sm:$0xe]  ;;  %v7651_v55 = vld [vmem:[%s10503_s3 + $0x108] sm:$0xff]   ;;  %v8515_v10 = vld [vmem:[#allocation2 + $0x78] sm:$0xf]  ;;  %v8529_v26 = vsel %vm8318_vm14, %v2226_v56, %v2227_v53  ;;  %v10543_v34 = vcombine.low %v8435_v46, %v8353_v12 }
  0xcd   : > { %7345 = vmatprep.subr.bf16.mxu0 %v7647_v48  ;;  %v2115_v20 = vld [vmem:[#allocation2 + $0xa8] sm:$0xe]  ;;  %v8531_v38 = vld [vmem:[#allocation2 + $0x84] sm:$0xf]  ;;  %v2241_v36 = vrot.slane %v8209_v6, 5  ;;  %v8548_v53 = vsel %vm8318_vm14, %v2233_v16, %v2234_v7  ;;  %v2245_v6 = vrot.slane %v8229_v44, 5 }
  0xce   : > { %v8525_v39 = vld [vmem:[%s10503_s3 + $0xe8] sm:$0xff]   ;;  %v2240_v11 = vrot.slane %v2238_v31, 4  ;;  %v8551_v56 = vld [vmem:[#allocation2 + $0xb4] sm:$0xe]  ;;  %v6340_v12 = vrot.slane %v2114_v30, 9  ;;  %v6341_v46 = vrot.slane %v2115_v20, 9  ;;  %v8570_v30 = vsel %vm8318_vm14, %v6339_v51, %v2238_v31 }
  0xcf   : > { %7208 = vmatmul.mubr.bf16.vlgmr.msra.gmra.mxu1 %v6304_v49  ;;  %v8544_v49 = vsel %vm8318_vm14, %v6338_v2, %v2231_v32  ;;  %v7655_v32 = vld [vmem:[%s10503_s3 + $0x100] sm:$0xff]   ;;  %v8559_v16 = vld [vmem:[#allocation2 + $0x10] sm:$0xf]  ;;  %v2247_v2 = vrot.slane %v2245_v6, 4  ;;  %v2248_v42 = vrot.slane %v8239_v21, 5  ;;  %v2255_v13 = vrot.slane %v8337_v27, 5 }
  0xd0   : > { %7288 = vmatpush3.bf16.msra.mxu1 %v7748_v23  ;;  %7211 = vmatprep.mubr.bf16.mxu1 %v10543_v34  ;;  %v2252_v34 = vrot.slane %v8333_v0, 5  ;;  %10544 = vst [vmem:[#allocation11_spill] sm:$0xff] %v8559_v16  ;;  %v2975_v7 = vld [vmem:[#allocation2 + $0x18] sm:$0xf]  ;;  %v7637_v21 = vld [vmem:[%s10503_s3 + $0xe0] sm:$0xff]   ;;  %v3021_v31 = vshrl.u32 %v2972_v18, 16 }
  0xd1   : > { %7289 = vmatprep.subr.bf16.mxu1 %v7629_v8  ;;  %7346 = vmatpush3.bf16.msra.mxu0 %v7647_v48  ;;  %v8584_v27 = vld [vmem:[#allocation2 + $0x1c] sm:$0xf]  ;;  %v8597_v48 = vld [vmem:[#allocation2 + $0x20] sm:$0x1]  ;;  %v8601_v51 = vsel %vm8318_vm14, %v2247_v2, %v2248_v42  ;;  %v2262_v18 = vrot.slane %v8378_v59, 5 }
  0xd2   : > { %7347 = vmatprep.subr.bf16.mxu0 %v7651_v55  ;;  %v2254_v23 = vrot.slane %v2252_v34, 4  ;;  %v3023_v20 = vrot.slane %v3021_v31, 4  ;;  %v2978_v2 = vld [vmem:[#allocation2 + $0x24] sm:$0xf]  ;;  %v10546_v31 = vcombine.low %v8447_v24, %v8152_v19  ;;  %v3058_v19 = vshrl.u32 %v8584_v27, 16 }
  0xd3   : > { %7268 = vmatmul.mubr.bf16.gmra.mxu0 %v6366_v15  ;;  %v8578_v15 = vsel %vm8318_vm14, %v2240_v11, %v2241_v36  ;;  %v6342_v36 = vrot.slane %v8551_v56, 9  ;;  %v2259_v11 = vrot.slane %v8376_v58, 5  ;;  %v10545_v56 = vcombine.low %v8439_v37, %v8358_v14 }
  0xd4   : > { %7290 = vmatpush3.bf16.msra.mxu1 %v7629_v8  ;;  %7271 = vmatprep.mubr.bf16.mxu0 %v6367_v63  ;;  %v8589_v8 = vsel %vm8318_vm14, %v6340_v12, %v2245_v6  ;;  %v8593_v63 = vsel %vm8318_vm14, %v6341_v46, %v2252_v34  ;;  %v3030_v6 = vshll.u32 %v8559_v16, 16  ;;  %v7641_v12 = vld [vmem:[%s10503_s3 + $0xd8] sm:$0xff]   ;;  %v8617_v42 = vsel %vm8318_vm14, %v2254_v23, %v2255_v13 }
  0xd5   : > { %7291 = vmatprep.subr.bf16.mxu1 %v8525_v39  ;;  %7348 = vmatpush3.bf16.msra.mxu0 %v7651_v55  ;;  %v8607_v55 = vld [vmem:[%s10503_s3 + $0x1b8] sm:$0xff]   ;;  %v3034_v46 = vshrl.u32 %v8559_v16, 16  ;;  %v3045_v34 = vshrl.u32 %v2975_v7, 16  ;;  %v3026_v14 = vrot.slane %v3024_v29, 5  ;;  %v3048_v58 = vshll.u32 %v2975_v7, 16 }
  0xd6   : > { %7349 = vmatprep.subr.bf16.mxu0 %v7655_v32  ;;  %v8625_v37 = vrot.slane %v3030_v6, 5  ;;  %v2261_v13 = vrot.slane %v2259_v11, 4  ;;  %v3054_v16 = vshll.u32 %v8584_v27, 16  ;;  %v3064_v24 = vshll.u32 %v8597_v48, 16 }
  0xd7   : > { %7212 = vmatmul.mubr.bf16.gmra.mxu1 %v10545_v56  ;;  %v3040_v56 = vshll.u32 %v2974_v35, 16  ;;  %v3036_v59 = vrot.slane %v3034_v46, 4  ;;  %v3047_v23 = vrot.slane %v3045_v34, 4  ;;  %v3027_v0 = vor.u32 %v3026_v14, %v3023_v20  ;;  %v7645_v20 = vld [vmem:[%s10503_s3 + $0xd0] sm:$0xff]  }
  0xd8   : > { %7215 = vmatprep.mubr.bf16.mxu1 %v10546_v31  ;;  %7292 = vmatpush3.bf16.msra.mxu1 %v8525_v39  ;;  %v3050_v57 = vrot.slane %v3048_v58, 5  ;;  %v10547_v29 = vcombine.low %v8481_v45, %v8485_v54  ;;  %v8637_v39 = vrot.slane %v3054_v16, 5  ;;  %v3072_v7 = vshll.u32 %v2978_v2, 16  ;;  %v2981_v54 = vld [vmem:[#allocation2 + $0x30] sm:$0xf] }
  0xd9   : > { %7293 = vmatprep.subr.bf16.mxu1 %v7637_v21  ;;  %7350 = vmatpush3.bf16.msra.mxu0 %v7655_v32  ;;  %v3037_v35 = vor.u32 %v3036_v59, %v8625_v37  ;;  %v3069_v32 = vshrl.u32 %v2978_v2, 16  ;;  %v10548_v58 = vcombine.low %v8513_v61, %v8529_v26  ;;  %v3028_v6 = vrot.slane %v3027_v0, 4  ;;  %v8645_v16 = vld [vmem:[#allocation2 + $0x2c] sm:$0x1]  ;;  %v8648_v59 = vld [vmem:[#allocation2 + $0x34] sm:$0xf] }
  0xda   : > { %7431 = vmatprep.subr.bf16.mxu0 %v8607_v55  ;;  %v3042_v46 = vrot.slane %v3040_v56, 5  ;;  %v3051_v34 = vor.u32 %v3050_v57, %v3047_v23  ;;  %v3060_v45 = vrot.slane %v3058_v19, 4  ;;  %v3074_v2 = vrot.slane %v3072_v7, 5 }
  0xdb   : > { %7272 = vmatmul.mubr.bf16.gmra.mxu0 %v10547_v29  ;;  %v3038_v31 = vrot.slane %v3037_v35, 4  ;;  %v3071_v14 = vrot.slane %v3069_v32, 4  ;;  %v6371_v61 = vcombine.low %v8570_v30, %v8578_v15  ;;  %v6372_v0 = vcombine.low %v8589_v8, %v8601_v51  ;;  %v8671_v29 = vld [vmem:[#allocation2 + $0x38] sm:$0x1] }
  0xdc   : > { %7294 = vmatpush3.bf16.msra.mxu1 %v7637_v21  ;;  %7275 = vmatprep.mubr.bf16.mxu0 %v10548_v58  ;;  %v3078_v21 = vshll.u32 %v8627_v50, 16  ;;  %v3061_v57 = vor.u32 %v3060_v45, %v8637_v39  ;;  %v3082_v26 = vshrl.u32 %v8627_v50, 16  ;;  %v10549_v56 = vcombine.low %v8174_v3, %v8180_v17 }
  0xdd   : > { %7295 = vmatprep.subr.bf16.mxu1 %v7641_v12  ;;  %v6373_v23 = vcombine.low %v8593_v63, %v8617_v42  ;;  %v8663_v19 = vsel %vm8318_vm14, %v6342_v36, %v2259_v11  ;;  %v8667_v30 = vsel %vm8318_vm14, %v2261_v13, %v2262_v18  ;;  %v8669_v15 = vrot.slane %v3064_v24, 5  ;;  %v2984_v18 = vld [vmem:[#allocation2 + $0x3c] sm:$0xf]  ;;  %v8683_v13 = vld [vmem:[#allocation2 + $0x40] sm:$0xf] }
  0xde   : > { %v10550_v35 = vcombine.low %v8267_v4, %v8274_v28  ;;  %v3033_v3 = vsel %vm7841_vm3, %v3028_v6, %v8625_v37  ;;  %v3043_v17 = vsel %vm7841_vm3, %v3038_v31, %v3042_v46  ;;  %v8681_v36 = vrot.slane %v3078_v21, 5  ;;  %v7649_v4 = vld [vmem:[%s10503_s3 + $0xc8] sm:$0xff]   ;;  %v2993_v42 = vld [vmem:[#allocation2 + $0x60] sm:$0xf] }
  0xdf   : > { %7216 = vmatmul.mubr.bf16.gmra.mxu1 %v10549_v56  ;;  %v3084_v11 = vrot.slane %v3082_v26, 4  ;;  %v3052_v28 = vrot.slane %v3051_v34, 4  ;;  %v3093_v24 = vshrl.u32 %v2981_v54, 16  ;;  %v3096_v32 = vshll.u32 %v2981_v54, 16  ;;  %v2987_v26 = vld [vmem:[#allocation2 + $0x48] sm:$0xf] }
  0xe0   : > { %7219 = vmatprep.mubr.bf16.mxu1 %v10550_v35  ;;  %7296 = vmatpush3.bf16.msra.mxu1 %v7641_v12  ;;  %v3075_v12 = vor.u32 %v3074_v2, %v3071_v14  ;;  %v3062_v7 = vrot.slane %v3061_v57, 4  ;;  %v3088_v37 = vshll.u32 %v8645_v16, 16  ;;  %v3102_v58 = vshll.u32 %v8648_v59, 16  ;;  %v8705_v56 = vld [vmem:[#allocation2 + $0x44] sm:$0x1] }
  0xe1   : > { %7297 = vmatprep.subr.bf16.mxu1 %v7645_v20  ;;  %v3106_v6 = vshrl.u32 %v8648_v59, 16  ;;  %v10551_v46 = vcombine.low %v8544_v49, %v8548_v53  ;;  %v8696_v31 = vcombine.low %v3033_v3, %v3043_v17  ;;  %v3095_v34 = vrot.slane %v3093_v24, 4  ;;  %v7653_v49 = vld [vmem:[%s10503_s3 + $0xc0] sm:$0xff]  }
  0xe2   : > { %v3098_v14 = vrot.slane %v3096_v32, 5  ;;  %v3085_v54 = vor.u32 %v3084_v11, %v8681_v36  ;;  %v8699_v2 = vrot.slane %v3102_v58, 5  ;;  %v3112_v57 = vshll.u32 %v8671_v29, 16  ;;  %v8715_v32 = vld [vmem:[#allocation2 + $0x4c] sm:$0xf] }
  0xe3   : > { %7276 = vmatmul.mubr.bf16.gmra.mxu0 %v10551_v46  ;;  %v3108_v21 = vrot.slane %v3106_v6, 4  ;;  %v3117_v35 = vshrl.u32 %v2984_v18, 16  ;;  %v3120_v3 = vshll.u32 %v2984_v18, 16  ;;  %v8711_v17 = vrot.slane %v3075_v12, 4  ;;  %v8728_v46 = vld [vmem:[#allocation2 + $0x50] sm:$0x1] }
  0xe4   : > { %7298 = vmatpush3.bf16.msra.mxu1 %v7645_v20  ;;  %7279 = vmatprep.mubr.bf16.mxu0 %v6371_v61  ;;  %v3099_v53 = vor.u32 %v3098_v14, %v3095_v34  ;;  %v3126_v20 = vshll.u32 %v8683_v13, 16  ;;  %v3057_v61 = vsel %vm7841_vm3, %v3052_v28, %v8637_v39  ;;  %v3130_v24 = vshrl.u32 %v8683_v13, 16  ;;  %v8726_v39 = vld [vmem:[%s10503_s3 + $0x178] sm:$0xff]  }
  0xe5   : > { %7299 = vmatprep.subr.bf16.mxu1 %v7649_v4  ;;  %v3109_v11 = vor.u32 %v3108_v21, %v8699_v2  ;;  %v10552_v58 = vcombine.low %v8297_v9, %v8304_v25  ;;  %v3067_v18 = vsel %vm7841_vm3, %v3062_v7, %v8669_v15  ;;  %v3090_v28 = vrot.slane %v3088_v37, 5  ;;  %v2990_v7 = vld [vmem:[#allocation2 + $0x54] sm:$0xf] }
  0xe6   : > { %v3119_v12 = vrot.slane %v3117_v35, 4  ;;  %v3122_v6 = vrot.slane %v3120_v3, 5  ;;  %v10553_v34 = vcombine.low %v8490_v1, %v8429_v43  ;;  %v3086_v9 = vrot.slane %v3085_v54, 4  ;;  %v8747_v3 = vld [vmem:[#allocation2 + $0x58] sm:$0xf] }
  0xe7   : > { %7220 = vmatmul.mubr.bf16.gmra.mxu1 %v10552_v58  ;;  %v3114_v25 = vrot.slane %v3112_v57, 5  ;;  %v8733_v14 = vrot.slane %v3126_v20, 5  ;;  %v3132_v15 = vrot.slane %v3130_v24, 4  ;;  %v3100_v21 = vrot.slane %v3099_v53, 4  ;;  %v8766_v24 = vld [vmem:[#allocation2 + $0x5c] sm:$0x1] }
  0xe8   : > { %7223 = vmatprep.mubr.bf16.mxu1 %v10553_v34  ;;  %7300 = vmatpush3.bf16.msra.mxu1 %v7649_v4  ;;  %v3110_v58 = vrot.slane %v3109_v11, 4  ;;  %v3141_v45 = vshrl.u32 %v2987_v26, 16  ;;  %v3144_v37 = vshll.u32 %v2987_v26, 16  ;;  %v8735_v35 = vcombine.low %v3057_v61, %v3067_v18 }
  0xe9   : > { %7301 = vmatprep.subr.bf16.mxu1 %v7653_v49  ;;  %v3081_v43 = vsel %vm7841_vm3, %v8711_v17, %v8681_v36  ;;  %v3136_v1 = vshll.u32 %v8705_v56, 16  ;;  %v3150_v4 = vshll.u32 %v8715_v32, 16  ;;  %v3123_v54 = vor.u32 %v3122_v6, %v3119_v12 }
  0xea   : > { %v3133_v57 = vor.u32 %v3132_v15, %v8733_v14  ;;  %v3143_v53 = vrot.slane %v3141_v45, 4  ;;  %v3146_v26 = vrot.slane %v3144_v37, 5  ;;  %v3091_v36 = vsel %vm7841_vm3, %v3086_v9, %v3090_v28 }
  0xeb   : > { %7280 = vmatmul.mubr.bf16.gmra.mxu0 %v6372_v0  ;;  %v8754_v20 = vrot.slane %v3150_v4, 5  ;;  %v3154_v51 = vshrl.u32 %v8715_v32, 16  ;;  %v3160_v8 = vshll.u32 %v8728_v46, 16  ;;  %v3105_v0 = vsel %vm7841_vm3, %v3100_v21, %v8699_v2  ;;  %v2996_v4 = vld [vmem:[#allocation2 + $0x6c] sm:$0xf] }
  0xec   : > { %7283 = vmatprep.mubr.bf16.mxu0 %v6373_v23  ;;  %7302 = vmatpush3.bf16.msra.mxu1 %v7653_v49  ;;  %v3147_v45 = vor.u32 %v3146_v26, %v3143_v53  ;;  %v3165_v61 = vshrl.u32 %v2990_v7, 16  ;;  %v3168_v63 = vshll.u32 %v2990_v7, 16  ;;  %v8762_v23 = vld [vmem:[#allocation2 + $0x64] sm:$0xf]  ;;  %v3115_v49 = vsel %vm7841_vm3, %v3110_v58, %v3114_v25  ;;  %v8779_v58 = vld [vmem:[#allocation2 + $0x68] sm:$0x1] }
  0xed   : > { %7383 = vmatprep.subr.bf16.mxu1 %v8726_v39  ;;  %v3138_v17 = vrot.slane %v3136_v1, 5  ;;  %v3156_v11 = vrot.slane %v3154_v51, 4  ;;  %v3174_v18 = vshll.u32 %v8747_v3, 16  ;;  %v10554_v28 = vcombine.low %v8499_v62, %v8444_v5 }
  0xee   : > { %v3124_v2 = vrot.slane %v3123_v54, 4  ;;  %v3134_v12 = vrot.slane %v3133_v57, 4  ;;  %v3167_v6 = vrot.slane %v3165_v61, 4  ;;  %v3170_v34 = vrot.slane %v3168_v63, 5  ;;  %v8792_v61 = vld [vmem:[#allocation2 + $0x70] sm:$0xf] }
  0xef   : > { %7224 = vmatmul.mubr.bf16.gmra.mxu1 %v10554_v28  ;;  %v10555_v9 = vcombine.low %v8515_v10, %v8476_v41  ;;  %v3157_v25 = vor.u32 %v3156_v11, %v8754_v20  ;;  %v3162_v15 = vrot.slane %v3160_v8, 5  ;;  %v8776_v7 = vrot.slane %v3174_v18, 5 }
  0xf0   : > { %v3178_v21 = vshrl.u32 %v8747_v3, 16  ;;  %v3148_v37 = vrot.slane %v3147_v45, 4  ;;  %v3171_v5 = vor.u32 %v3170_v34, %v3167_v6  ;;  %v3189_v62 = vshrl.u32 %v2993_v42, 16 }
  0xf1   : > { %7227 = vmatprep.mubr.bf16.mxu1 %v10555_v9  ;;  %v3192_v1 = vshll.u32 %v2993_v42, 16  ;;  %v6441_v54 = vcombine.low %v3081_v43, %v3091_v36  ;;  %v3158_v57 = vrot.slane %v3157_v25, 4  ;;  %v3198_v41 = vshll.u32 %v8762_v23, 16 }
  0xf2   : > { %v3180_v53 = vrot.slane %v3178_v21, 4  ;;  %v10556_v10 = vcombine.low %v8663_v19, %v8667_v30  ;;  %v8785_v26 = vcombine.low %v3105_v0, %v3115_v49  ;;  %v3129_v51 = vsel %vm7841_vm3, %v3124_v2, %v8733_v14  ;;  %v8806_v49 = vld [vmem:[#allocation2 + $0x74] sm:$0x1]  ;;  %v8810_v2 = vld [vmem:[#allocation2 + $0x7c] sm:$0xf] }
  0xf3   : > { %v3184_v8 = vshll.u32 %v8766_v24, 16  ;;  %v3202_v45 = vshrl.u32 %v8762_v23, 16  ;;  %v3139_v43 = vsel %vm7841_vm3, %v3134_v12, %v3138_v17  ;;  %v3191_v30 = vrot.slane %v3189_v62, 4 }
  0xf4   : > { %7284 = vmatmul.mubr.bf16.gmra.mxu0 %v10556_v10  ;;  %v3181_v19 = vor.u32 %v3180_v53, %v8776_v7  ;;  %v3194_v36 = vrot.slane %v3192_v1, 5  ;;  %v3153_v0 = vsel %vm7841_vm3, %v3148_v37, %v8754_v20  ;;  %v3163_v14 = vsel %vm7841_vm3, %v3158_v57, %v3162_v15  ;;  %v7663_v15 = vld [vmem:[%s10503_s3 + $0x1b0] sm:$0xff]  }
  0xf5   : > { %7351 = vmatprep.mubr.bf16.mxu0 %v8696_v31  ;;  %v8803_v63 = vrot.slane %v3171_v5, 4  ;;  %v3208_v42 = vshll.u32 %v8779_v58, 16  ;;  %v2999_v31 = vld [vmem:[#allocation2 + $0x78] sm:$0xf]  ;;  %v8808_v11 = vrot.slane %v3198_v41, 5  ;;  %v3204_v17 = vrot.slane %v3202_v45, 4 }
  0xf6   : > { %v3213_v18 = vshrl.u32 %v2996_v4, 16  ;;  %v3216_v28 = vshll.u32 %v2996_v4, 16  ;;  %v10557_v20 = vcombine.low %v8531_v38, %v8487_v33  ;;  %v8815_v12 = vcombine.low %v3129_v51, %v3139_v43  ;;  %v8829_v5 = vld [vmem:[#allocation2 + $0x80] sm:$0x1]  ;;  %v3002_v4 = vld [vmem:[#allocation2 + $0x84] sm:$0xf] }
  0xf7   : > { %v8817_v6 = vrot.slane %v3184_v8, 5  ;;  %v3222_v34 = vshll.u32 %v8792_v61, 16  ;;  %v3226_v9 = vshrl.u32 %v8792_v61, 16  ;;  %v10558_v25 = vcombine.low %v8191_v47, %v8199_v60  ;;  %v7667_v51 = vld [vmem:[%s10503_s3 + $0x1a8] sm:$0xff]  }
  0xf8   : > { %7228 = vmatmul.mubr.bf16.gmra.mxu1 %v10557_v20  ;;  %v8827_v21 = vrot.slane %v3181_v19, 4  ;;  %v3195_v33 = vor.u32 %v3194_v36, %v3191_v30  ;;  %v3215_v38 = vrot.slane %v3213_v18, 4  ;;  %v3218_v37 = vrot.slane %v3216_v28, 5 }
  0xf9   : > { %7231 = vmatprep.mubr.bf16.mxu1 %v10558_v25  ;;  %v8831_v62 = vcombine.low %v3153_v0, %v3163_v14  ;;  %v3177_v1 = vsel %vm7841_vm3, %v8803_v63, %v8776_v7  ;;  %v8837_v47 = vrot.slane %v3208_v42, 5  ;;  %v8839_v60 = vrot.slane %v3222_v34, 5  ;;  %v8857_v0 = vld [vmem:[#allocation2 + $0x88] sm:$0xf]  ;;  %v7671_v34 = vld [vmem:[%s10503_s3 + $0x1a0] sm:$0xff]  }
  0xfa   : > { %v3205_v57 = vor.u32 %v3204_v17, %v8808_v11  ;;  %v3228_v53 = vrot.slane %v3226_v9, 4  ;;  %v3232_v41 = vshll.u32 %v8806_v49, 16  ;;  %v3237_v10 = vshrl.u32 %v2999_v31, 16 }
  0xfb   : > { %v3219_v8 = vor.u32 %v3218_v37, %v3215_v38  ;;  %v3240_v45 = vshll.u32 %v2999_v31, 16  ;;  %v3246_v7 = vshll.u32 %v8810_v2, 16  ;;  %v3250_v43 = vshrl.u32 %v8810_v2, 16  ;;  %v3005_v31 = vld [vmem:[#allocation2 + $0x90] sm:$0xf]  ;;  %v10560_v38 = vld [vmem:[#allocation7_spill] sm:$0xff] }
  0xfc   : > { %7352 = vmatmul.mubr.bf16.vlgmr.msra.gmra.mxu0 %v8735_v35  ;;  %v3187_v19 = vsel %vm7841_vm3, %v8827_v21, %v8817_v6  ;;  %v8854_v30 = vrot.slane %v3195_v33, 4  ;;  %v3229_v35 = vor.u32 %v3228_v53, %v8839_v60  ;;  %v3239_v36 = vrot.slane %v3237_v10, 4  ;;  %v10561_v37 = vld [vmem:[#allocation8_spill] sm:$0xff] }
  0xfd   : > { %7432 = vmatpush3.bf16.msra.mxu0 %v8607_v55  ;;  %7355 = vmatprep.mubr.bf16.mxu0 %v6441_v54  ;;  %v3242_v14 = vrot.slane %v3240_v45, 5  ;;  %v8859_v63 = vrot.slane %v3246_v7, 5  ;;  %v3252_v42 = vrot.slane %v3250_v43, 4  ;;  %v3256_v55 = vshll.u32 %v8829_v5, 16  ;;  %v8862_v54 = vld [vmem:[#allocation2 + $0x8c] sm:$0x1] }
  0xfe   : > { %7433 = vmatprep.subr.bf16.mxu0 %v7663_v15  ;;  %v8864_v17 = vrot.slane %v3205_v57, 4  ;;  %v8866_v18 = vrot.slane %v3232_v41, 5  ;;  %v3261_v28 = vshrl.u32 %v3002_v4, 16  ;;  %v3264_v20 = vshll.u32 %v3002_v4, 16  ;;  %v3008_v43 = vld [vmem:[#allocation2 + $0x9c] sm:$0xf] }
  0xff   : > { %v10559_v6 = vcombine.low %v8227_v52, %v8229_v44  ;;  %v3220_v9 = vrot.slane %v3219_v8, 4  ;;  %v3243_v25 = vor.u32 %v3242_v14, %v3239_v36  ;;  %v3253_v21 = vor.u32 %v3252_v42, %v8859_v63  ;;  %v8880_v44 = vld [vmem:[#allocation2 + $0x94] sm:$0xf] }
 0x100   : > { %v3270_v33 = vshll.u32 %v8857_v0, 16  ;;  %v10562_v57 = vcombine.low %v10560_v38, %v10561_v37  ;;  %v3230_v4 = vrot.slane %v3229_v35, 4  ;;  %v3263_v53 = vrot.slane %v3261_v28, 4  ;;  %v8894_v28 = vld [vmem:[#allocation2 + $0x98] sm:$0x1]  ;;  %v10564_v38 = vld [vmem:[#allocation9_spill] sm:$0xff] }
 0x101   : > { %7232 = vmatmul.mubr.bf16.gmra.mxu1 %v10559_v6  ;;  %7434 = vmatpush3.bf16.msra.mxu0 %v7663_v15  ;;  %v3266_v41 = vrot.slane %v3264_v20, 5  ;;  %v3274_v52 = vshrl.u32 %v8857_v0, 16  ;;  %v3244_v10 = vrot.slane %v3243_v25, 4  ;;  %v3254_v8 = vrot.slane %v3253_v21, 4  ;;  %v7656_v25 = vld [vmem:[#allocation2 + $0xc] sm:$0xff]  }
 0x102   : > { %7235 = vmatprep.mubr.bf16.mxu1 %v10562_v57  ;;  %7435 = vmatprep.subr.bf16.mxu0 %v7667_v51  ;;  %v3258_v45 = vrot.slane %v3256_v55, 5  ;;  %v8882_v7 = vrot.slane %v3270_v33, 5  ;;  %v3280_v42 = vshll.u32 %v8862_v54, 16  ;;  %v3285_v6 = vshrl.u32 %v3005_v31, 16  ;;  %v3011_v33 = vld [vmem:[#allocation2 + $0xa8] sm:$0xf] }
 0x103   : > { %v3267_v36 = vor.u32 %v3266_v41, %v3263_v53  ;;  %v3276_v14 = vrot.slane %v3274_v52, 4  ;;  %v6445_v15 = vcombine.low %v3177_v1, %v3187_v19  ;;  %v3201_v35 = vsel %vm7841_vm3, %v8854_v30, %v8808_v11  ;;  %v10565_v37 = vld [vmem:[#allocation10_spill] sm:$0xff]  ;;  %v8922_v41 = vld [vmem:[#allocation2 + $0xa4] sm:$0x1] }
 0x104   : > { %7356 = vmatmul.mubr.bf16.gmra.mxu0 %v8785_v26  ;;  %v3211_v55 = vsel %vm7841_vm3, %v8864_v17, %v8837_v47  ;;  %v3288_v20 = vshll.u32 %v3005_v31, 16  ;;  %v3225_v26 = vsel %vm7841_vm3, %v3220_v9, %v8839_v60  ;;  %v3235_v11 = vsel %vm7841_vm3, %v3230_v4, %v8866_v18  ;;  %v8905_v47 = vld [vmem:[#allocation2 + $0xa0] sm:$0xf]  ;;  %v7679_v53 = vld [vmem:[%s10503_s3 + $0x190] sm:$0xff]   ;;  %10567 = vst [vmem:[#allocation8_spill] sm:$0xff] %v8922_v41 }
 0x105   : > { %7359 = vmatprep.mubr.bf16.mxu0 %v8815_v12  ;;  %7436 = vmatpush3.bf16.msra.mxu0 %v7667_v51  ;;  %v3277_v1 = vor.u32 %v3276_v14, %v8882_v7  ;;  %v3294_v19 = vshll.u32 %v8880_v44, 16  ;;  %10563 = vst [vmem:[#allocation7_spill] sm:$0xff] %v8905_v47  ;;  %v3249_v12 = vsel %vm7841_vm3, %v3244_v10, %v8859_v63  ;;  %v7675_v51 = vld [vmem:[%s10503_s3 + $0x198] sm:$0xff]   ;;  %v3287_v60 = vrot.slane %v3285_v6, 4 }
 0x106   : > { %7437 = vmatprep.subr.bf16.mxu0 %v7671_v34  ;;  %v3290_v30 = vrot.slane %v3288_v20, 5  ;;  %v3298_v31 = vshrl.u32 %v8880_v44, 16  ;;  %v3259_v17 = vsel %vm7841_vm3, %v3254_v8, %v3258_v45  ;;  %v3268_v18 = vrot.slane %v3267_v36, 4  ;;  %v8925_v8 = vld [vmem:[#allocation2 + $0xac] sm:$0xf] }
 0x107   : > { %v3282_v9 = vrot.slane %v3280_v42, 5  ;;  %v3309_v21 = vshrl.u32 %v3008_v43, 16  ;;  %v10566_v57 = vcombine.low %v10564_v38, %v10565_v37  ;;  %v3278_v63 = vrot.slane %v3277_v1, 4  ;;  %10568 = vst [vmem:[#allocation9_spill] sm:$0xff] %v8925_v8 }
 0x108   : > { %v3291_v4 = vor.u32 %v3290_v30, %v3287_v60  ;;  %v3312_v52 = vshll.u32 %v3008_v43, 16  ;;  %v3318_v10 = vshll.u32 %v8905_v47, 16  ;;  %v8927_v45 = vrot.slane %v3294_v19, 5  ;;  %v7658_v19 = vld [vmem:[#allocation2 + $0x18] sm:$0xff]  }
 0x109   : > { %7236 = vmatmul.mubr.bf16.gmra.mxu1 %v10566_v57  ;;  %7438 = vmatpush3.bf16.msra.mxu0 %v7671_v34  ;;  %v3300_v36 = vrot.slane %v3298_v31, 4  ;;  %v3304_v14 = vshll.u32 %v8894_v28, 16  ;;  %v3322_v42 = vshrl.u32 %v8905_v47, 16  ;;  %v8931_v6 = vcombine.low %v3201_v35, %v3211_v55 }
 0x10a   : > { %7303 = vmatprep.mubr.bf16.mxu1 %v7656_v25  ;;  %v8933_v20 = vcombine.low %v3225_v26, %v3235_v11  ;;  %7439 = vmatprep.subr.bf16.mxu0 %v7675_v51  ;;  %v3311_v1 = vrot.slane %v3309_v21, 4  ;;  %v3314_v43 = vrot.slane %v3312_v52, 5  ;;  %v8935_v60 = vrot.slane %v3291_v4, 4  ;;  %v8947_v26 = vld [vmem:[#allocation2 + $0xb0] sm:$0x1]  ;;  %v7660_v21 = vld [vmem:[#allocation2 + $0x24] sm:$0xff]  }
 0x10b   : > { %v8937_v30 = vrot.slane %v3318_v10, 5  ;;  %v3324_v25 = vrot.slane %v3322_v42, 4  ;;  %v3333_v34 = vshrl.u32 %v3011_v33, 16  ;;  %v8940_v31 = vcombine.low %v3249_v12, %v3259_v17  ;;  %10569 = vst [vmem:[#allocation10_spill] sm:$0xff] %v8947_v26  ;;  %v3014_v17 = vld [vmem:[#allocation2 + $0xb4] sm:$0xf] }
 0x10c   : > { %7360 = vmatmul.mubr.bf16.gmra.mxu0 %v8831_v62  ;;  %v3273_v35 = vsel %vm7841_vm3, %v3268_v18, %v8882_v7  ;;  %v3283_v55 = vsel %vm7841_vm3, %v3278_v63, %v3282_v9  ;;  %v3336_v11 = vshll.u32 %v3011_v33, 16  ;;  %v3301_v38 = vor.u32 %v3300_v36, %v8927_v45  ;;  %v7661_v7 = vld [vmem:[%s10503_s3 + $0x170] sm:$0xff]   ;;  %v7683_v10 = vld [vmem:[%s10503_s3 + $0x188] sm:$0xff]   ;;  %v470_v63 = vld [vmem:[#allocation2 + $0xc0] sm:$0x1] }
 0x10d   : > { %7363 = vmatprep.mubr.bf16.mxu0 %v6445_v15  ;;  %7440 = vmatpush3.bf16.msra.mxu0 %v7675_v51  ;;  %v3328_v37 = vshll.u32 %v8922_v41, 16  ;;  %v3335_v62 = vrot.slane %v3333_v34, 4  ;;  %v3342_v12 = vshll.u32 %v8925_v8, 16  ;;  %v3315_v18 = vor.u32 %v3314_v43, %v3311_v1  ;;  %v8957_v51 = vld [vmem:[#allocation2 + $0xb8] sm:$0xf]  ;;  %v8975_v36 = vld [vmem:[%s10503_s3 + $0x168] sm:$0xff]  }
 0x10e   : > { %7441 = vmatprep.subr.bf16.mxu0 %v7679_v53  ;;  %v3325_v9 = vor.u32 %v3324_v25, %v8937_v30  ;;  %v3338_v33 = vrot.slane %v3336_v11, 5  ;;  %v3346_v15 = vshrl.u32 %v8925_v8, 16  ;;  %v8959_v57 = vcombine.low %v3273_v35, %v3283_v55  ;;  %v6911_v34 = vld [vmem:[%s7822_s7 + $0x78] sm:$0xff]   ;;  %v7662_v8 = vld [vmem:[#allocation2 + $0x30] sm:$0xff]  }
 0x10f   : > { %v8965_v4 = vrot.slane %v3304_v14, 5  ;;  %v8967_v52 = vrot.slane %v3342_v12, 5  ;;  %v3352_v43 = vshll.u32 %v8947_v26, 16  ;;  %v3357_v25 = vshrl.u32 %v3014_v17, 16  ;;  %v8984_v55 = vld [vmem:[#allocation2 + $0xbc] sm:$0x1] }
 0x110   : > { %v3339_v42 = vor.u32 %v3338_v33, %v3335_v62  ;;  %v3348_v1 = vrot.slane %v3346_v15, 4  ;;  %v8980_v14 = vrot.slane %v3301_v38, 4  ;;  %v8982_v35 = vrot.slane %v3328_v37, 5  ;;  %v520_v26 = vld [vmem:[#allocation2 + $0xc8] sm:$0x1] }
 0x111   : > { %7304 = vmatmul.mubr.bf16.vlgmr.msra.gmra.mxu1 %v7658_v19  ;;  %v3360_v19 = vshll.u32 %v3014_v17, 16  ;;  %v3366_v11 = vshll.u32 %v8957_v51, 16  ;;  %7442 = vmatpush3.bf16.msra.mxu0 %v7679_v53  ;;  %v3316_v62 = vrot.slane %v3315_v18, 4  ;;  %v3326_v12 = vrot.slane %v3325_v9, 4 }
 0x112   : > { %7384 = vmatpush3.bf16.msra.mxu1 %v8726_v39  ;;  %7307 = vmatprep.mubr.bf16.mxu1 %v7660_v21  ;;  %v3349_v33 = vor.u32 %v3348_v1, %v8967_v52  ;;  %v3359_v15 = vrot.slane %v3357_v25, 4  ;;  %v7687_v39 = vld [vmem:[%s10503_s3 + $0x180] sm:$0xff]   ;;  %v3340_v21 = vrot.slane %v3339_v42, 4  ;;  %v3370_v17 = vshrl.u32 %v8957_v51, 16 }
 0x113   : > { %7385 = vmatprep.subr.bf16.mxu1 %v7661_v7  ;;  %7443 = vmatprep.subr.bf16.mxu0 %v7683_v10  ;;  %v3362_v38 = vrot.slane %v3360_v19, 5  ;;  %v8991_v37 = vrot.slane %v3366_v11, 5  ;;  %v3354_v18 = vrot.slane %v3352_v43, 5  ;;  %v6815_v9 = vunpack.c.l.bf16 %v6911_v34  ;;  %v7664_v25 = vld [vmem:[#allocation2 + $0x3c] sm:$0xff]  }
 0x114   : > { %7364 = vmatmul.mubr.bf16.gmra.mxu0 %v8931_v6  ;;  %v3350_v53 = vrot.slane %v3349_v33, 4  ;;  %v6816_v1 = vunpack.c.h.bf16 %v6911_v34  ;;  %v3372_v42 = vrot.slane %v3370_v17, 4  ;;  %v3376_v19 = vshll.u32 %v8984_v55, 16  ;;  %v7669_v6 = vld [vmem:[%s10503_s3 + $0x160] sm:$0xff]  }
 0x115   : > { %7367 = vmatprep.mubr.bf16.mxu0 %v8933_v20  ;;  %v3363_v41 = vor.u32 %v3362_v38, %v3359_v15  ;;  %v471_v47 = vsel %vm7849_vm5, 0, %v470_v63  ;;  %7444 = vmatpush3.bf16.msra.mxu0 %v7683_v10  ;;  %v7749_v20 = vld [vmem:[%s10501_s1] ss:$0 sm:$0xff]  ;;  %v521_v33 = vsel %vm7860_vm8, 0, %v520_v26  ;;  %v3727_v15 = vld [vmem:[#allocation2 + $0x18] sm:$0xe]  ;;  %v3321_v38 = vsel %vm7841_vm3, %v3316_v62, %v8937_v30 }
 0x116   : > { %7386 = vmatpush3.bf16.msra.mxu1 %v7661_v7  ;;  %v3307_v7 = vsel %vm7841_vm3, %v8980_v14, %v8965_v4  ;;  %v341_v43 = vmul.f32 %v7749_v20, %v6815_v9  ;;  %v342_v34 = vmul.f32 %v7749_v20, %v6816_v1  ;;  %472 = vst [vmem:[#allocation2 + $0xc0] sm:$0x1] %v471_v47  ;;  %522 = vst [vmem:[#allocation2 + $0xc8] sm:$0x1] %v521_v33  ;;  %v9025_v47 = vld [vmem:[%s10503_s3 + $0x238] sm:$0xff]   ;;  %v7685_v11 = vld [vmem:[%s10503_s3 + $0x140] sm:$0xff]  }
 0x117   : > { %7387 = vmatprep.subr.bf16.mxu1 %v8975_v36  ;;  %v3331_v4 = vsel %vm7841_vm3, %v3326_v12, %v8982_v35  ;;  %v3345_v10 = vsel %vm7841_vm3, %v3340_v21, %v8967_v52  ;;  %v3373_v14 = vor.u32 %v3372_v42, %v8991_v37  ;;  %7445 = vmatprep.subr.bf16.mxu0 %v7687_v39  ;;  %v9029_v26 = vrot.slane %v3363_v41, 4  ;;  %v7750_v35 = vld [vmem:[%s10502_s2] ss:$0 sm:$0xff]  ;;  %v7673_v41 = vld [vmem:[%s10503_s3 + $0x158] sm:$0xff]  }
 0x118   : > { %v3355_v30 = vsel %vm7841_vm3, %v3350_v53, %v3354_v18  ;;  %v380_v52 = vadd.f32 %v7750_v35, %v341_v43  ;;  %v381_v62 = vadd.f32 %v7750_v35, %v342_v34  ;;  %v9037_v21 = vrot.slane %v3376_v19, 5  ;;  %v7666_v34 = vld [vmem:[#allocation2 + $0x48] sm:$0xff]   ;;  %v7668_v63 = vld [vmem:[#allocation2 + $0x54] sm:$0xff]  }
 0x119   : > { %7308 = vmatmul.mubr.bf16.gmra.mxu1 %v7662_v8  ;;  %v9035_v12 = vrot.slane %v3373_v14, 4  ;;  %v6464_v17 = vrot.slane %v3727_v15, 9  ;;  %v3799_v8 = vrot.slane %v8584_v27, 5  ;;  %v10572_v53 = vsel %vm7841_vm3, %v8935_v60, %v8927_v45  ;;  %7446 = vmatpush3.bf16.msra.mxu0 %v7687_v39  ;;  %v10573_v27 = vld [vmem:[#allocation11_spill] sm:$0xff] }
 0x11a   : > { %7311 = vmatprep.mubr.bf16.mxu1 %v7664_v25  ;;  %7388 = vmatpush3.bf16.msra.mxu1 %v8975_v36  ;;  %v6450_v18 = vcombine.low %v10572_v53, %v3307_v7  ;;  %v9048_v9 = vcombine.low %v3321_v38, %v3331_v4  ;;  %v412_v36 = vmax.f32 %v380_v52, 0.0  ;;  %v413_v1 = vmax.f32 %v381_v62, 0.0  ;;  %v3728_v25 = vld [vmem:[#allocation2 + $0x24] sm:$0xe]  ;;  %v3729_v4 = vld [vmem:[#allocation2 + $0x30] sm:$0xe] }
 0x11b   : > { %7389 = vmatprep.subr.bf16.mxu1 %v7669_v6  ;;  %v9050_v42 = vcombine.low %v3345_v10, %v3355_v30  ;;  %v3792_v19 = vrot.slane %v10573_v27, 5  ;;  %v3801_v20 = vrot.slane %v3799_v8, 4  ;;  %v3802_v43 = vrot.slane %v8597_v48, 5  ;;  %7527 = vmatprep.subr.bf16.mxu0 %v9025_v47  ;;  %v7677_v48 = vld [vmem:[%s10503_s3 + $0x150] sm:$0xff]   ;;  %v3730_v30 = vld [vmem:[#allocation2 + $0x3c] sm:$0xe] }
 0x11c   : > { %7368 = vmatmul.mubr.bf16.gmra.mxu0 %v8940_v31  ;;  %v3369_v45 = vsel %vm7841_vm3, %v9029_v26, %v8991_v37  ;;  %v6719_v60 = vpack.c.bf16 %v412_v36, %v412_v36  ;;  %v6720_v39 = vpack.c.bf16 %v413_v1, %v413_v1  ;;  %v9062_v7 = vsel %vm8318_vm14, %v6464_v17, %v3799_v8  ;;  %v7703_v27 = vld [vmem:[%s10503_s3 + $0x220] sm:$0xff]  }
 0x11d   : > { %7371 = vmatprep.mubr.bf16.mxu0 %v8959_v57  ;;  %v3379_v31 = vsel %vm7841_vm3, %v9035_v12, %v9037_v21  ;;  %v9074_v33 = vsel %vm8318_vm14, %v3801_v20, %v3802_v43  ;;  %v6465_v15 = vrot.slane %v3728_v25, 9  ;;  %v3806_v38 = vrot.slane %v8627_v50, 5  ;;  %v1048_v53 = vld [vmem:[#allocation2 + $0xc0] sm:$0xf]  ;;  %v1052_v25 = vld [vmem:[#allocation2 + $0xc8] sm:$0x1] }
 0x11e   : > { %7390 = vmatpush3.bf16.msra.mxu1 %v7669_v6  ;;  %v877_v6 = vshrl.u32 %v6719_v60, 16  ;;  %v880_v57 = vshll.u32 %v6719_v60, 16  ;;  %v885_v10 = vshrl.u32 %v6720_v39, 16  ;;  %v888_v14 = vshll.u32 %v6720_v39, 16  ;;  %v9342_v12 = vld [vmem:[#allocation2 + $0x34] sm:$0xf] }
 0x11f   : > { %7391 = vmatprep.subr.bf16.mxu1 %v7673_v41  ;;  %v6496_v35 = vcombine.low %v9062_v7, %v9074_v33  ;;  %v9081_v52 = vsel %vm8318_vm14, %v6465_v15, %v3806_v38  ;;  %v3808_v62 = vrot.slane %v3806_v38, 4  ;;  %v3809_v17 = vrot.slane %v8645_v16, 5  ;;  %v7681_v16 = vld [vmem:[%s10503_s3 + $0x148] sm:$0xff]  }
 0x120   : > { %v879_v8 = vrot.slane %v877_v6, 7  ;;  %v887_v50 = vrot.slane %v885_v10, 7  ;;  %v6466_v36 = vrot.slane %v3729_v4, 9  ;;  %v3813_v1 = vrot.slane %v8648_v59, 5  ;;  %v3732_v6 = vld [vmem:[#allocation2 + $0x54] sm:$0xe] }
 0x121   : > { %7312 = vmatmul.mubr.bf16.gmra.mxu1 %v7666_v34  ;;  %v9087_v20 = vsel %vm8318_vm14, %v3808_v62, %v3809_v17  ;;  %v3816_v43 = vrot.slane %v8671_v29, 5  ;;  %v6467_v60 = vrot.slane %v3730_v30, 9  ;;  %v3820_v39 = vrot.slane %v8683_v13, 5  ;;  %v7670_v10 = vld [vmem:[#allocation2 + $0x60] sm:$0xff]   ;;  %v7698_v7 = vld [vmem:[%s10503_s3 + $0x1e8] sm:$0xff]  }
 0x122   : > { %7315 = vmatprep.mubr.bf16.mxu1 %v7668_v63  ;;  %7392 = vmatpush3.bf16.msra.mxu1 %v7673_v41  ;;  %v882_v34 = vor.u32 %v880_v57, %v879_v8  ;;  %v883_v15 = vrot.slane %v879_v8, 4  ;;  %v890_v59 = vor.u32 %v888_v14, %v887_v50  ;;  %v892_v63 = vrot.slane %v887_v50, 4  ;;  %v3731_v41 = vld [vmem:[#allocation2 + $0x48] sm:$0xe]  ;;  %v7672_v50 = vld [vmem:[#allocation2 + $0x6c] sm:$0xff]  }
 0x123   : > { %7393 = vmatprep.subr.bf16.mxu1 %v7677_v48  ;;  %v6497_v38 = vcombine.low %v9081_v52, %v9087_v20  ;;  %v9098_v4 = vsel %vm8318_vm14, %v6466_v36, %v3813_v1  ;;  %v3815_v29 = vrot.slane %v3813_v1, 4  ;;  %v9102_v13 = vsel %vm8318_vm14, %v6467_v60, %v3820_v39  ;;  %v3733_v60 = vld [vmem:[#allocation2 + $0x60] sm:$0xe]  ;;  %v4617_v20 = vld [vmem:[#allocation2 + $0x30] sm:$0xf] }
 0x124   : > { %7372 = vmatmul.mubr.bf16.gmra.mxu0 %v6450_v18  ;;  %v891_v14 = vsel %vm7897_vm10, %v883_v15, %v890_v59  ;;  %v1049_v62 = vsel %vm7906_vm11, %v882_v34, %v1048_v53  ;;  %v1053_v17 = vsel %vm7849_vm5, %v892_v63, %v1052_v25  ;;  %v3822_v8 = vrot.slane %v3820_v39, 4  ;;  %v3734_v39 = vld [vmem:[#allocation2 + $0x6c] sm:$0xe] }
 0x125   : > { %7375 = vmatprep.mubr.bf16.mxu0 %v9048_v9  ;;  %1050 = vst [vmem:[#allocation2 + $0xc0] sm:$0xf] %v1049_v62  ;;  %1051 = vst [vmem:[#allocation2 + $0xc4] sm:$0xf] %v891_v14  ;;  %v9113_v18 = vsel %vm8318_vm14, %v3815_v29, %v3816_v43  ;;  %v3823_v36 = vrot.slane %v8705_v56, 5  ;;  %v6468_v1 = vrot.slane %v3731_v41, 9 }
 0x126   : > { %7394 = vmatpush3.bf16.msra.mxu1 %v7677_v48  ;;  %1054 = vst [vmem:[#allocation2 + $0xc8] sm:$0x1] %v1053_v17  ;;  %v3827_v53 = vrot.slane %v8715_v32, 5  ;;  %v3830_v48 = vrot.slane %v8728_v46, 5  ;;  %v6469_v25 = vrot.slane %v3732_v6, 9  ;;  %v3834_v43 = vrot.slane %v8747_v3, 5 }
 0x127   : > { %7395 = vmatprep.subr.bf16.mxu1 %v7681_v16  ;;  %v9126_v56 = vsel %vm8318_vm14, %v3822_v8, %v3823_v36  ;;  %v3837_v15 = vrot.slane %v8766_v24, 5  ;;  %v6470_v63 = vrot.slane %v3733_v60, 9  ;;  %v3735_v41 = vld [vmem:[#allocation2 + $0x78] sm:$0xe]  ;;  %v6453_v24 = vcombine.low %v3369_v45, %v3379_v31 }
 0x128   : > { %v9130_v32 = vsel %vm8318_vm14, %v6468_v1, %v3827_v53  ;;  %v3829_v34 = vrot.slane %v3827_v53, 4  ;;  %v9137_v46 = vsel %vm8318_vm14, %v6469_v25, %v3834_v43  ;;  %v3836_v3 = vrot.slane %v3834_v43, 4  ;;  %v7674_v45 = vld [vmem:[#allocation2 + $0x78] sm:$0xff]   ;;  %v3736_v1 = vld [vmem:[#allocation2 + $0x84] sm:$0xe] }
 0x129   : > { %7316 = vmatmul.mubr.bf16.gmra.mxu1 %v7670_v10  ;;  %v3841_v6 = vrot.slane %v8762_v23, 5  ;;  %v6471_v10 = vrot.slane %v3734_v39, 9  ;;  %v3844_v26 = vrot.slane %v8779_v58, 5  ;;  %v3848_v21 = vrot.slane %v8792_v61, 5  ;;  %v7676_v23 = vld [vmem:[#allocation2 + $0x84] sm:$0xff]  }
 0x12a   : > { %7319 = vmatprep.mubr.bf16.mxu1 %v7672_v50  ;;  %7396 = vmatpush3.bf16.msra.mxu1 %v7681_v16  ;;  %v9151_v29 = vsel %vm8318_vm14, %v3829_v34, %v3830_v48  ;;  %v9157_v16 = vld [vmem:[%s10503_s3 + $0x1f8] sm:$0xff]   ;;  %v9163_v37 = vsel %vm8318_vm14, %v3836_v3, %v3837_v15  ;;  %v3851_v14 = vrot.slane %v8806_v49, 5  ;;  %v6472_v30 = vrot.slane %v3735_v41, 9 }
 0x12b   : > { %7397 = vmatprep.subr.bf16.mxu1 %v7685_v11  ;;  %v3843_v57 = vrot.slane %v3841_v6, 4  ;;  %v9177_v58 = vsel %vm8318_vm14, %v6470_v63, %v3841_v6  ;;  %v9181_v61 = vsel %vm8318_vm14, %v6471_v10, %v3848_v21  ;;  %v3850_v48 = vrot.slane %v3848_v21, 4  ;;  %v4614_v10 = vld [vmem:[#allocation2 + $0x24] sm:$0xf] }
 0x12c   : > { %7376 = vmatmul.mubr.bf16.gmra.mxu0 %v9050_v42  ;;  %v3017_v62 = vld [vmem:[#allocation2 + $0xc0] sm:$0xf]  ;;  %v9171_v17 = vld [vmem:[#allocation2 + $0xc4] sm:$0xf]  ;;  %v3855_v25 = vrot.slane %v8810_v2, 5  ;;  %v3858_v21 = vrot.slane %v8829_v5, 5 }
 0x12d   : > { %v9173_v8 = vld [vmem:[#allocation2 + $0xc8] sm:$0x1]  ;;  %7379 = vmatprep.mubr.bf16.mxu0 %v6453_v24  ;;  %v3381_v50 = vshrl.u32 %v3017_v62, 16  ;;  %v3384_v36 = vshll.u32 %v3017_v62, 16  ;;  %v3390_v49 = vshll.u32 %v9171_v17, 16  ;;  %v3394_v42 = vshrl.u32 %v9171_v17, 16 }
 0x12e   : > { %7398 = vmatpush3.bf16.msra.mxu1 %v7685_v11  ;;  %v3400_v53 = vshll.u32 %v9173_v8, 16  ;;  %v9189_v60 = vsel %vm8318_vm14, %v3843_v57, %v3844_v26  ;;  %v9196_v63 = vsel %vm8318_vm14, %v3850_v48, %v3851_v14  ;;  %v9200_v41 = vsel %vm8318_vm14, %v6472_v30, %v3855_v25  ;;  %v3737_v24 = vld [vmem:[#allocation2 + $0x90] sm:$0xe] }
 0x12f   : > { %7479 = vmatprep.subr.bf16.mxu1 %v9157_v16  ;;  %v3383_v43 = vrot.slane %v3381_v50, 4  ;;  %v3386_v39 = vrot.slane %v3384_v36, 5  ;;  %v3392_v34 = vrot.slane %v3390_v49, 5  ;;  %v3396_v15 = vrot.slane %v3394_v42, 4  ;;  %v3738_v49 = vld [vmem:[#allocation2 + $0x9c] sm:$0xe] }
 0x130   : > { %v3402_v3 = vrot.slane %v3400_v53, 5  ;;  %v3857_v26 = vrot.slane %v3855_v25, 4  ;;  %v3862_v57 = vrot.slane %v8857_v0, 5  ;;  %v3865_v14 = vrot.slane %v8862_v54, 5  ;;  %v7680_v54 = vld [vmem:[#allocation2 + $0x9c] sm:$0xff]  }
 0x131   : > { %7320 = vmatmul.mubr.bf16.gmra.mxu1 %v7674_v45  ;;  %v3387_v2 = vor.u32 %v3386_v39, %v3383_v43  ;;  %v3397_v6 = vor.u32 %v3396_v15, %v3392_v34  ;;  %v6473_v45 = vrot.slane %v3736_v1, 9  ;;  %v6474_v36 = vrot.slane %v3737_v24, 9  ;;  %v3739_v1 = vld [vmem:[#allocation2 + $0xa8] sm:$0xe]  ;;  %v7688_v25 = vld [vmem:[#allocation2 + $0x18] sm:$0xff]  }
 0x132   : > { %7323 = vmatprep.mubr.bf16.mxu1 %v7676_v23  ;;  %v3869_v30 = vrot.slane %v8880_v44, 5  ;;  %v7678_v23 = vld [vmem:[#allocation2 + $0x90] sm:$0xff]   ;;  %v9210_v42 = vsel %vm8318_vm14, %v3857_v26, %v3858_v21  ;;  %v3864_v5 = vrot.slane %v3862_v57, 4  ;;  %v3872_v0 = vrot.slane %v8894_v28, 5  ;;  %v10577_v21 = vld [vmem:[#allocation8_spill] sm:$0xff] }
 0x133   : > { %v3388_v62 = vrot.slane %v3387_v2, 4  ;;  %v3398_v50 = vrot.slane %v3397_v6, 4  ;;  %v9214_v53 = vsel %vm8318_vm14, %v6473_v45, %v3862_v57  ;;  %v3740_v15 = vld [vmem:[#allocation2 + $0xb4] sm:$0xe]  ;;  %v6475_v6 = vrot.slane %v3738_v49, 9 }
 0x134   : > { %v9225_v39 = vsel %vm8318_vm14, %v6474_v36, %v3869_v30  ;;  %v9229_v28 = vsel %vm8318_vm14, %v3864_v5, %v3865_v14  ;;  %v3871_v2 = vrot.slane %v3869_v30, 4  ;;  %v3879_v45 = vrot.slane %v10577_v21, 5  ;;  %v10578_v36 = vld [vmem:[#allocation9_spill] sm:$0xff]  ;;  %v10579_v5 = vld [vmem:[#allocation10_spill] sm:$0xff]  ;;  %v5366_v43 = vld [vmem:[#allocation2 + $0x24] sm:$0xe] }
 0x135   : > { %v3393_v48 = vsel %vm7841_vm3, %v3388_v62, %v3392_v34  ;;  %v3403_v44 = vsel %vm7841_vm3, %v3398_v50, %v3402_v3  ;;  %v10576_v3 = vld [vmem:[#allocation7_spill] sm:$0xff]  ;;  %v6476_v57 = vrot.slane %v3739_v1, 9  ;;  %v3741_v62 = vld [vmem:[#allocation2 + $0xc0] sm:$0xe]  ;;  %v3883_v14 = vrot.slane %v10578_v36, 5  ;;  %v7689_v21 = vld [vmem:[#allocation2 + $0x24] sm:$0xff]  }
 0x136   : > { %v6454_v24 = vcombine.low %v3393_v48, %v3403_v44  ;;  %v3876_v26 = vrot.slane %v10576_v3, 5  ;;  %v9237_v50 = vsel %vm8318_vm14, %v3871_v2, %v3872_v0  ;;  %v3886_v30 = vrot.slane %v10579_v5, 5  ;;  %v5365_v36 = vld [vmem:[#allocation2 + $0x18] sm:$0xe] }
 0x137   : > { %v6477_v49 = vrot.slane %v3740_v15, 9  ;;  %v3890_v44 = vrot.slane %v8957_v51, 5  ;;  %v9250_v0 = vsel %vm8318_vm14, %v6476_v57, %v3883_v14  ;;  %v3893_v2 = vrot.slane %v8984_v55, 5  ;;  %v9322_v57 = vld [vmem:[#allocation2 + $0x28] sm:$0xf] }
 0x138   : > { %7380 = vmatmul.mubr.bf16.gmra.mxu0 %v6454_v24  ;;  %v9245_v1 = vsel %vm8318_vm14, %v6475_v6, %v3876_v26  ;;  %v3885_v24 = vrot.slane %v3883_v14, 4  ;;  %v6478_v15 = vrot.slane %v3741_v62, 9  ;;  %v3897_v51 = vrot.slane %v9171_v17, 5 }
 0x139   : > { %7324 = vmatmul.mubr.bf16.gmra.mxu1 %v7678_v23  ;;  %7447 = vmatprep.mubr.bf16.mxu0 %v7688_v25  ;;  %v3878_v23 = vrot.slane %v3876_v26, 4  ;;  %v9259_v6 = vsel %vm8318_vm14, %v6477_v49, %v3890_v44  ;;  %v3892_v3 = vrot.slane %v3890_v44, 4  ;;  %v7682_v26 = vld [vmem:[#allocation2 + $0xa8] sm:$0xff]   ;;  %v3900_v62 = vrot.slane %v9173_v8, 5  ;;  %v7692_v8 = vld [vmem:[#allocation2 + $0x30] sm:$0xff]  }
 0x13a   : > { %7327 = vmatprep.mubr.bf16.mxu1 %v7680_v54  ;;  %v3726_v54 = vld [vmem:[#allocation2 + $0xc] sm:$0xe]  ;;  %v9266_v55 = vsel %vm8318_vm14, %v3885_v24, %v3886_v30  ;;  %v9277_v17 = vsel %vm8318_vm14, %v6478_v15, %v3897_v51  ;;  %v3899_v5 = vrot.slane %v3897_v51, 4  ;;  %v3794_v30 = vrot.slane %v3792_v19, 4  ;;  %v7695_v24 = vld [vmem:[%s10503_s3 + $0x230] sm:$0xff]  }
 0x13b   : > { %v9255_v25 = vsel %vm8318_vm14, %v3878_v23, %v3879_v45  ;;  %v7684_v45 = vld [vmem:[#allocation2 + $0xb4] sm:$0xff]   ;;  %v9273_v14 = vsel %vm8318_vm14, %v3892_v3, %v3893_v2  ;;  %10580 = vst [vmem:[#allocation3_spill] sm:$0xff] %v9277_v17  ;;  %v6463_v49 = vrot.slane %v3726_v54, 9  ;;  %v4613_v2 = vld [vmem:[#allocation2 + $0x20] sm:$0x1]  ;;  %v6599_v33 = vrot.slane %v5365_v36, 9 }
 0x13c   : > { %v7751_v23 = vld [vmem:[#allocation2 + $0x14] sm:$0x1]  ;;  %v9288_v3 = vsel %vm8318_vm14, %v3899_v5, %v3900_v62  ;;  %v7686_v62 = vld [vmem:[#allocation2 + $0xc0] sm:$0xff]   ;;  %v6600_v52 = vrot.slane %v5366_v43, 9  ;;  %v4684_v11 = vshrl.u32 %v4614_v10, 16  ;;  %v4687_v31 = vshll.u32 %v4614_v10, 16 }
 0x13d   : > { %v3795_v44 = vrot.slane %v7751_v23, 5  ;;  %10581 = vst [vmem:[#allocation4_spill] sm:$0xff] %v9288_v3  ;;  %v3793_v54 = vsel %vm8318_vm14, %v6463_v49, %v3792_v19  ;;  %v4612_v49 = vld [vmem:[#allocation2 + $0x1c] sm:$0xf]  ;;  %v4697_v59 = vshrl.u32 %v9322_v57, 16  ;;  %v7702_v43 = vld [vmem:[%s10503_s3 + $0x1e0] sm:$0xff]  }
 0x13e   : > { %v7707_v23 = vld [vmem:[%s10503_s3 + $0x218] sm:$0xff]   ;;  %v4673_v15 = vshrl.u32 %v4612_v49, 16 }
 0x13f   : > { %v3796_v51 = vsel %vm8318_vm14, %v3794_v30, %v3795_v44  ;;  %v4611_v30 = vld [vmem:[#allocation2 + $0x18] sm:$0xf] }
 0x140   : > { %7448 = vmatmul.mubr.bf16.vlgmr.msra.gmra.mxu0 %v7689_v21  ;;  %v9302_v21 = vpop.f32.mrf.mxu0  ;;  %v6495_v5 = vcombine.low %v3793_v54, %v3796_v51  ;;  %v4663_v54 = vshll.u32 %v4611_v30, 16  ;;  %v4669_v51 = vshll.u32 %v4612_v49, 16  ;;  %v4675_v34 = vrot.slane %v4673_v15, 4  ;;  %v9337_v15 = vld [vmem:[#allocation2 + $0x2c] sm:$0x1] }
 0x141   : > { %7328 = vmatmul.mubr.bf16.gmra.mxu1 %v7682_v26  ;;  %7528 = vmatpush3.bf16.msra.mxu0 %v9025_v47  ;;  %v7699_v26 = vld [vmem:[%s10503_s3 + $0x228] sm:$0xff]   ;;  %10582 = vst [vmem:[#allocation11_spill] sm:$0xff] %v9302_v21  ;;  %v10594_v21 = vcombine.low %v9130_v32, %v9151_v29 }
 0x142   : > { %7331 = vmatprep.mubr.bf16.mxu1 %v7684_v45  ;;  %7451 = vmatprep.mubr.bf16.mxu0 %v7692_v8  ;;  %v7693_v45 = vld [vmem:[#allocation2 + $0x3c] sm:$0xff]   ;;  %v7696_v47 = vld [vmem:[#allocation2 + $0x48] sm:$0xff]   ;;  %v9307_v19 = vpop.f32.mrf.mxu0  ;;  %v7697_v8 = vld [vmem:[#allocation2 + $0x54] sm:$0xff]   ;;  %v4665_v48 = vrot.slane %v4663_v54, 5 }
 0x143   : > { %7529 = vmatprep.subr.bf16.mxu0 %v7695_v24  ;;  %10583 = vst [vmem:[#allocation5_spill] sm:$0xff] %v9307_v19 }
 0x144   : > { %v9312_v44 = vpop.f32.mrf.mxu0 }
 0x145   : > { %7530 = vmatpush3.bf16.msra.mxu0 %v7695_v24  ;;  %10584 = vst [vmem:[#allocation6_spill] sm:$0xff] %v9312_v44  ;;  %v4660_v24 = vshrl.u32 %v4611_v30, 16 }
 0x146   : > { %7531 = vmatprep.subr.bf16.mxu0 %v7699_v26 }
 0x147   : > { %v4662_v30 = vrot.slane %v4660_v24, 4  ;;  %v4679_v24 = vshll.u32 %v4613_v2, 16 }
 0x148   : > { %7452 = vmatmul.mubr.bf16.gmra.mxu0 %v7693_v45  ;;  %v7700_v45 = vld [vmem:[#allocation2 + $0x60] sm:$0xff]  }
 0x149   : > { %7332 = vmatmul.mubr.bf16.gmra.mxu1 %v7686_v62  ;;  %7455 = vmatprep.mubr.bf16.mxu0 %v7696_v47  ;;  %v7694_v62 = vld [vmem:[%s10503_s3 + $0x1f0] sm:$0xff]   ;;  %v9320_v47 = vpop.f32.mrf.mxu0  ;;  %v4666_v54 = vor.u32 %v4665_v48, %v4662_v30  ;;  %v7704_v48 = vld [vmem:[#allocation2 + $0x78] sm:$0xff]   ;;  %v9363_v9 = vrot.slane %v4679_v24, 5  ;;  %v4686_v24 = vrot.slane %v4684_v11, 4 }
 0x14a   : > { %7399 = vmatprep.mubr.bf16.mxu1 %v6495_v5  ;;  %7532 = vmatpush3.bf16.msra.mxu0 %v7699_v26  ;;  %v7711_v26 = vld [vmem:[%s10503_s3 + $0x210] sm:$0xff]   ;;  %v5431_v5 = vrot.slane %v4612_v49, 5  ;;  %10585 = vst [vmem:[#allocation7_spill] sm:$0xff] %v9320_v47  ;;  %v5438_v49 = vrot.slane %v9322_v57, 5  ;;  %v4620_v47 = vld [vmem:[#allocation2 + $0x3c] sm:$0xf] }
 0x14b   : > { %7533 = vmatprep.subr.bf16.mxu0 %v7703_v27  ;;  %v4619_v11 = vld [vmem:[#allocation2 + $0x38] sm:$0x1] }
 0x14c   : > { %v5440_v36 = vrot.slane %v5438_v49, 4 }
 0x14e   : > { %7534 = vmatpush3.bf16.msra.mxu0 %v7703_v27  ;;  %v9327_v27 = vrot.slane %v4669_v51, 5 }
 0x14f   : > { %7535 = vmatprep.subr.bf16.mxu0 %v7707_v23 }
 0x150   : > { %7456 = vmatmul.mubr.bf16.gmra.mxu0 %v7697_v8  ;;  %v5434_v8 = vrot.slane %v4613_v2, 5  ;;  %v4676_v51 = vor.u32 %v4675_v34, %v9327_v27  ;;  %v9352_v34 = vsel %vm8318_vm14, %v6599_v33, %v5431_v5  ;;  %v4708_v2 = vshrl.u32 %v4617_v20, 16 }
 0x151   : > { %7400 = vmatmul.mubr.bf16.vlgmr.msra.gmra.mxu1 %v6496_v35  ;;  %7459 = vmatprep.mubr.bf16.mxu0 %v7700_v45  ;;  %v5433_v35 = vrot.slane %v5431_v5, 4  ;;  %v5441_v45 = vrot.slane %v9337_v15, 5  ;;  %v4717_v5 = vshll.u32 %v9342_v12, 16  ;;  %v4721_v33 = vshrl.u32 %v9342_v12, 16 }
 0x152   : > { %7480 = vmatpush3.bf16.msra.mxu1 %v9157_v16  ;;  %7403 = vmatprep.mubr.bf16.mxu1 %v6497_v38  ;;  %v9339_v16 = vpop.f32.mrf.mxu0  ;;  %v7701_v38 = vld [vmem:[#allocation2 + $0x6c] sm:$0xff]  }
 0x153   : > { %7481 = vmatprep.subr.bf16.mxu1 %v7694_v62  ;;  %7536 = vmatpush3.bf16.msra.mxu0 %v7707_v23  ;;  %10586 = vst [vmem:[#allocation8_spill] sm:$0xff] %v9339_v16  ;;  %v4693_v23 = vshll.u32 %v9322_v57, 16  ;;  %v9356_v10 = vsel %vm8318_vm14, %v5433_v35, %v5434_v8  ;;  %v7715_v57 = vld [vmem:[%s10503_s3 + $0x208] sm:$0xff]   ;;  %v9367_v16 = vsel %vm8318_vm14, %v6600_v52, %v5438_v49  ;;  %v9376_v8 = vrot.slane %v4666_v54, 4  ;;  %v5367_v54 = vld [vmem:[#allocation2 + $0x30] sm:$0xe] }
 0x154   : > { %7537 = vmatprep.subr.bf16.mxu0 %v7711_v26  ;;  %v9358_v30 = vpop.f32.mrf.mxu0  ;;  %v10588_v35 = vcombine.low %v9098_v4, %v9113_v18  ;;  %v10590_v49 = vcombine.low %v9102_v13, %v9126_v56  ;;  %v9386_v4 = vld [vmem:[%s10503_s3 + $0x200] sm:$0xff]   ;;  %v9390_v18 = vsel %vm8318_vm14, %v5440_v36, %v5441_v45  ;;  %v7706_v13 = vld [vmem:[%s10503_s3 + $0x1d8] sm:$0xff]  }
 0x155   : > { %10587 = vst [vmem:[#allocation9_spill] sm:$0xff] %v9358_v30  ;;  %v4689_v30 = vrot.slane %v4687_v31, 5  ;;  %v9392_v52 = vrot.slane %v4693_v23, 5  ;;  %v5445_v31 = vrot.slane %v9342_v12, 5  ;;  %v4723_v12 = vrot.slane %v4721_v33, 4 }
 0x156   : > { %7482 = vmatpush3.bf16.msra.mxu1 %v7694_v62  ;;  %v4711_v62 = vshll.u32 %v4617_v20, 16  ;;  %v9378_v20 = vrot.slane %v4676_v51, 4  ;;  %v4710_v51 = vrot.slane %v4708_v2, 4  ;;  %v9401_v45 = vpop.f32.mrf.mxu0  ;;  %v9405_v23 = vld [vmem:[#allocation2 + $0x40] sm:$0xf]  ;;  %v6601_v33 = vrot.slane %v5367_v54, 9 }
 0x157   : > { %7483 = vmatprep.subr.bf16.mxu1 %v7698_v7  ;;  %7538 = vmatpush3.bf16.msra.mxu0 %v7711_v26  ;;  %v9374_v26 = vpop.f32.mrf.mxu1  ;;  %10591 = vst [vmem:[#allocation12_spill] sm:$0xff] %v9401_v45  ;;  %v5447_v56 = vrot.slane %v5445_v31, 4  ;;  %v4623_v45 = vld [vmem:[#allocation2 + $0x48] sm:$0xf]  ;;  %v9429_v54 = vld [vmem:[#allocation2 + $0x44] sm:$0x1] }
 0x158   : > { %7460 = vmatmul.mubr.bf16.gmra.mxu0 %v7701_v38  ;;  %10589 = vst [vmem:[#allocation10_spill] sm:$0xff] %v9374_v26  ;;  %v4699_v38 = vrot.slane %v4697_v59, 4  ;;  %v4713_v36 = vrot.slane %v4711_v62, 5  ;;  %7539 = vmatprep.subr.bf16.mxu0 %v7715_v57  ;;  %v9403_v59 = vrot.slane %v4717_v5, 5  ;;  %v4682_v2 = vsel %vm7841_vm3, %v9378_v20, %v9363_v9  ;;  %v5368_v20 = vld [vmem:[#allocation2 + $0x3c] sm:$0xe] }
 0x159   : > { %7404 = vmatmul.mubr.bf16.gmra.mxu1 %v10588_v35  ;;  %7463 = vmatprep.mubr.bf16.mxu0 %v7704_v48  ;;  %v4732_v48 = vshrl.u32 %v4620_v47, 16  ;;  %v4735_v35 = vshll.u32 %v4620_v47, 16  ;;  %v9407_v26 = vpop.f32.mrf.mxu1  ;;  %v4690_v5 = vor.u32 %v4689_v30, %v4686_v24  ;;  %v7708_v47 = vld [vmem:[#allocation2 + $0x90] sm:$0xff]   ;;  %v4741_v30 = vshll.u32 %v9405_v23, 16  ;;  %v9426_v24 = vpop.f32.mrf.mxu0 }
 0x15a   : > { %7407 = vmatprep.mubr.bf16.mxu1 %v10590_v49  ;;  %7484 = vmatpush3.bf16.msra.mxu1 %v7698_v7  ;;  %v4703_v7 = vshll.u32 %v9337_v15, 16  ;;  %v7705_v49 = vld [vmem:[#allocation2 + $0x84] sm:$0xff]   ;;  %10592 = vst [vmem:[#allocation13_spill] sm:$0xff] %v9407_v26  ;;  %v4672_v15 = vsel %vm7841_vm3, %v9376_v8, %v9327_v27  ;;  %v5448_v26 = vrot.slane %v4619_v11, 5  ;;  %v7710_v27 = vld [vmem:[%s10503_s3 + $0x1d0] sm:$0xff]   ;;  %v4714_v9 = vor.u32 %v4713_v36, %v4710_v51 }
 0x15b   : > { %7485 = vmatprep.subr.bf16.mxu1 %v7702_v43  ;;  %7540 = vmatpush3.bf16.msra.mxu0 %v7715_v57  ;;  %v4700_v57 = vor.u32 %v4699_v38, %v9392_v52  ;;  %v4727_v8 = vshll.u32 %v4619_v11, 16  ;;  %10593 = vst [vmem:[#allocation14_spill] sm:$0xff] %v9426_v24  ;;  %v4724_v38 = vor.u32 %v4723_v12, %v9403_v59  ;;  %v5452_v62 = vrot.slane %v9405_v23, 5  ;;  %v9435_v11 = vpop.f32.mrf.mxu1 }
 0x15c   : > { %7541 = vmatprep.subr.bf16.mxu0 %v9386_v4  ;;  %v4734_v44 = vrot.slane %v4732_v48, 4  ;;  %v4737_v19 = vrot.slane %v4735_v35, 5  ;;  %10595 = vst [vmem:[#allocation15_spill] sm:$0xff] %v9435_v11  ;;  %v4691_v51 = vrot.slane %v4690_v5, 4  ;;  %v4705_v36 = vrot.slane %v4703_v7, 5  ;;  %v9456_v48 = vpop.f32.mrf.mxu0 }
 0x15d   : > { %v4756_v3 = vshrl.u32 %v4623_v45, 16  ;;  %v4759_v17 = vshll.u32 %v4623_v45, 16  ;;  %v10596_v12 = vcombine.low %v9137_v46, %v9163_v37  ;;  %v4701_v24 = vrot.slane %v4700_v57, 4  ;;  %v7714_v46 = vld [vmem:[%s10503_s3 + $0x1c8] sm:$0xff]   ;;  %v7709_v45 = vld [vmem:[#allocation2 + $0x9c] sm:$0xff]   ;;  %v9459_v5 = vpop.f32.mrf.mxu1 }
 0x15e   : > { %7486 = vmatpush3.bf16.msra.mxu1 %v7702_v43  ;;  %v4745_v43 = vshrl.u32 %v9405_v23, 16  ;;  %v9442_v23 = vsel %vm8318_vm14, %v6601_v33, %v5445_v31  ;;  %v9446_v32 = vsel %vm8318_vm14, %v5447_v56, %v5448_v26  ;;  %v6602_v29 = vrot.slane %v5368_v20, 9  ;;  %10597 = vst [vmem:[#allocation16_spill] sm:$0xff] %v9459_v5 }
 0x15f   : > { %7487 = vmatprep.subr.bf16.mxu1 %v7706_v13  ;;  %v4729_v37 = vrot.slane %v4727_v8, 5  ;;  %v9454_v7 = vrot.slane %v4741_v30, 5  ;;  %7542 = vmatpush3.bf16.msra.mxu0 %v9386_v4  ;;  %v4715_v26 = vrot.slane %v4714_v9, 4  ;;  %v4725_v56 = vrot.slane %v4724_v38, 4  ;;  %v7712_v30 = vld [vmem:[#allocation2 + $0xa8] sm:$0xff]   ;;  %v9479_v9 = vpop.f32.mrf.mxu0 }
 0x160   : > { %7464 = vmatmul.mubr.bf16.gmra.mxu0 %v7705_v49  ;;  %v4747_v31 = vrot.slane %v4745_v43, 4  ;;  %v5454_v35 = vrot.slane %v5452_v62, 4  ;;  %v4738_v49 = vor.u32 %v4737_v19, %v4734_v44  ;;  %v4758_v57 = vrot.slane %v4756_v3, 4 }
 0x161   : > { %7408 = vmatmul.mubr.bf16.gmra.mxu1 %v10594_v21  ;;  %v9448_v21 = vld [vmem:[#allocation2 + $0x4c] sm:$0xf]  ;;  %7467 = vmatprep.mubr.bf16.mxu0 %v7708_v47  ;;  %v5369_v47 = vld [vmem:[#allocation2 + $0x48] sm:$0xe]  ;;  %v4761_v33 = vrot.slane %v4759_v17, 5  ;;  %v9463_v43 = vcombine.low %v4672_v15, %v4682_v2  ;;  %v4696_v4 = vsel %vm7841_vm3, %v4691_v51, %v9392_v52  ;;  %v4706_v19 = vsel %vm7841_vm3, %v4701_v24, %v4705_v36  ;;  %v7718_v52 = vld [vmem:[%s10503_s3 + $0x1c0] sm:$0xff]  }
 0x162   : > { %7411 = vmatprep.mubr.bf16.mxu1 %v10596_v12  ;;  %7488 = vmatpush3.bf16.msra.mxu1 %v7706_v13  ;;  %v5455_v13 = vrot.slane %v9429_v54, 5  ;;  %v4765_v8 = vshll.u32 %v9448_v21, 16  ;;  %v4769_v20 = vshrl.u32 %v9448_v21, 16  ;;  %v4751_v44 = vshll.u32 %v9429_v54, 16  ;;  %v4625_v54 = vld [vmem:[#allocation2 + $0x50] sm:$0x1]  ;;  %v9496_v12 = vpop.f32.mrf.mxu1 }
 0x163   : > { %7489 = vmatprep.subr.bf16.mxu1 %v7710_v27  ;;  %v9475_v3 = vsel %vm8318_vm14, %v6602_v29, %v5452_v62  ;;  %v4748_v15 = vor.u32 %v4747_v31, %v9454_v7  ;;  %v5459_v2 = vrot.slane %v9448_v21, 5  ;;  %v4720_v24 = vsel %vm7841_vm3, %v4715_v26, %v9403_v59  ;;  %10599 = vst [vmem:[#allocation17_spill] sm:$0xff] %v9496_v12 }
 0x164   : > { %v4730_v38 = vsel %vm7841_vm3, %v4725_v56, %v4729_v37  ;;  %v9491_v62 = vsel %vm8318_vm14, %v5454_v35, %v5455_v13  ;;  %v6603_v51 = vrot.slane %v5369_v47, 9  ;;  %v10598_v36 = vcombine.low %v9177_v58, %v9189_v60  ;;  %v5370_v37 = vld [vmem:[#allocation2 + $0x54] sm:$0xe] }
 0x165   : > { %v9498_v29 = vrot.slane %v4738_v49, 4  ;;  %v4762_v21 = vor.u32 %v4761_v33, %v4758_v57  ;;  %v9500_v59 = vrot.slane %v4765_v8, 5  ;;  %v4771_v31 = vrot.slane %v4769_v20, 4  ;;  %v4627_v57 = vld [vmem:[#allocation2 + $0x58] sm:$0xf]  ;;  %v9511_v33 = vpop.f32.mrf.mxu0 }
 0x166   : > { %7490 = vmatpush3.bf16.msra.mxu1 %v7710_v27  ;;  %v4626_v27 = vld [vmem:[#allocation2 + $0x54] sm:$0xf]  ;;  %v10600_v13 = vcombine.low %v9181_v61, %v9196_v63  ;;  %v9505_v26 = vcombine.low %v4696_v4, %v4706_v19  ;;  %v9507_v56 = vrot.slane %v4751_v44, 5  ;;  %v5461_v35 = vrot.slane %v5459_v2, 4  ;;  %10601 = vst [vmem:[#allocation18_spill] sm:$0xff] %v9511_v33  ;;  %v9519_v4 = vpop.f32.mrf.mxu1 }
 0x167   : > { %7491 = vmatprep.subr.bf16.mxu1 %v7714_v46  ;;  %v4780_v58 = vshrl.u32 %v4626_v27, 16  ;;  %v4783_v60 = vshll.u32 %v4626_v27, 16  ;;  %v5462_v49 = vrot.slane %v4625_v54, 5  ;;  %v4775_v47 = vshll.u32 %v4625_v54, 16  ;;  %v9517_v63 = vld [vmem:[#allocation2 + $0x5c] sm:$0x1]  ;;  %v9545_v19 = vpop.f32.mrf.mxu0 }
 0x168   : > { %7468 = vmatmul.mubr.bf16.gmra.mxu0 %v7709_v45  ;;  %v9509_v45 = vrot.slane %v4748_v15, 4  ;;  %v9513_v8 = vcombine.low %v4720_v24, %v4730_v38  ;;  %v6604_v20 = vrot.slane %v5370_v37, 9  ;;  %10602 = vst [vmem:[#allocation19_spill] sm:$0xff] %v9519_v4  ;;  %v9527_v44 = vsel %vm8318_vm14, %v6603_v51, %v5459_v2  ;;  %v9532_v24 = vld [vmem:[#allocation2 + $0x64] sm:$0xf]  ;;  %10603 = vst [vmem:[#allocation20_spill] sm:$0xff] %v9545_v19 }
 0x169   : > { %7412 = vmatmul.mubr.bf16.gmra.mxu1 %v10598_v36  ;;  %7471 = vmatprep.mubr.bf16.mxu0 %v7712_v30  ;;  %v5466_v30 = vrot.slane %v4627_v57, 5  ;;  %v9529_v15 = vrot.slane %v4762_v21, 4  ;;  %v4772_v27 = vor.u32 %v4771_v31, %v9500_v59  ;;  %v4629_v38 = vld [vmem:[#allocation2 + $0x60] sm:$0xf]  ;;  %v4782_v36 = vrot.slane %v4780_v58, 4 }
 0x16a   : > { %7415 = vmatprep.mubr.bf16.mxu1 %v10600_v13  ;;  %7492 = vmatpush3.bf16.msra.mxu1 %v7714_v46  ;;  %v7713_v46 = vld [vmem:[#allocation2 + $0xb4] sm:$0xff]   ;;  %v7716_v54 = vld [vmem:[#allocation2 + $0xc0] sm:$0xff]   ;;  %v4785_v37 = vrot.slane %v4783_v60, 5  ;;  %v4789_v13 = vshll.u32 %v4627_v57, 16  ;;  %v4793_v61 = vshrl.u32 %v4627_v57, 16  ;;  %v4754_v17 = vsel %vm7841_vm3, %v9509_v45, %v9507_v56  ;;  %v9554_v45 = vpop.f32.mrf.mxu1 }
 0x16b   : > { %7493 = vmatprep.subr.bf16.mxu1 %v7718_v52  ;;  %v9540_v2 = vsel %vm8318_vm14, %v5461_v35, %v5462_v49  ;;  %v4777_v51 = vrot.slane %v4775_v47, 5  ;;  %v5469_v21 = vrot.slane %v9517_v63, 5  ;;  %v9543_v31 = vld [vmem:[#allocation2 + $0x70] sm:$0xf]  ;;  %v9549_v58 = vsel %vm8318_vm14, %v6604_v20, %v5466_v30  ;;  %v4632_v4 = vld [vmem:[#allocation2 + $0x6c] sm:$0xf] }
 0x16c   : > { %v4804_v60 = vshrl.u32 %v4629_v38, 16  ;;  %v4807_v57 = vshll.u32 %v4629_v38, 16  ;;  %v10604_v56 = vcombine.low %v9200_v41, %v9210_v42  ;;  %10605 = vst [vmem:[#allocation21_spill] sm:$0xff] %v9554_v45  ;;  %v4768_v35 = vsel %vm7841_vm3, %v9529_v15, %v9500_v59  ;;  %v4631_v45 = vld [vmem:[#allocation2 + $0x68] sm:$0x1] }
 0x16d   : > { %v4773_v49 = vrot.slane %v4772_v27, 4  ;;  %v4813_v47 = vshll.u32 %v9532_v24, 16  ;;  %v4817_v20 = vshrl.u32 %v9532_v24, 16  ;;  %v4786_v41 = vor.u32 %v4785_v37, %v4782_v36  ;;  %v9577_v36 = vpop.f32.mrf.mxu1 }
 0x16e   : > { %7494 = vmatpush3.bf16.msra.mxu1 %v7718_v52  ;;  %v5468_v52 = vrot.slane %v5466_v30, 4  ;;  %v10606_v30 = vcombine.low %v9214_v53, %v9229_v28  ;;  %v9565_v42 = vrot.slane %v4789_v13, 5  ;;  %v4795_v38 = vrot.slane %v4793_v61, 4  ;;  %10608 = vst [vmem:[#allocation23_spill] sm:$0xff] %v9577_v36 }
 0x16f   : > { %v4828_v12 = vshrl.u32 %v4632_v4, 16  ;;  %v4831_v59 = vshll.u32 %v4632_v4, 16  ;;  %v4837_v15 = vshll.u32 %v9543_v31, 16  ;;  %v4841_v27 = vshrl.u32 %v9543_v31, 16 }
 0x170   : > { %7472 = vmatmul.mubr.bf16.gmra.mxu0 %v7713_v46  ;;  %v5371_v46 = vld [vmem:[#allocation2 + $0x60] sm:$0xe]  ;;  %v9574_v53 = vsel %vm8318_vm14, %v5468_v52, %v5469_v21  ;;  %v4799_v28 = vshll.u32 %v9517_v63, 16  ;;  %v4809_v61 = vrot.slane %v4807_v57, 5  ;;  %v4778_v4 = vsel %vm7841_vm3, %v4773_v49, %v4777_v51 }
 0x171   : > { %7416 = vmatmul.mubr.bf16.gmra.mxu1 %v10604_v56  ;;  %7475 = vmatprep.mubr.bf16.mxu0 %v7716_v54  ;;  %v5473_v56 = vrot.slane %v9532_v24, 5  ;;  %v4806_v54 = vrot.slane %v4804_v60, 4  ;;  %v7717_v24 = vld [vmem:[#allocation2 + $0xcc] sm:$0xff]   ;;  %v6605_v37 = vrot.slane %v5371_v46, 9  ;;  %v9581_v13 = vrot.slane %v4813_v47, 5  ;;  %v9606_v46 = vpop.f32.mrf.mxu1 }
 0x172   : > { %7419 = vmatprep.mubr.bf16.mxu1 %v10606_v30  ;;  %v9570_v5 = vpop.f32.mrf.mxu0  ;;  %v4819_v30 = vrot.slane %v4817_v20, 4  ;;  %v4796_v21 = vor.u32 %v4795_v38, %v9565_v42  ;;  %v5476_v63 = vrot.slane %v4631_v45, 5  ;;  %v4830_v60 = vrot.slane %v4828_v12, 4  ;;  %10613 = vst [vmem:[#allocation26_spill] sm:$0xff] %v9606_v46 }
 0x173   : > { %10607 = vst [vmem:[#allocation22_spill] sm:$0xff] %v9570_v5  ;;  %v9585_v5 = vrot.slane %v4786_v41, 4  ;;  %v5475_v52 = vrot.slane %v5473_v56, 4  ;;  %v4833_v57 = vrot.slane %v4831_v59, 5  ;;  %v9588_v19 = vrot.slane %v4837_v15, 5 }
 0x174   : > { %v9583_v11 = vpop.f32.mrf.mxu0  ;;  %v4843_v36 = vrot.slane %v4841_v27, 4  ;;  %v10611_v51 = vsel %vm7841_vm3, %v9498_v29, %v9454_v7  ;;  %v4810_v12 = vor.u32 %v4809_v61, %v4806_v54  ;;  %v4634_v41 = vld [vmem:[#allocation2 + $0x74] sm:$0x1]  ;;  %v10612_v38 = vcombine.low %v9225_v39, %v9237_v50  ;;  %v5372_v29 = vld [vmem:[#allocation2 + $0x6c] sm:$0xe] }
 0x175   : > { %10609 = vst [vmem:[#allocation24_spill] sm:$0xff] %v9583_v11  ;;  %v9597_v49 = vcombine.low %v10611_v51, %v4754_v17  ;;  %v9608_v59 = vcombine.low %v4768_v35, %v4778_v4  ;;  %v4820_v7 = vor.u32 %v4819_v30, %v9581_v13  ;;  %v4823_v17 = vshll.u32 %v4631_v45, 16  ;;  %v4635_v27 = vld [vmem:[#allocation2 + $0x78] sm:$0xf] }
 0x176   : > { %v9590_v33 = vpop.f32.mrf.mxu0  ;;  %v5480_v15 = vrot.slane %v9543_v31, 5  ;;  %v10614_v54 = vcombine.low %v9245_v1, %v9255_v25  ;;  %v10616_v39 = vcombine.low %v9352_v34, %v9356_v10  ;;  %v9624_v45 = vrot.slane %v4796_v21, 4  ;;  %v9635_v21 = vpop.f32.mrf.mxu1 }
 0x177   : > { %10610 = vst [vmem:[#allocation25_spill] sm:$0xff] %v9590_v33  ;;  %v4801_v35 = vrot.slane %v4799_v28, 5  ;;  %v9628_v31 = vsel %vm8318_vm14, %v6605_v37, %v5473_v56  ;;  %v9632_v1 = vsel %vm8318_vm14, %v5475_v52, %v5476_v63  ;;  %v4834_v25 = vor.u32 %v4833_v57, %v4830_v60  ;;  %10617 = vst [vmem:[#allocation28_spill] sm:$0xff] %v9635_v21  ;;  %v4637_v63 = vld [vmem:[#allocation2 + $0x80] sm:$0x1] }
 0x178   : > { %7476 = vmatmul.mubr.bf16.gmra.mxu0 %v7717_v24  ;;  %v9615_v61 = vpop.f32.mrf.mxu0  ;;  %v4844_v34 = vor.u32 %v4843_v36, %v9588_v19  ;;  %v4847_v10 = vshll.u32 %v4634_v41, 16  ;;  %v4636_v24 = vld [vmem:[#allocation2 + $0x7c] sm:$0xf]  ;;  %v4811_v4 = vrot.slane %v4810_v12, 4  ;;  %v6606_v30 = vrot.slane %v5372_v29, 9  ;;  %v9656_v21 = vpop.f32.mrf.mxu1 }
 0x179   : > { %7420 = vmatmul.mubr.bf16.gmra.mxu1 %v10612_v38  ;;  %10615 = vst [vmem:[#allocation27_spill] sm:$0xff] %v9615_v61  ;;  %7543 = vmatprep.mubr.bf16.mxu0 %v10616_v39  ;;  %v4852_v51 = vshrl.u32 %v4635_v27, 16  ;;  %v4855_v38 = vshll.u32 %v4635_v27, 16  ;;  %v4825_v56 = vrot.slane %v4823_v17, 5  ;;  %v5482_v37 = vrot.slane %v5480_v15, 4  ;;  %10619 = vst [vmem:[#allocation29_spill] sm:$0xff] %v9656_v21 }
 0x17a   : > { %7423 = vmatprep.mubr.bf16.mxu1 %v10614_v54  ;;  %v4821_v54 = vrot.slane %v4820_v7, 4  ;;  %v5483_v39 = vrot.slane %v4634_v41, 5  ;;  %v4802_v52 = vsel %vm7841_vm3, %v9624_v45, %v4801_v35  ;;  %v5373_v60 = vld [vmem:[#allocation2 + $0x78] sm:$0xe]  ;;  %v4861_v57 = vshll.u32 %v4636_v24, 16 }
 0x17b   : > { %v9637_v28 = vpop.f32.mrf.mxu0  ;;  %v4865_v12 = vshrl.u32 %v4636_v24, 16  ;;  %v4835_v27 = vrot.slane %v4834_v25, 4  ;;  %v4845_v20 = vrot.slane %v4844_v34, 4  ;;  %v4849_v47 = vrot.slane %v4847_v10, 5  ;;  %v4638_v17 = vld [vmem:[#allocation2 + $0x84] sm:$0xf] }
 0x17c   : > { %v5487_v7 = vrot.slane %v4636_v24, 5  ;;  %v4816_v41 = vsel %vm7841_vm3, %v4811_v4, %v9581_v13  ;;  %v9651_v45 = vsel %vm8318_vm14, %v6606_v30, %v5480_v15  ;;  %v4854_v35 = vrot.slane %v4852_v51, 4  ;;  %v4639_v4 = vld [vmem:[#allocation2 + $0x88] sm:$0xf] }
 0x17d   : > { %v9644_v29 = vpop.f32.mrf.mxu0  ;;  %v4857_v36 = vrot.slane %v4855_v38, 5  ;;  %v10618_v50 = vcombine.low %v9250_v0, %v9266_v55  ;;  %v10620_v25 = vcombine.low %v9367_v16, %v9390_v18  ;;  %v4826_v13 = vsel %vm7841_vm3, %v4821_v54, %v4825_v56  ;;  %v5374_v56 = vld [vmem:[#allocation2 + $0x84] sm:$0xe] }
 0x17e   : > { %v9667_v15 = vsel %vm8318_vm14, %v5482_v37, %v5483_v39  ;;  %v6607_v10 = vrot.slane %v5373_v60, 9  ;;  %v5490_v24 = vrot.slane %v4637_v63, 5  ;;  %v10621_v0 = vcombine.low %v9259_v6, %v9273_v14 }
 0x17f   : > { %v9661_v34 = vpop.f32.mrf.mxu0  ;;  %v10622_v55 = vcombine.low %v9442_v23, %v9446_v32  ;;  %v9675_v16 = vrot.slane %v4861_v57, 5  ;;  %v4867_v18 = vrot.slane %v4865_v12, 4  ;;  %v4879_v30 = vshll.u32 %v4638_v17, 16  ;;  %v4640_v23 = vld [vmem:[#allocation2 + $0x8c] sm:$0x1]  ;;  %v9684_v57 = vpop.f32.mrf.mxu1 }
 0x180   : > { %7544 = vmatmul.mubr.bf16.vlgmr.msra.gmra.mxu0 %v10620_v25  ;;  %v4840_v38 = vsel %vm7841_vm3, %v4835_v27, %v9588_v19  ;;  %v4850_v54 = vsel %vm7841_vm3, %v4845_v20, %v4849_v47  ;;  %v5489_v6 = vrot.slane %v5487_v7, 4  ;;  %v4871_v14 = vshll.u32 %v4637_v63, 16  ;;  %10623 = vst [vmem:[#allocation30_spill] sm:$0xff] %v9684_v57  ;;  %v9703_v63 = vld [vmem:[#allocation2 + $0x94] sm:$0xf] }
 0x181   : > { %7424 = vmatmul.mubr.bf16.gmra.mxu1 %v10618_v50  ;;  %7547 = vmatprep.mubr.bf16.mxu0 %v10622_v55  ;;  %v4876_v50 = vshrl.u32 %v4638_v17, 16  ;;  %v9677_v51 = vpop.f32.mrf.mxu0  ;;  %v4858_v37 = vor.u32 %v4857_v36, %v4854_v35  ;;  %v5494_v32 = vrot.slane %v4639_v4, 5  ;;  %v4885_v39 = vshll.u32 %v4639_v4, 16 }
 0x182   : > { %7427 = vmatprep.mubr.bf16.mxu1 %v10621_v0  ;;  %v4889_v60 = vshrl.u32 %v4639_v4, 16  ;;  %v10624_v19 = vsel %vm7841_vm3, %v9585_v5, %v9565_v42  ;;  %v9695_v47 = vcombine.low %v4816_v41, %v4826_v13  ;;  %v9701_v36 = vsel %vm8318_vm14, %v6607_v10, %v5487_v7  ;;  %v4641_v0 = vld [vmem:[#allocation2 + $0x90] sm:$0xf]  ;;  %v9716_v13 = vld [vmem:[#allocation2 + $0xa0] sm:$0xf] }
 0x183   : > { %v9686_v12 = vpop.f32.mrf.mxu0  ;;  %v9693_v27 = vcombine.low %v10624_v19, %v4802_v52  ;;  %v4868_v17 = vor.u32 %v4867_v18, %v9675_v16  ;;  %v6608_v35 = vrot.slane %v5374_v56, 9  ;;  %v4878_v25 = vrot.slane %v4876_v50, 4 }
 0x184   : > { %v4881_v4 = vrot.slane %v4879_v30, 5  ;;  %v9708_v42 = vcombine.low %v4840_v38, %v4850_v54  ;;  %v9712_v52 = vsel %vm8318_vm14, %v5489_v6, %v5490_v24  ;;  %v9714_v41 = vrot.slane %v4871_v14, 5  ;;  %v4644_v30 = vld [vmem:[#allocation2 + $0x9c] sm:$0xf]  ;;  %v10628_v54 = vld [vmem:[#allocation4_spill] sm:$0xff] }
 0x185   : > { %v9706_v5 = vpop.f32.mrf.mxu0  ;;  %v5497_v7 = vrot.slane %v4640_v23, 5  ;;  %v9718_v10 = vrot.slane %v4858_v37, 4  ;;  %v5496_v55 = vrot.slane %v5494_v32, 4  ;;  %v9720_v18 = vrot.slane %v4885_v39, 5  ;;  %v10627_v38 = vld [vmem:[#allocation3_spill] sm:$0xff] }
 0x186   : > { %10625 = vst [vmem:[#allocation31_spill] sm:$0xff] %v9708_v42  ;;  %v4891_v50 = vrot.slane %v4889_v60, 4  ;;  %v10629_v19 = vcombine.low %v10627_v38, %v10628_v54  ;;  %v10630_v24 = vcombine.low %v9475_v3, %v9491_v62  ;;  %v4900_v14 = vshrl.u32 %v4641_v0, 16 }
 0x187   : > { %v9722_v56 = vpop.f32.mrf.mxu1  ;;  %v9730_v6 = vpop.f32.mrf.mxu0  ;;  %v4903_v37 = vshll.u32 %v4641_v0, 16  ;;  %v4909_v20 = vshll.u32 %v9703_v63, 16  ;;  %v4913_v39 = vshrl.u32 %v9703_v63, 16  ;;  %v10631_v60 = vcombine.low %v9527_v44, %v9540_v2 }
 0x188   : > { %10626 = vst [vmem:[#allocation32_spill] sm:$0xff] %v9722_v56  ;;  %7548 = vmatmul.mubr.bf16.gmra.mxu0 %v10630_v24  ;;  %v4869_v38 = vrot.slane %v4868_v17, 4  ;;  %v9740_v54 = vsel %vm8318_vm14, %v6608_v35, %v5494_v32  ;;  %v4882_v3 = vor.u32 %v4881_v4, %v4878_v25  ;;  %v4895_v62 = vshll.u32 %v4640_v23, 16  ;;  %v5375_v24 = vld [vmem:[#allocation2 + $0x90] sm:$0xe] }
 0x189   : > { %7428 = vmatmul.mubr.bf16.gmra.mxu1 %v10629_v19  ;;  %7551 = vmatprep.mubr.bf16.mxu0 %v10631_v60  ;;  %v9742_v19 = vpop.f32.mrf.mxu1  ;;  %v9744_v0 = vpop.f32.mrf.mxu0  ;;  %v4924_v56 = vshrl.u32 %v4644_v30, 16  ;;  %v4927_v57 = vshll.u32 %v4644_v30, 16  ;;  %v4937_v21 = vshrl.u32 %v9716_v13, 16  ;;  %v4864_v44 = vsel %vm7841_vm3, %v9718_v10, %v9675_v16  ;;  %v4643_v25 = vld [vmem:[#allocation2 + $0x98] sm:$0x1] }
 0x18a   : > { %7495 = vmatprep.mubr.bf16.mxu1 %v9463_v43  ;;  %10632 = vst [vmem:[#allocation3_spill] sm:$0xff] %v9742_v19  ;;  %v4933_v43 = vshll.u32 %v9716_v13, 16  ;;  %v9754_v2 = vsel %vm8318_vm14, %v5496_v55, %v5497_v7  ;;  %v4892_v23 = vor.u32 %v4891_v50, %v9720_v18  ;;  %v5501_v32 = vrot.slane %v9703_v63, 5 }
 0x18b   : > { %v9758_v17 = vpop.f32.mrf.mxu1  ;;  %v9760_v35 = vpop.f32.mrf.mxu0  ;;  %v4902_v4 = vrot.slane %v4900_v14, 4  ;;  %v4905_v30 = vrot.slane %v4903_v37, 5  ;;  %v9762_v60 = vrot.slane %v4909_v20, 5  ;;  %v4915_v19 = vrot.slane %v4913_v39, 4 }
 0x18c   : > { %10633 = vst [vmem:[#allocation4_spill] sm:$0xff] %v9758_v17  ;;  %v4874_v16 = vsel %vm7841_vm3, %v4869_v38, %v9714_v41  ;;  %v4883_v7 = vrot.slane %v4882_v3, 4  ;;  %v4897_v10 = vrot.slane %v4895_v62, 5  ;;  %v6609_v55 = vrot.slane %v5375_v24, 9  ;;  %v9771_v17 = vld [vmem:[#allocation2 + $0xa4] sm:$0x1] }
 0x18d   : > { %v9767_v50 = vpop.f32.mrf.mxu1  ;;  %v9769_v63 = vpop.f32.mrf.mxu0  ;;  %v4926_v46 = vrot.slane %v4924_v56, 4  ;;  %v4929_v61 = vrot.slane %v4927_v57, 5  ;;  %v9773_v14 = vrot.slane %v4933_v43, 5  ;;  %v4939_v20 = vrot.slane %v4937_v21, 4  ;;  %v5376_v21 = vld [vmem:[#allocation2 + $0x9c] sm:$0xe] }
 0x18e   : > { %10634 = vst [vmem:[#allocation33_spill] sm:$0xff] %v9767_v50  ;;  %v4893_v37 = vrot.slane %v4892_v23, 4  ;;  %v5503_v39 = vrot.slane %v5501_v32, 4  ;;  %v5504_v33 = vrot.slane %v4643_v25, 5  ;;  %v4919_v11 = vshll.u32 %v4643_v25, 16 }
 0x18f   : > { %v7209_v42 = vpop.f32.mrf.mxu1  ;;  %v10635_v41 = vcombine.low %v9549_v58, %v9574_v53  ;;  %v9779_v38 = vpop.f32.mrf.mxu0  ;;  %v6639_v56 = vcombine.low %v9701_v36, %v9712_v52  ;;  %v4906_v57 = vor.u32 %v4905_v30, %v4902_v4  ;;  %v4916_v3 = vor.u32 %v4915_v19, %v9762_v60  ;;  %v4648_v52 = vld [vmem:[#allocation2 + $0xac] sm:$0xf]  ;;  %v5377_v43 = vld [vmem:[#allocation2 + $0xa8] sm:$0xe] }
 0x190   : > { %v5508_v62 = vrot.slane %v9716_v13, 5  ;;  %v9789_v24 = vcombine.low %v4864_v44, %v4874_v16  ;;  %v9795_v53 = vsel %vm8318_vm14, %v6609_v55, %v5501_v32  ;;  %v4943_v36 = vshll.u32 %v9771_v17, 16  ;;  %v4647_v23 = vld [vmem:[#allocation2 + $0xa8] sm:$0xf]  ;;  %v9810_v16 = vld [vmem:[#allocation2 + $0xb0] sm:$0x1] }
 0x191   : > { %7496 = vmatmul.mubr.bf16.vlgmr.msra.gmra.mxu1 %v9505_v26  ;;  %7552 = vmatmul.mubr.bf16.gmra.mxu0 %v10635_v41  ;;  %v10636_v26 = vcombine.low %v9628_v31, %v9632_v1  ;;  %v1974_v19 = vpop.f32.mrf.mxu1  ;;  %v9798_v13 = vpop.f32.mrf.mxu0  ;;  %v4930_v31 = vor.u32 %v4929_v61, %v4926_v46  ;;  %v4940_v1 = vor.u32 %v4939_v20, %v9773_v14  ;;  %v5515_v44 = vrot.slane %v4648_v52, 5 }
 0x192   : > { %7499 = vmatprep.mubr.bf16.mxu1 %v9513_v8  ;;  %10637 = vst [vmem:[#allocation34_spill] sm:$0xff] %v9798_v13  ;;  %v4888_v8 = vsel %vm7841_vm3, %v4883_v7, %v9720_v18  ;;  %v4898_v32 = vsel %vm7841_vm3, %v4893_v37, %v4897_v10  ;;  %v9808_v25 = vsel %vm8318_vm14, %v5503_v39, %v5504_v33  ;;  %v4921_v4 = vrot.slane %v4919_v11, 5 }
 0x193   : > { %7555 = vmatprep.mubr.bf16.mxu0 %v10636_v26  ;;  %v6610_v30 = vrot.slane %v5376_v21, 9  ;;  %v7210_v55 = vpop.f32.mrf.mxu1  ;;  %v9812_v41 = vpop.f32.mrf.mxu0  ;;  %v4907_v46 = vrot.slane %v4906_v57, 4  ;;  %v4917_v61 = vrot.slane %v4916_v3, 4  ;;  %v5510_v18 = vrot.slane %v5508_v62, 4 }
 0x194   : > { %10638 = vst [vmem:[#allocation35_spill] sm:$0xff] %v9812_v41  ;;  %v5511_v7 = vrot.slane %v9771_v17, 5  ;;  %v4945_v20 = vrot.slane %v4943_v36, 5  ;;  %v6611_v26 = vrot.slane %v5377_v43, 9  ;;  %v4948_v58 = vshrl.u32 %v4647_v23, 16 }
 0x195   : > { %v4951_v10 = vshll.u32 %v4647_v23, 16  ;;  %v1977_v37 = vpop.f32.mrf.mxu1  ;;  %v9815_v50 = vpop.f32.mrf.mxu0  ;;  %v4931_v33 = vrot.slane %v4930_v31, 4  ;;  %v4941_v11 = vrot.slane %v4940_v1, 4  ;;  %v5517_v39 = vrot.slane %v5515_v44, 4 }
 0x196   : > { %v5518_v21 = vrot.slane %v9810_v16, 5  ;;  %v9818_v13 = vcombine.low %v4888_v8, %v4898_v32  ;;  %v6641_v57 = vcombine.low %v9795_v53, %v9808_v25  ;;  %v4957_v3 = vshll.u32 %v4648_v52, 16 }
 0x197   : > { %v4961_v41 = vshrl.u32 %v4648_v52, 16  ;;  %v7213_v17 = vpop.f32.mrf.mxu1  ;;  %v10639_v36 = vcombine.low %v9651_v45, %v9667_v15  ;;  %v9826_v43 = vpop.f32.mrf.mxu0  ;;  %v4912_v31 = vsel %vm7841_vm3, %v4907_v46, %v9762_v60  ;;  %v9833_v8 = vsel %vm8318_vm14, %v6610_v30, %v5508_v62  ;;  %v10640_v52 = vld [vmem:[#allocation11_spill] sm:$0xff]  ;;  %v5378_v46 = vld [vmem:[#allocation2 + $0xb4] sm:$0xe] }
 0x198   : > { %v9837_v53 = vsel %vm8318_vm14, %v5510_v18, %v5511_v7  ;;  %v9844_v45 = vsel %vm8318_vm14, %v6611_v26, %v5515_v44  ;;  %v4950_v15 = vrot.slane %v4948_v58, 4  ;;  %v4953_v60 = vrot.slane %v4951_v10, 5  ;;  %v10641_v44 = vld [vmem:[#allocation5_spill] sm:$0xff]  ;;  %v10642_v58 = vld [vmem:[#allocation6_spill] sm:$0xff]  ;;  %v10644_v7 = vld [vmem:[#allocation8_spill] sm:$0xff] }
 0x199   : > { %7500 = vmatmul.mubr.bf16.gmra.mxu1 %v9597_v49  ;;  %7556 = vmatmul.mubr.bf16.gmra.mxu0 %v10639_v36  ;;  %v4922_v49 = vsel %vm7841_vm3, %v4917_v61, %v4921_v4  ;;  %v1983_v1 = vadd.f32 %v7209_v42, %v10640_v52  ;;  %v1990_v62 = vpop.f32.mrf.mxu1  ;;  %v9847_v23 = vpop.f32.mrf.mxu0  ;;  %v4936_v32 = vsel %vm7841_vm3, %v4931_v33, %v9773_v14  ;;  %v9860_v30 = vrot.slane %v4957_v3, 5  ;;  %v10643_v61 = vld [vmem:[#allocation7_spill] sm:$0xff]  ;;  %v4650_v52 = vld [vmem:[#allocation2 + $0xb4] sm:$0xf] }
 0x19a   : > { %7503 = vmatprep.mubr.bf16.mxu1 %v9608_v59  ;;  %7559 = vmatprep.mubr.bf16.mxu0 %v6639_v56  ;;  %v4946_v59 = vsel %vm7841_vm3, %v4941_v11, %v4945_v20  ;;  %v9856_v56 = vsel %vm8318_vm14, %v5517_v39, %v5518_v21  ;;  %v1975_v25 = vadd.f32 %v1974_v19, %v10641_v44  ;;  %v4963_v42 = vrot.slane %v4961_v41, 4  ;;  %v10645_v11 = vld [vmem:[#allocation9_spill] sm:$0xff]  ;;  %v9875_v21 = vld [vmem:[#allocation2 + $0xbc] sm:$0x1] }
 0x19b   : > { %v1986_v4 = vadd.f32 %v7210_v55, %v10642_v58  ;;  %v1978_v18 = vadd.f32 %v1977_v37, %v10643_v61  ;;  %v1999_v26 = vadd.f32 %v7213_v17, %v10644_v7  ;;  %v7214_v14 = vpop.f32.mrf.mxu1  ;;  %v9864_v10 = vpop.f32.mrf.mxu0  ;;  %v9866_v20 = vcombine.low %v4912_v31, %v4922_v49  ;;  %v10646_v37 = vld [vmem:[#allocation12_spill] sm:$0xff]  ;;  %v9886_v58 = vld [vmem:[#allocation2 + $0xb8] sm:$0xf] }
 0x19c   : > { %v6642_v33 = vcombine.low %v9833_v8, %v9837_v53  ;;  %v1991_v19 = vadd.f32 %v1990_v62, %v10645_v11  ;;  %v9871_v39 = vcombine.low %v4936_v32, %v4946_v59  ;;  %v6643_v55 = vcombine.low %v9844_v45, %v9856_v56  ;;  %v10647_v62 = vld [vmem:[#allocation14_spill] sm:$0xff]  ;;  %v4653_v11 = vld [vmem:[#allocation2 + $0xc0] sm:$0xf]  ;;  %v5380_v53 = vld [vmem:[#allocation2 + $0xcc] sm:$0xe] }
 0x19d   : > { %v4954_v41 = vor.u32 %v4953_v60, %v4950_v15  ;;  %v2002_v3 = vadd.f32 %v7214_v14, %v10646_v37  ;;  %v1993_v17 = vpop.f32.mrf.mxu1  ;;  %v9878_v36 = vpop.f32.mrf.mxu0  ;;  %v4967_v31 = vshll.u32 %v9810_v16, 16  ;;  %v6612_v49 = vrot.slane %v5378_v46, 9  ;;  %v9902_v46 = vld [vmem:[#allocation2 + $0xc4] sm:$0xf] }
 0x19e   : > { %v9882_v44 = vadd.f32 %v9637_v28, %v1983_v1  ;;  %v1994_v32 = vadd.f32 %v1993_v17, %v10647_v62  ;;  %v4964_v59 = vor.u32 %v4963_v42, %v9860_v30  ;;  %v9889_v15 = vadd.f32 %v9644_v29, %v1975_v25  ;;  %v10655_v45 = vld [vmem:[#allocation24_spill] sm:$0xff] }
 0x19f   : > { %v9892_v60 = vadd.f32 %v9661_v34, %v1986_v4  ;;  %v7217_v61 = vpop.f32.mrf.mxu1  ;;  %v10648_v16 = vcombine.low %v9740_v54, %v9754_v2  ;;  %v9898_v28 = vpop.f32.mrf.mxu0  ;;  %v5522_v1 = vrot.slane %v9886_v58, 5  ;;  %v5525_v42 = vrot.slane %v9875_v21, 5  ;;  %v5379_v2 = vld [vmem:[#allocation2 + $0xc0] sm:$0xe] }
 0x1a0   : > { %v9905_v29 = vadd.f32 %v9677_v51, %v1978_v18  ;;  %v9908_v34 = vadd.f32 %v9686_v12, %v1999_v26  ;;  %v4972_v54 = vshrl.u32 %v4650_v52, 16  ;;  %v5529_v25 = vrot.slane %v9902_v46, 5  ;;  %v9922_v12 = vld [vmem:[#allocation2 + $0xc8] sm:$0x1] }
 0x1a1   : > { %7504 = vmatmul.mubr.bf16.gmra.mxu1 %v9693_v27  ;;  %7560 = vmatmul.mubr.bf16.gmra.mxu0 %v10648_v16  ;;  %v2015_v27 = vadd.f32 %v7217_v61, %v9456_v48  ;;  %v9914_v4 = vadd.f32 %v9706_v5, %v1991_v19  ;;  %v2006_v7 = vpop.f32.mrf.mxu1  ;;  %v9916_v14 = vpop.f32.mrf.mxu0  ;;  %v9918_v51 = vrot.slane %v4954_v41, 4  ;;  %v9920_v18 = vrot.slane %v4967_v31, 5  ;;  %v10649_v31 = vld [vmem:[#allocation18_spill] sm:$0xff] }
 0x1a2   : > { %7507 = vmatprep.mubr.bf16.mxu1 %v9695_v47  ;;  %7563 = vmatprep.mubr.bf16.mxu0 %v6641_v57  ;;  %v9925_v48 = vadd.f32 %v9730_v6, %v2002_v3  ;;  %v9928_v47 = vadd.f32 %v9744_v0, %v1994_v32  ;;  %v2007_v57 = vadd.f32 %v2006_v7, %v9479_v9  ;;  %v4975_v26 = vshll.u32 %v4650_v52, 16  ;;  %v10650_v7 = vld [vmem:[#allocation20_spill] sm:$0xff] }
 0x1a3   : > { %v4981_v5 = vshll.u32 %v9886_v58, 16  ;;  %v9933_v19 = vadd.f32 %v9760_v35, %v2015_v27  ;;  %v7218_v41 = vpop.f32.mrf.mxu1  ;;  %v9935_v37 = vpop.f32.mrf.mxu0  ;;  %v9937_v17 = vrot.slane %v4964_v59, 4  ;;  %v9941_v6 = vsel %vm8318_vm14, %v6612_v49, %v5522_v1 }
 0x1a4   : > { %v5524_v0 = vrot.slane %v5522_v1, 4  ;;  %v6613_v3 = vrot.slane %v5379_v2, 9  ;;  %v2018_v9 = vadd.f32 %v7218_v41, %v10649_v31  ;;  %v5531_v52 = vrot.slane %v5529_v25, 4 }
 0x1a5   : > { %v5532_v62 = vrot.slane %v9922_v12, 5  ;;  %v9946_v32 = vadd.f32 %v9769_v63, %v2007_v57  ;;  %v2009_v35 = vpop.f32.mrf.mxu1  ;;  %v9948_v61 = vpop.f32.mrf.mxu0  ;;  %v9950_v16 = vrot.slane %v4972_v54, 4  ;;  %v4985_v59 = vshrl.u32 %v9886_v58, 16  ;;  %v10651_v57 = vld [vmem:[#allocation31_spill] sm:$0xff] }
 0x1a6   : > { %v4996_v27 = vshrl.u32 %v4653_v11, 16  ;;  %v4999_v49 = vshll.u32 %v4653_v11, 16  ;;  %v2010_v1 = vadd.f32 %v2009_v35, %v10650_v7  ;;  %v5005_v2 = vshll.u32 %v9902_v46, 16  ;;  %v10652_v35 = vld [vmem:[#allocation22_spill] sm:$0xff] }
 0x1a7   : > { %v5009_v41 = vshrl.u32 %v9902_v46, 16  ;;  %v9957_v31 = vadd.f32 %v9779_v38, %v2018_v9  ;;  %v7221_v63 = vpop.f32.mrf.mxu1  ;;  %v9963_v54 = vpop.f32.mrf.mxu0  ;;  %v4960_v58 = vsel %vm7841_vm3, %v9918_v51, %v9860_v30  ;;  %v5526_v46 = vsel %vm8318_vm14, %v5524_v0, %v5525_v42  ;;  %v9973_v9 = vld [vmem:[#allocation2 + $0xd0] sm:$0xf] }
 0x1a8   : > { %v4977_v11 = vrot.slane %v4975_v26, 5  ;;  %v5530_v38 = vsel %vm8318_vm14, %v6613_v3, %v5529_v25  ;;  %v2031_v7 = vadd.f32 %v7221_v63, %v10652_v35  ;;  %v5533_v8 = vsel %vm8318_vm14, %v5531_v52, %v5532_v62  ;;  %v9990_v63 = vld [vmem:[#allocation2 + $0xd4] sm:$0x1]  ;;  %v10656_v62 = vld [vmem:[#allocation35_spill] sm:$0xff] }
 0x1a9   : > { %7508 = vmatmul.mubr.bf16.gmra.mxu1 %v10651_v57  ;;  %7564 = vmatmul.mubr.bf16.gmra.mxu0 %v6642_v33  ;;  %v5536_v30 = vrot.slane %v9973_v9, 5  ;;  %v10653_v33 = vld [vmem:[#allocation34_spill] sm:$0xff]  ;;  %v2022_v25 = vpop.f32.mrf.mxu1  ;;  %v9986_v51 = vpop.f32.mrf.mxu0  ;;  %v9988_v26 = vrot.slane %v4981_v5, 5  ;;  %v4987_v0 = vrot.slane %v4985_v59, 4  ;;  %v5001_v3 = vrot.slane %v4999_v49, 5 }
 0x1aa   : > { %7511 = vmatprep.mubr.bf16.mxu1 %v9789_v24  ;;  %7567 = vmatprep.mubr.bf16.mxu0 %v6643_v55  ;;  %v9984_v42 = vadd.f32 %v10653_v33, %v2010_v1  ;;  %v4998_v24 = vrot.slane %v4996_v27, 4  ;;  %v2023_v56 = vadd.f32 %v2022_v25, %v10655_v45  ;;  %v9993_v55 = vrot.slane %v5005_v2, 5  ;;  %v10658_v33 = vld [vmem:[#allocation25_spill] sm:$0xff] }
 0x1ab   : > { %v5011_v52 = vrot.slane %v5009_v41, 4  ;;  %v9996_v57 = vadd.f32 %v10656_v62, %v2031_v7  ;;  %v7222_v1 = vpop.f32.mrf.mxu1  ;;  %v9998_v35 = vpop.f32.mrf.mxu0  ;;  %v4970_v5 = vsel %vm7841_vm3, %v9937_v17, %v9920_v18  ;;  %v6644_v59 = vcombine.low %v9941_v6, %v5526_v46  ;;  %v4656_v45 = vld [vmem:[#allocation2 + $0xcc] sm:$0xf]  ;;  %v10659_v46 = vld [vmem:[#allocation27_spill] sm:$0xff] }
 0x1ac   : > { %10654 = vst [vmem:[#allocation11_spill] sm:$0xff] %v9984_v42  ;;  %v6645_v27 = vcombine.low %v5530_v38, %v5533_v8  ;;  %v6614_v49 = vrot.slane %v5380_v53, 9  ;;  %v2034_v25 = vadd.f32 %v7222_v1, %v10658_v33  ;;  %v5538_v2 = vrot.slane %v5536_v30, 4 }
 0x1ad   : > { %10657 = vst [vmem:[#allocation5_spill] sm:$0xff] %v9996_v57  ;;  %v5539_v41 = vrot.slane %v9990_v63, 5  ;;  %v10008_v7 = vadd.f32 %v9815_v50, %v2023_v56  ;;  %v2025_v62 = vpop.f32.mrf.mxu1  ;;  %v4978_v57 = vor.u32 %v4977_v11, %v9950_v16  ;;  %v4988_v42 = vor.u32 %v4987_v0, %v9988_v26  ;;  %v10013_v17 = vpop.f32.mrf.mxu0 }
 0x1ae   : > { %v4991_v18 = vshll.u32 %v9875_v21, 16  ;;  %v5002_v6 = vor.u32 %v5001_v3, %v4998_v24  ;;  %v2026_v38 = vadd.f32 %v2025_v62, %v10659_v46  ;;  %v5012_v8 = vor.u32 %v5011_v52, %v9993_v55  ;;  %v10660_v3 = vld [vmem:[#allocation10_spill] sm:$0xff] }
 0x1af   : > { %v5015_v53 = vshll.u32 %v9922_v12, 16  ;;  %v10019_v1 = vadd.f32 %v9826_v43, %v2034_v25  ;;  %v7225_v50 = vpop.f32.mrf.mxu1  ;;  %v10022_v16 = vpop.f32.mrf.mxu0  ;;  %v5537_v21 = vsel %vm8318_vm14, %v6614_v49, %v5536_v30  ;;  %v5020_v11 = vshrl.u32 %v4656_v45, 16 }
 0x1b0   : > { %v5023_v0 = vshll.u32 %v4656_v45, 16  ;;  %v5029_v24 = vshll.u32 %v9973_v9, 16  ;;  %v2047_v56 = vadd.f32 %v7225_v50, %v10660_v3  ;;  %v5540_v43 = vsel %vm8318_vm14, %v5538_v2, %v5539_v41  ;;  %v10661_v45 = vld [vmem:[#allocation13_spill] sm:$0xff] }
 0x1b1   : > { %7512 = vmatmul.mubr.bf16.gmra.mxu1 %v9818_v13  ;;  %7568 = vmatmul.mubr.bf16.gmra.mxu0 %v6644_v59  ;;  %v5033_v13 = vshrl.u32 %v9973_v9, 16  ;;  %v10033_v12 = vadd.f32 %v9847_v23, %v2026_v38  ;;  %v2038_v52 = vpop.f32.mrf.mxu1  ;;  %v6587_v59 = vcombine.low %v4960_v58, %v4970_v5  ;;  %v4979_v30 = vrot.slane %v4978_v57, 4  ;;  %v10035_v25 = vpop.f32.mrf.mxu0  ;;  %v10662_v58 = vld [vmem:[#allocation15_spill] sm:$0xff] }
 0x1b2   : > { %7515 = vmatprep.mubr.bf16.mxu1 %v9866_v20  ;;  %7571 = vmatprep.mubr.bf16.mxu0 %v6645_v27  ;;  %v4989_v49 = vrot.slane %v4988_v42, 4  ;;  %v4993_v33 = vrot.slane %v4991_v18, 5  ;;  %v2039_v62 = vadd.f32 %v2038_v52, %v10661_v45  ;;  %v5003_v46 = vrot.slane %v5002_v6, 4 }
 0x1b3   : > { %v5017_v20 = vrot.slane %v5015_v53, 5  ;;  %v10039_v27 = vadd.f32 %v9864_v10, %v2047_v56  ;;  %v7226_v40 = vpop.f32.mrf.mxu1  ;;  %v5013_v9 = vrot.slane %v5012_v8, 4  ;;  %v6646_v23 = vcombine.low %v5537_v21, %v5540_v43  ;;  %v10663_v53 = vld [vmem:[#allocation16_spill] sm:$0xff]  ;;  %v10664_v56 = vld [vmem:[#allocation17_spill] sm:$0xff] }
 0x1b4   : > { %v10041_v2 = vpop.f32.mrf.mxu0  ;;  %v5022_v41 = vrot.slane %v5020_v11, 4  ;;  %v5025_v38 = vrot.slane %v5023_v0, 5  ;;  %v2050_v57 = vadd.f32 %v7226_v40, %v10662_v58  ;;  %v5031_v42 = vrot.slane %v5029_v24, 5  ;;  %v10666_v40 = vld [vmem:[#allocation21_spill] sm:$0xff]  ;;  %v10667_v58 = vld [vmem:[#allocation23_spill] sm:$0xff] }
 0x1b5   : > { %v5035_v5 = vrot.slane %v5033_v13, 4  ;;  %v10045_v18 = vadd.f32 %v9878_v36, %v2039_v62  ;;  %v2041_v50 = vpop.f32.mrf.mxu1  ;;  %v4984_v3 = vsel %vm7841_vm3, %v4979_v30, %v9988_v26  ;;  %v4994_v11 = vsel %vm7841_vm3, %v4989_v49, %v4993_v33  ;;  %v10665_v49 = vld [vmem:[#allocation19_spill] sm:$0xff] }
 0x1b6   : > { %v10047_v6 = vpop.f32.mrf.mxu0  ;;  %v2042_v10 = vadd.f32 %v2041_v50, %v10663_v53  ;;  %v10054_v8 = vadd.f32 %v9898_v28, %v2050_v57  ;;  %v5008_v36 = vsel %vm7841_vm3, %v5003_v46, %v9993_v55  ;;  %v5018_v0 = vsel %vm7841_vm3, %v5013_v9, %v5017_v20  ;;  %v10668_v53 = vld [vmem:[#allocation26_spill] sm:$0xff] }
 0x1b7   : > { %v5039_v24 = vshll.u32 %v9990_v63, 16  ;;  %v5026_v43 = vor.u32 %v5025_v38, %v5022_v41  ;;  %v5036_v13 = vor.u32 %v5035_v5, %v5031_v42  ;;  %v6588_v62 = vcombine.low %v4984_v3, %v4994_v11 }
 0x1b8   : > { %v7229_v21 = vpop.f32.mrf.mxu1  ;;  %v7286_v26 = vpop.f32.mrf.mxu0  ;;  %v6589_v46 = vcombine.low %v5008_v36, %v5018_v0  ;;  %v10669_v0 = vld [vmem:[#allocation28_spill] sm:$0xff] }
 0x1b9   : > { %7516 = vmatmul.mubr.bf16.gmra.mxu1 %v9871_v39  ;;  %7572 = vmatmul.mubr.bf16.gmra.mxu0 %v6646_v23  ;;  %v2063_v28 = vadd.f32 %v7229_v21, %v10664_v56  ;;  %v10067_v39 = vadd.f32 %v9916_v14, %v2042_v10  ;;  %v5041_v63 = vrot.slane %v5039_v24, 5  ;;  %v5037_v23 = vrot.slane %v5036_v13, 4  ;;  %v10670_v13 = vld [vmem:[#allocation29_spill] sm:$0xff] }
 0x1ba   : > { %7519 = vmatprep.mubr.bf16.mxu1 %v6587_v59  ;;  %v2054_v52 = vpop.f32.mrf.mxu1  ;;  %v2542_v30 = vpop.f32.mrf.mxu0  ;;  %v5027_v59 = vrot.slane %v5026_v43, 4 }
 0x1bb   : > { %v2055_v33 = vadd.f32 %v2054_v52, %v10665_v49  ;;  %v10071_v55 = vadd.f32 %v9935_v37, %v2063_v28 }
 0x1bc   : > { %v7230_v45 = vpop.f32.mrf.mxu1  ;;  %v7353_v20 = vpop.f32.mrf.mxu0  ;;  %v5032_v3 = vsel %vm7841_vm3, %v5027_v59, %v5031_v42 }
 0x1bd   : > { %v2066_v9 = vadd.f32 %v7230_v45, %v10666_v40  ;;  %v10075_v41 = vadd.f32 %v9948_v61, %v2055_v33  ;;  %v5042_v61 = vsel %vm7841_vm3, %v5037_v23, %v5041_v63  ;;  %v10671_v33 = vld [vmem:[#allocation30_spill] sm:$0xff]  ;;  %v10673_v23 = vld [vmem:[#allocation3_spill] sm:$0xff] }
 0x1be   : > { %v2057_v14 = vpop.f32.mrf.mxu1  ;;  %v3567_v38 = vpop.f32.mrf.mxu0  ;;  %v6590_v28 = vcombine.low %v5032_v3, %v5042_v61  ;;  %v10675_v61 = vld [vmem:[#allocation33_spill] sm:$0xff] }
 0x1bf   : > { %v2058_v57 = vadd.f32 %v2057_v14, %v10667_v58  ;;  %v10079_v5 = vadd.f32 %v9963_v54, %v2066_v9 }
 0x1c0   : > { %v7354_v50 = vpop.f32.mrf.mxu0 }
 0x1c1   : > { %v7233_v37 = vpop.f32.mrf.mxu1  ;;  %7520 = vmatmul.mubr.bf16.gmra.mxu1 %v6588_v62  ;;  %v10087_v21 = vadd.f32 %v9986_v51, %v2058_v57 }
 0x1c2   : > { %v2079_v10 = vadd.f32 %v7233_v37, %v10668_v53  ;;  %7523 = vmatprep.mubr.bf16.mxu1 %v6589_v46  ;;  %v3570_v36 = vpop.f32.mrf.mxu0  ;;  %v10674_v37 = vld [vmem:[#allocation4_spill] sm:$0xff] }
 0x1c3   : > { %v2070_v11 = vpop.f32.mrf.mxu1 }
 0x1c4   : > { %v2071_v54 = vadd.f32 %v2070_v11, %v10669_v0  ;;  %v10091_v24 = vadd.f32 %v9998_v35, %v2079_v10  ;;  %v7357_v43 = vpop.f32.mrf.mxu0  ;;  %v10672_v35 = vld [vmem:[#allocation32_spill] sm:$0xff] }
 0x1c5   : > { %v7234_v56 = vpop.f32.mrf.mxu1 }
 0x1c6   : > { %v2082_v52 = vadd.f32 %v7234_v56, %v10670_v13  ;;  %v10095_v42 = vadd.f32 %v10013_v17, %v2071_v54  ;;  %v3583_v49 = vpop.f32.mrf.mxu0 }
 0x1c7   : > { %v2073_v22 = vpop.f32.mrf.mxu1 }
 0x1c8   : > { %v2074_v51 = vadd.f32 %v2073_v22, %v10671_v33  ;;  %v10099_v45 = vadd.f32 %v10022_v16, %v2082_v52  ;;  %v7358_v46 = vpop.f32.mrf.mxu0 }
 0x1c9   : > { %v7237_v62 = vpop.f32.mrf.mxu1  ;;  %7524 = vmatmul.mubr.bf16.gmra.mxu1 %v6590_v28 }
 0x1ca   : > { %v2095_v63 = vadd.f32 %v7237_v62, %v10672_v35  ;;  %v10103_v40 = vadd.f32 %v10035_v25, %v2074_v51  ;;  %v3586_v59 = vpop.f32.mrf.mxu0 }
 0x1cb   : > { %v2086_v9 = vpop.f32.mrf.mxu1 }
 0x1cc   : > { %v2087_v17 = vadd.f32 %v2086_v9, %v10673_v23  ;;  %v10107_v14 = vadd.f32 %v10041_v2, %v2095_v63  ;;  %v7361_v57 = vpop.f32.mrf.mxu0 }
 0x1cd   : > { %v7238_v58 = vpop.f32.mrf.mxu1 }
 0x1ce   : > { %v2098_v16 = vadd.f32 %v7238_v58, %v10674_v37  ;;  %v10111_v53 = vadd.f32 %v10047_v6, %v2087_v17  ;;  %v3599_v3 = vpop.f32.mrf.mxu0 }
 0x1cf   : > { %v2089_v10 = vpop.f32.mrf.mxu1 }
 0x1d0   : > { %v2090_v11 = vadd.f32 %v2089_v10, %v10675_v61  ;;  %v10114_v25 = vadd.f32 %v7286_v26, %v2098_v16  ;;  %v7362_v54 = vpop.f32.mrf.mxu0 }
 0x1d1   : > { %v7305_v0 = vpop.f32.mrf.mxu1 }
 0x1d2   : > { %v2942_v56 = vadd.f32 %v7305_v0, %v9882_v44  ;;  %v10117_v28 = vadd.f32 %v2542_v30, %v2090_v11  ;;  %v3602_v13 = vpop.f32.mrf.mxu0 }
 0x1d3   : > { %v2813_v2 = vpop.f32.mrf.mxu1 }
 0x1d4   : > { %v2940_v52 = vadd.f32 %v2813_v2, %v9889_v15  ;;  %v10120_v22 = vadd.f32 %v7353_v20, %v2942_v56  ;;  %v7365_v33 = vpop.f32.mrf.mxu0 }
 0x1d5   : > { %v7306_v6 = vpop.f32.mrf.mxu1 }
 0x1d6   : > { %v2943_v51 = vadd.f32 %v7306_v6, %v9892_v60  ;;  %v10123_v62 = vadd.f32 %v3567_v38, %v2940_v52  ;;  %v3615_v35 = vpop.f32.mrf.mxu0 }
 0x1d7   : > { %v2816_v26 = vpop.f32.mrf.mxu1 }
 0x1d8   : > { %v2941_v63 = vadd.f32 %v2816_v26, %v9905_v29  ;;  %v10126_v9 = vadd.f32 %v7354_v50, %v2943_v51  ;;  %v7366_v30 = vpop.f32.mrf.mxu0  ;;  %v10676_v26 = vld [vmem:[#allocation11_spill] sm:$0xff] }
 0x1d9   : > { %v7309_v44 = vpop.f32.mrf.mxu1 }
 0x1da   : > { %v2946_v23 = vadd.f32 %v7309_v44, %v9908_v34  ;;  %v10129_v17 = vadd.f32 %v3570_v36, %v2941_v63  ;;  %v3618_v20 = vpop.f32.mrf.mxu0 }
 0x1db   : > { %v2829_v15 = vpop.f32.mrf.mxu1 }
 0x1dc   : > { %v2944_v58 = vadd.f32 %v2829_v15, %v9914_v4  ;;  %v10132_v37 = vadd.f32 %v7357_v43, %v2946_v23  ;;  %v7369_v38 = vpop.f32.mrf.mxu0  ;;  %v10677_v23 = vld [vmem:[#allocation5_spill] sm:$0xff] }
 0x1dd   : > { %v7310_v60 = vpop.f32.mrf.mxu1 }
 0x1de   : > { %v2947_v16 = vadd.f32 %v7310_v60, %v9925_v48  ;;  %v10135_v10 = vadd.f32 %v3583_v49, %v2944_v58  ;;  %v3631_v50 = vpop.f32.mrf.mxu0 }
 0x1df   : > { %v2832_v29 = vpop.f32.mrf.mxu1 }
 0x1e0   : > { %v2945_v61 = vadd.f32 %v2832_v29, %v9928_v47  ;;  %v10138_v11 = vadd.f32 %v7358_v46, %v2947_v16  ;;  %v7370_v36 = vpop.f32.mrf.mxu0 }
 0x1e1   : > { %v7313_v34 = vpop.f32.mrf.mxu1 }
 0x1e2   : > { %v2950_v0 = vadd.f32 %v7313_v34, %v9933_v19  ;;  %v10141_v56 = vadd.f32 %v3586_v59, %v2945_v61  ;;  %v3634_v43 = vpop.f32.mrf.mxu0 }
 0x1e3   : > { %v2845_v4 = vpop.f32.mrf.mxu1 }
 0x1e4   : > { %v2948_v2 = vadd.f32 %v2845_v4, %v9946_v32  ;;  %v10144_v52 = vadd.f32 %v7361_v57, %v2950_v0  ;;  %v7373_v49 = vpop.f32.mrf.mxu0 }
 0x1e5   : > { %v7314_v48 = vpop.f32.mrf.mxu1 }
 0x1e6   : > { %v2951_v6 = vadd.f32 %v7314_v48, %v9957_v31  ;;  %v10147_v51 = vadd.f32 %v3599_v3, %v2948_v2  ;;  %v3647_v46 = vpop.f32.mrf.mxu0 }
 0x1e7   : > { %v2848_v47 = vpop.f32.mrf.mxu1 }
 0x1e8   : > { %v2949_v63 = vadd.f32 %v2848_v47, %v10676_v26  ;;  %v10150_v44 = vadd.f32 %v7362_v54, %v2951_v6  ;;  %v7374_v59 = vpop.f32.mrf.mxu0 }
 0x1e9   : > { %v7317_v19 = vpop.f32.mrf.mxu1 }
 0x1ea   : > { %v2954_v15 = vadd.f32 %v7317_v19, %v10677_v23  ;;  %v10153_v58 = vadd.f32 %v3602_v13, %v2949_v63  ;;  %v3650_v57 = vpop.f32.mrf.mxu0 }
 0x1eb   : > { %v2861_v32 = vpop.f32.mrf.mxu1 }
 0x1ec   : > { %v2952_v60 = vadd.f32 %v2861_v32, %v10008_v7  ;;  %v10156_v16 = vadd.f32 %v7365_v33, %v2954_v15  ;;  %v7377_v3 = vpop.f32.mrf.mxu0 }
 0x1ed   : > { %v7318_v31 = vpop.f32.mrf.mxu1 }
 0x1ee   : > { %v2955_v29 = vadd.f32 %v7318_v31, %v10019_v1  ;;  %v10159_v61 = vadd.f32 %v3615_v35, %v2952_v60  ;;  %v3663_v34 = vpop.f32.mrf.mxu0 }
 0x1ef   : > { %v2864_v54 = vpop.f32.mrf.mxu1 }
 0x1f0   : > { %v2953_v0 = vadd.f32 %v2864_v54, %v10033_v12  ;;  %v10162_v4 = vadd.f32 %v7366_v30, %v2955_v29  ;;  %v7378_v2 = vpop.f32.mrf.mxu0 }
 0x1f1   : > { %v7321_v13 = vpop.f32.mrf.mxu1 }
 0x1f2   : > { %v2958_v48 = vadd.f32 %v7321_v13, %v10039_v27  ;;  %v10165_v6 = vadd.f32 %v3618_v20, %v2953_v0  ;;  %v3666_v35 = vpop.f32.mrf.mxu0 }
 0x1f3   : > { %v2877_v7 = vpop.f32.mrf.mxu1 }
 0x1f4   : > { %v2956_v33 = vadd.f32 %v2877_v7, %v10045_v18  ;;  %v10168_v47 = vadd.f32 %v7369_v38, %v2958_v48 }
 0x1f5   : > { %v7322_v1 = vpop.f32.mrf.mxu1 }
 0x1f6   : > { %v2959_v26 = vadd.f32 %v7322_v1, %v10054_v8  ;;  %v10171_v63 = vadd.f32 %v3631_v50, %v2956_v33 }
 0x1f7   : > { %v2880_v12 = vpop.f32.mrf.mxu1 }
 0x1f8   : > { %v2957_v30 = vadd.f32 %v2880_v12, %v10067_v39  ;;  %v10174_v19 = vadd.f32 %v7370_v36, %v2959_v26  ;;  %v7381_v27 = vpop.f32.mrf.mxu0 }
 0x1f9   : > { %v7325_v23 = vpop.f32.mrf.mxu1 }
 0x1fa   : > { %v2962_v20 = vadd.f32 %v7325_v23, %v10071_v55  ;;  %v10177_v15 = vadd.f32 %v3634_v43, %v2957_v30  ;;  %v3679_v38 = vpop.f32.mrf.mxu0 }
 0x1fb   : > { %v2893_v18 = vpop.f32.mrf.mxu1 }
 0x1fc   : > { %v2960_v32 = vadd.f32 %v2893_v18, %v10075_v41  ;;  %v10180_v60 = vadd.f32 %v7373_v49, %v2962_v20  ;;  %v7382_v50 = vpop.f32.mrf.mxu0 }
 0x1fd   : > { %v7326_v8 = vpop.f32.mrf.mxu1 }
 0x1fe   : > { %v2963_v31 = vadd.f32 %v7326_v8, %v10079_v5  ;;  %v10183_v29 = vadd.f32 %v3647_v46, %v2960_v32  ;;  %v3682_v36 = vpop.f32.mrf.mxu0 }
 0x1ff   : > { %v2896_v39 = vpop.f32.mrf.mxu1 }
 0x200   : > { %10678 = vst [vmem:[#allocation6_spill] sm:$0xff] %v10183_v29  ;;  %v2961_v54 = vadd.f32 %v2896_v39, %v10087_v21  ;;  %v10186_v0 = vadd.f32 %v7374_v59, %v2963_v31  ;;  %v7449_v43 = vpop.f32.mrf.mxu0 }
 0x201   : > { %v7329_v55 = vpop.f32.mrf.mxu1 }
 0x202   : > { %10679 = vst [vmem:[#allocation7_spill] sm:$0xff] %v10186_v0  ;;  %v2966_v13 = vadd.f32 %v7329_v55, %v10091_v24  ;;  %v10189_v48 = vadd.f32 %v3650_v57, %v2961_v54  ;;  %v4452_v49 = vpop.f32.mrf.mxu0 }
 0x203   : > { %v2909_v41 = vpop.f32.mrf.mxu1 }
 0x204   : > { %10680 = vst [vmem:[#allocation8_spill] sm:$0xff] %v10189_v48  ;;  %v2964_v7 = vadd.f32 %v2909_v41, %v10095_v42  ;;  %v10192_v33 = vadd.f32 %v7377_v3, %v2966_v13  ;;  %v10194_v46 = vpop.f32.mrf.mxu0 }
 0x205   : > { %v7330_v5 = vpop.f32.mrf.mxu1 }
 0x206   : > { %v2967_v1 = vadd.f32 %v7330_v5, %v10099_v45  ;;  %v10197_v21 = vadd.f32 %v3663_v34, %v2964_v7  ;;  %v10199_v26 = vpop.f32.mrf.mxu0 }
 0x207   : > { %v2912_v59 = vpop.f32.mrf.mxu1 }
 0x208   : > { %10681 = vst [vmem:[#allocation9_spill] sm:$0xff] %v10197_v21  ;;  %v2965_v24 = vadd.f32 %v2912_v59, %v10103_v40  ;;  %v10202_v57 = vadd.f32 %v7378_v2, %v2967_v1  ;;  %v7453_v30 = vpop.f32.mrf.mxu0 }
 0x209   : > { %v7333_v12 = vpop.f32.mrf.mxu1 }
 0x20a   : > { %10682 = vst [vmem:[#allocation12_spill] sm:$0xff] %v10202_v57  ;;  %v2970_v42 = vadd.f32 %v7333_v12, %v10107_v14  ;;  %v10205_v3 = vadd.f32 %v3666_v35, %v2965_v24  ;;  %v10207_v20 = vpop.f32.mrf.mxu0 }
 0x20b   : > { %v2925_v23 = vpop.f32.mrf.mxu1 }
 0x20c   : > { %10683 = vst [vmem:[#allocation14_spill] sm:$0xff] %v10205_v3  ;;  %v2968_v45 = vadd.f32 %v2925_v23, %v10111_v53  ;;  %v10210_v34 = vadd.f32 %v7381_v27, %v2970_v42  ;;  %v10212_v32 = vpop.f32.mrf.mxu0 }
 0x20d   : > { %v7334_v18 = vpop.f32.mrf.mxu1 }
 0x20e   : > { %v2971_v40 = vadd.f32 %v7334_v18, %v10114_v25  ;;  %v10215_v2 = vadd.f32 %v3679_v38, %v2968_v45  ;;  %v10217_v31 = vpop.f32.mrf.mxu0 }
 0x20f   : > { %v2928_v8 = vpop.f32.mrf.mxu1 }
 0x210   : > { %10684 = vst [vmem:[#allocation18_spill] sm:$0xff] %v10215_v2  ;;  %v2969_v14 = vadd.f32 %v2928_v8, %v10117_v28  ;;  %v10220_v35 = vadd.f32 %v7382_v50, %v2971_v40  ;;  %v7457_v54 = vpop.f32.mrf.mxu0 }
 0x211   : > { %v7401_v39 = vpop.f32.mrf.mxu1 }
 0x212   : > { %10685 = vst [vmem:[#allocation20_spill] sm:$0xff] %v10220_v35  ;;  %v4194_v53 = vadd.f32 %v7401_v39, %v10120_v22  ;;  %v10223_v27 = vadd.f32 %v3682_v36, %v2969_v14  ;;  %v10225_v13 = vpop.f32.mrf.mxu0 }
 0x213   : > { %v4065_v55 = vpop.f32.mrf.mxu1 }
 0x214   : > { %10686 = vst [vmem:[#allocation31_spill] sm:$0xff] %v10223_v27  ;;  %v4192_v25 = vadd.f32 %v4065_v55, %v10123_v62  ;;  %v10228_v38 = vadd.f32 %v7449_v43, %v4194_v53  ;;  %v10232_v7 = vpop.f32.mrf.mxu0 }
 0x215   : > { %v10230_v41 = vpop.f32.mrf.mxu1 }
 0x216   : > { %v10234_v28 = vadd.f32 %v4452_v49, %v4192_v25  ;;  %v10238_v5 = vpop.f32.mrf.mxu0 }
 0x217   : > { %v10236_v50 = vpop.f32.mrf.mxu1 }
 0x218   : > { %v7461_v36 = vpop.f32.mrf.mxu0 }
 0x219   : > { %v7405_v22 = vpop.f32.mrf.mxu1 }
 0x21a   : > { %v4198_v1 = vadd.f32 %v7405_v22, %v10132_v37  ;;  %v10243_v24 = vpop.f32.mrf.mxu0 }
 0x21b   : > { %v10241_v59 = vpop.f32.mrf.mxu1 }
 0x21c   : > { %v10245_v62 = vadd.f32 %v7453_v30, %v4198_v1  ;;  %v10249_v12 = vpop.f32.mrf.mxu0 }
 0x21d   : > { %v10247_v43 = vpop.f32.mrf.mxu1 }
 0x21e   : > { %v10253_v42 = vpop.f32.mrf.mxu0 }
 0x21f   : > { %v10251_v49 = vpop.f32.mrf.mxu1 }
 0x220   : > { %v7465_v45 = vpop.f32.mrf.mxu0 }
 0x221   : > { %v7409_v23 = vpop.f32.mrf.mxu1 }
 0x222   : > { %v4202_v18 = vadd.f32 %v7409_v23, %v10144_v52  ;;  %v10258_v37 = vpop.f32.mrf.mxu0 }
 0x223   : > { %v10256_v40 = vpop.f32.mrf.mxu1  ;;  %10687 = vst [vmem:[#allocation22_spill] sm:$0xff] %v10258_v37 }
 0x224   : > { %v10260_v8 = vadd.f32 %v7457_v54, %v4202_v18  ;;  %v10264_v14 = vpop.f32.mrf.mxu0 }
 0x225   : > { %v10262_v30 = vpop.f32.mrf.mxu1  ;;  %10688 = vst [vmem:[#allocation34_spill] sm:$0xff] %v10264_v14 }
 0x226   : > { %v10268_v53 = vpop.f32.mrf.mxu0 }
 0x227   : > { %v10266_v39 = vpop.f32.mrf.mxu1  ;;  %10689 = vst [vmem:[#allocation24_spill] sm:$0xff] %v10268_v53 }
 0x228   : > { %v7469_v25 = vpop.f32.mrf.mxu0 }
 0x229   : > { %v7413_v55 = vpop.f32.mrf.mxu1 }
 0x22a   : > { %v4206_v22 = vadd.f32 %v7413_v55, %v10156_v16  ;;  %v10273_v52 = vpop.f32.mrf.mxu0 }
 0x22b   : > { %v10271_v1 = vpop.f32.mrf.mxu1  ;;  %10690 = vst [vmem:[#allocation35_spill] sm:$0xff] %v10273_v52 }
 0x22c   : > { %v10275_v23 = vadd.f32 %v7461_v36, %v4206_v22  ;;  %v10279_v18 = vpop.f32.mrf.mxu0 }
 0x22d   : > { %v10277_v54 = vpop.f32.mrf.mxu1  ;;  %10691 = vst [vmem:[#allocation25_spill] sm:$0xff] %v10279_v18 }
 0x22e   : > { %v10283_v35 = vpop.f32.mrf.mxu0 }
 0x22f   : > { %v10281_v27 = vpop.f32.mrf.mxu1  ;;  %10692 = vst [vmem:[#allocation27_spill] sm:$0xff] %v10283_v35 }
 0x230   : > { %v7473_v3 = vpop.f32.mrf.mxu0 }
 0x231   : > { %v7417_v2 = vpop.f32.mrf.mxu1 }
 0x232   : > { %v4210_v57 = vadd.f32 %v7417_v2, %v10168_v47  ;;  %v10288_v16 = vpop.f32.mrf.mxu0 }
 0x233   : > { %v10286_v21 = vpop.f32.mrf.mxu1  ;;  %10693 = vst [vmem:[#allocation10_spill] sm:$0xff] %v10288_v16 }
 0x234   : > { %v10290_v55 = vadd.f32 %v7465_v45, %v4210_v57  ;;  %v10294_v22 = vpop.f32.mrf.mxu0 }
 0x235   : > { %v10292_v36 = vpop.f32.mrf.mxu1  ;;  %10695 = vst [vmem:[#allocation15_spill] sm:$0xff] %v10294_v22 }
 0x236   : > { %10694 = vst [vmem:[#allocation13_spill] sm:$0xff] %v10290_v55  ;;  %v10298_v18 = vpop.f32.mrf.mxu0 }
 0x237   : > { %v10296_v52 = vpop.f32.mrf.mxu1  ;;  %10697 = vst [vmem:[#allocation17_spill] sm:$0xff] %v10298_v18 }
 0x238   : > { %10696 = vst [vmem:[#allocation16_spill] sm:$0xff] %v10296_v52  ;;  %v7477_v35 = vpop.f32.mrf.mxu0 }
 0x239   : > { %v7421_v48 = vpop.f32.mrf.mxu1 }
 0x23a   : > { %v4214_v53 = vadd.f32 %v7421_v48, %v10180_v60  ;;  %v10303_v47 = vpop.f32.mrf.mxu0 }
 0x23b   : > { %v10301_v0 = vpop.f32.mrf.mxu1  ;;  %10699 = vst [vmem:[#allocation21_spill] sm:$0xff] %v10303_v47 }
 0x23c   : > { %10698 = vst [vmem:[#allocation19_spill] sm:$0xff] %v10301_v0  ;;  %v10305_v2 = vadd.f32 %v7469_v25, %v4214_v53  ;;  %v10309_v45 = vpop.f32.mrf.mxu0 }
 0x23d   : > { %v10307_v57 = vpop.f32.mrf.mxu1  ;;  %10702 = vst [vmem:[#allocation28_spill] sm:$0xff] %v10309_v45 }
 0x23e   : > { %10700 = vst [vmem:[#allocation23_spill] sm:$0xff] %v10305_v2  ;;  %10701 = vst [vmem:[#allocation26_spill] sm:$0xff] %v10307_v57  ;;  %v10313_v22 = vpop.f32.mrf.mxu0 }
 0x23f   : > { %v10311_v16 = vpop.f32.mrf.mxu1  ;;  %10704 = vst [vmem:[#allocation30_spill] sm:$0xff] %v10313_v22 }
 0x240   : > { %10703 = vst [vmem:[#allocation29_spill] sm:$0xff] %v10311_v16  ;;  %v7545_v18 = vpop.f32.mrf.mxu0 }
 0x241   : > { %v7425_v29 = vpop.f32.mrf.mxu1 }
 0x242   : > { %v4218_v55 = vadd.f32 %v7425_v29, %v10192_v33  ;;  %v5704_v60 = vpop.f32.mrf.mxu0 }
 0x243   : > { %v10316_v14 = vpop.f32.mrf.mxu1 }
 0x244   : > { %10705 = vst [vmem:[#allocation32_spill] sm:$0xff] %v10316_v14  ;;  %v10318_v48 = vadd.f32 %v7473_v3, %v4218_v55  ;;  %v7546_v53 = vpop.f32.mrf.mxu0  ;;  %v4196_v14 = vadd.f32 %v10241_v59, %v10135_v10 }
 0x245   : > { %v10320_v47 = vpop.f32.mrf.mxu1 }
 0x246   : > { %10706 = vst [vmem:[#allocation3_spill] sm:$0xff] %v10318_v48  ;;  %10707 = vst [vmem:[#allocation4_spill] sm:$0xff] %v10320_v47  ;;  %v5707_v2 = vpop.f32.mrf.mxu0  ;;  %v4195_v48 = vadd.f32 %v10230_v41, %v10126_v9 }
 0x247   : > { %v10322_v25 = vpop.f32.mrf.mxu1 }
 0x248   : > { %10708 = vst [vmem:[#allocation33_spill] sm:$0xff] %v10322_v25  ;;  %v7549_v57 = vpop.f32.mrf.mxu0 }
 0x249   : > { %v7429_v45 = vpop.f32.mrf.mxu1 }
 0x24a   : > { %v4222_v16 = vadd.f32 %v7429_v45, %v10210_v34  ;;  %v5720_v0 = vpop.f32.mrf.mxu0  ;;  %v4193_v34 = vadd.f32 %v10236_v50, %v10129_v17  ;;  %v4199_v17 = vadd.f32 %v10247_v43, %v10138_v11 }
 0x24b   : > { %v10325_v22 = vpop.f32.mrf.mxu1 }
 0x24c   : > { %10709 = vst [vmem:[#allocation11_spill] sm:$0xff] %v10325_v22  ;;  %v10327_v37 = vadd.f32 %v7477_v35, %v4222_v16  ;;  %v7550_v33 = vpop.f32.mrf.mxu0  ;;  %v4580_v41 = vadd.f32 %v10199_v26, %v4193_v34  ;;  %v4200_v34 = vadd.f32 %v10256_v40, %v10147_v51 }
 0x24d   : > { %v10329_v29 = vpop.f32.mrf.mxu1 }
 0x24e   : > { %10710 = vst [vmem:[#allocation5_spill] sm:$0xff] %v10327_v37  ;;  %10711 = vst [vmem:[#allocation36_spill] sm:$0xff] %v10329_v29  ;;  %v10333_v55 = vpop.f32.mrf.mxu0  ;;  %v4582_v37 = vadd.f32 %v10194_v46, %v4195_v48  ;;  %v4197_v46 = vadd.f32 %v10251_v49, %v10141_v56  ;;  %v4586_v56 = vadd.f32 %v10212_v32, %v4199_v17 }
 0x24f   : > { %v10331_v3 = vpop.f32.mrf.mxu1 }
 0x250   : > { %10712 = vst [vmem:[#allocation37_spill] sm:$0xff] %v10331_v3 }
 0x251   : > { %v7497_v25 = vpop.f32.mrf.mxu1  ;;  %v10337_v47 = vpop.f32.mrf.mxu0 }
 0x252   : > { %v5335_v35 = vadd.f32 %v7497_v25, %v10228_v38 }
 0x253   : > { %v5206_v45 = vpop.f32.mrf.mxu1  ;;  %v10341_v22 = vpop.f32.mrf.mxu0 }
 0x254   : > { %v5333_v16 = vadd.f32 %v5206_v45, %v10234_v28  ;;  %v5833_v38 = vadd.f32 %v7545_v18, %v5335_v35 }
 0x255   : > { %v7498_v3 = vpop.f32.mrf.mxu1  ;;  %v10346_v29 = vpop.f32.mrf.mxu0 }
 0x256   : > { %v5336_v9 = vadd.f32 %v7498_v3, %v4582_v37  ;;  %v5831_v25 = vadd.f32 %v5704_v60, %v5333_v16  ;;  %v4583_v37 = vadd.f32 %v10207_v20, %v4196_v14  ;;  %v6062_v20 = vmul.f32 %v5833_v38, %v5833_v38 }
 0x257   : > { %v5209_v50 = vpop.f32.mrf.mxu1  ;;  %v10353_v52 = vpop.f32.mrf.mxu0 }
 0x258   : > { %v5834_v28 = vadd.f32 %v7546_v53, %v5336_v9  ;;  %v5334_v45 = vadd.f32 %v5209_v50, %v4580_v41  ;;  %v6060_v60 = vmul.f32 %v5831_v25, %v5831_v25  ;;  %v4203_v41 = vadd.f32 %v10262_v30, %v10150_v44 }
 0x259   : > { %v7501_v10 = vpop.f32.mrf.mxu1  ;;  %v10364_v26 = vpop.f32.mrf.mxu0 }
 0x25a   : > { %v6825_v11 = vpack.c.bf16 %v5834_v28, %v5833_v38  ;;  %v5832_v59 = vadd.f32 %v5707_v2, %v5334_v45  ;;  %v5339_v43 = vadd.f32 %v7501_v10, %v10245_v62  ;;  %v4584_v62 = vadd.f32 %v10217_v31, %v4197_v46 }
 0x25b   : > { %v5222_v18 = vpop.f32.mrf.mxu1  ;;  %v10369_v49 = vpop.f32.mrf.mxu0  ;;  %v6063_v17 = vmul.f32 %v5834_v28, %v5834_v28 }
 0x25c   : > { %6912 = vst [vmem:[%s10362_s21 + $0x8] sm:$0xff] %v6825_v11   ;;  %v6820_v48 = vpack.c.bf16 %v5832_v59, %v5831_v25  ;;  %v6023_v53 = vadd.f32 %v5832_v59, %v5831_v25  ;;  %v6061_v3 = vmul.f32 %v5832_v59, %v5832_v59  ;;  %v5337_v35 = vadd.f32 %v5222_v18, %v4583_v37 }
 0x25d   : > { %v7502_v2 = vpop.f32.mrf.mxu1  ;;  %v10375_v16 = vpop.f32.mrf.mxu0  ;;  %v5837_v50 = vadd.f32 %v7549_v57, %v5339_v43  ;;  %v4201_v11 = vadd.f32 %v10266_v39, %v10153_v58  ;;  %v4587_v59 = vadd.f32 %v10225_v13, %v4200_v34  ;;  %v4590_v39 = vadd.f32 %v10232_v7, %v4203_v41 }
 0x25e   : > { %6821 = vst [vmem:[%s10362_s21] sm:$0xff] %v6820_v48   ;;  %v6024_v14 = vadd.f32 %v6023_v53, %v5833_v38  ;;  %v6092_v32 = vadd.f32 %v6061_v3, %v6060_v60  ;;  %v5340_v9 = vadd.f32 %v7502_v2, %v4586_v56  ;;  %v5835_v25 = vadd.f32 %v5720_v0, %v5337_v35 }
 0x25f   : > { %v5225_v45 = vpop.f32.mrf.mxu1  ;;  %v10380_v10 = vpop.f32.mrf.mxu0  ;;  %v4207_v34 = vadd.f32 %v10277_v54, %v10162_v4  ;;  %v4588_v2 = vadd.f32 %v10238_v5, %v4201_v11 }
 0x260   : > { %v6093_v51 = vadd.f32 %v6092_v32, %v6062_v20  ;;  %v6025_v40 = vadd.f32 %v6024_v14, %v5834_v28  ;;  %v5838_v31 = vadd.f32 %v7550_v33, %v5340_v9  ;;  %v5338_v46 = vadd.f32 %v5225_v45, %v4584_v62 }
 0x261   : > { %v7505_v38 = vpop.f32.mrf.mxu1  ;;  %v10385_v37 = vpop.f32.mrf.mxu0  ;;  %v6064_v30 = vmul.f32 %v5835_v25, %v5835_v25  ;;  %v6066_v62 = vmul.f32 %v5837_v50, %v5837_v50 }
 0x262   : > { %v6026_v44 = vadd.f32 %v6025_v40, %v5835_v25  ;;  %v6094_v57 = vadd.f32 %v6093_v51, %v6063_v17  ;;  %v6835_v0 = vpack.c.bf16 %v5838_v31, %v5837_v50  ;;  %v5836_v43 = vadd.f32 %v10333_v55, %v5338_v46 }
 0x263   : > { %v5238_v18 = vpop.f32.mrf.mxu1  ;;  %v10388_v56 = vpop.f32.mrf.mxu0  ;;  %v5343_v28 = vadd.f32 %v7505_v38, %v10260_v8  ;;  %v4204_v55 = vadd.f32 %v10271_v1, %v10159_v61  ;;  %v6067_v1 = vmul.f32 %v5838_v31, %v5838_v31  ;;  %v4594_v46 = vadd.f32 %v10249_v12, %v4207_v34 }
 0x264   : > { %v6095_v33 = vadd.f32 %v6094_v57, %v6064_v30  ;;  %6914 = vst [vmem:[%s10362_s21 + $0x18] sm:$0xff] %v6835_v0   ;;  %v5341_v58 = vadd.f32 %v5238_v18, %v4587_v59  ;;  %v6830_v13 = vpack.c.bf16 %v5836_v43, %v5835_v25  ;;  %v6027_v60 = vadd.f32 %v6026_v44, %v5836_v43 }
 0x265   : > { %v6065_v48 = vmul.f32 %v5836_v43, %v5836_v43  ;;  %v7506_v53 = vpop.f32.mrf.mxu1  ;;  %v10393_v3 = vpop.f32.mrf.mxu0  ;;  %v5841_v9 = vadd.f32 %v10337_v47, %v5343_v28  ;;  %v4591_v45 = vadd.f32 %v10243_v24, %v4204_v55  ;;  %v4208_v24 = vadd.f32 %v10286_v21, %v10171_v63 }
 0x266   : > { %v5344_v35 = vadd.f32 %v7506_v53, %v4590_v39  ;;  %6913 = vst [vmem:[%s10362_s21 + $0x10] sm:$0xff] %v6830_v13   ;;  %v6028_v8 = vadd.f32 %v6027_v60, %v5837_v50  ;;  %v5839_v7 = vadd.f32 %v10341_v22, %v5341_v58  ;;  %v4205_v50 = vadd.f32 %v10281_v27, %v10165_v6 }
 0x267   : > { %v6096_v20 = vadd.f32 %v6095_v33, %v6065_v48  ;;  %v5241_v14 = vpop.f32.mrf.mxu1  ;;  %v10402_v32 = vpop.f32.mrf.mxu0  ;;  %v4211_v57 = vadd.f32 %v10292_v36, %v10174_v19  ;;  %v6070_v43 = vmul.f32 %v5841_v9, %v5841_v9 }
 0x268   : > { %v5842_v41 = vadd.f32 %v10346_v29, %v5344_v35  ;;  %v5342_v61 = vadd.f32 %v5241_v14, %v4588_v2  ;;  %v6029_v54 = vadd.f32 %v6028_v8, %v5838_v31  ;;  %v6068_v47 = vmul.f32 %v5839_v7, %v5839_v7  ;;  %v10716_v14 = vld [vmem:[#allocation13_spill] sm:$0xff] }
 0x269   : > { %v6097_v4 = vadd.f32 %v6096_v20, %v6066_v62  ;;  %v7509_v17 = vpop.f32.mrf.mxu1  ;;  %v10406_v5 = vpop.f32.mrf.mxu0  ;;  %v4592_v0 = vadd.f32 %v10253_v42, %v4205_v50  ;;  %v10713_v42 = vld [vmem:[#allocation16_spill] sm:$0xff]  ;;  %v10715_v62 = vld [vmem:[#allocation34_spill] sm:$0xff]  ;;  %v10719_v50 = vld [vmem:[#allocation7_spill] sm:$0xff] }
 0x26a   : > { %v6845_v25 = vpack.c.bf16 %v5842_v41, %v5841_v9  ;;  %v5840_v22 = vadd.f32 %v10353_v52, %v5342_v61  ;;  %v6030_v51 = vadd.f32 %v6029_v54, %v5839_v7  ;;  %v5347_v59 = vadd.f32 %v7509_v17, %v10275_v23  ;;  %v10718_v54 = vld [vmem:[#allocation19_spill] sm:$0xff] }
 0x26b   : > { %v6098_v29 = vadd.f32 %v6097_v4, %v6067_v1  ;;  %v5254_v40 = vpop.f32.mrf.mxu1  ;;  %v10413_v11 = vpop.f32.mrf.mxu0  ;;  %v6071_v63 = vmul.f32 %v5842_v41, %v5842_v41  ;;  %v4209_v48 = vadd.f32 %v10713_v42, %v10177_v15  ;;  %v4598_v8 = vadd.f32 %v10715_v62, %v4211_v57 }
 0x26c   : > { %6916 = vst [vmem:[%s10362_s21 + $0x28] sm:$0xff] %v6845_v25   ;;  %v6840_v31 = vpack.c.bf16 %v5840_v22, %v5839_v7  ;;  %v6069_v38 = vmul.f32 %v5840_v22, %v5840_v22  ;;  %v5345_v6 = vadd.f32 %v5254_v40, %v4591_v45  ;;  %v6031_v44 = vadd.f32 %v6030_v51, %v5840_v22  ;;  %v10720_v25 = vld [vmem:[#allocation26_spill] sm:$0xff]  ;;  %v10721_v51 = vld [vmem:[#allocation24_spill] sm:$0xff] }
 0x26d   : > { %v6099_v27 = vadd.f32 %v6098_v29, %v6068_v47  ;;  %v7510_v52 = vpop.f32.mrf.mxu1  ;;  %v10417_v30 = vpop.f32.mrf.mxu0  ;;  %v5845_v58 = vadd.f32 %v10364_v26, %v5347_v59  ;;  %v4215_v22 = vadd.f32 %v10720_v25, %v10719_v50  ;;  %v4596_v47 = vadd.f32 %v10721_v51, %v4209_v48  ;;  %v10732_v51 = vld [vmem:[#allocation14_spill] sm:$0xff] }
 0x26e   : > { %6915 = vst [vmem:[%s10362_s21 + $0x20] sm:$0xff] %v6840_v31   ;;  %v5348_v12 = vadd.f32 %v7510_v52, %v4594_v46  ;;  %v6032_v18 = vadd.f32 %v6031_v44, %v5841_v9  ;;  %v5843_v23 = vadd.f32 %v10369_v49, %v5345_v6  ;;  %v10714_v49 = vld [vmem:[#allocation22_spill] sm:$0xff] }
 0x26f   : > { %v6100_v33 = vadd.f32 %v6099_v27, %v6069_v38  ;;  %v5257_v28 = vpop.f32.mrf.mxu1  ;;  %v10428_v36 = vpop.f32.mrf.mxu0  ;;  %v4595_v34 = vadd.f32 %v10714_v49, %v4208_v24  ;;  %v6074_v29 = vmul.f32 %v5845_v58, %v5845_v58 }
 0x270   : > { %v5846_v39 = vadd.f32 %v10375_v16, %v5348_v12  ;;  %v5346_v13 = vadd.f32 %v5257_v28, %v4592_v0  ;;  %v6033_v60 = vadd.f32 %v6032_v18, %v5842_v41  ;;  %v6072_v26 = vmul.f32 %v5843_v23, %v5843_v23  ;;  %v10722_v0 = vld [vmem:[#allocation8_spill] sm:$0xff] }
 0x271   : > { %v6101_v21 = vadd.f32 %v6100_v33, %v6070_v43  ;;  %v7513_v19 = vpop.f32.mrf.mxu1  ;;  %v10437_v4 = vpop.f32.mrf.mxu0  ;;  %v10723_v43 = vld [vmem:[#allocation29_spill] sm:$0xff] }
 0x272   : > { %v6855_v53 = vpack.c.bf16 %v5846_v39, %v5845_v58  ;;  %v5844_v55 = vadd.f32 %v10380_v10, %v5346_v13  ;;  %v6034_v35 = vadd.f32 %v6033_v60, %v5843_v23  ;;  %v5351_v9 = vadd.f32 %v7513_v19, %v10716_v14  ;;  %v10717_v10 = vld [vmem:[#allocation6_spill] sm:$0xff]  ;;  %v10726_v19 = vld [vmem:[#allocation23_spill] sm:$0xff] }
 0x273   : > { %v6102_v16 = vadd.f32 %v6101_v21, %v6071_v63  ;;  %v5270_v2 = vpop.f32.mrf.mxu1  ;;  %v4212_v17 = vadd.f32 %v10718_v54, %v10717_v10  ;;  %v6075_v44 = vmul.f32 %v5846_v39, %v5846_v39  ;;  %v10448_v12 = vpop.f32.mrf.mxu0  ;;  %v4213_v18 = vadd.f32 %v10723_v43, %v10722_v0  ;;  %v10725_v63 = vld [vmem:[#allocation25_spill] sm:$0xff] }
 0x274   : > { %6918 = vst [vmem:[%s10362_s21 + $0x38] sm:$0xff] %v6855_v53   ;;  %v6850_v20 = vpack.c.bf16 %v5844_v55, %v5843_v23  ;;  %v6073_v7 = vmul.f32 %v5844_v55, %v5844_v55  ;;  %v5349_v41 = vadd.f32 %v5270_v2, %v4595_v34  ;;  %v6035_v15 = vadd.f32 %v6034_v35, %v5844_v55  ;;  %v10728_v35 = vld [vmem:[#allocation32_spill] sm:$0xff] }
 0x275   : > { %v6103_v61 = vadd.f32 %v6102_v16, %v6072_v26  ;;  %v7514_v1 = vpop.f32.mrf.mxu1  ;;  %v5849_v59 = vadd.f32 %v10385_v37, %v5351_v9  ;;  %v4602_v21 = vadd.f32 %v10725_v63, %v4215_v22  ;;  %v7570_v34 = vpop.f32.mrf.mxu0  ;;  %v10729_v16 = vld [vmem:[#allocation12_spill] sm:$0xff]  ;;  %v10741_v63 = vld [vmem:[#allocation17_spill] sm:$0xff] }
 0x276   : > { %6917 = vst [vmem:[%s10362_s21 + $0x30] sm:$0xff] %v6850_v20   ;;  %v5352_v45 = vadd.f32 %v7514_v1, %v4598_v8  ;;  %v6036_v40 = vadd.f32 %v6035_v15, %v5845_v58  ;;  %v5847_v31 = vadd.f32 %v10388_v56, %v5349_v41  ;;  %v10724_v56 = vld [vmem:[#allocation35_spill] sm:$0xff]  ;;  %v10730_v2 = vld [vmem:[#allocation4_spill] sm:$0xff] }
 0x277   : > { %v6104_v46 = vadd.f32 %v6103_v61, %v6073_v7  ;;  %v5273_v38 = vpop.f32.mrf.mxu1  ;;  %v4599_v28 = vadd.f32 %v10724_v56, %v4212_v17  ;;  %v4219_v62 = vadd.f32 %v10730_v2, %v10729_v16  ;;  %v10731_v20 = vld [vmem:[#allocation27_spill] sm:$0xff]  ;;  %v6078_v14 = vmul.f32 %v5849_v59, %v5849_v59 }
 0x278   : > { %v5850_v6 = vadd.f32 %v10393_v3, %v5352_v45  ;;  %v5350_v27 = vadd.f32 %v5273_v38, %v4596_v47  ;;  %v6037_v24 = vadd.f32 %v6036_v40, %v5846_v39  ;;  %v6076_v37 = vmul.f32 %v5847_v31, %v5847_v31  ;;  %v5803_v45 = vpop.f32.mrf.mxu0  ;;  %v10733_v47 = vld [vmem:[#allocation33_spill] sm:$0xff]  ;;  %v10738_v56 = vld [vmem:[#allocation11_spill] sm:$0xff] }
 0x279   : > { %v6105_v52 = vadd.f32 %v6104_v46, %v6074_v29  ;;  %v7517_v57 = vpop.f32.mrf.mxu1  ;;  %v4600_v7 = vadd.f32 %v10731_v20, %v4213_v18  ;;  %v4217_v29 = vadd.f32 %v10733_v47, %v10732_v51 }
 0x27a   : > { %v6865_v33 = vpack.c.bf16 %v5850_v6, %v5849_v59  ;;  %v5848_v23 = vadd.f32 %v10402_v32, %v5350_v27  ;;  %v6038_v58 = vadd.f32 %v6037_v24, %v5847_v31  ;;  %v5355_v42 = vadd.f32 %v7517_v57, %v10726_v19  ;;  %v10727_v32 = vld [vmem:[#allocation9_spill] sm:$0xff]  ;;  %v10735_v27 = vld [vmem:[#allocation15_spill] sm:$0xff] }
 0x27b   : > { %v6106_v3 = vadd.f32 %v6105_v52, %v6075_v44  ;;  %v5286_v13 = vpop.f32.mrf.mxu1  ;;  %v4216_v26 = vadd.f32 %v10728_v35, %v10727_v32  ;;  %v6079_v17 = vmul.f32 %v5850_v6, %v5850_v6  ;;  %v4606_v44 = vadd.f32 %v10735_v27, %v4219_v62  ;;  %v10736_v24 = vld [vmem:[#allocation3_spill] sm:$0xff] }
 0x27c   : > { %6920 = vst [vmem:[%s10362_s21 + $0x48] sm:$0xff] %v6865_v33   ;;  %v6860_v39 = vpack.c.bf16 %v5848_v23, %v5847_v31  ;;  %v6077_v60 = vmul.f32 %v5848_v23, %v5848_v23  ;;  %v5353_v48 = vadd.f32 %v5286_v13, %v4599_v28  ;;  %v6039_v55 = vadd.f32 %v6038_v58, %v5848_v23  ;;  %v10734_v31 = vld [vmem:[#allocation10_spill] sm:$0xff]  ;;  %v7573_v23 = vpop.f32.mrf.mxu0  ;;  %v10739_v58 = vld [vmem:[#allocation20_spill] sm:$0xff]  ;;  %v10742_v62 = vld [vmem:[#allocation31_spill] sm:$0xff] }
 0x27d   : > { %v6107_v53 = vadd.f32 %v6106_v3, %v6076_v37  ;;  %v7518_v49 = vpop.f32.mrf.mxu1  ;;  %v5853_v1 = vadd.f32 %v10406_v5, %v5355_v42  ;;  %v10740_v37 = vld [vmem:[#allocation36_spill] sm:$0xff] }
 0x27e   : > { %6919 = vst [vmem:[%s10362_s21 + $0x40] sm:$0xff] %v6860_v39   ;;  %v5356_v8 = vadd.f32 %v7518_v49, %v4602_v21  ;;  %v6040_v9 = vadd.f32 %v6039_v55, %v5849_v59  ;;  %v5851_v61 = vadd.f32 %v10413_v11, %v5353_v48  ;;  %v4603_v11 = vadd.f32 %v10734_v31, %v4216_v26  ;;  %v5816_v2 = vpop.f32.mrf.mxu0 }
 0x27f   : > { %v6108_v41 = vadd.f32 %v6107_v53, %v6077_v60  ;;  %v5289_v15 = vpop.f32.mrf.mxu1  ;;  %v4223_v3 = vadd.f32 %v10740_v37, %v10739_v58  ;;  %v4604_v21 = vadd.f32 %v10741_v63, %v4217_v29  ;;  %v6082_v39 = vmul.f32 %v5853_v1, %v5853_v1 }
 0x280   : > { %v5854_v10 = vadd.f32 %v10417_v30, %v5356_v8  ;;  %v5354_v54 = vadd.f32 %v5289_v15, %v4600_v7  ;;  %v6041_v25 = vadd.f32 %v6040_v9, %v5850_v6  ;;  %v6080_v5 = vmul.f32 %v5851_v61, %v5851_v61  ;;  %v10743_v8 = vld [vmem:[#allocation37_spill] sm:$0xff]  ;;  %v7574_v47 = vpop.f32.mrf.mxu0 }
 0x281   : > { %v6109_v50 = vadd.f32 %v6108_v41, %v6078_v14  ;;  %v7521_v22 = vpop.f32.mrf.mxu1  ;;  %v4221_v20 = vadd.f32 %v10743_v8, %v10742_v62  ;;  %v10744_v9 = vld [vmem:[#allocation21_spill] sm:$0xff] }
 0x282   : > { %v6875_v40 = vpack.c.bf16 %v5854_v10, %v5853_v1  ;;  %v5852_v46 = vadd.f32 %v10428_v36, %v5354_v54  ;;  %v6042_v38 = vadd.f32 %v6041_v25, %v5851_v61  ;;  %v5359_v57 = vadd.f32 %v7521_v22, %v10736_v24  ;;  %v10737_v36 = vld [vmem:[#allocation18_spill] sm:$0xff] }
 0x283   : > { %v6110_v59 = vadd.f32 %v6109_v50, %v6079_v17  ;;  %v5302_v30 = vpop.f32.mrf.mxu1  ;;  %v4220_v28 = vadd.f32 %v10738_v56, %v10737_v36  ;;  %v6083_v32 = vmul.f32 %v5854_v10, %v5854_v10 }
 0x284   : > { %6922 = vst [vmem:[%s10362_s21 + $0x58] sm:$0xff] %v6875_v40   ;;  %v6870_v52 = vpack.c.bf16 %v5852_v46, %v5851_v61  ;;  %v6081_v6 = vmul.f32 %v5852_v46, %v5852_v46  ;;  %v5357_v0 = vadd.f32 %v5302_v30, %v4603_v11  ;;  %v6043_v18 = vadd.f32 %v6042_v38, %v5852_v46  ;;  %v10747_v40 = vld [vmem:[#allocation30_spill] sm:$0xff] }
 0x285   : > { %v6111_v43 = vadd.f32 %v6110_v59, %v6080_v5  ;;  %v7522_v33 = vpop.f32.mrf.mxu1  ;;  %v5857_v53 = vadd.f32 %v10437_v4, %v5359_v57  ;;  %v4607_v41 = vadd.f32 %v10744_v9, %v4220_v28  ;;  %v4608_v46 = vadd.f32 %v10747_v40, %v4221_v20  ;;  %v5819_v57 = vpop.f32.mrf.mxu0 }
 0x286   : > { %6921 = vst [vmem:[%s10362_s21 + $0x50] sm:$0xff] %v6870_v52   ;;  %v5360_v13 = vadd.f32 %v7522_v33, %v4606_v44  ;;  %v6044_v60 = vadd.f32 %v6043_v18, %v5853_v1  ;;  %v5855_v42 = vadd.f32 %v10448_v12, %v5357_v0 }
 0x287   : > { %v6112_v19 = vadd.f32 %v6111_v43, %v6081_v6  ;;  %v5305_v48 = vpop.f32.mrf.mxu1  ;;  %v6086_v31 = vmul.f32 %v5857_v53, %v5857_v53 }
 0x288   : > { %v5858_v55 = vadd.f32 %v7570_v34, %v5360_v13  ;;  %v5358_v49 = vadd.f32 %v5305_v48, %v4604_v21  ;;  %v6045_v26 = vadd.f32 %v6044_v60, %v5854_v10  ;;  %v6084_v61 = vmul.f32 %v5855_v42, %v5855_v42  ;;  %v10745_v34 = vld [vmem:[#allocation28_spill] sm:$0xff]  ;;  %v10746_v10 = vld [vmem:[#allocation5_spill] sm:$0xff] }
 0x289   : > { %v6113_v35 = vadd.f32 %v6112_v19, %v6082_v39  ;;  %v7525_v16 = vpop.f32.mrf.mxu1  ;;  %v4610_v1 = vadd.f32 %v10745_v34, %v4223_v3 }
 0x28a   : > { %v6885_v7 = vpack.c.bf16 %v5858_v55, %v5857_v53  ;;  %v5856_v14 = vadd.f32 %v5803_v45, %v5358_v49  ;;  %v6046_v12 = vadd.f32 %v6045_v26, %v5855_v42  ;;  %v5363_v50 = vadd.f32 %v7525_v16, %v10746_v10 }
 0x28b   : > { %v6114_v15 = vadd.f32 %v6113_v35, %v6083_v32  ;;  %v5318_v4 = vpop.f32.mrf.mxu1  ;;  %v6087_v52 = vmul.f32 %v5858_v55, %v5858_v55 }
 0x28c   : > { %6924 = vst [vmem:[%s10362_s21 + $0x68] sm:$0xff] %v6885_v7   ;;  %v6880_v54 = vpack.c.bf16 %v5856_v14, %v5855_v42  ;;  %v6085_v17 = vmul.f32 %v5856_v14, %v5856_v14  ;;  %v5361_v25 = vadd.f32 %v5318_v4, %v4607_v41  ;;  %v6047_v51 = vadd.f32 %v6046_v12, %v5856_v14 }
 0x28d   : > { %v6115_v22 = vadd.f32 %v6114_v15, %v6084_v61  ;;  %v7526_v29 = vpop.f32.mrf.mxu1  ;;  %v5861_v30 = vadd.f32 %v7573_v23, %v5363_v50 }
 0x28e   : > { %6923 = vst [vmem:[%s10362_s21 + $0x60] sm:$0xff] %v6880_v54   ;;  %v5364_v45 = vadd.f32 %v7526_v29, %v4610_v1  ;;  %v6048_v11 = vadd.f32 %v6047_v51, %v5857_v53  ;;  %v5859_v5 = vadd.f32 %v5816_v2, %v5361_v25 }
 0x28f   : > { %v6116_v38 = vadd.f32 %v6115_v22, %v6085_v17  ;;  %v5321_v59 = vpop.f32.mrf.mxu1  ;;  %v6090_v23 = vmul.f32 %v5861_v30, %v5861_v30 }
 0x290   : > { %v5862_v27 = vadd.f32 %v7574_v47, %v5364_v45  ;;  %v5362_v44 = vadd.f32 %v5321_v59, %v4608_v46  ;;  %v6049_v24 = vadd.f32 %v6048_v11, %v5858_v55  ;;  %v6088_v33 = vmul.f32 %v5859_v5, %v5859_v5 }
 0x291   : > { %v6117_v6 = vadd.f32 %v6116_v38, %v6086_v31 }
 0x292   : > { %v6895_v0 = vpack.c.bf16 %v5862_v27, %v5861_v30  ;;  %v5860_v43 = vadd.f32 %v5819_v57, %v5362_v44  ;;  %v6050_v18 = vadd.f32 %v6049_v24, %v5859_v5  ;;  %v6091_v63 = vmul.f32 %v5862_v27, %v5862_v27 }
 0x293   : > { %v6118_v36 = vadd.f32 %v6117_v6, %v6087_v52 }
 0x294   : > { %6926 = vst [vmem:[%s10362_s21 + $0x78] sm:$0xff] %v6895_v0   ;;  %v6890_v56 = vpack.c.bf16 %v5860_v43, %v5859_v5  ;;  %v6089_v28 = vmul.f32 %v5860_v43, %v5860_v43  ;;  %v6051_v37 = vadd.f32 %v6050_v18, %v5860_v43 }
 0x295   : > { %v6119_v58 = vadd.f32 %v6118_v36, %v6088_v33 }
 0x296   : > { %6925 = vst [vmem:[%s10362_s21 + $0x70] sm:$0xff] %v6890_v56   ;;  %v6052_v3 = vadd.f32 %v6051_v37, %v5861_v30 }
 0x297   : > { %v6120_v13 = vadd.f32 %v6119_v58, %v6089_v28 }
 0x298   : > { %v6053_v21 = vadd.f32 %v6052_v3, %v5862_v27 }
 0x299   : > { %v6121_v39 = vadd.f32 %v6120_v13, %v6090_v23 }
 0x29a   : > { %v6054_v60 = vrot.slane %v6053_v21, 4 }
 0x29b   : > { %v6122_v19 = vadd.f32 %v6121_v39, %v6091_v63 }
 0x29c   : > { %v6055_v42 = vadd.f32 %v6054_v60, %v6053_v21 }
 0x29d   : > { %v6123_v48 = vrot.slane %v6122_v19, 4 }
 0x29e   : > { %v6056_v53 = vrot.slane %v6055_v42, 2 }
 0x29f   : > { %v6124_v55 = vadd.f32 %v6123_v48, %v6122_v19 }
 0x2a0   : > { %v6057_v49 = vadd.f32 %v6056_v53, %v6055_v42 }
 0x2a1   : > { %v6125_v32 = vrot.slane %v6124_v55, 2 }
 0x2a2   : > { %v6058_v35 = vrot.slane %v6057_v49, 1 }
 0x2a3   : > { %v6126_v26 = vadd.f32 %v6125_v32, %v6124_v55 }
 0x2a4   : > { %v6059_v2 = vadd.f32 %v6058_v35, %v6057_v49 }
 0x2a5   : > { %v6127_v16 = vrot.slane %v6126_v26, 1 }
 0x2a7   : > { %v6128_v62 = vadd.f32 %v6127_v16, %v6126_v26 }
 0x2a9   : > { %v6130_v8 = vsel %vm422_vm2, %v6059_v2, %v6128_v62 }
 0x2aa   : > { %6131 = vst [vmem:[%s238_s23] sm:$0x3] %v6130_v8 }
 0x2ab PF: > { %s16_s18 = sadd.s32 1, %s7758_s18  }
 0x2ac   : > { %p13_p5 = scmp.ge.s32.totalorder %s16_s18, 4  }
 0x2ae   :  { %15 = sbr.rel (!%p13_p5) target bundleno = 1 (0x1), region = 89 }

</bundles_post_ra>
